<compile_context>
chip_gen: v7x
topology: tpu7x:2x2x1
jax: 0.10.0
libtpu: 0.0.40
codegen_flags: <defaults>
</compile_context>

<pallas_src>
import jax
import jax.numpy as jnp
from jax.experimental import pallas as pl
from jax.experimental.pallas import tpu as pltpu

# ---------------- hyper-parameters ----------------
B = 2                 # batch
IND = 4               # input feature planes
C = 32                # RES_BLOCK_FILLTERS
BLOCKS = 2            # number of residual blocks
H = W = 8             # board size
OUTD = H * W          # 64 (policy / value spatial flatten)
POLICY_K = 2          # policy 1x1-conv kernels
HSZ = 32              # value hidden size
EPS = 1e-5
DTYPE = jnp.float32

N_TRUNK = 1 + 2 * BLOCKS   # feature conv + 2 convs per residual block

# Padded-activation scratch geometry.  The HxW interior is written at a
# sublane-aligned column offset (IW0 = 8) so the per-conv interior store is a
# fully aligned tile store; columns IW0-1 / IW0+W and rows 0 / H+1 stay zero
# and provide the conv's zero padding.
IH0 = 1
IW0 = 8
HP = H + 2            # 10
WP = IW0 + W + 1      # 17


# ---------------- the fused kernel ----------------
def _net_kernel(x_ref, tw_ref, ts_ref, tb_ref,
                vcw_ref, vcs_ref, vcb_ref,
                vw1_ref, vb1_ref, vw2_ref, vb2_ref,
                pcw_ref, pcs_ref, pcb_ref,
                pw_ref, pb_ref,
                win_ref, props_ref,
                pad_ref):
    """Entire Net forward in one kernel; all activations stay in VMEM."""
    # Zero the padded scratch once: its borders are the 3x3 convs' zero pad.
    pad_ref[...] = jnp.zeros(pad_ref.shape, jnp.float32)

    def write_interior(y4):                       # y4: (B, H, W, C) f32
        pad_ref[:, IH0:IH0 + H, IW0:IW0 + W, :] = y4

    def conv3x3_bn_relu(idx, residual=None):
        """3x3 conv (folded BN) [+ residual] + ReLU, reading the padded scratch."""
        xp = pad_ref[...]                         # (B, HP, WP, C) f32
        acc = jnp.zeros((B * H * W, C), jnp.float32)
        for kh in range(3):                       # 9 bf16 MXU dots, f32 acc
            for kw in range(3):
                c0 = IW0 - 1 + kw
                patch = xp[:, kh:kh + H, c0:c0 + W, :]
                patch = patch.reshape(B * H * W, C).astype(jnp.bfloat16)
                acc = acc + jnp.dot(patch, tw_ref[idx, kh, kw],
                                    preferred_element_type=jnp.float32)
        y = acc * ts_ref[idx] + tb_ref[idx]       # folded BatchNorm (f32, VPU)
        if residual is not None:
            y = y + residual
        return jnp.maximum(y, 0.0)                # (B*H*W, C) f32

    # ---------------- trunk ----------------
    write_interior(x_ref[...])                    # input already NHWC, C-padded
    x = conv3x3_bn_relu(0)                        # Feature: conv + BN + ReLU
    idx = 1
    for _ in range(BLOCKS):                       # ResBlockNet x BLOCKS
        res = x
        write_interior(x.reshape(B, H, W, C))
        h1 = conv3x3_bn_relu(idx)                 # conv + BN + ReLU
        idx += 1
        write_interior(h1.reshape(B, H, W, C))
        x = conv3x3_bn_relu(idx, residual=res)    # conv + BN, + res, ReLU
        idx += 1

    x3 = x.reshape(B, OUTD, C)                    # rows: b ; p = h*W + w

    # ---------------- value head ----------------
    # 1x1 conv (C->1) as multiply + lane-reduce (spatial already lane-dense).
    v = jnp.sum(x3 * vcw_ref[...], axis=-1)                       # (B, OUTD)
    v = jnp.maximum(v * vcs_ref[...] + vcb_ref[...], 0.0)
    hdn = jnp.dot(v.astype(jnp.bfloat16), vw1_ref[...],
                  preferred_element_type=jnp.float32) + vb1_ref[...]
    hdn = jnp.maximum(hdn, 0.0)
    win = jnp.dot(hdn.astype(jnp.bfloat16), vw2_ref[...],
                  preferred_element_type=jnp.float32) + vb2_ref[...]
    win_ref[...] = jnp.tanh(win).astype(win_ref.dtype)

    # ---------------- policy head ----------------
    # 1x1 conv (C->2).  PyTorch's NCHW .view flatten order (c*OUTD + h*W + w)
    # is reproduced transpose-free by contracting each conv channel with its
    # own OUTD-row slice of the policy linear weight and summing.
    logits = jnp.zeros((B, OUTD), jnp.float32)
    for k in range(POLICY_K):
        pk = jnp.sum(x3 * pcw_ref[k], axis=-1)                    # (B, OUTD)
        pk = jnp.maximum(pk * pcs_ref[k] + pcb_ref[k], 0.0)
        logits = logits + jnp.dot(pk.astype(jnp.bfloat16),
                                  pw_ref[k * OUTD:(k + 1) * OUTD, :],
                                  preferred_element_type=jnp.float32)
    logits = logits + pb_ref[...]
    m = jnp.max(logits, axis=-1, keepdims=True)
    z = logits - m
    lse = jnp.log(jnp.sum(jnp.exp(z), axis=-1, keepdims=True))
    props_ref[...] = (z - lse).astype(props_ref.dtype)


# ---------------- pallas_call wrapper ----------------
def _vmem():
    return pl.BlockSpec(memory_space=pltpu.MemorySpace.VMEM)


@jax.jit
def net_forward(params, x_nchw):
    # One tiny XLA-side transform of the 2 KB input (NCHW -> NHWC plus a zero
    # channel-pad IND -> C so every conv sees the same C-wide lane layout);
    # everything else runs inside the single fused kernel.
    x = jnp.transpose(x_nchw, (0, 2, 3, 1)).astype(DTYPE)
    x = jnp.pad(x, ((0, 0), (0, 0), (0, 0), (0, C - IND)))

    winners, props = pl.pallas_call(
        _net_kernel,
        out_shape=(jax.ShapeDtypeStruct((B, 1), DTYPE),
                   jax.ShapeDtypeStruct((B, OUTD), DTYPE)),
        in_specs=[_vmem()] * 16,
        out_specs=(_vmem(), _vmem()),
        scratch_shapes=[pltpu.VMEM((B, HP, WP, C), jnp.float32)],
    )(x,
      params["trunk_w"], params["trunk_scale"], params["trunk_bias"],
      params["vconv_w"], params["vconv_scale"], params["vconv_bias"],
      params["vlin_w1"], params["vlin_b1"], params["vlin_w2"], params["vlin_b2"],
      params["pconv_w"], params["pconv_scale"], params["pconv_bias"],
      params["plin_w"], params["plin_b"])
    return winners, props


# ---------------- parameters (deterministic, synthetic) ----------------
def make_params(key):
    keys = iter(jax.random.split(key, 64))

    def bn_fold(cout, conv_bias=None):
        gamma = jax.random.uniform(next(keys), (cout,), minval=0.5, maxval=1.5)
        beta = 0.1 * jax.random.normal(next(keys), (cout,))
        mean = 0.1 * jax.random.normal(next(keys), (cout,))
        var = jax.random.uniform(next(keys), (cout,), minval=0.5, maxval=1.5)
        scale = gamma / jnp.sqrt(var + EPS)
        bias = beta - mean * scale
        if conv_bias is not None:
            bias = bias + scale * conv_bias       # fold the conv's own bias
        return scale.astype(DTYPE), bias.astype(DTYPE)

    def uni(shape, lim):
        return jax.random.uniform(next(keys), shape, minval=-lim,
                                  maxval=lim).astype(DTYPE)

    # --- trunk: feature conv (Cin=IND, zero-extended to C) + 2*BLOCKS convs ---
    tw, ts, tb = [], [], []
    w0 = 0.1 * jax.random.normal(next(keys), (3, 3, IND, C))
    w0 = jnp.pad(w0, ((0, 0), (0, 0), (0, C - IND), (0, 0)))  # zero in-channels
    s, b_ = bn_fold(C)
    tw.append(w0); ts.append(s.reshape(1, C)); tb.append(b_.reshape(1, C))
    for _ in range(2 * BLOCKS):
        w = 0.1 * jax.random.normal(next(keys), (3, 3, C, C))
        s, b_ = bn_fold(C)
        tw.append(w); ts.append(s.reshape(1, C)); tb.append(b_.reshape(1, C))

    # --- value / policy 1x1 convs (bias=True in torch, folded into BN bias) ---
    vw = 0.1 * jax.random.normal(next(keys), (C,))
    v_conv_bias = 0.1 * jax.random.normal(next(keys), (1,))
    vs, vb = bn_fold(1, conv_bias=v_conv_bias)

    pw = 0.1 * jax.random.normal(next(keys), (POLICY_K, C))
    p_conv_bias = 0.1 * jax.random.normal(next(keys), (POLICY_K,))
    ps, pb = bn_fold(POLICY_K, conv_bias=p_conv_bias)

    return {
        "trunk_w": jnp.stack(tw).astype(jnp.bfloat16),     # (5, 3, 3, C, C)
        "trunk_scale": jnp.stack(ts).astype(DTYPE),        # (5, 1, C)
        "trunk_bias": jnp.stack(tb).astype(DTYPE),         # (5, 1, C)
        "vconv_w": vw.reshape(1, 1, C).astype(DTYPE),
        "vconv_scale": vs.reshape(1, 1),
        "vconv_bias": vb.reshape(1, 1),
        "vlin_w1": uni((OUTD, HSZ), 0.1).astype(jnp.bfloat16),   # Value._reset_parameters
        "vlin_b1": uni((1, HSZ), 0.05),
        "vlin_w2": uni((HSZ, 1), 0.1).astype(jnp.bfloat16),
        "vlin_b2": uni((1, 1), 0.05),
        "pconv_w": pw.reshape(POLICY_K, 1, 1, C).astype(DTYPE),
        "pconv_scale": ps.reshape(POLICY_K, 1, 1),
        "pconv_bias": pb.reshape(POLICY_K, 1, 1),
        "plin_w": uni((POLICY_K * OUTD, OUTD), 0.1).astype(jnp.bfloat16),
        "plin_b": uni((1, OUTD), 0.05),
    }


# ---------------- pure-JAX reference (XLA) ----------------
def reference_forward(params, x_nchw):
    """Independent XLA reference using the same folded/stacked parameters."""
    x = jnp.transpose(x_nchw, (0, 2, 3, 1)).astype(DTYPE)
    x = jnp.pad(x, ((0, 0), (0, 0), (0, 0), (0, C - IND)))

    def conv3x3(x4, i, residual=None):
        y = jax.lax.conv_general_dilated(
            x4.astype(jnp.bfloat16), params["trunk_w"][i],
            window_strides=(1, 1), padding="SAME",
            dimension_numbers=("NHWC", "HWIO", "NHWC"),
            preferred_element_type=jnp.float32)
        y = (y * params["trunk_scale"][i].reshape(1, 1, 1, C)
             + params["trunk_bias"][i].reshape(1, 1, 1, C))
        if residual is not None:
            y = y + residual
        return jnp.maximum(y, 0.0)

    x = conv3x3(x, 0)
    i = 1
    for _ in range(BLOCKS):
        res = x
        h1 = conv3x3(x, i); i += 1
        x = conv3x3(h1, i, residual=res); i += 1

    flat = x.reshape(B, OUTD, C)

    v = jnp.sum(flat * params["vconv_w"], axis=-1)
    v = jnp.maximum(v * params["vconv_scale"] + params["vconv_bias"], 0.0)
    hdn = jnp.maximum(
        jnp.dot(v.astype(jnp.bfloat16), params["vlin_w1"],
                preferred_element_type=jnp.float32) + params["vlin_b1"], 0.0)
    winners = jnp.tanh(
        jnp.dot(hdn.astype(jnp.bfloat16), params["vlin_w2"],
                preferred_element_type=jnp.float32) + params["vlin_b2"])

    logits = jnp.zeros((B, OUTD), jnp.float32) + params["plin_b"]
    for k in range(POLICY_K):
        pk = jnp.sum(flat * params["pconv_w"][k], axis=-1)
        pk = jnp.maximum(pk * params["pconv_scale"][k] + params["pconv_bias"][k], 0.0)
        logits = logits + jnp.dot(
            pk.astype(jnp.bfloat16), params["plin_w"][k * OUTD:(k + 1) * OUTD],
            preferred_element_type=jnp.float32)
    props = jax.nn.log_softmax(logits, axis=-1)
    return winners, props


if __name__ == "__main__":
    key = jax.random.PRNGKey(0)
    pkey, xkey = jax.random.split(key)
    params = make_params(pkey)
    x = jax.random.normal(xkey, (B, IND, H, W), dtype=DTYPE)

    winners, props = net_forward(params, x)
    jax.block_until_ready((winners, props))

    assert winners.shape == (B, 1)
    assert props.shape == (B, OUTD)
    assert bool(jnp.all(jnp.isfinite(winners)))
    assert bool(jnp.all(jnp.isfinite(props)))
    # log_softmax rows must exponentiate-sum to 1
    assert bool(jnp.allclose(jnp.sum(jnp.exp(props), axis=-1), 1.0, atol=1e-4))
    # check against the pure-JAX reference (same folded params, bf16 matmuls)
    ref_w, ref_p = reference_forward(params, x)
    assert bool(jnp.allclose(winners, ref_w, atol=2e-2, rtol=2e-2))
    assert bool(jnp.allclose(props, ref_p, atol=2e-2, rtol=2e-2))
    print("KERNEL_OK")
</pallas_src>

<mosaic_0001>
module attributes {stable_mosaic.version = 11 : i64} {
  func.func @_net_kernel(%arg0: memref<2x8x8x32xf32, #tpu.memory_space<vmem>>, %arg1: memref<5x3x3x32x32xbf16, #tpu.memory_space<vmem>>, %arg2: memref<5x1x32xf32, #tpu.memory_space<vmem>>, %arg3: memref<5x1x32xf32, #tpu.memory_space<vmem>>, %arg4: memref<1x1x32xf32, #tpu.memory_space<vmem>>, %arg5: memref<1x1xf32, #tpu.memory_space<vmem>>, %arg6: memref<1x1xf32, #tpu.memory_space<vmem>>, %arg7: memref<64x32xbf16, #tpu.memory_space<vmem>>, %arg8: memref<1x32xf32, #tpu.memory_space<vmem>>, %arg9: memref<32x1xbf16, #tpu.memory_space<vmem>>, %arg10: memref<1x1xf32, #tpu.memory_space<vmem>>, %arg11: memref<2x1x1x32xf32, #tpu.memory_space<vmem>>, %arg12: memref<2x1x1xf32, #tpu.memory_space<vmem>>, %arg13: memref<2x1x1xf32, #tpu.memory_space<vmem>>, %arg14: memref<128x64xbf16, #tpu.memory_space<vmem>>, %arg15: memref<1x64xf32, #tpu.memory_space<vmem>>, %arg16: memref<2x1xf32, #tpu.memory_space<vmem>>, %arg17: memref<2x64xf32, #tpu.memory_space<vmem>>, %arg18: memref<2x10x17x32xf32, #tpu.memory_space<vmem>>) attributes {dimension_semantics = [], scalar_prefetch = 0 : i64, scratch_operands = 1 : i64, tpu.core_type = #tpu.core_type<tc>} {
    %cst = arith.constant 0.000000e+00 : f32
    %0 = vector.broadcast %cst : f32 to vector<2x10x17x32xf32>
    %c0 = arith.constant 0 : index
    %c0_0 = arith.constant 0 : index
    %c0_1 = arith.constant 0 : index
    %c0_2 = arith.constant 0 : index
    %1 = vector.load %arg18[%c0, %c0_0, %c0_1, %c0_2] : memref<2x10x17x32xf32, #tpu.memory_space<vmem>>, vector<2x10x17x32xf32>
    tpu.vector_store %arg18[%c0, %c0_0, %c0_1, %c0_2], %0 {strides = array<i32>} : memref<2x10x17x32xf32, #tpu.memory_space<vmem>>, vector<2x10x17x32xf32>,
    %c0_3 = arith.constant 0 : index
    %c0_4 = arith.constant 0 : index
    %c0_5 = arith.constant 0 : index
    %c0_6 = arith.constant 0 : index
    %2 = vector.load %arg0[%c0_3, %c0_4, %c0_5, %c0_6] : memref<2x8x8x32xf32, #tpu.memory_space<vmem>>, vector<2x8x8x32xf32>
    %c0_7 = arith.constant 0 : index
    %c1 = arith.constant 1 : index
    %c8 = arith.constant 8 : index
    %c0_8 = arith.constant 0 : index
    %3 = vector.load %arg18[%c0_7, %c1, %c8, %c0_8] : memref<2x10x17x32xf32, #tpu.memory_space<vmem>>, vector<2x8x8x32xf32>
    tpu.vector_store %arg18[%c0_7, %c1, %c8, %c0_8], %2 {strides = array<i32>} : memref<2x10x17x32xf32, #tpu.memory_space<vmem>>, vector<2x8x8x32xf32>,
    %c0_9 = arith.constant 0 : index
    %c0_10 = arith.constant 0 : index
    %c0_11 = arith.constant 0 : index
    %c0_12 = arith.constant 0 : index
    %4 = vector.load %arg18[%c0_9, %c0_10, %c0_11, %c0_12] : memref<2x10x17x32xf32, #tpu.memory_space<vmem>>, vector<2x10x17x32xf32>
    %cst_13 = arith.constant 0.000000e+00 : f32
    %5 = vector.broadcast %cst_13 : f32 to vector<128x32xf32>
    %6 = vector.extract_strided_slice %4 {offsets = [0, 0, 7, 0], sizes = [2, 8, 8, 32], strides = [1, 1, 1, 1]} : vector<2x10x17x32xf32> to vector<2x8x8x32xf32>
    %7 = vector.shape_cast %6 : vector<2x8x8x32xf32> to vector<128x32xf32>
    %8 = arith.truncf %7 : vector<128x32xf32> to vector<128x32xbf16>
    %c0_14 = arith.constant 0 : index
    %c0_15 = arith.constant 0 : index
    %c0_16 = arith.constant 0 : index
    %c0_17 = arith.constant 0 : index
    %c0_18 = arith.constant 0 : index
    %9 = vector.load %arg1[%c0_14, %c0_15, %c0_16, %c0_17, %c0_18] : memref<5x3x3x32x32xbf16, #tpu.memory_space<vmem>>, vector<1x1x1x32x32xbf16>
    %10 = vector.shape_cast %9 : vector<1x1x1x32x32xbf16> to vector<32x32xbf16>
    %cst_19 = arith.constant dense<0.000000e+00> : vector<128x32xf32>
    %11 = tpu.matmul %8, %10, %cst_19 {dimension_numbers = #tpu.dot_dimension_numbers<[1], [0], [0], [1], [0, 0, 1, 1], [], []>} : vector<128x32xbf16>, vector<32x32xbf16>, vector<128x32xf32> -> vector<128x32xf32>
    %12 = arith.addf %5, %11 : vector<128x32xf32>
    %13 = vector.extract_strided_slice %4 {offsets = [0, 0, 8, 0], sizes = [2, 8, 8, 32], strides = [1, 1, 1, 1]} : vector<2x10x17x32xf32> to vector<2x8x8x32xf32>
    %14 = vector.shape_cast %13 : vector<2x8x8x32xf32> to vector<128x32xf32>
    %15 = arith.truncf %14 : vector<128x32xf32> to vector<128x32xbf16>
    %c0_20 = arith.constant 0 : index
    %c0_21 = arith.constant 0 : index
    %c1_22 = arith.constant 1 : index
    %c0_23 = arith.constant 0 : index
    %c0_24 = arith.constant 0 : index
    %16 = vector.load %arg1[%c0_20, %c0_21, %c1_22, %c0_23, %c0_24] : memref<5x3x3x32x32xbf16, #tpu.memory_space<vmem>>, vector<1x1x1x32x32xbf16>
    %17 = vector.shape_cast %16 : vector<1x1x1x32x32xbf16> to vector<32x32xbf16>
    %cst_25 = arith.constant dense<0.000000e+00> : vector<128x32xf32>
    %18 = tpu.matmul %15, %17, %cst_25 {dimension_numbers = #tpu.dot_dimension_numbers<[1], [0], [0], [1], [0, 0, 1, 1], [], []>} : vector<128x32xbf16>, vector<32x32xbf16>, vector<128x32xf32> -> vector<128x32xf32>
    %19 = arith.addf %12, %18 : vector<128x32xf32>
    %20 = vector.extract_strided_slice %4 {offsets = [0, 0, 9, 0], sizes = [2, 8, 8, 32], strides = [1, 1, 1, 1]} : vector<2x10x17x32xf32> to vector<2x8x8x32xf32>
    %21 = vector.shape_cast %20 : vector<2x8x8x32xf32> to vector<128x32xf32>
    %22 = arith.truncf %21 : vector<128x32xf32> to vector<128x32xbf16>
    %c0_26 = arith.constant 0 : index
    %c0_27 = arith.constant 0 : index
    %c2 = arith.constant 2 : index
    %c0_28 = arith.constant 0 : index
    %c0_29 = arith.constant 0 : index
    %23 = vector.load %arg1[%c0_26, %c0_27, %c2, %c0_28, %c0_29] : memref<5x3x3x32x32xbf16, #tpu.memory_space<vmem>>, vector<1x1x1x32x32xbf16>
    %24 = vector.shape_cast %23 : vector<1x1x1x32x32xbf16> to vector<32x32xbf16>
    %cst_30 = arith.constant dense<0.000000e+00> : vector<128x32xf32>
    %25 = tpu.matmul %22, %24, %cst_30 {dimension_numbers = #tpu.dot_dimension_numbers<[1], [0], [0], [1], [0, 0, 1, 1], [], []>} : vector<128x32xbf16>, vector<32x32xbf16>, vector<128x32xf32> -> vector<128x32xf32>
    %26 = arith.addf %19, %25 : vector<128x32xf32>
    %27 = vector.extract_strided_slice %4 {offsets = [0, 1, 7, 0], sizes = [2, 8, 8, 32], strides = [1, 1, 1, 1]} : vector<2x10x17x32xf32> to vector<2x8x8x32xf32>
    %28 = vector.shape_cast %27 : vector<2x8x8x32xf32> to vector<128x32xf32>
    %29 = arith.truncf %28 : vector<128x32xf32> to vector<128x32xbf16>
    %c0_31 = arith.constant 0 : index
    %c1_32 = arith.constant 1 : index
    %c0_33 = arith.constant 0 : index
    %c0_34 = arith.constant 0 : index
    %c0_35 = arith.constant 0 : index
    %30 = vector.load %arg1[%c0_31, %c1_32, %c0_33, %c0_34, %c0_35] : memref<5x3x3x32x32xbf16, #tpu.memory_space<vmem>>, vector<1x1x1x32x32xbf16>
    %31 = vector.shape_cast %30 : vector<1x1x1x32x32xbf16> to vector<32x32xbf16>
    %cst_36 = arith.constant dense<0.000000e+00> : vector<128x32xf32>
    %32 = tpu.matmul %29, %31, %cst_36 {dimension_numbers = #tpu.dot_dimension_numbers<[1], [0], [0], [1], [0, 0, 1, 1], [], []>} : vector<128x32xbf16>, vector<32x32xbf16>, vector<128x32xf32> -> vector<128x32xf32>
    %33 = arith.addf %26, %32 : vector<128x32xf32>
    %34 = vector.extract_strided_slice %4 {offsets = [0, 1, 8, 0], sizes = [2, 8, 8, 32], strides = [1, 1, 1, 1]} : vector<2x10x17x32xf32> to vector<2x8x8x32xf32>
    %35 = vector.shape_cast %34 : vector<2x8x8x32xf32> to vector<128x32xf32>
    %36 = arith.truncf %35 : vector<128x32xf32> to vector<128x32xbf16>
    %c0_37 = arith.constant 0 : index
    %c1_38 = arith.constant 1 : index
    %c1_39 = arith.constant 1 : index
    %c0_40 = arith.constant 0 : index
    %c0_41 = arith.constant 0 : index
    %37 = vector.load %arg1[%c0_37, %c1_38, %c1_39, %c0_40, %c0_41] : memref<5x3x3x32x32xbf16, #tpu.memory_space<vmem>>, vector<1x1x1x32x32xbf16>
    %38 = vector.shape_cast %37 : vector<1x1x1x32x32xbf16> to vector<32x32xbf16>
    %cst_42 = arith.constant dense<0.000000e+00> : vector<128x32xf32>
    %39 = tpu.matmul %36, %38, %cst_42 {dimension_numbers = #tpu.dot_dimension_numbers<[1], [0], [0], [1], [0, 0, 1, 1], [], []>} : vector<128x32xbf16>, vector<32x32xbf16>, vector<128x32xf32> -> vector<128x32xf32>
    %40 = arith.addf %33, %39 : vector<128x32xf32>
    %41 = vector.extract_strided_slice %4 {offsets = [0, 1, 9, 0], sizes = [2, 8, 8, 32], strides = [1, 1, 1, 1]} : vector<2x10x17x32xf32> to vector<2x8x8x32xf32>
    %42 = vector.shape_cast %41 : vector<2x8x8x32xf32> to vector<128x32xf32>
    %43 = arith.truncf %42 : vector<128x32xf32> to vector<128x32xbf16>
    %c0_43 = arith.constant 0 : index
    %c1_44 = arith.constant 1 : index
    %c2_45 = arith.constant 2 : index
    %c0_46 = arith.constant 0 : index
    %c0_47 = arith.constant 0 : index
    %44 = vector.load %arg1[%c0_43, %c1_44, %c2_45, %c0_46, %c0_47] : memref<5x3x3x32x32xbf16, #tpu.memory_space<vmem>>, vector<1x1x1x32x32xbf16>
    %45 = vector.shape_cast %44 : vector<1x1x1x32x32xbf16> to vector<32x32xbf16>
    %cst_48 = arith.constant dense<0.000000e+00> : vector<128x32xf32>
    %46 = tpu.matmul %43, %45, %cst_48 {dimension_numbers = #tpu.dot_dimension_numbers<[1], [0], [0], [1], [0, 0, 1, 1], [], []>} : vector<128x32xbf16>, vector<32x32xbf16>, vector<128x32xf32> -> vector<128x32xf32>
    %47 = arith.addf %40, %46 : vector<128x32xf32>
    %48 = vector.extract_strided_slice %4 {offsets = [0, 2, 7, 0], sizes = [2, 8, 8, 32], strides = [1, 1, 1, 1]} : vector<2x10x17x32xf32> to vector<2x8x8x32xf32>
    %49 = vector.shape_cast %48 : vector<2x8x8x32xf32> to vector<128x32xf32>
    %50 = arith.truncf %49 : vector<128x32xf32> to vector<128x32xbf16>
    %c0_49 = arith.constant 0 : index
    %c2_50 = arith.constant 2 : index
    %c0_51 = arith.constant 0 : index
    %c0_52 = arith.constant 0 : index
    %c0_53 = arith.constant 0 : index
    %51 = vector.load %arg1[%c0_49, %c2_50, %c0_51, %c0_52, %c0_53] : memref<5x3x3x32x32xbf16, #tpu.memory_space<vmem>>, vector<1x1x1x32x32xbf16>
    %52 = vector.shape_cast %51 : vector<1x1x1x32x32xbf16> to vector<32x32xbf16>
    %cst_54 = arith.constant dense<0.000000e+00> : vector<128x32xf32>
    %53 = tpu.matmul %50, %52, %cst_54 {dimension_numbers = #tpu.dot_dimension_numbers<[1], [0], [0], [1], [0, 0, 1, 1], [], []>} : vector<128x32xbf16>, vector<32x32xbf16>, vector<128x32xf32> -> vector<128x32xf32>
    %54 = arith.addf %47, %53 : vector<128x32xf32>
    %55 = vector.extract_strided_slice %4 {offsets = [0, 2, 8, 0], sizes = [2, 8, 8, 32], strides = [1, 1, 1, 1]} : vector<2x10x17x32xf32> to vector<2x8x8x32xf32>
    %56 = vector.shape_cast %55 : vector<2x8x8x32xf32> to vector<128x32xf32>
    %57 = arith.truncf %56 : vector<128x32xf32> to vector<128x32xbf16>
    %c0_55 = arith.constant 0 : index
    %c2_56 = arith.constant 2 : index
    %c1_57 = arith.constant 1 : index
    %c0_58 = arith.constant 0 : index
    %c0_59 = arith.constant 0 : index
    %58 = vector.load %arg1[%c0_55, %c2_56, %c1_57, %c0_58, %c0_59] : memref<5x3x3x32x32xbf16, #tpu.memory_space<vmem>>, vector<1x1x1x32x32xbf16>
    %59 = vector.shape_cast %58 : vector<1x1x1x32x32xbf16> to vector<32x32xbf16>
    %cst_60 = arith.constant dense<0.000000e+00> : vector<128x32xf32>
    %60 = tpu.matmul %57, %59, %cst_60 {dimension_numbers = #tpu.dot_dimension_numbers<[1], [0], [0], [1], [0, 0, 1, 1], [], []>} : vector<128x32xbf16>, vector<32x32xbf16>, vector<128x32xf32> -> vector<128x32xf32>
    %61 = arith.addf %54, %60 : vector<128x32xf32>
    %62 = vector.extract_strided_slice %4 {offsets = [0, 2, 9, 0], sizes = [2, 8, 8, 32], strides = [1, 1, 1, 1]} : vector<2x10x17x32xf32> to vector<2x8x8x32xf32>
    %63 = vector.shape_cast %62 : vector<2x8x8x32xf32> to vector<128x32xf32>
    %64 = arith.truncf %63 : vector<128x32xf32> to vector<128x32xbf16>
    %c0_61 = arith.constant 0 : index
    %c2_62 = arith.constant 2 : index
    %c2_63 = arith.constant 2 : index
    %c0_64 = arith.constant 0 : index
    %c0_65 = arith.constant 0 : index
    %65 = vector.load %arg1[%c0_61, %c2_62, %c2_63, %c0_64, %c0_65] : memref<5x3x3x32x32xbf16, #tpu.memory_space<vmem>>, vector<1x1x1x32x32xbf16>
    %66 = vector.shape_cast %65 : vector<1x1x1x32x32xbf16> to vector<32x32xbf16>
    %cst_66 = arith.constant dense<0.000000e+00> : vector<128x32xf32>
    %67 = tpu.matmul %64, %66, %cst_66 {dimension_numbers = #tpu.dot_dimension_numbers<[1], [0], [0], [1], [0, 0, 1, 1], [], []>} : vector<128x32xbf16>, vector<32x32xbf16>, vector<128x32xf32> -> vector<128x32xf32>
    %68 = arith.addf %61, %67 : vector<128x32xf32>
    %c0_67 = arith.constant 0 : index
    %c0_68 = arith.constant 0 : index
    %c0_69 = arith.constant 0 : index
    %69 = vector.load %arg2[%c0_67, %c0_68, %c0_69] : memref<5x1x32xf32, #tpu.memory_space<vmem>>, vector<1x1x32xf32>
    %70 = vector.shape_cast %69 : vector<1x1x32xf32> to vector<1x32xf32>
    %71 = vector.broadcast %70 : vector<1x32xf32> to vector<128x32xf32>
    %72 = arith.mulf %68, %71 : vector<128x32xf32>
    %c0_70 = arith.constant 0 : index
    %c0_71 = arith.constant 0 : index
    %c0_72 = arith.constant 0 : index
    %73 = vector.load %arg3[%c0_70, %c0_71, %c0_72] : memref<5x1x32xf32, #tpu.memory_space<vmem>>, vector<1x1x32xf32>
    %74 = vector.shape_cast %73 : vector<1x1x32xf32> to vector<1x32xf32>
    %75 = vector.broadcast %74 : vector<1x32xf32> to vector<128x32xf32>
    %76 = arith.addf %72, %75 : vector<128x32xf32>
    %cst_73 = arith.constant 0.000000e+00 : f32
    %77 = vector.broadcast %cst_73 : f32 to vector<128x32xf32>
    %78 = arith.maximumf %76, %77 : vector<128x32xf32>
    %79 = vector.shape_cast %78 : vector<128x32xf32> to vector<2x8x8x32xf32>
    %c0_74 = arith.constant 0 : index
    %c1_75 = arith.constant 1 : index
    %c8_76 = arith.constant 8 : index
    %c0_77 = arith.constant 0 : index
    %80 = vector.load %arg18[%c0_74, %c1_75, %c8_76, %c0_77] : memref<2x10x17x32xf32, #tpu.memory_space<vmem>>, vector<2x8x8x32xf32>
    tpu.vector_store %arg18[%c0_74, %c1_75, %c8_76, %c0_77], %79 {strides = array<i32>} : memref<2x10x17x32xf32, #tpu.memory_space<vmem>>, vector<2x8x8x32xf32>,
    %c0_78 = arith.constant 0 : index
    %c0_79 = arith.constant 0 : index
    %c0_80 = arith.constant 0 : index
    %c0_81 = arith.constant 0 : index
    %81 = vector.load %arg18[%c0_78, %c0_79, %c0_80, %c0_81] : memref<2x10x17x32xf32, #tpu.memory_space<vmem>>, vector<2x10x17x32xf32>
    %cst_82 = arith.constant 0.000000e+00 : f32
    %82 = vector.broadcast %cst_82 : f32 to vector<128x32xf32>
    %83 = vector.extract_strided_slice %81 {offsets = [0, 0, 7, 0], sizes = [2, 8, 8, 32], strides = [1, 1, 1, 1]} : vector<2x10x17x32xf32> to vector<2x8x8x32xf32>
    %84 = vector.shape_cast %83 : vector<2x8x8x32xf32> to vector<128x32xf32>
    %85 = arith.truncf %84 : vector<128x32xf32> to vector<128x32xbf16>
    %c1_83 = arith.constant 1 : index
    %c0_84 = arith.constant 0 : index
    %c0_85 = arith.constant 0 : index
    %c0_86 = arith.constant 0 : index
    %c0_87 = arith.constant 0 : index
    %86 = vector.load %arg1[%c1_83, %c0_84, %c0_85, %c0_86, %c0_87] : memref<5x3x3x32x32xbf16, #tpu.memory_space<vmem>>, vector<1x1x1x32x32xbf16>
    %87 = vector.shape_cast %86 : vector<1x1x1x32x32xbf16> to vector<32x32xbf16>
    %cst_88 = arith.constant dense<0.000000e+00> : vector<128x32xf32>
    %88 = tpu.matmul %85, %87, %cst_88 {dimension_numbers = #tpu.dot_dimension_numbers<[1], [0], [0], [1], [0, 0, 1, 1], [], []>} : vector<128x32xbf16>, vector<32x32xbf16>, vector<128x32xf32> -> vector<128x32xf32>
    %89 = arith.addf %82, %88 : vector<128x32xf32>
    %90 = vector.extract_strided_slice %81 {offsets = [0, 0, 8, 0], sizes = [2, 8, 8, 32], strides = [1, 1, 1, 1]} : vector<2x10x17x32xf32> to vector<2x8x8x32xf32>
    %91 = vector.shape_cast %90 : vector<2x8x8x32xf32> to vector<128x32xf32>
    %92 = arith.truncf %91 : vector<128x32xf32> to vector<128x32xbf16>
    %c1_89 = arith.constant 1 : index
    %c0_90 = arith.constant 0 : index
    %c1_91 = arith.constant 1 : index
    %c0_92 = arith.constant 0 : index
    %c0_93 = arith.constant 0 : index
    %93 = vector.load %arg1[%c1_89, %c0_90, %c1_91, %c0_92, %c0_93] : memref<5x3x3x32x32xbf16, #tpu.memory_space<vmem>>, vector<1x1x1x32x32xbf16>
    %94 = vector.shape_cast %93 : vector<1x1x1x32x32xbf16> to vector<32x32xbf16>
    %cst_94 = arith.constant dense<0.000000e+00> : vector<128x32xf32>
    %95 = tpu.matmul %92, %94, %cst_94 {dimension_numbers = #tpu.dot_dimension_numbers<[1], [0], [0], [1], [0, 0, 1, 1], [], []>} : vector<128x32xbf16>, vector<32x32xbf16>, vector<128x32xf32> -> vector<128x32xf32>
    %96 = arith.addf %89, %95 : vector<128x32xf32>
    %97 = vector.extract_strided_slice %81 {offsets = [0, 0, 9, 0], sizes = [2, 8, 8, 32], strides = [1, 1, 1, 1]} : vector<2x10x17x32xf32> to vector<2x8x8x32xf32>
    %98 = vector.shape_cast %97 : vector<2x8x8x32xf32> to vector<128x32xf32>
    %99 = arith.truncf %98 : vector<128x32xf32> to vector<128x32xbf16>
    %c1_95 = arith.constant 1 : index
    %c0_96 = arith.constant 0 : index
    %c2_97 = arith.constant 2 : index
    %c0_98 = arith.constant 0 : index
    %c0_99 = arith.constant 0 : index
    %100 = vector.load %arg1[%c1_95, %c0_96, %c2_97, %c0_98, %c0_99] : memref<5x3x3x32x32xbf16, #tpu.memory_space<vmem>>, vector<1x1x1x32x32xbf16>
    %101 = vector.shape_cast %100 : vector<1x1x1x32x32xbf16> to vector<32x32xbf16>
    %cst_100 = arith.constant dense<0.000000e+00> : vector<128x32xf32>
    %102 = tpu.matmul %99, %101, %cst_100 {dimension_numbers = #tpu.dot_dimension_numbers<[1], [0], [0], [1], [0, 0, 1, 1], [], []>} : vector<128x32xbf16>, vector<32x32xbf16>, vector<128x32xf32> -> vector<128x32xf32>
    %103 = arith.addf %96, %102 : vector<128x32xf32>
    %104 = vector.extract_strided_slice %81 {offsets = [0, 1, 7, 0], sizes = [2, 8, 8, 32], strides = [1, 1, 1, 1]} : vector<2x10x17x32xf32> to vector<2x8x8x32xf32>
    %105 = vector.shape_cast %104 : vector<2x8x8x32xf32> to vector<128x32xf32>
    %106 = arith.truncf %105 : vector<128x32xf32> to vector<128x32xbf16>
    %c1_101 = arith.constant 1 : index
    %c1_102 = arith.constant 1 : index
    %c0_103 = arith.constant 0 : index
    %c0_104 = arith.constant 0 : index
    %c0_105 = arith.constant 0 : index
    %107 = vector.load %arg1[%c1_101, %c1_102, %c0_103, %c0_104, %c0_105] : memref<5x3x3x32x32xbf16, #tpu.memory_space<vmem>>, vector<1x1x1x32x32xbf16>
    %108 = vector.shape_cast %107 : vector<1x1x1x32x32xbf16> to vector<32x32xbf16>
    %cst_106 = arith.constant dense<0.000000e+00> : vector<128x32xf32>
    %109 = tpu.matmul %106, %108, %cst_106 {dimension_numbers = #tpu.dot_dimension_numbers<[1], [0], [0], [1], [0, 0, 1, 1], [], []>} : vector<128x32xbf16>, vector<32x32xbf16>, vector<128x32xf32> -> vector<128x32xf32>
    %110 = arith.addf %103, %109 : vector<128x32xf32>
    %111 = vector.extract_strided_slice %81 {offsets = [0, 1, 8, 0], sizes = [2, 8, 8, 32], strides = [1, 1, 1, 1]} : vector<2x10x17x32xf32> to vector<2x8x8x32xf32>
    %112 = vector.shape_cast %111 : vector<2x8x8x32xf32> to vector<128x32xf32>
    %113 = arith.truncf %112 : vector<128x32xf32> to vector<128x32xbf16>
    %c1_107 = arith.constant 1 : index
    %c1_108 = arith.constant 1 : index
    %c1_109 = arith.constant 1 : index
    %c0_110 = arith.constant 0 : index
    %c0_111 = arith.constant 0 : index
    %114 = vector.load %arg1[%c1_107, %c1_108, %c1_109, %c0_110, %c0_111] : memref<5x3x3x32x32xbf16, #tpu.memory_space<vmem>>, vector<1x1x1x32x32xbf16>
    %115 = vector.shape_cast %114 : vector<1x1x1x32x32xbf16> to vector<32x32xbf16>
    %cst_112 = arith.constant dense<0.000000e+00> : vector<128x32xf32>
    %116 = tpu.matmul %113, %115, %cst_112 {dimension_numbers = #tpu.dot_dimension_numbers<[1], [0], [0], [1], [0, 0, 1, 1], [], []>} : vector<128x32xbf16>, vector<32x32xbf16>, vector<128x32xf32> -> vector<128x32xf32>
    %117 = arith.addf %110, %116 : vector<128x32xf32>
    %118 = vector.extract_strided_slice %81 {offsets = [0, 1, 9, 0], sizes = [2, 8, 8, 32], strides = [1, 1, 1, 1]} : vector<2x10x17x32xf32> to vector<2x8x8x32xf32>
    %119 = vector.shape_cast %118 : vector<2x8x8x32xf32> to vector<128x32xf32>
    %120 = arith.truncf %119 : vector<128x32xf32> to vector<128x32xbf16>
    %c1_113 = arith.constant 1 : index
    %c1_114 = arith.constant 1 : index
    %c2_115 = arith.constant 2 : index
    %c0_116 = arith.constant 0 : index
    %c0_117 = arith.constant 0 : index
    %121 = vector.load %arg1[%c1_113, %c1_114, %c2_115, %c0_116, %c0_117] : memref<5x3x3x32x32xbf16, #tpu.memory_space<vmem>>, vector<1x1x1x32x32xbf16>
    %122 = vector.shape_cast %121 : vector<1x1x1x32x32xbf16> to vector<32x32xbf16>
    %cst_118 = arith.constant dense<0.000000e+00> : vector<128x32xf32>
    %123 = tpu.matmul %120, %122, %cst_118 {dimension_numbers = #tpu.dot_dimension_numbers<[1], [0], [0], [1], [0, 0, 1, 1], [], []>} : vector<128x32xbf16>, vector<32x32xbf16>, vector<128x32xf32> -> vector<128x32xf32>
    %124 = arith.addf %117, %123 : vector<128x32xf32>
    %125 = vector.extract_strided_slice %81 {offsets = [0, 2, 7, 0], sizes = [2, 8, 8, 32], strides = [1, 1, 1, 1]} : vector<2x10x17x32xf32> to vector<2x8x8x32xf32>
    %126 = vector.shape_cast %125 : vector<2x8x8x32xf32> to vector<128x32xf32>
    %127 = arith.truncf %126 : vector<128x32xf32> to vector<128x32xbf16>
    %c1_119 = arith.constant 1 : index
    %c2_120 = arith.constant 2 : index
    %c0_121 = arith.constant 0 : index
    %c0_122 = arith.constant 0 : index
    %c0_123 = arith.constant 0 : index
    %128 = vector.load %arg1[%c1_119, %c2_120, %c0_121, %c0_122, %c0_123] : memref<5x3x3x32x32xbf16, #tpu.memory_space<vmem>>, vector<1x1x1x32x32xbf16>
    %129 = vector.shape_cast %128 : vector<1x1x1x32x32xbf16> to vector<32x32xbf16>
    %cst_124 = arith.constant dense<0.000000e+00> : vector<128x32xf32>
    %130 = tpu.matmul %127, %129, %cst_124 {dimension_numbers = #tpu.dot_dimension_numbers<[1], [0], [0], [1], [0, 0, 1, 1], [], []>} : vector<128x32xbf16>, vector<32x32xbf16>, vector<128x32xf32> -> vector<128x32xf32>
    %131 = arith.addf %124, %130 : vector<128x32xf32>
    %132 = vector.extract_strided_slice %81 {offsets = [0, 2, 8, 0], sizes = [2, 8, 8, 32], strides = [1, 1, 1, 1]} : vector<2x10x17x32xf32> to vector<2x8x8x32xf32>
    %133 = vector.shape_cast %132 : vector<2x8x8x32xf32> to vector<128x32xf32>
    %134 = arith.truncf %133 : vector<128x32xf32> to vector<128x32xbf16>
    %c1_125 = arith.constant 1 : index
    %c2_126 = arith.constant 2 : index
    %c1_127 = arith.constant 1 : index
    %c0_128 = arith.constant 0 : index
    %c0_129 = arith.constant 0 : index
    %135 = vector.load %arg1[%c1_125, %c2_126, %c1_127, %c0_128, %c0_129] : memref<5x3x3x32x32xbf16, #tpu.memory_space<vmem>>, vector<1x1x1x32x32xbf16>
    %136 = vector.shape_cast %135 : vector<1x1x1x32x32xbf16> to vector<32x32xbf16>
    %cst_130 = arith.constant dense<0.000000e+00> : vector<128x32xf32>
    %137 = tpu.matmul %134, %136, %cst_130 {dimension_numbers = #tpu.dot_dimension_numbers<[1], [0], [0], [1], [0, 0, 1, 1], [], []>} : vector<128x32xbf16>, vector<32x32xbf16>, vector<128x32xf32> -> vector<128x32xf32>
    %138 = arith.addf %131, %137 : vector<128x32xf32>
    %139 = vector.extract_strided_slice %81 {offsets = [0, 2, 9, 0], sizes = [2, 8, 8, 32], strides = [1, 1, 1, 1]} : vector<2x10x17x32xf32> to vector<2x8x8x32xf32>
    %140 = vector.shape_cast %139 : vector<2x8x8x32xf32> to vector<128x32xf32>
    %141 = arith.truncf %140 : vector<128x32xf32> to vector<128x32xbf16>
    %c1_131 = arith.constant 1 : index
    %c2_132 = arith.constant 2 : index
    %c2_133 = arith.constant 2 : index
    %c0_134 = arith.constant 0 : index
    %c0_135 = arith.constant 0 : index
    %142 = vector.load %arg1[%c1_131, %c2_132, %c2_133, %c0_134, %c0_135] : memref<5x3x3x32x32xbf16, #tpu.memory_space<vmem>>, vector<1x1x1x32x32xbf16>
    %143 = vector.shape_cast %142 : vector<1x1x1x32x32xbf16> to vector<32x32xbf16>
    %cst_136 = arith.constant dense<0.000000e+00> : vector<128x32xf32>
    %144 = tpu.matmul %141, %143, %cst_136 {dimension_numbers = #tpu.dot_dimension_numbers<[1], [0], [0], [1], [0, 0, 1, 1], [], []>} : vector<128x32xbf16>, vector<32x32xbf16>, vector<128x32xf32> -> vector<128x32xf32>
    %145 = arith.addf %138, %144 : vector<128x32xf32>
    %c1_137 = arith.constant 1 : index
    %c0_138 = arith.constant 0 : index
    %c0_139 = arith.constant 0 : index
    %146 = vector.load %arg2[%c1_137, %c0_138, %c0_139] : memref<5x1x32xf32, #tpu.memory_space<vmem>>, vector<1x1x32xf32>
    %147 = vector.shape_cast %146 : vector<1x1x32xf32> to vector<1x32xf32>
    %148 = vector.broadcast %147 : vector<1x32xf32> to vector<128x32xf32>
    %149 = arith.mulf %145, %148 : vector<128x32xf32>
    %c1_140 = arith.constant 1 : index
    %c0_141 = arith.constant 0 : index
    %c0_142 = arith.constant 0 : index
    %150 = vector.load %arg3[%c1_140, %c0_141, %c0_142] : memref<5x1x32xf32, #tpu.memory_space<vmem>>, vector<1x1x32xf32>
    %151 = vector.shape_cast %150 : vector<1x1x32xf32> to vector<1x32xf32>
    %152 = vector.broadcast %151 : vector<1x32xf32> to vector<128x32xf32>
    %153 = arith.addf %149, %152 : vector<128x32xf32>
    %cst_143 = arith.constant 0.000000e+00 : f32
    %154 = vector.broadcast %cst_143 : f32 to vector<128x32xf32>
    %155 = arith.maximumf %153, %154 : vector<128x32xf32>
    %156 = vector.shape_cast %155 : vector<128x32xf32> to vector<2x8x8x32xf32>
    %c0_144 = arith.constant 0 : index
    %c1_145 = arith.constant 1 : index
    %c8_146 = arith.constant 8 : index
    %c0_147 = arith.constant 0 : index
    %157 = vector.load %arg18[%c0_144, %c1_145, %c8_146, %c0_147] : memref<2x10x17x32xf32, #tpu.memory_space<vmem>>, vector<2x8x8x32xf32>
    tpu.vector_store %arg18[%c0_144, %c1_145, %c8_146, %c0_147], %156 {strides = array<i32>} : memref<2x10x17x32xf32, #tpu.memory_space<vmem>>, vector<2x8x8x32xf32>,
    %c0_148 = arith.constant 0 : index
    %c0_149 = arith.constant 0 : index
    %c0_150 = arith.constant 0 : index
    %c0_151 = arith.constant 0 : index
    %158 = vector.load %arg18[%c0_148, %c0_149, %c0_150, %c0_151] : memref<2x10x17x32xf32, #tpu.memory_space<vmem>>, vector<2x10x17x32xf32>
    %cst_152 = arith.constant 0.000000e+00 : f32
    %159 = vector.broadcast %cst_152 : f32 to vector<128x32xf32>
    %160 = vector.extract_strided_slice %158 {offsets = [0, 0, 7, 0], sizes = [2, 8, 8, 32], strides = [1, 1, 1, 1]} : vector<2x10x17x32xf32> to vector<2x8x8x32xf32>
    %161 = vector.shape_cast %160 : vector<2x8x8x32xf32> to vector<128x32xf32>
    %162 = arith.truncf %161 : vector<128x32xf32> to vector<128x32xbf16>
    %c2_153 = arith.constant 2 : index
    %c0_154 = arith.constant 0 : index
    %c0_155 = arith.constant 0 : index
    %c0_156 = arith.constant 0 : index
    %c0_157 = arith.constant 0 : index
    %163 = vector.load %arg1[%c2_153, %c0_154, %c0_155, %c0_156, %c0_157] : memref<5x3x3x32x32xbf16, #tpu.memory_space<vmem>>, vector<1x1x1x32x32xbf16>
    %164 = vector.shape_cast %163 : vector<1x1x1x32x32xbf16> to vector<32x32xbf16>
    %cst_158 = arith.constant dense<0.000000e+00> : vector<128x32xf32>
    %165 = tpu.matmul %162, %164, %cst_158 {dimension_numbers = #tpu.dot_dimension_numbers<[1], [0], [0], [1], [0, 0, 1, 1], [], []>} : vector<128x32xbf16>, vector<32x32xbf16>, vector<128x32xf32> -> vector<128x32xf32>
    %166 = arith.addf %159, %165 : vector<128x32xf32>
    %167 = vector.extract_strided_slice %158 {offsets = [0, 0, 8, 0], sizes = [2, 8, 8, 32], strides = [1, 1, 1, 1]} : vector<2x10x17x32xf32> to vector<2x8x8x32xf32>
    %168 = vector.shape_cast %167 : vector<2x8x8x32xf32> to vector<128x32xf32>
    %169 = arith.truncf %168 : vector<128x32xf32> to vector<128x32xbf16>
    %c2_159 = arith.constant 2 : index
    %c0_160 = arith.constant 0 : index
    %c1_161 = arith.constant 1 : index
    %c0_162 = arith.constant 0 : index
    %c0_163 = arith.constant 0 : index
    %170 = vector.load %arg1[%c2_159, %c0_160, %c1_161, %c0_162, %c0_163] : memref<5x3x3x32x32xbf16, #tpu.memory_space<vmem>>, vector<1x1x1x32x32xbf16>
    %171 = vector.shape_cast %170 : vector<1x1x1x32x32xbf16> to vector<32x32xbf16>
    %cst_164 = arith.constant dense<0.000000e+00> : vector<128x32xf32>
    %172 = tpu.matmul %169, %171, %cst_164 {dimension_numbers = #tpu.dot_dimension_numbers<[1], [0], [0], [1], [0, 0, 1, 1], [], []>} : vector<128x32xbf16>, vector<32x32xbf16>, vector<128x32xf32> -> vector<128x32xf32>
    %173 = arith.addf %166, %172 : vector<128x32xf32>
    %174 = vector.extract_strided_slice %158 {offsets = [0, 0, 9, 0], sizes = [2, 8, 8, 32], strides = [1, 1, 1, 1]} : vector<2x10x17x32xf32> to vector<2x8x8x32xf32>
    %175 = vector.shape_cast %174 : vector<2x8x8x32xf32> to vector<128x32xf32>
    %176 = arith.truncf %175 : vector<128x32xf32> to vector<128x32xbf16>
    %c2_165 = arith.constant 2 : index
    %c0_166 = arith.constant 0 : index
    %c2_167 = arith.constant 2 : index
    %c0_168 = arith.constant 0 : index
    %c0_169 = arith.constant 0 : index
    %177 = vector.load %arg1[%c2_165, %c0_166, %c2_167, %c0_168, %c0_169] : memref<5x3x3x32x32xbf16, #tpu.memory_space<vmem>>, vector<1x1x1x32x32xbf16>
    %178 = vector.shape_cast %177 : vector<1x1x1x32x32xbf16> to vector<32x32xbf16>
    %cst_170 = arith.constant dense<0.000000e+00> : vector<128x32xf32>
    %179 = tpu.matmul %176, %178, %cst_170 {dimension_numbers = #tpu.dot_dimension_numbers<[1], [0], [0], [1], [0, 0, 1, 1], [], []>} : vector<128x32xbf16>, vector<32x32xbf16>, vector<128x32xf32> -> vector<128x32xf32>
    %180 = arith.addf %173, %179 : vector<128x32xf32>
    %181 = vector.extract_strided_slice %158 {offsets = [0, 1, 7, 0], sizes = [2, 8, 8, 32], strides = [1, 1, 1, 1]} : vector<2x10x17x32xf32> to vector<2x8x8x32xf32>
    %182 = vector.shape_cast %181 : vector<2x8x8x32xf32> to vector<128x32xf32>
    %183 = arith.truncf %182 : vector<128x32xf32> to vector<128x32xbf16>
    %c2_171 = arith.constant 2 : index
    %c1_172 = arith.constant 1 : index
    %c0_173 = arith.constant 0 : index
    %c0_174 = arith.constant 0 : index
    %c0_175 = arith.constant 0 : index
    %184 = vector.load %arg1[%c2_171, %c1_172, %c0_173, %c0_174, %c0_175] : memref<5x3x3x32x32xbf16, #tpu.memory_space<vmem>>, vector<1x1x1x32x32xbf16>
    %185 = vector.shape_cast %184 : vector<1x1x1x32x32xbf16> to vector<32x32xbf16>
    %cst_176 = arith.constant dense<0.000000e+00> : vector<128x32xf32>
    %186 = tpu.matmul %183, %185, %cst_176 {dimension_numbers = #tpu.dot_dimension_numbers<[1], [0], [0], [1], [0, 0, 1, 1], [], []>} : vector<128x32xbf16>, vector<32x32xbf16>, vector<128x32xf32> -> vector<128x32xf32>
    %187 = arith.addf %180, %186 : vector<128x32xf32>
    %188 = vector.extract_strided_slice %158 {offsets = [0, 1, 8, 0], sizes = [2, 8, 8, 32], strides = [1, 1, 1, 1]} : vector<2x10x17x32xf32> to vector<2x8x8x32xf32>
    %189 = vector.shape_cast %188 : vector<2x8x8x32xf32> to vector<128x32xf32>
    %190 = arith.truncf %189 : vector<128x32xf32> to vector<128x32xbf16>
    %c2_177 = arith.constant 2 : index
    %c1_178 = arith.constant 1 : index
    %c1_179 = arith.constant 1 : index
    %c0_180 = arith.constant 0 : index
    %c0_181 = arith.constant 0 : index
    %191 = vector.load %arg1[%c2_177, %c1_178, %c1_179, %c0_180, %c0_181] : memref<5x3x3x32x32xbf16, #tpu.memory_space<vmem>>, vector<1x1x1x32x32xbf16>
    %192 = vector.shape_cast %191 : vector<1x1x1x32x32xbf16> to vector<32x32xbf16>
    %cst_182 = arith.constant dense<0.000000e+00> : vector<128x32xf32>
    %193 = tpu.matmul %190, %192, %cst_182 {dimension_numbers = #tpu.dot_dimension_numbers<[1], [0], [0], [1], [0, 0, 1, 1], [], []>} : vector<128x32xbf16>, vector<32x32xbf16>, vector<128x32xf32> -> vector<128x32xf32>
    %194 = arith.addf %187, %193 : vector<128x32xf32>
    %195 = vector.extract_strided_slice %158 {offsets = [0, 1, 9, 0], sizes = [2, 8, 8, 32], strides = [1, 1, 1, 1]} : vector<2x10x17x32xf32> to vector<2x8x8x32xf32>
    %196 = vector.shape_cast %195 : vector<2x8x8x32xf32> to vector<128x32xf32>
    %197 = arith.truncf %196 : vector<128x32xf32> to vector<128x32xbf16>
    %c2_183 = arith.constant 2 : index
    %c1_184 = arith.constant 1 : index
    %c2_185 = arith.constant 2 : index
    %c0_186 = arith.constant 0 : index
    %c0_187 = arith.constant 0 : index
    %198 = vector.load %arg1[%c2_183, %c1_184, %c2_185, %c0_186, %c0_187] : memref<5x3x3x32x32xbf16, #tpu.memory_space<vmem>>, vector<1x1x1x32x32xbf16>
    %199 = vector.shape_cast %198 : vector<1x1x1x32x32xbf16> to vector<32x32xbf16>
    %cst_188 = arith.constant dense<0.000000e+00> : vector<128x32xf32>
    %200 = tpu.matmul %197, %199, %cst_188 {dimension_numbers = #tpu.dot_dimension_numbers<[1], [0], [0], [1], [0, 0, 1, 1], [], []>} : vector<128x32xbf16>, vector<32x32xbf16>, vector<128x32xf32> -> vector<128x32xf32>
    %201 = arith.addf %194, %200 : vector<128x32xf32>
    %202 = vector.extract_strided_slice %158 {offsets = [0, 2, 7, 0], sizes = [2, 8, 8, 32], strides = [1, 1, 1, 1]} : vector<2x10x17x32xf32> to vector<2x8x8x32xf32>
    %203 = vector.shape_cast %202 : vector<2x8x8x32xf32> to vector<128x32xf32>
    %204 = arith.truncf %203 : vector<128x32xf32> to vector<128x32xbf16>
    %c2_189 = arith.constant 2 : index
    %c2_190 = arith.constant 2 : index
    %c0_191 = arith.constant 0 : index
    %c0_192 = arith.constant 0 : index
    %c0_193 = arith.constant 0 : index
    %205 = vector.load %arg1[%c2_189, %c2_190, %c0_191, %c0_192, %c0_193] : memref<5x3x3x32x32xbf16, #tpu.memory_space<vmem>>, vector<1x1x1x32x32xbf16>
    %206 = vector.shape_cast %205 : vector<1x1x1x32x32xbf16> to vector<32x32xbf16>
    %cst_194 = arith.constant dense<0.000000e+00> : vector<128x32xf32>
    %207 = tpu.matmul %204, %206, %cst_194 {dimension_numbers = #tpu.dot_dimension_numbers<[1], [0], [0], [1], [0, 0, 1, 1], [], []>} : vector<128x32xbf16>, vector<32x32xbf16>, vector<128x32xf32> -> vector<128x32xf32>
    %208 = arith.addf %201, %207 : vector<128x32xf32>
    %209 = vector.extract_strided_slice %158 {offsets = [0, 2, 8, 0], sizes = [2, 8, 8, 32], strides = [1, 1, 1, 1]} : vector<2x10x17x32xf32> to vector<2x8x8x32xf32>
    %210 = vector.shape_cast %209 : vector<2x8x8x32xf32> to vector<128x32xf32>
    %211 = arith.truncf %210 : vector<128x32xf32> to vector<128x32xbf16>
    %c2_195 = arith.constant 2 : index
    %c2_196 = arith.constant 2 : index
    %c1_197 = arith.constant 1 : index
    %c0_198 = arith.constant 0 : index
    %c0_199 = arith.constant 0 : index
    %212 = vector.load %arg1[%c2_195, %c2_196, %c1_197, %c0_198, %c0_199] : memref<5x3x3x32x32xbf16, #tpu.memory_space<vmem>>, vector<1x1x1x32x32xbf16>
    %213 = vector.shape_cast %212 : vector<1x1x1x32x32xbf16> to vector<32x32xbf16>
    %cst_200 = arith.constant dense<0.000000e+00> : vector<128x32xf32>
    %214 = tpu.matmul %211, %213, %cst_200 {dimension_numbers = #tpu.dot_dimension_numbers<[1], [0], [0], [1], [0, 0, 1, 1], [], []>} : vector<128x32xbf16>, vector<32x32xbf16>, vector<128x32xf32> -> vector<128x32xf32>
    %215 = arith.addf %208, %214 : vector<128x32xf32>
    %216 = vector.extract_strided_slice %158 {offsets = [0, 2, 9, 0], sizes = [2, 8, 8, 32], strides = [1, 1, 1, 1]} : vector<2x10x17x32xf32> to vector<2x8x8x32xf32>
    %217 = vector.shape_cast %216 : vector<2x8x8x32xf32> to vector<128x32xf32>
    %218 = arith.truncf %217 : vector<128x32xf32> to vector<128x32xbf16>
    %c2_201 = arith.constant 2 : index
    %c2_202 = arith.constant 2 : index
    %c2_203 = arith.constant 2 : index
    %c0_204 = arith.constant 0 : index
    %c0_205 = arith.constant 0 : index
    %219 = vector.load %arg1[%c2_201, %c2_202, %c2_203, %c0_204, %c0_205] : memref<5x3x3x32x32xbf16, #tpu.memory_space<vmem>>, vector<1x1x1x32x32xbf16>
    %220 = vector.shape_cast %219 : vector<1x1x1x32x32xbf16> to vector<32x32xbf16>
    %cst_206 = arith.constant dense<0.000000e+00> : vector<128x32xf32>
    %221 = tpu.matmul %218, %220, %cst_206 {dimension_numbers = #tpu.dot_dimension_numbers<[1], [0], [0], [1], [0, 0, 1, 1], [], []>} : vector<128x32xbf16>, vector<32x32xbf16>, vector<128x32xf32> -> vector<128x32xf32>
    %222 = arith.addf %215, %221 : vector<128x32xf32>
    %c2_207 = arith.constant 2 : index
    %c0_208 = arith.constant 0 : index
    %c0_209 = arith.constant 0 : index
    %223 = vector.load %arg2[%c2_207, %c0_208, %c0_209] : memref<5x1x32xf32, #tpu.memory_space<vmem>>, vector<1x1x32xf32>
    %224 = vector.shape_cast %223 : vector<1x1x32xf32> to vector<1x32xf32>
    %225 = vector.broadcast %224 : vector<1x32xf32> to vector<128x32xf32>
    %226 = arith.mulf %222, %225 : vector<128x32xf32>
    %c2_210 = arith.constant 2 : index
    %c0_211 = arith.constant 0 : index
    %c0_212 = arith.constant 0 : index
    %227 = vector.load %arg3[%c2_210, %c0_211, %c0_212] : memref<5x1x32xf32, #tpu.memory_space<vmem>>, vector<1x1x32xf32>
    %228 = vector.shape_cast %227 : vector<1x1x32xf32> to vector<1x32xf32>
    %229 = vector.broadcast %228 : vector<1x32xf32> to vector<128x32xf32>
    %230 = arith.addf %226, %229 : vector<128x32xf32>
    %231 = arith.addf %230, %78 : vector<128x32xf32>
    %cst_213 = arith.constant 0.000000e+00 : f32
    %232 = vector.broadcast %cst_213 : f32 to vector<128x32xf32>
    %233 = arith.maximumf %231, %232 : vector<128x32xf32>
    %234 = vector.shape_cast %233 : vector<128x32xf32> to vector<2x8x8x32xf32>
    %c0_214 = arith.constant 0 : index
    %c1_215 = arith.constant 1 : index
    %c8_216 = arith.constant 8 : index
    %c0_217 = arith.constant 0 : index
    %235 = vector.load %arg18[%c0_214, %c1_215, %c8_216, %c0_217] : memref<2x10x17x32xf32, #tpu.memory_space<vmem>>, vector<2x8x8x32xf32>
    tpu.vector_store %arg18[%c0_214, %c1_215, %c8_216, %c0_217], %234 {strides = array<i32>} : memref<2x10x17x32xf32, #tpu.memory_space<vmem>>, vector<2x8x8x32xf32>,
    %c0_218 = arith.constant 0 : index
    %c0_219 = arith.constant 0 : index
    %c0_220 = arith.constant 0 : index
    %c0_221 = arith.constant 0 : index
    %236 = vector.load %arg18[%c0_218, %c0_219, %c0_220, %c0_221] : memref<2x10x17x32xf32, #tpu.memory_space<vmem>>, vector<2x10x17x32xf32>
    %cst_222 = arith.constant 0.000000e+00 : f32
    %237 = vector.broadcast %cst_222 : f32 to vector<128x32xf32>
    %238 = vector.extract_strided_slice %236 {offsets = [0, 0, 7, 0], sizes = [2, 8, 8, 32], strides = [1, 1, 1, 1]} : vector<2x10x17x32xf32> to vector<2x8x8x32xf32>
    %239 = vector.shape_cast %238 : vector<2x8x8x32xf32> to vector<128x32xf32>
    %240 = arith.truncf %239 : vector<128x32xf32> to vector<128x32xbf16>
    %c3 = arith.constant 3 : index
    %c0_223 = arith.constant 0 : index
    %c0_224 = arith.constant 0 : index
    %c0_225 = arith.constant 0 : index
    %c0_226 = arith.constant 0 : index
    %241 = vector.load %arg1[%c3, %c0_223, %c0_224, %c0_225, %c0_226] : memref<5x3x3x32x32xbf16, #tpu.memory_space<vmem>>, vector<1x1x1x32x32xbf16>
    %242 = vector.shape_cast %241 : vector<1x1x1x32x32xbf16> to vector<32x32xbf16>
    %cst_227 = arith.constant dense<0.000000e+00> : vector<128x32xf32>
    %243 = tpu.matmul %240, %242, %cst_227 {dimension_numbers = #tpu.dot_dimension_numbers<[1], [0], [0], [1], [0, 0, 1, 1], [], []>} : vector<128x32xbf16>, vector<32x32xbf16>, vector<128x32xf32> -> vector<128x32xf32>
    %244 = arith.addf %237, %243 : vector<128x32xf32>
    %245 = vector.extract_strided_slice %236 {offsets = [0, 0, 8, 0], sizes = [2, 8, 8, 32], strides = [1, 1, 1, 1]} : vector<2x10x17x32xf32> to vector<2x8x8x32xf32>
    %246 = vector.shape_cast %245 : vector<2x8x8x32xf32> to vector<128x32xf32>
    %247 = arith.truncf %246 : vector<128x32xf32> to vector<128x32xbf16>
    %c3_228 = arith.constant 3 : index
    %c0_229 = arith.constant 0 : index
    %c1_230 = arith.constant 1 : index
    %c0_231 = arith.constant 0 : index
    %c0_232 = arith.constant 0 : index
    %248 = vector.load %arg1[%c3_228, %c0_229, %c1_230, %c0_231, %c0_232] : memref<5x3x3x32x32xbf16, #tpu.memory_space<vmem>>, vector<1x1x1x32x32xbf16>
    %249 = vector.shape_cast %248 : vector<1x1x1x32x32xbf16> to vector<32x32xbf16>
    %cst_233 = arith.constant dense<0.000000e+00> : vector<128x32xf32>
    %250 = tpu.matmul %247, %249, %cst_233 {dimension_numbers = #tpu.dot_dimension_numbers<[1], [0], [0], [1], [0, 0, 1, 1], [], []>} : vector<128x32xbf16>, vector<32x32xbf16>, vector<128x32xf32> -> vector<128x32xf32>
    %251 = arith.addf %244, %250 : vector<128x32xf32>
    %252 = vector.extract_strided_slice %236 {offsets = [0, 0, 9, 0], sizes = [2, 8, 8, 32], strides = [1, 1, 1, 1]} : vector<2x10x17x32xf32> to vector<2x8x8x32xf32>
    %253 = vector.shape_cast %252 : vector<2x8x8x32xf32> to vector<128x32xf32>
    %254 = arith.truncf %253 : vector<128x32xf32> to vector<128x32xbf16>
    %c3_234 = arith.constant 3 : index
    %c0_235 = arith.constant 0 : index
    %c2_236 = arith.constant 2 : index
    %c0_237 = arith.constant 0 : index
    %c0_238 = arith.constant 0 : index
    %255 = vector.load %arg1[%c3_234, %c0_235, %c2_236, %c0_237, %c0_238] : memref<5x3x3x32x32xbf16, #tpu.memory_space<vmem>>, vector<1x1x1x32x32xbf16>
    %256 = vector.shape_cast %255 : vector<1x1x1x32x32xbf16> to vector<32x32xbf16>
    %cst_239 = arith.constant dense<0.000000e+00> : vector<128x32xf32>
    %257 = tpu.matmul %254, %256, %cst_239 {dimension_numbers = #tpu.dot_dimension_numbers<[1], [0], [0], [1], [0, 0, 1, 1], [], []>} : vector<128x32xbf16>, vector<32x32xbf16>, vector<128x32xf32> -> vector<128x32xf32>
    %258 = arith.addf %251, %257 : vector<128x32xf32>
    %259 = vector.extract_strided_slice %236 {offsets = [0, 1, 7, 0], sizes = [2, 8, 8, 32], strides = [1, 1, 1, 1]} : vector<2x10x17x32xf32> to vector<2x8x8x32xf32>
    %260 = vector.shape_cast %259 : vector<2x8x8x32xf32> to vector<128x32xf32>
    %261 = arith.truncf %260 : vector<128x32xf32> to vector<128x32xbf16>
    %c3_240 = arith.constant 3 : index
    %c1_241 = arith.constant 1 : index
    %c0_242 = arith.constant 0 : index
    %c0_243 = arith.constant 0 : index
    %c0_244 = arith.constant 0 : index
    %262 = vector.load %arg1[%c3_240, %c1_241, %c0_242, %c0_243, %c0_244] : memref<5x3x3x32x32xbf16, #tpu.memory_space<vmem>>, vector<1x1x1x32x32xbf16>
    %263 = vector.shape_cast %262 : vector<1x1x1x32x32xbf16> to vector<32x32xbf16>
    %cst_245 = arith.constant dense<0.000000e+00> : vector<128x32xf32>
    %264 = tpu.matmul %261, %263, %cst_245 {dimension_numbers = #tpu.dot_dimension_numbers<[1], [0], [0], [1], [0, 0, 1, 1], [], []>} : vector<128x32xbf16>, vector<32x32xbf16>, vector<128x32xf32> -> vector<128x32xf32>
    %265 = arith.addf %258, %264 : vector<128x32xf32>
    %266 = vector.extract_strided_slice %236 {offsets = [0, 1, 8, 0], sizes = [2, 8, 8, 32], strides = [1, 1, 1, 1]} : vector<2x10x17x32xf32> to vector<2x8x8x32xf32>
    %267 = vector.shape_cast %266 : vector<2x8x8x32xf32> to vector<128x32xf32>
    %268 = arith.truncf %267 : vector<128x32xf32> to vector<128x32xbf16>
    %c3_246 = arith.constant 3 : index
    %c1_247 = arith.constant 1 : index
    %c1_248 = arith.constant 1 : index
    %c0_249 = arith.constant 0 : index
    %c0_250 = arith.constant 0 : index
    %269 = vector.load %arg1[%c3_246, %c1_247, %c1_248, %c0_249, %c0_250] : memref<5x3x3x32x32xbf16, #tpu.memory_space<vmem>>, vector<1x1x1x32x32xbf16>
    %270 = vector.shape_cast %269 : vector<1x1x1x32x32xbf16> to vector<32x32xbf16>
    %cst_251 = arith.constant dense<0.000000e+00> : vector<128x32xf32>
    %271 = tpu.matmul %268, %270, %cst_251 {dimension_numbers = #tpu.dot_dimension_numbers<[1], [0], [0], [1], [0, 0, 1, 1], [], []>} : vector<128x32xbf16>, vector<32x32xbf16>, vector<128x32xf32> -> vector<128x32xf32>
    %272 = arith.addf %265, %271 : vector<128x32xf32>
    %273 = vector.extract_strided_slice %236 {offsets = [0, 1, 9, 0], sizes = [2, 8, 8, 32], strides = [1, 1, 1, 1]} : vector<2x10x17x32xf32> to vector<2x8x8x32xf32>
    %274 = vector.shape_cast %273 : vector<2x8x8x32xf32> to vector<128x32xf32>
    %275 = arith.truncf %274 : vector<128x32xf32> to vector<128x32xbf16>
    %c3_252 = arith.constant 3 : index
    %c1_253 = arith.constant 1 : index
    %c2_254 = arith.constant 2 : index
    %c0_255 = arith.constant 0 : index
    %c0_256 = arith.constant 0 : index
    %276 = vector.load %arg1[%c3_252, %c1_253, %c2_254, %c0_255, %c0_256] : memref<5x3x3x32x32xbf16, #tpu.memory_space<vmem>>, vector<1x1x1x32x32xbf16>
    %277 = vector.shape_cast %276 : vector<1x1x1x32x32xbf16> to vector<32x32xbf16>
    %cst_257 = arith.constant dense<0.000000e+00> : vector<128x32xf32>
    %278 = tpu.matmul %275, %277, %cst_257 {dimension_numbers = #tpu.dot_dimension_numbers<[1], [0], [0], [1], [0, 0, 1, 1], [], []>} : vector<128x32xbf16>, vector<32x32xbf16>, vector<128x32xf32> -> vector<128x32xf32>
    %279 = arith.addf %272, %278 : vector<128x32xf32>
    %280 = vector.extract_strided_slice %236 {offsets = [0, 2, 7, 0], sizes = [2, 8, 8, 32], strides = [1, 1, 1, 1]} : vector<2x10x17x32xf32> to vector<2x8x8x32xf32>
    %281 = vector.shape_cast %280 : vector<2x8x8x32xf32> to vector<128x32xf32>
    %282 = arith.truncf %281 : vector<128x32xf32> to vector<128x32xbf16>
    %c3_258 = arith.constant 3 : index
    %c2_259 = arith.constant 2 : index
    %c0_260 = arith.constant 0 : index
    %c0_261 = arith.constant 0 : index
    %c0_262 = arith.constant 0 : index
    %283 = vector.load %arg1[%c3_258, %c2_259, %c0_260, %c0_261, %c0_262] : memref<5x3x3x32x32xbf16, #tpu.memory_space<vmem>>, vector<1x1x1x32x32xbf16>
    %284 = vector.shape_cast %283 : vector<1x1x1x32x32xbf16> to vector<32x32xbf16>
    %cst_263 = arith.constant dense<0.000000e+00> : vector<128x32xf32>
    %285 = tpu.matmul %282, %284, %cst_263 {dimension_numbers = #tpu.dot_dimension_numbers<[1], [0], [0], [1], [0, 0, 1, 1], [], []>} : vector<128x32xbf16>, vector<32x32xbf16>, vector<128x32xf32> -> vector<128x32xf32>
    %286 = arith.addf %279, %285 : vector<128x32xf32>
    %287 = vector.extract_strided_slice %236 {offsets = [0, 2, 8, 0], sizes = [2, 8, 8, 32], strides = [1, 1, 1, 1]} : vector<2x10x17x32xf32> to vector<2x8x8x32xf32>
    %288 = vector.shape_cast %287 : vector<2x8x8x32xf32> to vector<128x32xf32>
    %289 = arith.truncf %288 : vector<128x32xf32> to vector<128x32xbf16>
    %c3_264 = arith.constant 3 : index
    %c2_265 = arith.constant 2 : index
    %c1_266 = arith.constant 1 : index
    %c0_267 = arith.constant 0 : index
    %c0_268 = arith.constant 0 : index
    %290 = vector.load %arg1[%c3_264, %c2_265, %c1_266, %c0_267, %c0_268] : memref<5x3x3x32x32xbf16, #tpu.memory_space<vmem>>, vector<1x1x1x32x32xbf16>
    %291 = vector.shape_cast %290 : vector<1x1x1x32x32xbf16> to vector<32x32xbf16>
    %cst_269 = arith.constant dense<0.000000e+00> : vector<128x32xf32>
    %292 = tpu.matmul %289, %291, %cst_269 {dimension_numbers = #tpu.dot_dimension_numbers<[1], [0], [0], [1], [0, 0, 1, 1], [], []>} : vector<128x32xbf16>, vector<32x32xbf16>, vector<128x32xf32> -> vector<128x32xf32>
    %293 = arith.addf %286, %292 : vector<128x32xf32>
    %294 = vector.extract_strided_slice %236 {offsets = [0, 2, 9, 0], sizes = [2, 8, 8, 32], strides = [1, 1, 1, 1]} : vector<2x10x17x32xf32> to vector<2x8x8x32xf32>
    %295 = vector.shape_cast %294 : vector<2x8x8x32xf32> to vector<128x32xf32>
    %296 = arith.truncf %295 : vector<128x32xf32> to vector<128x32xbf16>
    %c3_270 = arith.constant 3 : index
    %c2_271 = arith.constant 2 : index
    %c2_272 = arith.constant 2 : index
    %c0_273 = arith.constant 0 : index
    %c0_274 = arith.constant 0 : index
    %297 = vector.load %arg1[%c3_270, %c2_271, %c2_272, %c0_273, %c0_274] : memref<5x3x3x32x32xbf16, #tpu.memory_space<vmem>>, vector<1x1x1x32x32xbf16>
    %298 = vector.shape_cast %297 : vector<1x1x1x32x32xbf16> to vector<32x32xbf16>
    %cst_275 = arith.constant dense<0.000000e+00> : vector<128x32xf32>
    %299 = tpu.matmul %296, %298, %cst_275 {dimension_numbers = #tpu.dot_dimension_numbers<[1], [0], [0], [1], [0, 0, 1, 1], [], []>} : vector<128x32xbf16>, vector<32x32xbf16>, vector<128x32xf32> -> vector<128x32xf32>
    %300 = arith.addf %293, %299 : vector<128x32xf32>
    %c3_276 = arith.constant 3 : index
    %c0_277 = arith.constant 0 : index
    %c0_278 = arith.constant 0 : index
    %301 = vector.load %arg2[%c3_276, %c0_277, %c0_278] : memref<5x1x32xf32, #tpu.memory_space<vmem>>, vector<1x1x32xf32>
    %302 = vector.shape_cast %301 : vector<1x1x32xf32> to vector<1x32xf32>
    %303 = vector.broadcast %302 : vector<1x32xf32> to vector<128x32xf32>
    %304 = arith.mulf %300, %303 : vector<128x32xf32>
    %c3_279 = arith.constant 3 : index
    %c0_280 = arith.constant 0 : index
    %c0_281 = arith.constant 0 : index
    %305 = vector.load %arg3[%c3_279, %c0_280, %c0_281] : memref<5x1x32xf32, #tpu.memory_space<vmem>>, vector<1x1x32xf32>
    %306 = vector.shape_cast %305 : vector<1x1x32xf32> to vector<1x32xf32>
    %307 = vector.broadcast %306 : vector<1x32xf32> to vector<128x32xf32>
    %308 = arith.addf %304, %307 : vector<128x32xf32>
    %cst_282 = arith.constant 0.000000e+00 : f32
    %309 = vector.broadcast %cst_282 : f32 to vector<128x32xf32>
    %310 = arith.maximumf %308, %309 : vector<128x32xf32>
    %311 = vector.shape_cast %310 : vector<128x32xf32> to vector<2x8x8x32xf32>
    %c0_283 = arith.constant 0 : index
    %c1_284 = arith.constant 1 : index
    %c8_285 = arith.constant 8 : index
    %c0_286 = arith.constant 0 : index
    %312 = vector.load %arg18[%c0_283, %c1_284, %c8_285, %c0_286] : memref<2x10x17x32xf32, #tpu.memory_space<vmem>>, vector<2x8x8x32xf32>
    tpu.vector_store %arg18[%c0_283, %c1_284, %c8_285, %c0_286], %311 {strides = array<i32>} : memref<2x10x17x32xf32, #tpu.memory_space<vmem>>, vector<2x8x8x32xf32>,
    %c0_287 = arith.constant 0 : index
    %c0_288 = arith.constant 0 : index
    %c0_289 = arith.constant 0 : index
    %c0_290 = arith.constant 0 : index
    %313 = vector.load %arg18[%c0_287, %c0_288, %c0_289, %c0_290] : memref<2x10x17x32xf32, #tpu.memory_space<vmem>>, vector<2x10x17x32xf32>
    %cst_291 = arith.constant 0.000000e+00 : f32
    %314 = vector.broadcast %cst_291 : f32 to vector<128x32xf32>
    %315 = vector.extract_strided_slice %313 {offsets = [0, 0, 7, 0], sizes = [2, 8, 8, 32], strides = [1, 1, 1, 1]} : vector<2x10x17x32xf32> to vector<2x8x8x32xf32>
    %316 = vector.shape_cast %315 : vector<2x8x8x32xf32> to vector<128x32xf32>
    %317 = arith.truncf %316 : vector<128x32xf32> to vector<128x32xbf16>
    %c4 = arith.constant 4 : index
    %c0_292 = arith.constant 0 : index
    %c0_293 = arith.constant 0 : index
    %c0_294 = arith.constant 0 : index
    %c0_295 = arith.constant 0 : index
    %318 = vector.load %arg1[%c4, %c0_292, %c0_293, %c0_294, %c0_295] : memref<5x3x3x32x32xbf16, #tpu.memory_space<vmem>>, vector<1x1x1x32x32xbf16>
    %319 = vector.shape_cast %318 : vector<1x1x1x32x32xbf16> to vector<32x32xbf16>
    %cst_296 = arith.constant dense<0.000000e+00> : vector<128x32xf32>
    %320 = tpu.matmul %317, %319, %cst_296 {dimension_numbers = #tpu.dot_dimension_numbers<[1], [0], [0], [1], [0, 0, 1, 1], [], []>} : vector<128x32xbf16>, vector<32x32xbf16>, vector<128x32xf32> -> vector<128x32xf32>
    %321 = arith.addf %314, %320 : vector<128x32xf32>
    %322 = vector.extract_strided_slice %313 {offsets = [0, 0, 8, 0], sizes = [2, 8, 8, 32], strides = [1, 1, 1, 1]} : vector<2x10x17x32xf32> to vector<2x8x8x32xf32>
    %323 = vector.shape_cast %322 : vector<2x8x8x32xf32> to vector<128x32xf32>
    %324 = arith.truncf %323 : vector<128x32xf32> to vector<128x32xbf16>
    %c4_297 = arith.constant 4 : index
    %c0_298 = arith.constant 0 : index
    %c1_299 = arith.constant 1 : index
    %c0_300 = arith.constant 0 : index
    %c0_301 = arith.constant 0 : index
    %325 = vector.load %arg1[%c4_297, %c0_298, %c1_299, %c0_300, %c0_301] : memref<5x3x3x32x32xbf16, #tpu.memory_space<vmem>>, vector<1x1x1x32x32xbf16>
    %326 = vector.shape_cast %325 : vector<1x1x1x32x32xbf16> to vector<32x32xbf16>
    %cst_302 = arith.constant dense<0.000000e+00> : vector<128x32xf32>
    %327 = tpu.matmul %324, %326, %cst_302 {dimension_numbers = #tpu.dot_dimension_numbers<[1], [0], [0], [1], [0, 0, 1, 1], [], []>} : vector<128x32xbf16>, vector<32x32xbf16>, vector<128x32xf32> -> vector<128x32xf32>
    %328 = arith.addf %321, %327 : vector<128x32xf32>
    %329 = vector.extract_strided_slice %313 {offsets = [0, 0, 9, 0], sizes = [2, 8, 8, 32], strides = [1, 1, 1, 1]} : vector<2x10x17x32xf32> to vector<2x8x8x32xf32>
    %330 = vector.shape_cast %329 : vector<2x8x8x32xf32> to vector<128x32xf32>
    %331 = arith.truncf %330 : vector<128x32xf32> to vector<128x32xbf16>
    %c4_303 = arith.constant 4 : index
    %c0_304 = arith.constant 0 : index
    %c2_305 = arith.constant 2 : index
    %c0_306 = arith.constant 0 : index
    %c0_307 = arith.constant 0 : index
    %332 = vector.load %arg1[%c4_303, %c0_304, %c2_305, %c0_306, %c0_307] : memref<5x3x3x32x32xbf16, #tpu.memory_space<vmem>>, vector<1x1x1x32x32xbf16>
    %333 = vector.shape_cast %332 : vector<1x1x1x32x32xbf16> to vector<32x32xbf16>
    %cst_308 = arith.constant dense<0.000000e+00> : vector<128x32xf32>
    %334 = tpu.matmul %331, %333, %cst_308 {dimension_numbers = #tpu.dot_dimension_numbers<[1], [0], [0], [1], [0, 0, 1, 1], [], []>} : vector<128x32xbf16>, vector<32x32xbf16>, vector<128x32xf32> -> vector<128x32xf32>
    %335 = arith.addf %328, %334 : vector<128x32xf32>
    %336 = vector.extract_strided_slice %313 {offsets = [0, 1, 7, 0], sizes = [2, 8, 8, 32], strides = [1, 1, 1, 1]} : vector<2x10x17x32xf32> to vector<2x8x8x32xf32>
    %337 = vector.shape_cast %336 : vector<2x8x8x32xf32> to vector<128x32xf32>
    %338 = arith.truncf %337 : vector<128x32xf32> to vector<128x32xbf16>
    %c4_309 = arith.constant 4 : index
    %c1_310 = arith.constant 1 : index
    %c0_311 = arith.constant 0 : index
    %c0_312 = arith.constant 0 : index
    %c0_313 = arith.constant 0 : index
    %339 = vector.load %arg1[%c4_309, %c1_310, %c0_311, %c0_312, %c0_313] : memref<5x3x3x32x32xbf16, #tpu.memory_space<vmem>>, vector<1x1x1x32x32xbf16>
    %340 = vector.shape_cast %339 : vector<1x1x1x32x32xbf16> to vector<32x32xbf16>
    %cst_314 = arith.constant dense<0.000000e+00> : vector<128x32xf32>
    %341 = tpu.matmul %338, %340, %cst_314 {dimension_numbers = #tpu.dot_dimension_numbers<[1], [0], [0], [1], [0, 0, 1, 1], [], []>} : vector<128x32xbf16>, vector<32x32xbf16>, vector<128x32xf32> -> vector<128x32xf32>
    %342 = arith.addf %335, %341 : vector<128x32xf32>
    %343 = vector.extract_strided_slice %313 {offsets = [0, 1, 8, 0], sizes = [2, 8, 8, 32], strides = [1, 1, 1, 1]} : vector<2x10x17x32xf32> to vector<2x8x8x32xf32>
    %344 = vector.shape_cast %343 : vector<2x8x8x32xf32> to vector<128x32xf32>
    %345 = arith.truncf %344 : vector<128x32xf32> to vector<128x32xbf16>
    %c4_315 = arith.constant 4 : index
    %c1_316 = arith.constant 1 : index
    %c1_317 = arith.constant 1 : index
    %c0_318 = arith.constant 0 : index
    %c0_319 = arith.constant 0 : index
    %346 = vector.load %arg1[%c4_315, %c1_316, %c1_317, %c0_318, %c0_319] : memref<5x3x3x32x32xbf16, #tpu.memory_space<vmem>>, vector<1x1x1x32x32xbf16>
    %347 = vector.shape_cast %346 : vector<1x1x1x32x32xbf16> to vector<32x32xbf16>
    %cst_320 = arith.constant dense<0.000000e+00> : vector<128x32xf32>
    %348 = tpu.matmul %345, %347, %cst_320 {dimension_numbers = #tpu.dot_dimension_numbers<[1], [0], [0], [1], [0, 0, 1, 1], [], []>} : vector<128x32xbf16>, vector<32x32xbf16>, vector<128x32xf32> -> vector<128x32xf32>
    %349 = arith.addf %342, %348 : vector<128x32xf32>
    %350 = vector.extract_strided_slice %313 {offsets = [0, 1, 9, 0], sizes = [2, 8, 8, 32], strides = [1, 1, 1, 1]} : vector<2x10x17x32xf32> to vector<2x8x8x32xf32>
    %351 = vector.shape_cast %350 : vector<2x8x8x32xf32> to vector<128x32xf32>
    %352 = arith.truncf %351 : vector<128x32xf32> to vector<128x32xbf16>
    %c4_321 = arith.constant 4 : index
    %c1_322 = arith.constant 1 : index
    %c2_323 = arith.constant 2 : index
    %c0_324 = arith.constant 0 : index
    %c0_325 = arith.constant 0 : index
    %353 = vector.load %arg1[%c4_321, %c1_322, %c2_323, %c0_324, %c0_325] : memref<5x3x3x32x32xbf16, #tpu.memory_space<vmem>>, vector<1x1x1x32x32xbf16>
    %354 = vector.shape_cast %353 : vector<1x1x1x32x32xbf16> to vector<32x32xbf16>
    %cst_326 = arith.constant dense<0.000000e+00> : vector<128x32xf32>
    %355 = tpu.matmul %352, %354, %cst_326 {dimension_numbers = #tpu.dot_dimension_numbers<[1], [0], [0], [1], [0, 0, 1, 1], [], []>} : vector<128x32xbf16>, vector<32x32xbf16>, vector<128x32xf32> -> vector<128x32xf32>
    %356 = arith.addf %349, %355 : vector<128x32xf32>
    %357 = vector.extract_strided_slice %313 {offsets = [0, 2, 7, 0], sizes = [2, 8, 8, 32], strides = [1, 1, 1, 1]} : vector<2x10x17x32xf32> to vector<2x8x8x32xf32>
    %358 = vector.shape_cast %357 : vector<2x8x8x32xf32> to vector<128x32xf32>
    %359 = arith.truncf %358 : vector<128x32xf32> to vector<128x32xbf16>
    %c4_327 = arith.constant 4 : index
    %c2_328 = arith.constant 2 : index
    %c0_329 = arith.constant 0 : index
    %c0_330 = arith.constant 0 : index
    %c0_331 = arith.constant 0 : index
    %360 = vector.load %arg1[%c4_327, %c2_328, %c0_329, %c0_330, %c0_331] : memref<5x3x3x32x32xbf16, #tpu.memory_space<vmem>>, vector<1x1x1x32x32xbf16>
    %361 = vector.shape_cast %360 : vector<1x1x1x32x32xbf16> to vector<32x32xbf16>
    %cst_332 = arith.constant dense<0.000000e+00> : vector<128x32xf32>
    %362 = tpu.matmul %359, %361, %cst_332 {dimension_numbers = #tpu.dot_dimension_numbers<[1], [0], [0], [1], [0, 0, 1, 1], [], []>} : vector<128x32xbf16>, vector<32x32xbf16>, vector<128x32xf32> -> vector<128x32xf32>
    %363 = arith.addf %356, %362 : vector<128x32xf32>
    %364 = vector.extract_strided_slice %313 {offsets = [0, 2, 8, 0], sizes = [2, 8, 8, 32], strides = [1, 1, 1, 1]} : vector<2x10x17x32xf32> to vector<2x8x8x32xf32>
    %365 = vector.shape_cast %364 : vector<2x8x8x32xf32> to vector<128x32xf32>
    %366 = arith.truncf %365 : vector<128x32xf32> to vector<128x32xbf16>
    %c4_333 = arith.constant 4 : index
    %c2_334 = arith.constant 2 : index
    %c1_335 = arith.constant 1 : index
    %c0_336 = arith.constant 0 : index
    %c0_337 = arith.constant 0 : index
    %367 = vector.load %arg1[%c4_333, %c2_334, %c1_335, %c0_336, %c0_337] : memref<5x3x3x32x32xbf16, #tpu.memory_space<vmem>>, vector<1x1x1x32x32xbf16>
    %368 = vector.shape_cast %367 : vector<1x1x1x32x32xbf16> to vector<32x32xbf16>
    %cst_338 = arith.constant dense<0.000000e+00> : vector<128x32xf32>
    %369 = tpu.matmul %366, %368, %cst_338 {dimension_numbers = #tpu.dot_dimension_numbers<[1], [0], [0], [1], [0, 0, 1, 1], [], []>} : vector<128x32xbf16>, vector<32x32xbf16>, vector<128x32xf32> -> vector<128x32xf32>
    %370 = arith.addf %363, %369 : vector<128x32xf32>
    %371 = vector.extract_strided_slice %313 {offsets = [0, 2, 9, 0], sizes = [2, 8, 8, 32], strides = [1, 1, 1, 1]} : vector<2x10x17x32xf32> to vector<2x8x8x32xf32>
    %372 = vector.shape_cast %371 : vector<2x8x8x32xf32> to vector<128x32xf32>
    %373 = arith.truncf %372 : vector<128x32xf32> to vector<128x32xbf16>
    %c4_339 = arith.constant 4 : index
    %c2_340 = arith.constant 2 : index
    %c2_341 = arith.constant 2 : index
    %c0_342 = arith.constant 0 : index
    %c0_343 = arith.constant 0 : index
    %374 = vector.load %arg1[%c4_339, %c2_340, %c2_341, %c0_342, %c0_343] : memref<5x3x3x32x32xbf16, #tpu.memory_space<vmem>>, vector<1x1x1x32x32xbf16>
    %375 = vector.shape_cast %374 : vector<1x1x1x32x32xbf16> to vector<32x32xbf16>
    %cst_344 = arith.constant dense<0.000000e+00> : vector<128x32xf32>
    %376 = tpu.matmul %373, %375, %cst_344 {dimension_numbers = #tpu.dot_dimension_numbers<[1], [0], [0], [1], [0, 0, 1, 1], [], []>} : vector<128x32xbf16>, vector<32x32xbf16>, vector<128x32xf32> -> vector<128x32xf32>
    %377 = arith.addf %370, %376 : vector<128x32xf32>
    %c4_345 = arith.constant 4 : index
    %c0_346 = arith.constant 0 : index
    %c0_347 = arith.constant 0 : index
    %378 = vector.load %arg2[%c4_345, %c0_346, %c0_347] : memref<5x1x32xf32, #tpu.memory_space<vmem>>, vector<1x1x32xf32>
    %379 = vector.shape_cast %378 : vector<1x1x32xf32> to vector<1x32xf32>
    %380 = vector.broadcast %379 : vector<1x32xf32> to vector<128x32xf32>
    %381 = arith.mulf %377, %380 : vector<128x32xf32>
    %c4_348 = arith.constant 4 : index
    %c0_349 = arith.constant 0 : index
    %c0_350 = arith.constant 0 : index
    %382 = vector.load %arg3[%c4_348, %c0_349, %c0_350] : memref<5x1x32xf32, #tpu.memory_space<vmem>>, vector<1x1x32xf32>
    %383 = vector.shape_cast %382 : vector<1x1x32xf32> to vector<1x32xf32>
    %384 = vector.broadcast %383 : vector<1x32xf32> to vector<128x32xf32>
    %385 = arith.addf %381, %384 : vector<128x32xf32>
    %386 = arith.addf %385, %233 : vector<128x32xf32>
    %cst_351 = arith.constant 0.000000e+00 : f32
    %387 = vector.broadcast %cst_351 : f32 to vector<128x32xf32>
    %388 = arith.maximumf %386, %387 : vector<128x32xf32>
    %389 = vector.shape_cast %388 : vector<128x32xf32> to vector<2x64x32xf32>
    %c0_352 = arith.constant 0 : index
    %c0_353 = arith.constant 0 : index
    %c0_354 = arith.constant 0 : index
    %390 = vector.load %arg4[%c0_352, %c0_353, %c0_354] : memref<1x1x32xf32, #tpu.memory_space<vmem>>, vector<1x1x32xf32>
    %391 = vector.broadcast %390 : vector<1x1x32xf32> to vector<2x64x32xf32>
    %392 = arith.mulf %389, %391 : vector<2x64x32xf32>
    %cst_355 = arith.constant dense<0.000000e+00> : vector<2x64xf32>
    %393 = vector.multi_reduction <add>, %392, %cst_355 [2] : vector<2x64x32xf32> to vector<2x64xf32>
    %c0_356 = arith.constant 0 : index
    %c0_357 = arith.constant 0 : index
    %394 = vector.load %arg5[%c0_356, %c0_357] : memref<1x1xf32, #tpu.memory_space<vmem>>, vector<1x1xf32>
    %395 = vector.broadcast %394 : vector<1x1xf32> to vector<2x64xf32>
    %396 = arith.mulf %393, %395 : vector<2x64xf32>
    %c0_358 = arith.constant 0 : index
    %c0_359 = arith.constant 0 : index
    %397 = vector.load %arg6[%c0_358, %c0_359] : memref<1x1xf32, #tpu.memory_space<vmem>>, vector<1x1xf32>
    %398 = vector.broadcast %397 : vector<1x1xf32> to vector<2x64xf32>
    %399 = arith.addf %396, %398 : vector<2x64xf32>
    %cst_360 = arith.constant 0.000000e+00 : f32
    %400 = vector.broadcast %cst_360 : f32 to vector<2x64xf32>
    %401 = arith.maximumf %399, %400 : vector<2x64xf32>
    %402 = arith.truncf %401 : vector<2x64xf32> to vector<2x64xbf16>
    %c0_361 = arith.constant 0 : index
    %c0_362 = arith.constant 0 : index
    %403 = vector.load %arg7[%c0_361, %c0_362] : memref<64x32xbf16, #tpu.memory_space<vmem>>, vector<64x32xbf16>
    %cst_363 = arith.constant dense<0.000000e+00> : vector<2x32xf32>
    %404 = tpu.matmul %402, %403, %cst_363 {dimension_numbers = #tpu.dot_dimension_numbers<[1], [0], [0], [1], [0, 0, 1, 1], [], []>} : vector<2x64xbf16>, vector<64x32xbf16>, vector<2x32xf32> -> vector<2x32xf32>
    %c0_364 = arith.constant 0 : index
    %c0_365 = arith.constant 0 : index
    %405 = vector.load %arg8[%c0_364, %c0_365] : memref<1x32xf32, #tpu.memory_space<vmem>>, vector<1x32xf32>
    %406 = vector.broadcast %405 : vector<1x32xf32> to vector<2x32xf32>
    %407 = arith.addf %404, %406 : vector<2x32xf32>
    %cst_366 = arith.constant 0.000000e+00 : f32
    %408 = vector.broadcast %cst_366 : f32 to vector<2x32xf32>
    %409 = arith.maximumf %407, %408 : vector<2x32xf32>
    %410 = arith.truncf %409 : vector<2x32xf32> to vector<2x32xbf16>
    %c0_367 = arith.constant 0 : index
    %c0_368 = arith.constant 0 : index
    %411 = vector.load %arg9[%c0_367, %c0_368] : memref<32x1xbf16, #tpu.memory_space<vmem>>, vector<32x1xbf16>
    %cst_369 = arith.constant dense<0.000000e+00> : vector<2x1xf32>
    %412 = tpu.matmul %410, %411, %cst_369 {dimension_numbers = #tpu.dot_dimension_numbers<[1], [0], [0], [1], [0, 0, 1, 1], [], []>} : vector<2x32xbf16>, vector<32x1xbf16>, vector<2x1xf32> -> vector<2x1xf32>
    %c0_370 = arith.constant 0 : index
    %c0_371 = arith.constant 0 : index
    %413 = vector.load %arg10[%c0_370, %c0_371] : memref<1x1xf32, #tpu.memory_space<vmem>>, vector<1x1xf32>
    %414 = vector.broadcast %413 : vector<1x1xf32> to vector<2x1xf32>
    %415 = arith.addf %412, %414 : vector<2x1xf32>
    %416 = math.tanh %415 : vector<2x1xf32>
    %c0_372 = arith.constant 0 : index
    %c0_373 = arith.constant 0 : index
    %417 = vector.load %arg16[%c0_372, %c0_373] : memref<2x1xf32, #tpu.memory_space<vmem>>, vector<2x1xf32>
    tpu.vector_store %arg16[%c0_372, %c0_373], %416 {strides = array<i32>} : memref<2x1xf32, #tpu.memory_space<vmem>>, vector<2x1xf32>,
    %cst_374 = arith.constant 0.000000e+00 : f32
    %418 = vector.broadcast %cst_374 : f32 to vector<2x64xf32>
    %c0_375 = arith.constant 0 : index
    %c0_376 = arith.constant 0 : index
    %c0_377 = arith.constant 0 : index
    %c0_378 = arith.constant 0 : index
    %419 = vector.load %arg11[%c0_375, %c0_376, %c0_377, %c0_378] : memref<2x1x1x32xf32, #tpu.memory_space<vmem>>, vector<1x1x1x32xf32>
    %420 = vector.shape_cast %419 : vector<1x1x1x32xf32> to vector<1x1x32xf32>
    %421 = vector.broadcast %420 : vector<1x1x32xf32> to vector<2x64x32xf32>
    %422 = arith.mulf %389, %421 : vector<2x64x32xf32>
    %cst_379 = arith.constant dense<0.000000e+00> : vector<2x64xf32>
    %423 = vector.multi_reduction <add>, %422, %cst_379 [2] : vector<2x64x32xf32> to vector<2x64xf32>
    %c0_380 = arith.constant 0 : index
    %c0_381 = arith.constant 0 : index
    %c0_382 = arith.constant 0 : index
    %424 = vector.load %arg12[%c0_380, %c0_381, %c0_382] : memref<2x1x1xf32, #tpu.memory_space<vmem>>, vector<1x1x1xf32>
    %425 = vector.shape_cast %424 : vector<1x1x1xf32> to vector<1x1xf32>
    %426 = vector.broadcast %425 : vector<1x1xf32> to vector<2x64xf32>
    %427 = arith.mulf %423, %426 : vector<2x64xf32>
    %c0_383 = arith.constant 0 : index
    %c0_384 = arith.constant 0 : index
    %c0_385 = arith.constant 0 : index
    %428 = vector.load %arg13[%c0_383, %c0_384, %c0_385] : memref<2x1x1xf32, #tpu.memory_space<vmem>>, vector<1x1x1xf32>
    %429 = vector.shape_cast %428 : vector<1x1x1xf32> to vector<1x1xf32>
    %430 = vector.broadcast %429 : vector<1x1xf32> to vector<2x64xf32>
    %431 = arith.addf %427, %430 : vector<2x64xf32>
    %cst_386 = arith.constant 0.000000e+00 : f32
    %432 = vector.broadcast %cst_386 : f32 to vector<2x64xf32>
    %433 = arith.maximumf %431, %432 : vector<2x64xf32>
    %434 = arith.truncf %433 : vector<2x64xf32> to vector<2x64xbf16>
    %c0_387 = arith.constant 0 : index
    %c0_388 = arith.constant 0 : index
    %435 = vector.load %arg14[%c0_387, %c0_388] : memref<128x64xbf16, #tpu.memory_space<vmem>>, vector<64x64xbf16>
    %cst_389 = arith.constant dense<0.000000e+00> : vector<2x64xf32>
    %436 = tpu.matmul %434, %435, %cst_389 {dimension_numbers = #tpu.dot_dimension_numbers<[1], [0], [0], [1], [0, 0, 1, 1], [], []>} : vector<2x64xbf16>, vector<64x64xbf16>, vector<2x64xf32> -> vector<2x64xf32>
    %437 = arith.addf %418, %436 : vector<2x64xf32>
    %c1_390 = arith.constant 1 : index
    %c0_391 = arith.constant 0 : index
    %c0_392 = arith.constant 0 : index
    %c0_393 = arith.constant 0 : index
    %438 = vector.load %arg11[%c1_390, %c0_391, %c0_392, %c0_393] : memref<2x1x1x32xf32, #tpu.memory_space<vmem>>, vector<1x1x1x32xf32>
    %439 = vector.shape_cast %438 : vector<1x1x1x32xf32> to vector<1x1x32xf32>
    %440 = vector.broadcast %439 : vector<1x1x32xf32> to vector<2x64x32xf32>
    %441 = arith.mulf %389, %440 : vector<2x64x32xf32>
    %cst_394 = arith.constant dense<0.000000e+00> : vector<2x64xf32>
    %442 = vector.multi_reduction <add>, %441, %cst_394 [2] : vector<2x64x32xf32> to vector<2x64xf32>
    %c1_395 = arith.constant 1 : index
    %c0_396 = arith.constant 0 : index
    %c0_397 = arith.constant 0 : index
    %443 = vector.load %arg12[%c1_395, %c0_396, %c0_397] : memref<2x1x1xf32, #tpu.memory_space<vmem>>, vector<1x1x1xf32>
    %444 = vector.shape_cast %443 : vector<1x1x1xf32> to vector<1x1xf32>
    %445 = vector.broadcast %444 : vector<1x1xf32> to vector<2x64xf32>
    %446 = arith.mulf %442, %445 : vector<2x64xf32>
    %c1_398 = arith.constant 1 : index
    %c0_399 = arith.constant 0 : index
    %c0_400 = arith.constant 0 : index
    %447 = vector.load %arg13[%c1_398, %c0_399, %c0_400] : memref<2x1x1xf32, #tpu.memory_space<vmem>>, vector<1x1x1xf32>
    %448 = vector.shape_cast %447 : vector<1x1x1xf32> to vector<1x1xf32>
    %449 = vector.broadcast %448 : vector<1x1xf32> to vector<2x64xf32>
    %450 = arith.addf %446, %449 : vector<2x64xf32>
    %cst_401 = arith.constant 0.000000e+00 : f32
    %451 = vector.broadcast %cst_401 : f32 to vector<2x64xf32>
    %452 = arith.maximumf %450, %451 : vector<2x64xf32>
    %453 = arith.truncf %452 : vector<2x64xf32> to vector<2x64xbf16>
    %c64 = arith.constant 64 : index
    %c0_402 = arith.constant 0 : index
    %454 = vector.load %arg14[%c64, %c0_402] : memref<128x64xbf16, #tpu.memory_space<vmem>>, vector<64x64xbf16>
    %cst_403 = arith.constant dense<0.000000e+00> : vector<2x64xf32>
    %455 = tpu.matmul %453, %454, %cst_403 {dimension_numbers = #tpu.dot_dimension_numbers<[1], [0], [0], [1], [0, 0, 1, 1], [], []>} : vector<2x64xbf16>, vector<64x64xbf16>, vector<2x64xf32> -> vector<2x64xf32>
    %456 = arith.addf %437, %455 : vector<2x64xf32>
    %c0_404 = arith.constant 0 : index
    %c0_405 = arith.constant 0 : index
    %457 = vector.load %arg15[%c0_404, %c0_405] : memref<1x64xf32, #tpu.memory_space<vmem>>, vector<1x64xf32>
    %458 = vector.broadcast %457 : vector<1x64xf32> to vector<2x64xf32>
    %459 = arith.addf %456, %458 : vector<2x64xf32>
    %cst_406 = arith.constant dense<0xFF800000> : vector<2xf32>
    %460 = vector.multi_reduction <maximumf>, %459, %cst_406 [1] : vector<2x64xf32> to vector<2xf32>
    %461 = vector.shape_cast %460 : vector<2xf32> to vector<2x1xf32>
    %462 = vector.broadcast %461 : vector<2x1xf32> to vector<2x64xf32>
    %463 = arith.subf %459, %462 : vector<2x64xf32>
    %464 = math.exp %463 : vector<2x64xf32>
    %cst_407 = arith.constant dense<0.000000e+00> : vector<2xf32>
    %465 = vector.multi_reduction <add>, %464, %cst_407 [1] : vector<2x64xf32> to vector<2xf32>
    %466 = vector.shape_cast %465 : vector<2xf32> to vector<2x1xf32>
    %467 = math.log %466 : vector<2x1xf32>
    %468 = vector.broadcast %467 : vector<2x1xf32> to vector<2x64xf32>
    %469 = arith.subf %463, %468 : vector<2x64xf32>
    %c0_408 = arith.constant 0 : index
    %c0_409 = arith.constant 0 : index
    %470 = vector.load %arg17[%c0_408, %c0_409] : memref<2x64xf32, #tpu.memory_space<vmem>>, vector<2x64xf32>
    tpu.vector_store %arg17[%c0_408, %c0_409], %469 {strides = array<i32>} : memref<2x64xf32, #tpu.memory_space<vmem>>, vector<2x64xf32>,
    return
  }
}

</mosaic_0001>

<bundles_post_ra>
// kernel: net_forward.1
= control target key start
LH: loop header
LB: loop body
LE: loop exit
PB: predicated region body
PF: predicated region fallthrough
CT: control target
= control target key end

     0   :  { %s16590_s0 = inlined_call_operand.vmem [shape: f32[2,8,8,32], index: 0, kind: input, shape index: {}]   ;;  %s16591_s1 = inlined_call_operand.hbm [shape: bf16[5,3,3,32,32], index: 1, kind: input, shape index: {}]   ;;  %s16592_s2 = inlined_call_operand.vmem [shape: f32[5,1,32], index: 2, kind: input, shape index: {}]   ;;  %s16593_s3 = inlined_call_operand.vmem [shape: f32[5,1,32], index: 3, kind: input, shape index: {}]   ;;  %s16594_s4 = inlined_call_operand.vmem [shape: f32[1,1,32], index: 4, kind: input, shape index: {}]   ;;  %s16595_s5 = inlined_call_operand.<no memory space> [shape: f32[1,1], index: 5, kind: input, shape index: {}]   ;;  %s16596_s7 = inlined_call_operand.vmem [shape: bf16[64,32], index: 7, kind: input, shape index: {}]   ;;  %s16597_s8 = inlined_call_operand.vmem [shape: f32[1,32], index: 8, kind: input, shape index: {}]   ;;  %s16598_s9 = inlined_call_operand.vmem [shape: bf16[32,1], index: 9, kind: input, shape index: {}]   ;;  %s16599_s11 = inlined_call_operand.vmem [shape: f32[2,1,1,32], index: 11, kind: input, shape index: {}]   ;;  %s16600_s12 = inlined_call_operand.vmem [shape: f32[2,1,1], index: 12, kind: input, shape index: {}]   ;;  %s16601_s13 = inlined_call_operand.vmem [shape: f32[2,1,1], index: 13, kind: input, shape index: {}]   ;;  %s16602_s14 = inlined_call_operand.vmem [shape: bf16[128,64], index: 14, kind: input, shape index: {}]   ;;  %s16603_s15 = inlined_call_operand.vmem [shape: f32[1,64], index: 15, kind: input, shape index: {}]   ;;  %s16604_s16 = inlined_call_operand.vmem [shape: f32[2,1], index: 16, kind: output, shape index: {0}]   ;;  %s16605_s17 = inlined_call_operand.hbm [shape: f32[2,64], index: 17, kind: output, shape index: {1}]   ;;  %s16606_s6 = inlined_call_operand.<no memory space> [shape: f32[1,1], index: 6, kind: input, shape index: {}]   ;;  %s16607_s10 = inlined_call_operand.<no memory space> [shape: f32[1,1], index: 10, kind: input, shape index: {}]  }
   0x1   :  { %16777 = sst [smem:[#allocation49_spill]] %s16590_s0  ;;  %v23_v0 = vstv %s16595_s5  ;;  %v25_v1 = vstv %s16606_s6  ;;  %v27_v2 = vstv %s16607_s10 }
   0x2   :  { %16778 = sst [smem:[#allocation50_spill]] %s16591_s1  ;;  %24 = vst [vmem:[#allocation3] sm:$0x1] %v23_v0  ;;  %26 = vst [vmem:[#allocation4] sm:$0x1] %v25_v1 }
   0x3   :  { %28 = vst [vmem:[#allocation5] sm:$0x1] %v27_v2 }
   0x4   :  { %29 = vsyncpa [#allocation7], 0 }
   0x5   :  { %30 = vsyncpa [#allocation8], 0  ;;  %s12600_s0 = smov [#allocation6]   ;;  %s16779_s1 = sld [smem:[#allocation50_spill]] }
   0x6   :  { %s38_s30 = sshll.u32 %s12600_s0, 4  ;;  %s39_s30 = int_to_ptr.vmem [resolvable:$true] %s38_s30 }
   0xb   :  { %s12552_s5 = scalar_lea.hbm %s16779_s1, 11520 }
   0xc   :  { %p12553_p0 = scmp.ne.s32.totalorder %s16779_s1, %s12552_s5  ;;  %p12556_p1 = scmp.lt.u32.totalorder %s12552_s5, %s16779_s1 }
   0xe   :  { %p12558_p2 = pnand %p12556_p1, %p12553_p0 }
  0x10   :  { %12561 = shalt.err (!%p12558_p2)
}
  0x11   :  { %s12562_s10 = scalar_lea.vmem %s39_s30, 11520  ;;  %p12567_p4 = scmp.lt.s32.totalorder %s39_s30, %s39_s30 }
  0x12   :  { %p12563_p3 = scmp.ne.s32.totalorder %s39_s30, %s12562_s10  ;;  %p12568_p5 = scmp.lt.s32.totalorder %s12562_s10, %s12562_s10 }
  0x14   :  { %p12569_p6 = por %p12568_p5, %p12567_p4 }
  0x16   :  { %p12570_p7 = pnand %p12569_p6, %p12563_p3 }
  0x18   :  { %12573 = shalt.err (!%p12570_p7)
}
  0x19   :  { %s12601_s23 = smov 64   ;;  %s12602_s24 = smov 4  }
  0x1a   :  { %44 = dma.hbm_to_vmem [thread:$0]  %s16779_s1, 11520, %s39_s30, [#allocation7], %s12601_s23, %s12601_s23, %s12602_s24  }
  0x1b   :  { %12596 = dma.done.wait [#allocation7], 11520  }
  0x1c   :  { %12597 = vsyncadd [#allocation7], 4294955776  ;;  %vm77_vm0 = vcmask 261120   ;;  %vm80_vm1 = vcmask 253952   ;;  %v16610_v3 = vmov 0.0   ;;  %v12441_v4 = vld [vmem:[#allocation6 + $0x10] sm:$0xff]  }
  0x1d   :  { %79 = vst.msk [vmem:[#allocation2 + $0x8] sm:$0xff] %vm77_vm0, %v16610_v3  ;;  %83 = vst.msk [vmem:[#allocation2 + $0x20] sm:$0xff] %vm77_vm0, %v16610_v3  ;;  %v12838_v5 = vld [vmem:[#allocation6 + $0x30] sm:$0xff]   ;;  %10844 = vmatprep.subr.bf16.mxu1 %v12441_v4  ;;  %v12443_v6 = vld [vmem:[#allocation6 + $0x18] sm:$0xff]   ;;  %s16781_s29 = sld [smem:[#allocation49_spill]]  ;;  %vm264_vm2 = vcmask 1040384  }
  0x1e   :  { %78 = vst.msk [vmem:[#allocation2] sm:$0xff] %vm77_vm0, %v16610_v3  ;;  %82 = vst.msk [vmem:[#allocation2 + $0x18] sm:$0xff] %vm77_vm0, %v16610_v3  ;;  %10845 = vmatpush3.bf16.msra.mxu1 %v12441_v4  ;;  %10904 = vmatprep.subr.bf16.mxu0 %v12838_v5  ;;  %v12841_v7 = vld [vmem:[#allocation6 + $0x38] sm:$0xff]   ;;  %v12445_v16 = vld [vmem:[#allocation6 + $0x40] sm:$0xff]   ;;  %vm636_vm3 = vcmask 1046528   ;;  %vm12605_vm4 = vmmov 0  }
  0x1f   :  { %85 = vst.msk [vmem:[#allocation2 + $0x30] sm:$0xff] %vm77_vm0, %v16610_v3  ;;  %86 = vst.msk [vmem:[#allocation2 + $0x38] sm:$0xff] %vm77_vm0, %v16610_v3  ;;  %10905 = vmatpush3.bf16.msra.mxu0 %v12838_v5  ;;  %10846 = vmatprep.subr.bf16.mxu1 %v12443_v6  ;;  %v12446_v42 = vld [vmem:[#allocation6 + $0x48] sm:$0xff]   ;;  %v12448_v56 = vld [vmem:[#allocation6] sm:$0xff]   ;;  %vm8954_vm5 = vcmask 130112   ;;  %vm8961_vm6 = vcmask 195712  }
  0x20   :  { %88 = vst.msk [vmem:[#allocation2 + $0x48] sm:$0xff] %vm77_vm0, %v16610_v3  ;;  %89 = vst.msk [vmem:[#allocation2 + $0x50] sm:$0xff] %vm77_vm0, %v16610_v3  ;;  %10906 = vmatprep.subr.bf16.mxu0 %v12841_v7  ;;  %v12449_v57 = vld [vmem:[#allocation6 + $0x8] sm:$0xff]   ;;  %v12447_v62 = vld [vmem:[#allocation6 + $0x50] sm:$0xff]   ;;  %vm8968_vm7 = vcmask 261312   ;;  %vm8975_vm8 = vcmask 326912  }
  0x21   :  { %91 = vst.msk [vmem:[#allocation2 + $0x60] sm:$0xff] %vm77_vm0, %v16610_v3  ;;  %92 = vst.msk [vmem:[#allocation2 + $0x68] sm:$0xff] %vm77_vm0, %v16610_v3  ;;  %vm8982_vm9 = vcmask 392512   ;;  %vm8989_vm10 = vcmask 458112   ;;  %vm8996_vm11 = vcmask 523712   ;;  %vm9037_vm12 = vcmask 1041409  }
  0x22   :  { %94 = vst.msk [vmem:[#allocation2 + $0x78] sm:$0xff] %vm77_vm0, %v16610_v3  ;;  %95 = vst.msk [vmem:[#allocation2 + $0x80] sm:$0xff] %vm77_vm0, %v16610_v3  ;;  %10847 = vmatpush3.bf16.msra.mxu1 %v12443_v6  ;;  %v13047_v6 = vld [vmem:[#allocation6 + $0x60] sm:$0xff]   ;;  %vm9064_vm13 = vcmask 523264   ;;  %vm9177_vm14 = vcmask 1024   ;;  %vm9842_vm15 = vcmask 517120  }
  0x23   :  { %97 = vst.msk [vmem:[#allocation2 + $0x90] sm:$0xff] %vm77_vm0, %v16610_v3  ;;  %98 = vst.msk [vmem:[#allocation2 + $0x98] sm:$0xff] %vm77_vm0, %v16610_v3  ;;  %v139_v8 = vld [vmem:[%s16781_s29] sm:$0xff]  ;;  %v140_v9 = vld [vmem:[%s16781_s29 + $0x8] sm:$0xff]  ;;  %10907 = vmatpush3.bf16.msra.mxu0 %v12841_v7  ;;  %10864 = vmatprep.subr.bf16.mxu1 %v12448_v56 }
  0x24   :  { %100 = vst.msk [vmem:[#allocation2 + $0xa8] sm:$0xff] %vm77_vm0, %v16610_v3  ;;  %101 = vst.msk [vmem:[#allocation2 + $0xb0] sm:$0xff] %vm77_vm0, %v16610_v3  ;;  %v141_v10 = vld [vmem:[%s16781_s29 + $0x10] sm:$0xff]  ;;  %v142_v11 = vld [vmem:[%s16781_s29 + $0x18] sm:$0xff]  ;;  %10924 = vmatprep.subr.bf16.mxu0 %v12445_v16 }
  0x25   :  { %103 = vst.msk [vmem:[#allocation2 + $0xc0] sm:$0xff] %vm77_vm0, %v16610_v3  ;;  %104 = vst.msk [vmem:[#allocation2 + $0xc8] sm:$0xff] %vm77_vm0, %v16610_v3  ;;  %v175_v12 = vld [vmem:[#allocation2 + $0x18] sm:$0xff]  ;;  %v143_v17 = vld [vmem:[%s16781_s29 + $0x20] sm:$0xff] }
  0x26   :  { %106 = vst.msk [vmem:[#allocation2 + $0xd8] sm:$0xff] %vm77_vm0, %v16610_v3  ;;  %107 = vst.msk [vmem:[#allocation2 + $0xe0] sm:$0xff] %vm77_vm0, %v16610_v3  ;;  %v178_v13 = vld [vmem:[#allocation2 + $0x30] sm:$0xff]  ;;  %v144_v18 = vld [vmem:[%s16781_s29 + $0x28] sm:$0xff]  ;;  %v268_v21 = vrot.slane %v175_v12, 7 }
  0x27   :  { %109 = vst.msk [vmem:[#allocation2 + $0xf0] sm:$0xff] %vm77_vm0, %v16610_v3  ;;  %110 = vst.msk [vmem:[#allocation2 + $0xf8] sm:$0xff] %vm77_vm0, %v16610_v3  ;;  %v181_v14 = vld [vmem:[#allocation2 + $0x48] sm:$0xff]  ;;  %v145_v19 = vld [vmem:[%s16781_s29 + $0x30] sm:$0xff]  ;;  %v271_v22 = vrot.slane %v178_v13, 7 }
  0x28   :  { %112 = vst.msk [vmem:[#allocation2 + $0x108] sm:$0xff] %vm77_vm0, %v16610_v3  ;;  %113 = vst.msk [vmem:[#allocation2 + $0x110] sm:$0xff] %vm77_vm0, %v16610_v3  ;;  %v184_v15 = vld [vmem:[#allocation2 + $0x60] sm:$0xff]  ;;  %v12872_v20 = vld [vmem:[#allocation2 + $0x8] sm:$0xff]  ;;  %v274_v26 = vrot.slane %v181_v14, 7 }
  0x29   :  { %115 = vst.msk [vmem:[#allocation2 + $0x120] sm:$0xff] %vm77_vm0, %v16610_v3  ;;  %116 = vst.msk [vmem:[#allocation2 + $0x128] sm:$0xff] %vm77_vm0, %v16610_v3  ;;  %v147_v23 = vld [vmem:[%s16781_s29 + $0x40] sm:$0xff]  ;;  %v277_v27 = vrot.slane %v184_v15, 7  ;;  %v148_v33 = vld [vmem:[%s16781_s29 + $0x48] sm:$0xff]  ;;  %v266_v0 = vrot.slane %v12872_v20, 7 }
  0x2a   :  { %118 = vst.msk [vmem:[#allocation2 + $0x138] sm:$0xff] %vm77_vm0, %v16610_v3  ;;  %119 = vst.msk [vmem:[#allocation2 + $0x140] sm:$0xff] %vm77_vm0, %v16610_v3  ;;  %v149_v37 = vld [vmem:[%s16781_s29 + $0x50] sm:$0xff]  ;;  %v150_v38 = vld [vmem:[%s16781_s29 + $0x58] sm:$0xff] }
  0x2b   :  { %121 = vst.msk [vmem:[#allocation2 + $0x150] sm:$0xff] %vm77_vm0, %v16610_v3  ;;  %122 = vst.msk [vmem:[#allocation2 + $0x158] sm:$0xff] %vm77_vm0, %v16610_v3  ;;  %v151_v39 = vld [vmem:[%s16781_s29 + $0x60] sm:$0xff]  ;;  %v146_v43 = vld [vmem:[%s16781_s29 + $0x38] sm:$0xff] }
  0x2c   :  { %124 = vst.msk [vmem:[#allocation2 + $0x168] sm:$0xff] %vm77_vm0, %v16610_v3  ;;  %125 = vst.msk [vmem:[#allocation2 + $0x170] sm:$0xff] %vm77_vm0, %v16610_v3  ;;  %v152_v44 = vld [vmem:[%s16781_s29 + $0x68] sm:$0xff]  ;;  %v153_v45 = vld [vmem:[%s16781_s29 + $0x70] sm:$0xff] }
  0x2d   :  { %127 = vst.msk [vmem:[#allocation2 + $0x180] sm:$0xff] %vm77_vm0, %v16610_v3  ;;  %128 = vst.msk [vmem:[#allocation2 + $0x188] sm:$0xff] %vm77_vm0, %v16610_v3  ;;  %v172_v59 = vld [vmem:[#allocation2] sm:$0xff]  ;;  %v154_v61 = vld [vmem:[%s16781_s29 + $0x78] sm:$0xff] }
  0x2e   :  { %130 = vst.msk [vmem:[#allocation2 + $0x198] sm:$0xff] %vm77_vm0, %v16610_v3  ;;  %131 = vst.msk [vmem:[#allocation2 + $0x1a0] sm:$0xff] %vm77_vm0, %v16610_v3  ;;  %v12944_v51 = vld [vmem:[#allocation2 + $0xf8] sm:$0xff]  ;;  %v265_v2 = vrot.slane %v172_v59, 7  ;;  %v12993_v14 = vld [vmem:[#allocation2 + $0xa8] sm:$0xff] }
  0x2f   :  { %133 = vst.msk [vmem:[#allocation2 + $0x1b0] sm:$0xff] %vm77_vm0, %v16610_v3  ;;  %134 = vst.msk [vmem:[#allocation2 + $0x1b8] sm:$0xff] %vm77_vm0, %v16610_v3  ;;  %v13040_v59 = vld [vmem:[#allocation2 + $0x108] sm:$0xff] }
  0x30   :  { %136 = vst.msk [vmem:[#allocation2 + $0x1c8] sm:$0xff] %vm77_vm0, %v16610_v3  ;;  %137 = vst.msk [vmem:[#allocation2 + $0x1d0] sm:$0xff] %vm77_vm0, %v16610_v3 }
  0x31   :  { %84 = vst.msk [vmem:[#allocation2 + $0x28] sm:$0x1] %vm80_vm1, %v16610_v3  ;;  %87 = vst.msk [vmem:[#allocation2 + $0x40] sm:$0x1] %vm80_vm1, %v16610_v3 }
  0x32   :  { %90 = vst.msk [vmem:[#allocation2 + $0x58] sm:$0x1] %vm80_vm1, %v16610_v3  ;;  %93 = vst.msk [vmem:[#allocation2 + $0x70] sm:$0x1] %vm80_vm1, %v16610_v3 }
  0x33   :  { %81 = vst.msk [vmem:[#allocation2 + $0x10] sm:$0x1] %vm80_vm1, %v16610_v3  ;;  %96 = vst.msk [vmem:[#allocation2 + $0x88] sm:$0x1] %vm80_vm1, %v16610_v3 }
  0x34   :  { %99 = vst.msk [vmem:[#allocation2 + $0xa0] sm:$0x1] %vm80_vm1, %v16610_v3  ;;  %102 = vst.msk [vmem:[#allocation2 + $0xb8] sm:$0x1] %vm80_vm1, %v16610_v3 }
  0x35   :  { %105 = vst.msk [vmem:[#allocation2 + $0xd0] sm:$0x1] %vm80_vm1, %v16610_v3  ;;  %108 = vst.msk [vmem:[#allocation2 + $0xe8] sm:$0x1] %vm80_vm1, %v16610_v3 }
  0x36   :  { %111 = vst.msk [vmem:[#allocation2 + $0x100] sm:$0x1] %vm80_vm1, %v16610_v3  ;;  %114 = vst.msk [vmem:[#allocation2 + $0x118] sm:$0x1] %vm80_vm1, %v16610_v3 }
  0x37   :  { %117 = vst.msk [vmem:[#allocation2 + $0x130] sm:$0x1] %vm80_vm1, %v16610_v3  ;;  %120 = vst.msk [vmem:[#allocation2 + $0x148] sm:$0x1] %vm80_vm1, %v16610_v3 }
  0x38   :  { %123 = vst.msk [vmem:[#allocation2 + $0x160] sm:$0x1] %vm80_vm1, %v16610_v3  ;;  %126 = vst.msk [vmem:[#allocation2 + $0x178] sm:$0x1] %vm80_vm1, %v16610_v3 }
  0x39   :  { %129 = vst.msk [vmem:[#allocation2 + $0x190] sm:$0x1] %vm80_vm1, %v16610_v3  ;;  %132 = vst.msk [vmem:[#allocation2 + $0x1a8] sm:$0x1] %vm80_vm1, %v16610_v3 }
  0x3a   :  { %135 = vst.msk [vmem:[#allocation2 + $0x1c0] sm:$0x1] %vm80_vm1, %v16610_v3  ;;  %138 = vst.msk [vmem:[#allocation2 + $0x1d8] sm:$0x1] %vm80_vm1, %v16610_v3 }
  0x3b   :  { %16780 = vst [vmem:[#allocation12_spill] sm:$0xff] %v12841_v7  ;;  %156 = vst.msk [vmem:[#allocation2 + $0x20] sm:$0xff] %vm77_vm0, %v139_v8 }
  0x3c   :  { %157 = vst.msk [vmem:[#allocation2 + $0x38] sm:$0xff] %vm77_vm0, %v140_v9  ;;  %158 = vst.msk [vmem:[#allocation2 + $0x50] sm:$0xff] %vm77_vm0, %v141_v10  ;;  %v12984_v9 = vld [vmem:[#allocation2 + $0x78] sm:$0xff]  ;;  %v13083_v4 = vld [vmem:[#allocation2 + $0xd0] sm:$0x1] }
  0x3d   :  { %159 = vst.msk [vmem:[#allocation2 + $0x68] sm:$0xff] %vm77_vm0, %v142_v11  ;;  %160 = vst.msk [vmem:[#allocation2 + $0x80] sm:$0xff] %vm77_vm0, %v143_v17  ;;  %v12987_v11 = vld [vmem:[#allocation2 + $0x90] sm:$0xff]  ;;  %v13098_v15 = vld [vmem:[#allocation2 + $0x118] sm:$0x1] }
  0x3e   :  { %161 = vst.msk [vmem:[#allocation2 + $0x98] sm:$0xff] %vm77_vm0, %v144_v18  ;;  %162 = vst.msk [vmem:[#allocation2 + $0xb0] sm:$0xff] %vm77_vm0, %v145_v19  ;;  %v13104_v12 = vld [vmem:[#allocation2 + $0x130] sm:$0x1]  ;;  %v13166_v19 = vld [vmem:[#allocation2 + $0xd8] sm:$0xff] }
  0x3f   :  { %164 = vst.msk [vmem:[#allocation2 + $0x110] sm:$0xff] %vm77_vm0, %v147_v23  ;;  %165 = vst.msk [vmem:[#allocation2 + $0x128] sm:$0xff] %vm77_vm0, %v148_v33  ;;  %v13018_v33 = vld [vmem:[#allocation2 + $0x70] sm:$0x1] }
  0x40   :  { %166 = vst.msk [vmem:[#allocation2 + $0x140] sm:$0xff] %vm77_vm0, %v149_v37  ;;  %167 = vst.msk [vmem:[#allocation2 + $0x158] sm:$0xff] %vm77_vm0, %v150_v38  ;;  %v13070_v37 = vld [vmem:[#allocation2 + $0x168] sm:$0xff] }
  0x41   :  { %168 = vst.msk [vmem:[#allocation2 + $0x170] sm:$0xff] %vm77_vm0, %v151_v39  ;;  %163 = vst.msk [vmem:[#allocation2 + $0xc8] sm:$0xff] %vm77_vm0, %v146_v43  ;;  %v12450_v39 = vld [vmem:[#allocation6 + $0x58] sm:$0xff]  }
  0x42   :  { %v12879_v24 = vld [vmem:[#allocation2 + $0x20] sm:$0xff]  ;;  %169 = vst.msk [vmem:[#allocation2 + $0x188] sm:$0xff] %vm77_vm0, %v152_v44  ;;  %170 = vst.msk [vmem:[#allocation2 + $0x1a0] sm:$0xff] %vm77_vm0, %v153_v45  ;;  %v13050_v44 = vld [vmem:[#allocation2 + $0x138] sm:$0xff] }
  0x43   :  { %v12881_v25 = vld [vmem:[#allocation2 + $0x38] sm:$0xff]  ;;  %v341_v28 = vpack.c.bf16 %v12879_v24, %v12872_v20  ;;  %v12886_v29 = vld [vmem:[#allocation2 + $0x50] sm:$0xff]  ;;  %v269_v31 = vrot.slane %v12879_v24, 7  ;;  %171 = vst.msk [vmem:[#allocation2 + $0x1b8] sm:$0xff] %vm77_vm0, %v154_v61  ;;  %16785 = vst [vmem:[#allocation16_spill] sm:$0xff] %v12984_v9 }
  0x44   :  { %v12888_v30 = vld [vmem:[#allocation2 + $0x68] sm:$0xff]  ;;  %v272_v32 = vrot.slane %v12881_v25, 7  ;;  %v12897_v34 = vpack.c.bf16 %v12886_v29, %v12881_v25  ;;  %v275_v35 = vrot.slane %v12886_v29, 7  ;;  %v12940_v49 = vld [vmem:[#allocation2 + $0x80] sm:$0xff]  ;;  %v1037_v50 = vpack.c.bf16 %v12881_v25, %v12879_v24  ;;  %16786 = vst [vmem:[#allocation17_spill] sm:$0xff] %v12987_v11  ;;  %16787 = vst [vmem:[#allocation18_spill] sm:$0xff] %v12993_v14 }
  0x45   :  { %v278_v36 = vrot.slane %v12888_v30, 7  ;;  %10848 = vmatprep.mubr.msk.bf16.mxu1 %vm77_vm0, %v341_v28  ;;  %v12913_v40 = vsel %vm264_vm2, %v268_v21, %v269_v31  ;;  %v12953_v53 = vpack.c.bf16 %v12940_v49, %v12888_v30  ;;  %v12955_v54 = vld [vmem:[#allocation2 + $0x98] sm:$0xff]  ;;  %v12957_v55 = vld [vmem:[#allocation2 + $0xb0] sm:$0xff]  ;;  %v281_v10 = vrot.slane %v12940_v49, 7  ;;  %16790 = vst [vmem:[#allocation21_spill] sm:$0xff] %v13040_v59  ;;  %v13042_v61 = vld [vmem:[#allocation2 + $0x120] sm:$0xff] }
  0x46   :  { %16782 = vst [vmem:[#allocation13_spill] sm:$0xff] %v12897_v34  ;;  %v12916_v41 = vsel %vm264_vm2, %v271_v22, %v272_v32  ;;  %10849 = vmatmul.mubr.msk.bf16.vlgmr.msra.gmra.mrb[0].mxu1 %vm77_vm0, %v12897_v34  ;;  %v12933_v46 = vsel %vm264_vm2, %v274_v26, %v275_v35  ;;  %v12963_v58 = vld [vmem:[#allocation2 + $0x110] sm:$0xff]  ;;  %v12967_v60 = vpack.c.bf16 %v12957_v55, %v12955_v54  ;;  %v12982_v8 = vld [vmem:[#allocation2 + $0x128] sm:$0xff]  ;;  %v13011_v28 = vld [vmem:[#allocation2 + $0x58] sm:$0x1] }
  0x47   :  { %v12936_v47 = vsel %vm264_vm2, %v277_v27, %v278_v36  ;;  %v875_v48 = vpack.c.bf16 %v12916_v41, %v12913_v40  ;;  %16783 = vst [vmem:[#allocation14_spill] sm:$0xff] %v12953_v53  ;;  %10852 = vmatprep.mubr.msk.bf16.mxu1 %vm77_vm0, %v12953_v53  ;;  %v345_v63 = vpack.c.bf16 %v12963_v58, %v12944_v51  ;;  %v12991_v13 = vld [vmem:[#allocation2 + $0x140] sm:$0xff]  ;;  %v12997_v17 = vld [vmem:[#allocation2 + $0x158] sm:$0xff]  ;;  %v13007_v26 = vld [vmem:[#allocation2 + $0x28] sm:$0x1]  ;;  %v16798_v53 = vrot.slane %v12987_v11, 7 }
  0x48   :  { %v876_v52 = vpack.c.bf16 %v12936_v47, %v12933_v46  ;;  %16784 = vst [vmem:[#allocation15_spill] sm:$0xff] %v12967_v60  ;;  %10865 = vmatpush3.bf16.msra.mxu1 %v12448_v56  ;;  %v12999_v18 = vld [vmem:[#allocation2 + $0x170] sm:$0xff]  ;;  %v1038_v22 = vpack.c.bf16 %v12888_v30, %v12886_v29  ;;  %v1039_v23 = vpack.c.bf16 %v12955_v54, %v12940_v49  ;;  %v13009_v27 = vld [vmem:[#allocation2 + $0x40] sm:$0x1]  ;;  %v13031_v45 = vld [vmem:[#allocation2 + $0xc8] sm:$0xff]  ;;  %v16803_v11 = vrot.slane %v12879_v24, 1 }
  0x49   :  { %10908 = vmatprep.mubr.msk.bf16.mxu0 %vm77_vm0, %v875_v48  ;;  %10866 = vmatprep.subr.bf16.mxu1 %v12449_v57  ;;  %v13015_v31 = vpack.c.bf16 %v12991_v13, %v12982_v8  ;;  %v13021_v36 = vld [vmem:[#allocation2 + $0xf0] sm:$0xff]  ;;  %v13026_v38 = vpack.c.bf16 %v12999_v18, %v12997_v17  ;;  %v13033_v48 = vld [vmem:[#allocation2 + $0x188] sm:$0xff]  ;;  %v13091_v43 = vld [vmem:[#allocation2 + $0x198] sm:$0xff] }
  0x4a   :  { %10909 = vmatmul.mubr.msk.bf16.vlgmr.msra.gmra.mrb[0].mxu0 %vm77_vm0, %v876_v52  ;;  %v13052_v35 = vld [vmem:[#allocation6 + $0x20] sm:$0xff]   ;;  %v13111_v32 = vld [vmem:[#allocation2 + $0x10] sm:$0x1]  ;;  %v16807_v24 = vrot.slane %v13021_v36, 7  ;;  %v231_v36 = vld [vmem:[#allocation2 + $0x1d8] sm:$0x1] }
  0x4b   :  { %10925 = vmatpush3.bf16.msra.mxu0 %v12445_v16  ;;  %10928 = vmatprep.mubr.msk.bf16.mxu0 %vm77_vm0, %v1037_v50  ;;  %16788 = vst [vmem:[#allocation19_spill] sm:$0xff] %v13015_v31  ;;  %16789 = vst [vmem:[#allocation20_spill] sm:$0xff] %v13026_v38  ;;  %v13035_v50 = vld [vmem:[#allocation2 + $0x1a0] sm:$0xff]  ;;  %v13056_v21 = vld [vmem:[#allocation2 + $0x88] sm:$0x1] }
  0x4c   :  { %10926 = vmatprep.subr.bf16.mxu0 %v12446_v42  ;;  %10867 = vmatpush3.bf16.msra.mxu1 %v12449_v57  ;;  %v13079_v1 = vpack.c.bf16 %v13035_v50, %v13033_v48  ;;  %v13089_v52 = vld [vmem:[#allocation2 + $0x180] sm:$0xff]  ;;  %v13123_v57 = vld [vmem:[#allocation2 + $0x178] sm:$0x1]  ;;  %v12453_v16 = vld [vmem:[#allocation6 + $0x28] sm:$0xff]  }
  0x4d   :  { %10884 = vmatprep.subr.bf16.mxu1 %v13052_v35 }
  0x4e   :  { %10853 = vmatmul.mubr.msk.bf16.gmra.mrb[4].mxu1 %vm77_vm0, %v12967_v60  ;;  %16791 = vst [vmem:[#allocation22_spill] sm:$0xff] %v13079_v1  ;;  %v228_v60 = vld [vmem:[#allocation2 + $0x1c0] sm:$0x1] }
  0x4f   :  { %10927 = vmatpush3.bf16.msra.mxu0 %v12446_v42  ;;  %10856 = vmatprep.mubr.msk.bf16.mxu1 %vm77_vm0, %v345_v63  ;;  %v267_v63 = vsel %vm264_vm2, %v265_v2, %v266_v0  ;;  %v13062_v2 = vld [vmem:[#allocation2 + $0xa0] sm:$0x1]  ;;  %v1040_v0 = vpack.c.bf16 %v13031_v45, %v12957_v55  ;;  %v13138_v42 = vld [vmem:[#allocation2 + $0x1a8] sm:$0x1] }
  0x50   :  { %10944 = vmatprep.subr.bf16.mxu0 %v12447_v62  ;;  %v329_v3 = vpack.c.bf16 %v12913_v40, %v267_v63  ;;  %v13120_v40 = vld [vmem:[#allocation2 + $0x160] sm:$0x1]  ;;  %v13125_v63 = vld [vmem:[#allocation2 + $0x190] sm:$0x1]  ;;  %16794 = vst [vmem:[#allocation24_spill] sm:$0xff] %v13138_v42  ;;  %v16812_v42 = vrot.slane %v13011_v28, 1 }
  0x51   :  { %v16819_v28 = vrot.slane %v13042_v61, 7 }
  0x56   :  { %10929 = vmatmul.mubr.msk.bf16.vlgmr.msra.gmra.mrb[0].mxu0 %vm77_vm0, %v1038_v22  ;;  %10857 = vmatmul.mubr.msk.bf16.gmra.mrb[8].mxu1 %vm77_vm0, %v13015_v31  ;;  %v13064_v22 = vld [vmem:[#allocation2 + $0x150] sm:$0xff] }
  0x57   :  { %10945 = vmatpush3.bf16.msra.mxu0 %v12447_v62  ;;  %10932 = vmatprep.mubr.msk.bf16.mxu0 %vm77_vm0, %v1039_v23  ;;  %v1041_v62 = vpack.c.bf16 %v12982_v8, %v12963_v58  ;;  %v13072_v23 = vld [vmem:[#allocation2 + $0xb8] sm:$0x1] }
  0x58   :  { %10860 = vmatprep.mubr.msk.bf16.mxu1 %vm77_vm0, %v13026_v38  ;;  %10946 = vmatprep.subr.bf16.mxu0 %v12450_v39  ;;  %v13160_v38 = vld [vmem:[#allocation2 + $0x100] sm:$0x1] }
  0x5b   :  { %10947 = vmatpush3.bf16.msra.mxu0 %v12450_v39  ;;  %v1042_v39 = vpack.c.bf16 %v12997_v17, %v12991_v13 }
  0x5c   :  { %10964 = vmatprep.subr.bf16.mxu0 %v13047_v6 }
  0x5e   :  { %10933 = vmatmul.mubr.msk.bf16.gmra.mrb[4].mxu0 %vm77_vm0, %v1040_v0  ;;  %10861 = vmatmul.mubr.msk.bf16.gmra.mrb[12].mxu1 %vm77_vm0, %v13079_v1  ;;  %v13118_v0 = vld [vmem:[#allocation2 + $0x148] sm:$0x1]  ;;  %v13154_v1 = vld [vmem:[#allocation2 + $0xc0] sm:$0xff] }
  0x5f   :  { %10936 = vmatprep.mubr.msk.bf16.mxu0 %vm77_vm0, %v1041_v62  ;;  %10868 = vmatprep.mubr.msk.bf16.mxu1 %vm77_vm0, %v329_v3  ;;  %v16792_v62 = vrot.slane %v12984_v9, 7  ;;  %v13146_v9 = vpack.c.bf16 %v12933_v46, %v12916_v41  ;;  %v13168_v3 = vld [vmem:[#allocation2 + $0xe0] sm:$0xff]  ;;  %v16797_v46 = vrot.slane %v12955_v54, 7  ;;  %v16799_v41 = vrot.slane %v12957_v55, 7 }
  0x61   :  { %v13134_v56 = vsel %vm264_vm2, %v16792_v62, %v281_v10  ;;  %16795 = vst [vmem:[#allocation25_spill] sm:$0xff] %v13146_v9  ;;  %v1043_v10 = vpack.c.bf16 %v13033_v48, %v12999_v18  ;;  %v13150_v62 = vld [vmem:[#allocation2 + $0x1b8] sm:$0xff]  ;;  %v13181_v34 = vsel %vm264_vm2, %v16798_v53, %v16797_v46  ;;  %v16804_v46 = vrot.slane %v13009_v27, 1 }
  0x62   :  { %16793 = vst [vmem:[#allocation23_spill] sm:$0xff] %v13134_v56  ;;  %16796 = vst [vmem:[#allocation26_spill] sm:$0xff] %v13150_v62  ;;  %v13158_v31 = vpack.c.bf16 %v13134_v56, %v12936_v47  ;;  %v1204_v47 = vrot.slane %v13150_v62, 1  ;;  %v1205_v56 = vrot.slane %v228_v60, 1  ;;  %v16809_v27 = vrot.slane %v12963_v58, 7  ;;  %v13228_v60 = vld [vmem:[#allocation2 + $0x1d0] sm:$0xff] }
  0x66   :  { %10937 = vmatmul.mubr.msk.bf16.gmra.mrb[8].mxu0 %vm77_vm0, %v1042_v39  ;;  %10869 = vmatmul.mubr.msk.bf16.vlgmr.msra.gmra.mrb[0].mxu1 %vm77_vm0, %v13146_v9  ;;  %v16800_v39 = vrot.slane %v12993_v14, 7  ;;  %v201_v9 = vld [vmem:[#allocation2 + $0xe8] sm:$0x1]  ;;  %v16805_v14 = vrot.slane %v12881_v25, 1  ;;  %v16810_v25 = vrot.slane %v13040_v59, 7  ;;  %v16813_v59 = vrot.slane %v12886_v29, 1 }
  0x67   :  { %10940 = vmatprep.mubr.msk.bf16.mxu0 %vm77_vm0, %v1043_v10  ;;  %10872 = vmatprep.mubr.msk.bf16.mxu1 %vm77_vm0, %v13158_v31  ;;  %v16802_v10 = vrot.slane %v13007_v26, 1  ;;  %v16806_v26 = vrot.slane %v12944_v51, 7  ;;  %v13266_v29 = vsel %vm636_vm3, %v1204_v47, %v1205_v56  ;;  %v16821_v56 = vrot.slane %v13050_v44, 7 }
  0x68   :  { %v13188_v7 = vsel %vm264_vm2, %v16800_v39, %v16799_v41  ;;  %v13205_v41 = vsel %vm636_vm3, %v16805_v14, %v16804_v46  ;;  %10885 = vmatpush3.bf16.msra.mxu1 %v13052_v35  ;;  %v13222_v14 = vsel %vm264_vm2, %v16810_v25, %v16809_v27  ;;  %v1044_v35 = vpack.c.bf16 %v13150_v62, %v13035_v50 }
  0x69   :  { %16801 = vst [vmem:[#allocation27_spill] sm:$0xff] %v13188_v7  ;;  %v13198_v53 = vsel %vm636_vm3, %v16803_v11, %v16802_v10  ;;  %v13215_v11 = vsel %vm264_vm2, %v16807_v24, %v16806_v26  ;;  %16811 = vst [vmem:[#allocation29_spill] sm:$0xff] %v13222_v14  ;;  %10886 = vmatprep.subr.bf16.mxu1 %v12453_v16  ;;  %v13232_v26 = vpack.c.bf16 %v13188_v7, %v13181_v34 }
  0x6a   :  { %16808 = vst [vmem:[#allocation28_spill] sm:$0xff] %v13215_v11  ;;  %v1209_v24 = vpack.c.bf16 %v13205_v41, %v13198_v53  ;;  %v333_v27 = vpack.c.bf16 %v13222_v14, %v13215_v11  ;;  %v1661_v25 = vrot.slane %v13168_v3, 1  ;;  %v1662_v39 = vrot.slane %v201_v9, 1 }
  0x6b   :  { %v1664_v10 = vrot.slane %v13228_v60, 1  ;;  %v1665_v46 = vrot.slane %v231_v36, 1  ;;  %v648_v62 = vsel %vm636_vm3, %v16813_v59, %v16812_v42  ;;  %v16814_v7 = vrot.slane %v13018_v33, 1 }
  0x6c   :  { %10887 = vmatpush3.bf16.msra.mxu1 %v12453_v16  ;;  %v16815_v16 = vrot.slane %v12888_v30, 1  ;;  %v16816_v9 = vrot.slane %v13083_v4, 1  ;;  %v16817_v14 = vrot.slane %v13031_v45, 1  ;;  %v16818_v4 = vrot.slane %v12982_v8, 7 }
  0x6d   :  { %11788 = vmatprep.subr.bf16.mxu1 %v12838_v5  ;;  %v13271_v30 = vsel %vm636_vm3, %v1664_v10, %v1665_v46  ;;  %v16820_v42 = vrot.slane %v12991_v13, 7  ;;  %v16824_v46 = vrot.slane %v13062_v2, 1  ;;  %v12454_v2 = vld [vmem:[#allocation6 + $0x68] sm:$0xff]   ;;  %v16841_v47 = vrot.slane %v12872_v20, 1 }
  0x6e   :  { %10941 = vmatmul.mubr.msk.bf16.gmra.mrb[12].mxu0 %vm77_vm0, %v1044_v35  ;;  %v651_v11 = vsel %vm636_vm3, %v16815_v16, %v16814_v7  ;;  %v13257_v36 = vsel %vm636_vm3, %v16817_v14, %v16816_v9  ;;  %v13260_v35 = vsel %vm636_vm3, %v1661_v25, %v1662_v39  ;;  %10873 = vmatmul.mubr.msk.bf16.gmra.mrb[4].mxu1 %vm77_vm0, %v13232_v26  ;;  %v16822_v39 = vrot.slane %v13056_v21, 1 }
  0x6f   :  { %10948 = vmatprep.mubr.msk.bf16.mxu0 %vm77_vm0, %v1209_v24  ;;  %v1669_v7 = vpack.c.bf16 %v13260_v35, %v13257_v36  ;;  %10876 = vmatprep.mubr.msk.bf16.mxu1 %vm77_vm0, %v333_v27  ;;  %v13279_v33 = vsel %vm264_vm2, %v16819_v28, %v16818_v4  ;;  %v13286_v59 = vsel %vm264_vm2, %v16821_v56, %v16820_v42  ;;  %v16823_v14 = vrot.slane %v12940_v49, 1 }
  0x70   :  { %v16825_v24 = vrot.slane %v12955_v54, 1  ;;  %v16826_v25 = vrot.slane %v12997_v17, 7  ;;  %v16827_v16 = vrot.slane %v13064_v22, 7  ;;  %v16828_v4 = vrot.slane %v12999_v18, 7 }
  0x71   :  { %v654_v10 = vsel %vm636_vm3, %v16823_v14, %v16822_v39  ;;  %v16829_v21 = vrot.slane %v13070_v37, 7  ;;  %v1210_v28 = vpack.c.bf16 %v651_v11, %v648_v62  ;;  %v13316_v54 = vpack.c.bf16 %v13286_v59, %v13279_v33  ;;  %v12455_v39 = vld [vmem:[#allocation6 + $0x70] sm:$0xff]  }
  0x72   :  { %v657_v27 = vsel %vm636_vm3, %v16825_v24, %v16824_v46  ;;  %v13305_v9 = vsel %vm264_vm2, %v16827_v16, %v16826_v25  ;;  %v16830_v14 = vrot.slane %v13072_v23, 1  ;;  %v16831_v46 = vrot.slane %v12957_v55, 1 }
  0x73   :  { %v13312_v49 = vsel %vm264_vm2, %v16829_v21, %v16828_v4  ;;  %v1211_v42 = vpack.c.bf16 %v657_v27, %v654_v10  ;;  %v16832_v25 = vrot.slane %v13033_v48, 7  ;;  %v16833_v16 = vrot.slane %v13089_v52, 7 }
  0x74   :  { %v13320_v56 = vpack.c.bf16 %v13312_v49, %v13305_v9  ;;  %v660_v24 = vsel %vm636_vm3, %v16831_v46, %v16830_v14  ;;  %v16835_v23 = vrot.slane %v13091_v43, 7  ;;  %v16836_v21 = vrot.slane %v13098_v15, 1 }
  0x75   :  { %v13336_v4 = vsel %vm264_vm2, %v16833_v16, %v16832_v25  ;;  %v16838_v46 = vrot.slane %v13104_v12, 1  ;;  %v16840_v16 = vrot.slane %v13111_v32, 1  ;;  %v16842_v20 = vrot.slane %v13118_v0, 1 }
  0x76   :  { %10949 = vmatmul.mubr.msk.bf16.vlgmr.msra.gmra.mrb[0].mxu0 %vm77_vm0, %v1210_v28  ;;  %10877 = vmatmul.mubr.msk.bf16.gmra.mrb[8].mxu1 %vm77_vm0, %v13316_v54  ;;  %v16837_v28 = vrot.slane %v12963_v58, 1  ;;  %v16848_v0 = vrot.slane %v13125_v63, 1 }
  0x77   :  { %10965 = vmatpush3.bf16.msra.mxu0 %v13047_v6  ;;  %10952 = vmatprep.mubr.msk.bf16.mxu0 %vm77_vm0, %v1211_v42  ;;  %v16834_v6 = vrot.slane %v13035_v50, 7  ;;  %v16839_v42 = vrot.slane %v12982_v8, 1  ;;  %v16843_v8 = vrot.slane %v12991_v13, 1  ;;  %v16849_v13 = vrot.slane %v13033_v48, 1 }
  0x78   :  { %10880 = vmatprep.mubr.msk.bf16.mxu1 %vm77_vm0, %v13320_v56  ;;  %v666_v14 = vsel %vm636_vm3, %v16837_v28, %v16836_v21  ;;  %10966 = vmatprep.subr.bf16.mxu0 %v12454_v2  ;;  %v16846_v21 = vrot.slane %v13123_v57, 1  ;;  %v16847_v28 = vrot.slane %v12999_v18, 1  ;;  %v16850_v18 = vld [vmem:[#allocation24_spill] sm:$0xff]  ;;  %v16852_v48 = vrot.slane %v13035_v50, 1 }
  0x79   :  { %v13346_v55 = vsel %vm264_vm2, %v16835_v23, %v16834_v6  ;;  %v669_v25 = vsel %vm636_vm3, %v16839_v42, %v16838_v46  ;;  %v639_v6 = vsel %vm636_vm3, %v16841_v47, %v16840_v16  ;;  %v1212_v23 = vpack.c.bf16 %v13257_v36, %v660_v24  ;;  %v13512_v36 = vld [vmem:[#allocation6 + $0x90] sm:$0xff]  }
  0x7a   :  { %v13366_v58 = vpack.c.bf16 %v13346_v55, %v13336_v4  ;;  %v1213_v15 = vpack.c.bf16 %v669_v25, %v666_v14  ;;  %v701_v12 = vpack.c.bf16 %v13198_v53, %v639_v6  ;;  %v672_v32 = vsel %vm636_vm3, %v16843_v8, %v16842_v20 }
  0x7b   :  { %10967 = vmatpush3.bf16.msra.mxu0 %v12454_v2  ;;  %v16844_v47 = vrot.slane %v13120_v40, 1  ;;  %v16845_v2 = vrot.slane %v12997_v17, 1  ;;  %v678_v46 = vsel %vm636_vm3, %v16847_v28, %v16846_v21  ;;  %v681_v42 = vsel %vm636_vm3, %v16849_v13, %v16848_v0  ;;  %v13445_v21 = vld [vmem:[#allocation2 + $0x1b0] sm:$0xff]  ;;  %v16863_v0 = vld [vmem:[#allocation26_spill] sm:$0xff] }
  0x7c   :  { %10984 = vmatprep.subr.bf16.mxu0 %v12455_v39  ;;  %v13395_v40 = vpack.c.bf16 %v648_v62, %v13205_v41  ;;  %v1215_v17 = vpack.c.bf16 %v681_v42, %v678_v46  ;;  %v13397_v6 = vpack.c.bf16 %v654_v10, %v651_v11  ;;  %v16851_v57 = vrot.slane %v16850_v18, 1  ;;  %v16855_v10 = vld [vmem:[#allocation12_spill] sm:$0xff]  ;;  %v16862_v28 = vld [vmem:[#allocation27_spill] sm:$0xff] }
  0x7d   :  { %v675_v53 = vsel %vm636_vm3, %v16845_v2, %v16844_v47  ;;  %v16853_v62 = vrot.slane %v13160_v38, 1  ;;  %v16854_v41 = vrot.slane %v12944_v51, 1  ;;  %v706_v38 = vpack.c.bf16 %v672_v32, %v669_v25 }
  0x7e   :  { %10953 = vmatmul.mubr.msk.bf16.gmra.mrb[4].mxu0 %vm77_vm0, %v1212_v23  ;;  %10881 = vmatmul.mubr.msk.bf16.gmra.mrb[12].mxu1 %vm77_vm0, %v13366_v58  ;;  %v1214_v16 = vpack.c.bf16 %v675_v53, %v672_v32  ;;  %v684_v63 = vsel %vm636_vm3, %v16852_v48, %v16851_v57  ;;  %v707_v20 = vpack.c.bf16 %v678_v46, %v675_v53  ;;  %v16859_v47 = vrot.slane %v13168_v3, 7  ;;  %v16861_v32 = vld [vmem:[#allocation23_spill] sm:$0xff] }
  0x7f   :  { %10956 = vmatprep.mubr.msk.bf16.mxu0 %vm77_vm0, %v1213_v15  ;;  %10888 = vmatprep.mubr.msk.bf16.mxu1 %vm77_vm0, %v701_v12  ;;  %v663_v11 = vsel %vm636_vm3, %v16854_v41, %v16853_v62  ;;  %v1216_v23 = vpack.c.bf16 %v13266_v29, %v684_v63  ;;  %v13418_v15 = vpack.c.bf16 %v660_v24, %v657_v27  ;;  %v12456_v12 = vld [vmem:[#allocation6 + $0x78] sm:$0xff]   ;;  %v12457_v27 = vld [vmem:[#allocation6 + $0x80] sm:$0xff]   ;;  %v16857_v24 = vrot.slane %v13031_v45, 7 }
  0x80   :  { %v705_v50 = vpack.c.bf16 %v666_v14, %v663_v11  ;;  %v16858_v14 = vrot.slane %v13154_v1, 7  ;;  %v16860_v2 = vrot.slane %v13166_v19, 7  ;;  %v877_v53 = vpack.c.bf16 %v13181_v34, %v16861_v32  ;;  %v229_v19 = vld [vmem:[#allocation2 + $0x1c8] sm:$0xff] }
  0x81   :  { %v871_v13 = vrot.slane %v16863_v0, 7  ;;  %v1378_v34 = vrot.slane %v229_v19, 7  ;;  %v16866_v62 = vld [vmem:[#allocation14_spill] sm:$0xff]  ;;  %v1522_v41 = vpack.c.bf16 %v13228_v60, %v16863_v0 }
  0x82   :  { %v869_v8 = vsel %vm264_vm2, %v16858_v14, %v16857_v24  ;;  %v1377_v25 = vsel %vm264_vm2, %v16860_v2, %v16859_v47  ;;  %v13530_v14 = vld [vmem:[%s16592_s2] ss:$0 sm:$0xff] }
  0x83   :  { %v878_v46 = vpack.c.bf16 %v869_v8, %v16862_v28  ;;  %v13535_v2 = vld [vmem:[%s16593_s3] ss:$0 sm:$0xff] }
  0x86   :  { %10957 = vmatmul.mubr.msk.bf16.gmra.mrb[8].mxu0 %vm77_vm0, %v1214_v16  ;;  %10889 = vmatmul.mubr.msk.bf16.vlgmr.msra.gmra.mrb[0].mxu1 %vm77_vm0, %v13395_v40  ;;  %v16864_v16 = vld [vmem:[#allocation29_spill] sm:$0xff] }
  0x87   :  { %10960 = vmatprep.mubr.msk.bf16.mxu0 %vm77_vm0, %v1215_v17  ;;  %10892 = vmatprep.mubr.msk.bf16.mxu1 %vm77_vm0, %v13397_v6  ;;  %v879_v17 = vpack.c.bf16 %v13279_v33, %v16864_v16  ;;  %v880_v33 = vpack.c.bf16 %v13305_v9, %v13286_v59  ;;  %v16867_v59 = vld [vmem:[#allocation15_spill] sm:$0xff]  ;;  %v1521_v9 = vpack.c.bf16 %v13168_v3, %v13031_v45  ;;  %v12459_v3 = vld [vmem:[#allocation6 + $0xa0] sm:$0xff]  }
  0x88   :  { %11790 = vmatpush3.bf16.msra.mxu1 %v12838_v5  ;;  %v16856_v5 = vld [vmem:[#allocation25_spill] sm:$0xff]  ;;  %v16871_v45 = vpack.c.bf16 %v13271_v30, %v13266_v29 }
  0x89   :  { %11789 = vmatprep.subr.bf16.mxu1 %v16855_v10 }
  0x8c   :  { %11791 = vmatpush3.bf16.msra.mxu1 %v16855_v10 }
  0x8d   :  { %11024 = vmatprep.subr.bf16.mxu1 %v12459_v3 }
  0x8e   :  { %10961 = vmatmul.mubr.msk.bf16.gmra.mrb[12].mxu0 %vm77_vm0, %v1216_v23  ;;  %10893 = vmatmul.mubr.msk.bf16.gmra.mrb[4].mxu1 %vm77_vm0, %v13418_v15 }
  0x8f   :  { %10968 = vmatprep.mubr.msk.bf16.mxu0 %vm77_vm0, %v16856_v5  ;;  %10896 = vmatprep.mubr.msk.bf16.mxu1 %vm77_vm0, %v705_v50 }
  0x96   :  { %10969 = vmatmul.mubr.msk.bf16.vlgmr.msra.gmra.mrb[0].mxu0 %vm77_vm0, %v13158_v31  ;;  %10897 = vmatmul.mubr.msk.bf16.gmra.mrb[8].mxu1 %vm77_vm0, %v706_v38  ;;  %v1383_v31 = vpack.c.bf16 %v1377_v25, %v869_v8 }
  0x97   :  { %10985 = vmatpush3.bf16.msra.mxu0 %v12455_v39  ;;  %10972 = vmatprep.mubr.msk.bf16.mxu0 %vm77_vm0, %v13232_v26  ;;  %v708_v39 = vpack.c.bf16 %v684_v63, %v681_v42  ;;  %v16648_v26 = vrot.slane %v13445_v21, 7  ;;  %v1379_v42 = vrot.slane %v13228_v60, 7  ;;  %v12458_v63 = vld [vmem:[#allocation6 + $0x88] sm:$0xff]  }
  0x98   :  { %10900 = vmatprep.mubr.msk.bf16.mxu1 %vm77_vm0, %v707_v20  ;;  %10986 = vmatprep.subr.bf16.mxu0 %v12456_v12  ;;  %v12460_v60 = vld [vmem:[#allocation6 + $0xa8] sm:$0xff]  }
  0x99   :  { %v1380_v18 = vsel %vm264_vm2, %v1378_v34, %v1379_v42 }
  0x9b   :  { %10987 = vmatpush3.bf16.msra.mxu0 %v12456_v12 }
  0x9c   :  { %11004 = vmatprep.subr.bf16.mxu0 %v12457_v27 }
  0x9e   :  { %10973 = vmatmul.mubr.msk.bf16.gmra.mrb[4].mxu0 %vm77_vm0, %v1383_v31  ;;  %10901 = vmatmul.mubr.msk.bf16.gmra.mrb[12].mxu1 %vm77_vm0, %v708_v39 }
  0x9f   :  { %10976 = vmatprep.mubr.msk.bf16.mxu0 %vm77_vm0, %v13316_v54  ;;  %10912 = vmatprep.mubr.msk.bf16.mxu1 %vm77_vm0, %v877_v53  ;;  %v872_v54 = vsel %vm264_vm2, %v16648_v26, %v871_v13  ;;  %v1935_v26 = vld [vmem:[#allocation2 + $0x190] sm:$0x1] }
  0xa0   :  { %v1384_v57 = vpack.c.bf16 %v1380_v18, %v872_v54  ;;  %v882_v48 = vpack.c.bf16 %v872_v54, %v13346_v55  ;;  %v16870_v55 = vld [vmem:[#allocation22_spill] sm:$0xff] }
  0xa6   :  { %10977 = vmatmul.mubr.msk.bf16.gmra.mrb[8].mxu0 %vm77_vm0, %v13320_v56  ;;  %10913 = vmatmul.mubr.msk.bf16.vlgmr.msra.gmra.mrb[4].mxu1 %vm77_vm0, %v878_v46  ;;  %v881_v56 = vpack.c.bf16 %v13336_v4, %v13312_v49  ;;  %v16868_v49 = vld [vmem:[#allocation19_spill] sm:$0xff]  ;;  %v16869_v4 = vld [vmem:[#allocation20_spill] sm:$0xff] }
  0xa7   :  { %10980 = vmatprep.mubr.msk.bf16.mxu0 %vm77_vm0, %v13366_v58  ;;  %10916 = vmatprep.mubr.msk.bf16.mxu1 %vm77_vm0, %v879_v17  ;;  %v16865_v58 = vld [vmem:[#allocation13_spill] sm:$0xff] }
  0xa8   :  { %11025 = vmatpush3.bf16.msra.mxu1 %v12459_v3 }
  0xa9   :  { %11026 = vmatprep.subr.bf16.mxu1 %v12460_v60 }
  0xac   :  { %11027 = vmatpush3.bf16.msra.mxu1 %v12460_v60 }
  0xad   :  { %11044 = vmatprep.subr.bf16.mxu1 %v13512_v36 }
  0xae   :  { %10981 = vmatmul.mubr.msk.bf16.gmra.mrb[12].mxu0 %vm77_vm0, %v1384_v57  ;;  %10917 = vmatmul.mubr.msk.bf16.gmra.mrb[8].mxu1 %vm77_vm0, %v880_v33 }
  0xaf   :  { %10988 = vmatprep.mubr.msk.bf16.mxu0 %vm77_vm0, %v16865_v58  ;;  %10920 = vmatprep.mubr.msk.bf16.mxu1 %vm77_vm0, %v881_v56 }
  0xb6   :  { %10989 = vmatmul.mubr.msk.bf16.vlgmr.msra.gmra.mrb[0].mxu0 %vm77_vm0, %v16866_v62  ;;  %10921 = vmatmul.mubr.msk.bf16.gmra.mrb[12].mxu1 %vm77_vm0, %v882_v48 }
  0xb7   :  { %11005 = vmatpush3.bf16.msra.mxu0 %v12457_v27  ;;  %10992 = vmatprep.mubr.msk.bf16.mxu0 %vm77_vm0, %v16867_v59 }
  0xb8   :  { %11006 = vmatprep.subr.bf16.mxu0 %v12458_v63 }
  0xbb   :  { %11007 = vmatpush3.bf16.msra.mxu0 %v12458_v63 }
  0xbe   :  { %10993 = vmatmul.mubr.msk.bf16.gmra.mrb[4].mxu0 %vm77_vm0, %v1521_v9 }
  0xbf   :  { %10996 = vmatprep.mubr.msk.bf16.mxu0 %vm77_vm0, %v16868_v49 }
  0xc6   :  { %10997 = vmatmul.mubr.msk.bf16.gmra.mrb[8].mxu0 %vm77_vm0, %v16869_v4 }
  0xc7   :  { %11000 = vmatprep.mubr.msk.bf16.mxu0 %vm77_vm0, %v16870_v55 }
  0xce   :  { %11001 = vmatmul.mubr.msk.bf16.gmra.mrb[12].mxu0 %vm77_vm0, %v1522_v41 }
  0xcf   :  { %11008 = vmatprep.mubr.msk.bf16.mxu0 %vm77_vm0, %v13395_v40 }
  0xd6   :  { %11009 = vmatmul.mubr.msk.bf16.vlgmr.msra.gmra.mrb[0].mxu0 %vm77_vm0, %v13397_v6 }
  0xd7   :  { %11012 = vmatprep.mubr.msk.bf16.mxu0 %vm77_vm0, %v13418_v15 }
  0xde   :  { %11013 = vmatmul.mubr.msk.bf16.gmra.mrb[4].mxu0 %vm77_vm0, %v1669_v7 }
  0xdf   :  { %11016 = vmatprep.mubr.msk.bf16.mxu0 %vm77_vm0, %v706_v38 }
  0xe6   :  { %11017 = vmatmul.mubr.msk.bf16.gmra.mrb[8].mxu0 %vm77_vm0, %v707_v20 }
  0xe7   :  { %11020 = vmatprep.mubr.msk.bf16.mxu0 %vm77_vm0, %v708_v39 }
  0xee   :  { %11021 = vmatmul.mubr.msk.bf16.gmra.mrb[12].mxu0 %vm77_vm0, %v16871_v45 }
 0x159   :  { %v10890_v35 = vpop.f32.mrb[0].mxu1 }
 0x15a   :  { %v784_v7 = vpop.f32.mrb[1].mxu1 }
 0x15b   :  { %v10891_v40 = vpop.f32.mrb[2].mxu1 }
 0x15c   :  { %v787_v6 = vpop.f32.mrb[3].mxu1 }
 0x179   :  { %v10914_v11 = vpop.f32.mrb[4].mxu1 }
 0x17a   :  { %v974_v10 = vpop.f32.mrb[5].mxu1 }
 0x17b   :  { %v10915_v23 = vpop.f32.mrb[6].mxu1 }
 0x17c   :  { %v977_v29 = vpop.f32.mrb[7].mxu1 }
 0x181   :  { %v10918_v30 = vpop.f32.mrb[8].mxu1 }
 0x182   :  { %v990_v15 = vpop.f32.mrb[9].mxu1 }
 0x183   :  { %v13515_v50 = vpop.f32.mrb[10].mxu1 }
 0x184   :  { %v13517_v5 = vpop.f32.mrb[11].mxu1 }
 0x189   :  { %v13519_v38 = vpop.f32.mrb[12].mxu1 }
 0x18a   :  { %v13521_v12 = vpop.f32.mrb[13].mxu1 }
 0x18b   :  { %v13523_v20 = vpop.f32.mrb[14].mxu1 }
 0x18c   :  { %v13525_v27 = vpop.f32.mrb[15].mxu1 }
 0x1a9   :  { %v11010_v24 = vpop.f32.mrb[0].mxu0 }
 0x1aa   :  { %v11792_v8 = vadd.f32 %v11010_v24, %v10890_v35  ;;  %v1728_v47 = vpop.f32.mrb[1].mxu0 }
 0x1ab   :  { %v11793_v25 = vadd.f32 %v1728_v47, %v784_v7  ;;  %v11011_v31 = vpop.f32.mrb[2].mxu0  ;;  %v13583_v7 = vld [vmem:[#allocation2 + $0x8] sm:$0xff] }
 0x1ac   :  { %v1816_v39 = vmul.f32 %v11792_v8, %v13530_v14  ;;  %v11794_v32 = vadd.f32 %v11011_v31, %v10891_v40  ;;  %v1731_v53 = vpop.f32.mrb[3].mxu0  ;;  %16879 = vst [vmem:[#allocation13_spill] sm:$0xff] %v13583_v7 }
 0x1ad   :  { %v1814_v19 = vmul.f32 %v11793_v25, %v13530_v14  ;;  %v11795_v28 = vadd.f32 %v1731_v53, %v787_v6 }
 0x1ae   :  { %v13540_v46 = vadd.f32 %v13535_v2, %v1816_v39  ;;  %v1817_v0 = vmul.f32 %v11794_v32, %v13530_v14 }
 0x1af   :  { %v13544_v13 = vadd.f32 %v13535_v2, %v1814_v19  ;;  %v1815_v34 = vmul.f32 %v11795_v28, %v13530_v14 }
 0x1b0   :  { %16872 = vst [vmem:[#allocation24_spill] sm:$0xff] %v13540_v46  ;;  %v16647_v42 = vmax.f32 %v13540_v46, 0.0  ;;  %v13549_v16 = vadd.f32 %v13535_v2, %v1817_v0 }
 0x1b1   :  { %16873 = vst [vmem:[#allocation12_spill] sm:$0xff] %v13544_v13  ;;  %v16646_v17 = vmax.f32 %v13544_v13, 0.0  ;;  %v13553_v54 = vadd.f32 %v13535_v2, %v1815_v34  ;;  %v11014_v18 = vpop.f32.mrb[4].mxu0 }
 0x1b2   :  { %16874 = vst [vmem:[#allocation25_spill] sm:$0xff] %v13549_v16  ;;  %1871 = vst.msk [vmem:[#allocation2 + $0x50] sm:$0xff] %vm77_vm0, %v16647_v42  ;;  %v16645_v57 = vmax.f32 %v13549_v16, 0.0  ;;  %v11796_v33 = vadd.f32 %v11014_v18, %v10914_v11  ;;  %v1744_v56 = vpop.f32.mrb[5].mxu0 }
 0x1b3   :  { %16875 = vst [vmem:[#allocation23_spill] sm:$0xff] %v13553_v54  ;;  %1869 = vst.msk [vmem:[#allocation2 + $0x20] sm:$0xff] %vm77_vm0, %v16646_v17  ;;  %v16644_v58 = vmax.f32 %v13553_v54, 0.0  ;;  %v11797_v48 = vadd.f32 %v1744_v56, %v974_v10  ;;  %v11015_v63 = vpop.f32.mrb[6].mxu0 }
 0x1b4   :  { %1872 = vst.msk [vmem:[#allocation2 + $0x68] sm:$0xff] %vm77_vm0, %v16645_v57  ;;  %v1820_v62 = vmul.f32 %v11796_v33, %v13530_v14  ;;  %v11798_v59 = vadd.f32 %v11015_v63, %v10915_v23  ;;  %v1747_v9 = vpop.f32.mrb[7].mxu0 }
 0x1b5   :  { %1870 = vst.msk [vmem:[#allocation2 + $0x38] sm:$0xff] %vm77_vm0, %v16644_v58  ;;  %v1818_v49 = vmul.f32 %v11797_v48, %v13530_v14  ;;  %v11799_v4 = vadd.f32 %v1747_v9, %v977_v29  ;;  %v13639_v9 = vld [vmem:[#allocation6 + $0xb0] sm:$0xff]   ;;  %v1926_v58 = vld [vmem:[#allocation2 + $0x148] sm:$0x1] }
 0x1b6   :  { %v13572_v55 = vadd.f32 %v13535_v2, %v1820_v62  ;;  %v1821_v41 = vmul.f32 %v11798_v59, %v13530_v14 }
 0x1b7   :  { %v13576_v45 = vadd.f32 %v13535_v2, %v1818_v49  ;;  %v1819_v3 = vmul.f32 %v11799_v4, %v13530_v14 }
 0x1b8   :  { %16876 = vst [vmem:[#allocation27_spill] sm:$0xff] %v13572_v55  ;;  %v16643_v60 = vmax.f32 %v13572_v55, 0.0  ;;  %v13581_v35 = vadd.f32 %v13535_v2, %v1821_v41 }
 0x1b9   :  { %16877 = vst [vmem:[#allocation26_spill] sm:$0xff] %v13576_v45  ;;  %v16642_v40 = vmax.f32 %v13576_v45, 0.0  ;;  %v13587_v6 = vadd.f32 %v13535_v2, %v1819_v3  ;;  %v11018_v11 = vpop.f32.mrb[8].mxu0  ;;  %v13608_v19 = vld [vmem:[#allocation2 + $0x50] sm:$0xff] }
 0x1ba   :  { %16878 = vst [vmem:[#allocation29_spill] sm:$0xff] %v13581_v35  ;;  %1875 = vst.msk [vmem:[#allocation2 + $0xb0] sm:$0xff] %vm77_vm0, %v16643_v60  ;;  %v16640_v10 = vmax.f32 %v13581_v35, 0.0  ;;  %v11800_v23 = vadd.f32 %v11018_v11, %v10918_v30  ;;  %v1760_v29 = vpop.f32.mrb[9].mxu0  ;;  %v13593_v24 = vld [vmem:[#allocation2 + $0x20] sm:$0xff] }
 0x1bb   :  { %16880 = vst [vmem:[#allocation14_spill] sm:$0xff] %v13587_v6  ;;  %1873 = vst.msk [vmem:[#allocation2 + $0x80] sm:$0xff] %vm77_vm0, %v16642_v40  ;;  %v16639_v8 = vmax.f32 %v13587_v6, 0.0  ;;  %v11801_v47 = vadd.f32 %v1760_v29, %v990_v15  ;;  %v11019_v25 = vpop.f32.mrb[10].mxu0  ;;  %v2054_v31 = vpack.c.bf16 %v13593_v24, %v13583_v7  ;;  %v13646_v3 = vld [vmem:[#allocation2 + $0x68] sm:$0xff] }
 0x1bc   :  { %1876 = vst.msk [vmem:[#allocation2 + $0xc8] sm:$0xff] %vm77_vm0, %v16640_v10  ;;  %v1824_v30 = vmul.f32 %v11800_v23, %v13530_v14  ;;  %v11802_v39 = vadd.f32 %v11019_v25, %v13515_v50  ;;  %v1763_v32 = vpop.f32.mrb[11].mxu0  ;;  %v13606_v53 = vld [vmem:[#allocation2 + $0x38] sm:$0xff]  ;;  %v1890_v10 = vld [vmem:[#allocation2 + $0x28] sm:$0x1] }
 0x1bd   :  { %1874 = vst.msk [vmem:[#allocation2 + $0x98] sm:$0xff] %vm77_vm0, %v16639_v8  ;;  %v1822_v15 = vmul.f32 %v11801_v47, %v13530_v14  ;;  %v11803_v28 = vadd.f32 %v1763_v32, %v13517_v5  ;;  %11028 = vmatprep.mubr.msk.bf16.mxu1 %vm77_vm0, %v2054_v31  ;;  %v13618_v0 = vpack.c.bf16 %v13608_v19, %v13606_v53  ;;  %v12462_v50 = vld [vmem:[#allocation6 + $0x98] sm:$0xff]   ;;  %v1896_v25 = vld [vmem:[#allocation2 + $0x58] sm:$0x1]  ;;  %v1923_v60 = vld [vmem:[#allocation2 + $0x130] sm:$0x1] }
 0x1be   :  { %v13621_v34 = vadd.f32 %v13535_v2, %v1824_v30  ;;  %v1825_v18 = vmul.f32 %v11802_v39, %v13530_v14  ;;  %v13744_v8 = vld [vmem:[#allocation2 + $0x60] sm:$0xff]  ;;  %v1984_v6 = vrot.slane %v13606_v53, 7 }
 0x1bf   :  { %v13625_v33 = vadd.f32 %v13535_v2, %v1822_v15  ;;  %v1823_v56 = vmul.f32 %v11803_v28, %v13530_v14  ;;  %11029 = vmatmul.mubr.msk.bf16.vlgmr.msra.gmra.mrb[16].mxu1 %vm77_vm0, %v13618_v0  ;;  %16894 = vst [vmem:[#allocation39_spill] sm:$0xff] %v13744_v8  ;;  %v1905_v40 = vld [vmem:[#allocation2 + $0xa0] sm:$0x1] }
 0x1c0   :  { %16881 = vst [vmem:[#allocation15_spill] sm:$0xff] %v13621_v34  ;;  %v16638_v5 = vmax.f32 %v13621_v34, 0.0  ;;  %v13632_v48 = vadd.f32 %v13535_v2, %v1825_v18  ;;  %11045 = vmatpush3.bf16.msra.mxu1 %v13512_v36 }
 0x1c1   :  { %16882 = vst [vmem:[#allocation19_spill] sm:$0xff] %v13625_v33  ;;  %v16636_v63 = vmax.f32 %v13625_v33, 0.0  ;;  %v13637_v62 = vadd.f32 %v13535_v2, %v1823_v56  ;;  %v11022_v59 = vpop.f32.mrb[12].mxu0  ;;  %11046 = vmatprep.subr.bf16.mxu1 %v12462_v50  ;;  %v13666_v32 = vld [vmem:[#allocation2 + $0xb0] sm:$0xff]  ;;  %v2359_v56 = vrot.slane %v1896_v25, 1 }
 0x1c2   :  { %16883 = vst [vmem:[#allocation20_spill] sm:$0xff] %v13632_v48  ;;  %1879 = vst.msk [vmem:[#allocation2 + $0x140] sm:$0xff] %vm77_vm0, %v16638_v5  ;;  %v16634_v49 = vmax.f32 %v13632_v48, 0.0  ;;  %v11804_v4 = vadd.f32 %v11022_v59, %v13519_v38  ;;  %v1776_v41 = vpop.f32.mrb[13].mxu0  ;;  %v13648_v36 = vld [vmem:[#allocation2 + $0x80] sm:$0xff] }
 0x1c3   :  { %16884 = vst [vmem:[#allocation22_spill] sm:$0xff] %v13637_v62  ;;  %1877 = vst.msk [vmem:[#allocation2 + $0x110] sm:$0xff] %vm77_vm0, %v16636_v63  ;;  %v16633_v11 = vmax.f32 %v13637_v62, 0.0  ;;  %v11805_v23 = vadd.f32 %v1776_v41, %v13521_v12  ;;  %v11023_v29 = vpop.f32.mrb[14].mxu0  ;;  %v13657_v47 = vpack.c.bf16 %v13648_v36, %v13646_v3  ;;  %v1899_v12 = vld [vmem:[#allocation2 + $0x70] sm:$0x1] }
 0x1c4   :  { %1880 = vst.msk [vmem:[#allocation2 + $0x158] sm:$0xff] %vm77_vm0, %v16634_v49  ;;  %v1828_v38 = vmul.f32 %v11804_v4, %v13530_v14  ;;  %v11806_v31 = vadd.f32 %v11023_v29, %v13523_v20  ;;  %v1779_v30 = vpop.f32.mrb[15].mxu0  ;;  %v13664_v39 = vld [vmem:[#allocation2 + $0x98] sm:$0xff]  ;;  %11047 = vmatpush3.bf16.msra.mxu1 %v12462_v50  ;;  %v2358_v4 = vrot.slane %v13608_v19, 1  ;;  %v2362_v41 = vrot.slane %v1899_v12, 1  ;;  %v1885_v12 = vld [vmem:[#allocation2] sm:$0xff] }
 0x1c5   :  { %1878 = vst.msk [vmem:[#allocation2 + $0x128] sm:$0xff] %vm77_vm0, %v16633_v11  ;;  %v1826_v15 = vmul.f32 %v11805_v23, %v13530_v14  ;;  %v11807_v28 = vadd.f32 %v1779_v30, %v13525_v27  ;;  %11032 = vmatprep.mubr.msk.bf16.mxu1 %vm77_vm0, %v13657_v47  ;;  %v13677_v20 = vpack.c.bf16 %v13666_v32, %v13664_v39  ;;  %v1978_v49 = vrot.slane %v13583_v7, 7 }
 0x1c6   :  { %11064 = vmatprep.subr.bf16.mxu1 %v13639_v9  ;;  %v13681_v50 = vadd.f32 %v13535_v2, %v1828_v38  ;;  %v1829_v18 = vmul.f32 %v11806_v31, %v13530_v14  ;;  %v2361_v31 = vrot.slane %v13646_v3, 1  ;;  %v2368_v62 = vrot.slane %v1905_v40, 1 }
 0x1c7   :  { %16885 = vst [vmem:[#allocation30_spill] sm:$0xff] %v13677_v20  ;;  %v13685_v59 = vadd.f32 %v13535_v2, %v1826_v15  ;;  %v1827_v27 = vmul.f32 %v11807_v28, %v13530_v14  ;;  %11033 = vmatmul.mubr.msk.bf16.gmra.mrb[20].mxu1 %vm77_vm0, %v13677_v20  ;;  %v13706_v15 = vld [vmem:[#allocation2 + $0x18] sm:$0xff]  ;;  %v2392_v40 = vrot.slane %v1935_v26, 1  ;;  %v1993_v35 = vrot.slane %v13648_v36, 7 }
 0x1c8   :  { %16886 = vst [vmem:[#allocation31_spill] sm:$0xff] %v13681_v50  ;;  %v16632_v23 = vmax.f32 %v13681_v50, 0.0  ;;  %v13693_v29 = vadd.f32 %v13535_v2, %v1829_v18  ;;  %16890 = vst [vmem:[#allocation35_spill] sm:$0xff] %v13706_v15  ;;  %v12551_v28 = vld [vmem:[#allocation2 + $0xf8] sm:$0xff]  ;;  %v13719_v11 = vsel %vm636_vm3, %v2361_v31, %v2362_v41  ;;  %v16654_v41 = vrot.slane %v13706_v15, 7 }
 0x1c9   :  { %16887 = vst [vmem:[#allocation32_spill] sm:$0xff] %v13685_v59  ;;  %v16635_v38 = vmax.f32 %v13685_v59, 0.0  ;;  %v13697_v25 = vadd.f32 %v13535_v2, %v1827_v27  ;;  %v13713_v27 = vld [vmem:[#allocation2 + $0x48] sm:$0xff]  ;;  %v13727_v63 = vld [vmem:[#allocation2 + $0x140] sm:$0xff]  ;;  %v1981_v31 = vrot.slane %v13593_v24, 7  ;;  %v2352_v26 = vrot.slane %v13593_v24, 1 }
 0x1ca   :  { %16888 = vst [vmem:[#allocation33_spill] sm:$0xff] %v13693_v29  ;;  %1883 = vst.msk [vmem:[#allocation2 + $0x1a0] sm:$0xff] %vm77_vm0, %v16632_v23  ;;  %v16637_v14 = vmax.f32 %v13693_v29, 0.0  ;;  %v13704_v30 = vld [vmem:[#allocation2 + $0x110] sm:$0xff]  ;;  %v13716_v23 = vsel %vm636_vm3, %v2358_v4, %v2359_v56  ;;  %v1977_v4 = vrot.slane %v1885_v12, 7  ;;  %v2353_v29 = vrot.slane %v1890_v10, 1 }
 0x1cb   :  { %16889 = vst [vmem:[#allocation34_spill] sm:$0xff] %v13697_v25  ;;  %1881 = vst.msk [vmem:[#allocation2 + $0x170] sm:$0xff] %vm77_vm0, %v16635_v38  ;;  %v16641_v2 = vmax.f32 %v13697_v25, 0.0  ;;  %v2058_v18 = vpack.c.bf16 %v13704_v30, %v12551_v28  ;;  %v1929_v12 = vld [vmem:[#allocation2 + $0x160] sm:$0x1]  ;;  %v13754_v17 = vsel %vm264_vm2, %v16654_v41, %v1981_v31  ;;  %v13758_v5 = vld [vmem:[#allocation2 + $0x158] sm:$0xff] }
 0x1cc   :  { %16891 = vst [vmem:[#allocation36_spill] sm:$0xff] %v13713_v27  ;;  %1884 = vst.msk [vmem:[#allocation2 + $0x1b8] sm:$0xff] %vm77_vm0, %v16637_v14  ;;  %v13725_v38 = vld [vmem:[#allocation2 + $0x128] sm:$0xff]  ;;  %v13741_v14 = vld [vmem:[#allocation2 + $0x30] sm:$0xff]  ;;  %v13749_v57 = vsel %vm264_vm2, %v1977_v4, %v1978_v49  ;;  %v2380_v31 = vrot.slane %v1923_v60, 1  ;;  %v2383_v41 = vrot.slane %v1926_v58, 1 }
 0x1cd   :  { %1882 = vst.msk [vmem:[#allocation2 + $0x188] sm:$0xff] %vm77_vm0, %v16641_v2  ;;  %11036 = vmatprep.mubr.msk.bf16.mxu1 %vm77_vm0, %v2058_v18  ;;  %v13737_v56 = vpack.c.bf16 %v13727_v63, %v13725_v38  ;;  %16893 = vst [vmem:[#allocation38_spill] sm:$0xff] %v13741_v14  ;;  %v1893_v18 = vld [vmem:[#allocation2 + $0x40] sm:$0x1]  ;;  %v1902_v2 = vld [vmem:[#allocation2 + $0x88] sm:$0x1]  ;;  %v2041_v33 = vpack.c.bf16 %v13754_v17, %v13749_v57 }
 0x1ce   :  { %16895 = vst [vmem:[#allocation40_spill] sm:$0xff] %v13749_v57  ;;  %v2356_v59 = vrot.slane %v1893_v18, 1  ;;  %v2365_v50 = vrot.slane %v1902_v2, 1  ;;  %v1920_v4 = vld [vmem:[#allocation2 + $0x118] sm:$0x1]  ;;  %v2386_v48 = vrot.slane %v1929_v12, 1 }
 0x1cf   :  { %16892 = vst [vmem:[#allocation37_spill] sm:$0xff] %v13737_v56  ;;  %11037 = vmatmul.mubr.msk.bf16.gmra.mrb[24].mxu1 %vm77_vm0, %v13737_v56  ;;  %v1987_v10 = vrot.slane %v13608_v19, 7  ;;  %v2355_v2 = vrot.slane %v13606_v53, 1  ;;  %v2367_v58 = vrot.slane %v13664_v39, 1  ;;  %v2379_v18 = vrot.slane %v13725_v38, 1 }
 0x1d0   :  { %v1932_v12 = vld [vmem:[#allocation2 + $0x178] sm:$0x1]  ;;  %v2385_v34 = vrot.slane %v13758_v5, 1  ;;  %v2364_v55 = vrot.slane %v13648_v36, 1  ;;  %v2376_v54 = vrot.slane %v13704_v30, 1  ;;  %v2377_v16 = vrot.slane %v1920_v4, 1 }
 0x1d1   :  { %v13768_v28 = vld [vmem:[#allocation2 + $0x1a0] sm:$0xff]  ;;  %v2382_v13 = vrot.slane %v13727_v63, 1  ;;  %v16898_v46 = vrot.slane %v13713_v27, 7  ;;  %v13799_v15 = vsel %vm636_vm3, %v2355_v2, %v2356_v59  ;;  %v1990_v56 = vrot.slane %v13646_v3, 7  ;;  %v16900_v59 = vld [vmem:[#allocation16_spill] sm:$0xff] }
 0x1d2   :  { %v13760_v25 = vld [vmem:[#allocation2 + $0x170] sm:$0xff]  ;;  %v13804_v20 = vsel %vm636_vm3, %v2367_v58, %v2368_v62  ;;  %v13807_v4 = vsel %vm636_vm3, %v2379_v18, %v2380_v31  ;;  %v16901_v2 = vrot.slane %v16900_v59, 7  ;;  %v13823_v27 = vsel %vm636_vm3, %v2352_v26, %v2353_v29  ;;  %v12465_v58 = vld [vmem:[#allocation6 + $0xc0] sm:$0xff]  }
 0x1d3   :  { %v13764_v49 = vpack.c.bf16 %v13760_v25, %v13758_v5  ;;  %v13796_v57 = vsel %vm264_vm2, %v16898_v46, %v1987_v10  ;;  %v16899_v46 = vrot.slane %v13741_v14, 7  ;;  %v13829_v31 = vsel %vm636_vm3, %v2364_v55, %v2365_v50  ;;  %v12464_v50 = vld [vmem:[#allocation6 + $0xb8] sm:$0xff]  }
 0x1d4   :  { %v13766_v42 = vld [vmem:[#allocation2 + $0x188] sm:$0xff]  ;;  %v16903_v18 = vld [vmem:[#allocation17_spill] sm:$0xff] }
 0x1d5   :  { %16896 = vst [vmem:[#allocation41_spill] sm:$0xff] %v13764_v49  ;;  %11040 = vmatprep.mubr.msk.bf16.mxu1 %vm77_vm0, %v13764_v49  ;;  %v13778_v60 = vpack.c.bf16 %v13768_v28, %v13766_v42  ;;  %v2391_v45 = vrot.slane %v13766_v42, 1  ;;  %v2388_v49 = vrot.slane %v13760_v25, 1  ;;  %v13815_v10 = vsel %vm264_vm2, %v16899_v46, %v1984_v6  ;;  %v16905_v59 = vld [vmem:[#allocation21_spill] sm:$0xff] }
 0x1d6   :  { %v13835_v6 = vsel %vm636_vm3, %v2382_v13, %v2383_v41  ;;  %v16902_v13 = vrot.slane %v13744_v8, 7  ;;  %v16904_v26 = vrot.slane %v16903_v18, 7  ;;  %v16907_v41 = vld [vmem:[#allocation18_spill] sm:$0xff]  ;;  %v16909_v18 = vld [vmem:[#allocation28_spill] sm:$0xff] }
 0x1d7   :  { %16897 = vst [vmem:[#allocation42_spill] sm:$0xff] %v13778_v60  ;;  %11041 = vmatmul.mubr.msk.bf16.gmra.mrb[28].mxu1 %vm77_vm0, %v13778_v60  ;;  %v2389_v60 = vrot.slane %v1932_v12, 1  ;;  %v13820_v12 = vsel %vm264_vm2, %v16901_v2, %v1993_v35  ;;  %v13826_v62 = vsel %vm636_vm3, %v2391_v45, %v2392_v40  ;;  %v1996_v40 = vrot.slane %v13664_v39, 7 }
 0x1d8   :  { %11048 = vmatprep.mubr.msk.bf16.mxu1 %vm77_vm0, %v2041_v33  ;;  %v13810_v33 = vsel %vm636_vm3, %v2385_v34, %v2386_v48  ;;  %v13832_v34 = vsel %vm636_vm3, %v2376_v54, %v2377_v16  ;;  %v13850_v16 = vpack.c.bf16 %v13796_v57, %v13815_v10  ;;  %v13855_v54 = vsel %vm264_vm2, %v16902_v13, %v1990_v56 }
 0x1d9   :  { %v13840_v35 = vsel %vm636_vm3, %v2388_v49, %v2389_v60  ;;  %v13861_v49 = vpack.c.bf16 %v13820_v12, %v13855_v54  ;;  %v2005_v60 = vrot.slane %v13704_v30, 7  ;;  %v1999_v56 = vrot.slane %v13666_v32, 7 }
 0x1da   :  { %v13874_v46 = vsel %vm264_vm2, %v16904_v26, %v1996_v40  ;;  %v16906_v2 = vrot.slane %v16905_v59, 7  ;;  %v16908_v55 = vrot.slane %v16907_v41, 7  ;;  %v2008_v26 = vrot.slane %v13725_v38, 7 }
 0x1db   :  { %v16910_v41 = vrot.slane %v13042_v61, 7  ;;  %v16911_v59 = vrot.slane %v13070_v37, 7  ;;  %v16913_v61 = vrot.slane %v13064_v22, 7  ;;  %v2023_v22 = vrot.slane %v13768_v28, 7 }
 0x1dc   :  { %v13879_v13 = vsel %vm264_vm2, %v16906_v2, %v2005_v60  ;;  %v2017_v60 = vrot.slane %v13760_v25, 7 }
 0x1dd   :  { %v2045_v40 = vpack.c.bf16 %v13879_v13, %v16909_v18  ;;  %v16912_v18 = vrot.slane %v13050_v44, 7  ;;  %v16674_v44 = vrot.slane %v13583_v7, 1 }
 0x1de   :  { %v13907_v2 = vsel %vm264_vm2, %v16911_v59, %v2017_v60  ;;  %v2020_v60 = vrot.slane %v13766_v42, 7 }
 0x1df   :  { %11049 = vmatmul.mubr.msk.bf16.vlgmr.msra.gmra.mrb[16].mxu1 %vm77_vm0, %v13850_v16 }
 0x1e0   :  { %11065 = vmatpush3.bf16.msra.mxu1 %v13639_v9  ;;  %11052 = vmatprep.mubr.msk.bf16.mxu1 %vm77_vm0, %v13861_v49  ;;  %v13884_v9 = vsel %vm264_vm2, %v16908_v55, %v1999_v56  ;;  %v2011_v55 = vrot.slane %v13727_v63, 7  ;;  %v13902_v56 = vsel %vm264_vm2, %v16910_v41, %v2008_v26 }
 0x1e1   :  { %11066 = vmatprep.subr.bf16.mxu1 %v12464_v50  ;;  %v13888_v45 = vpack.c.bf16 %v13884_v9, %v13874_v46 }
 0x1e2   :  { %v13912_v29 = vsel %vm264_vm2, %v16912_v18, %v2011_v55  ;;  %v16915_v18 = vrot.slane %v13091_v43, 7  ;;  %v1908_v43 = vld [vmem:[#allocation2 + $0xb8] sm:$0x1] }
 0x1e3   :  { %v13916_v48 = vpack.c.bf16 %v13912_v29, %v13902_v56 }
 0x1e4   :  { %11067 = vmatpush3.bf16.msra.mxu1 %v12464_v50  ;;  %v2014_v50 = vrot.slane %v13758_v5, 7 }
 0x1e5   :  { %11084 = vmatprep.subr.bf16.mxu1 %v12465_v58 }
 0x1e6   :  { %v13921_v26 = vsel %vm264_vm2, %v16913_v61, %v2014_v50  ;;  %v16914_v50 = vrot.slane %v13089_v52, 7  ;;  %v13945_v61 = vsel %vm264_vm2, %v16915_v18, %v2023_v22  ;;  %v1917_v52 = vld [vmem:[#allocation2 + $0x100] sm:$0x1]  ;;  %v13961_v22 = vpack.c.bf16 %v13829_v31, %v13719_v11  ;;  %v12467_v18 = vld [vmem:[#allocation6 + $0xd0] sm:$0xff]  }
 0x1e7   :  { %11053 = vmatmul.mubr.msk.bf16.gmra.mrb[20].mxu1 %vm77_vm0, %v13888_v45  ;;  %v13925_v37 = vpack.c.bf16 %v13907_v2, %v13921_v26 }
 0x1e8   :  { %11056 = vmatprep.mubr.msk.bf16.mxu1 %vm77_vm0, %v2045_v40  ;;  %v1887_v40 = vld [vmem:[#allocation2 + $0x10] sm:$0x1]  ;;  %v13937_v41 = vsel %vm264_vm2, %v16914_v50, %v2020_v60  ;;  %v13957_v60 = vpack.c.bf16 %v13716_v23, %v13799_v15  ;;  %v2374_v50 = vrot.slane %v1917_v52, 1 }
 0x1e9   :  { %v2350_v55 = vrot.slane %v1887_v40, 1  ;;  %v13949_v40 = vpack.c.bf16 %v13945_v61, %v13937_v41 }
 0x1eb   :  { %v2351_v59 = vsel %vm636_vm3, %v16674_v44, %v2350_v55  ;;  %v12466_v55 = vld [vmem:[#allocation6 + $0xc8] sm:$0xff]   ;;  %v16916_v44 = vrot.slane %v12944_v51, 1  ;;  %v13984_v51 = vpack.c.bf16 %v13835_v6, %v13807_v4 }
 0x1ec   :  { %v2413_v8 = vpack.c.bf16 %v13823_v27, %v2351_v59  ;;  %v2371_v59 = vrot.slane %v1908_v43, 1  ;;  %v13988_v43 = vpack.c.bf16 %v13840_v35, %v13810_v33 }
 0x1ed   :  { %v2375_v14 = vsel %vm636_vm3, %v16916_v44, %v2374_v50  ;;  %v1938_v44 = vld [vmem:[#allocation2 + $0x1a8] sm:$0x1] }
 0x1ee   :  { %16917 = vst [vmem:[#allocation16_spill] sm:$0xff] %v13988_v43 }
 0x1ef   :  { %11057 = vmatmul.mubr.msk.bf16.gmra.mrb[24].mxu1 %vm77_vm0, %v13916_v48 }
 0x1f0   :  { %11060 = vmatprep.mubr.msk.bf16.mxu1 %vm77_vm0, %v13925_v37 }
 0x1f7   :  { %11061 = vmatmul.mubr.msk.bf16.gmra.mrb[28].mxu1 %vm77_vm0, %v13949_v40 }
 0x1f8   :  { %11068 = vmatprep.mubr.msk.bf16.mxu1 %vm77_vm0, %v2413_v8  ;;  %v2370_v8 = vrot.slane %v13666_v32, 1 }
 0x1fa   :  { %v13972_v7 = vsel %vm636_vm3, %v2370_v8, %v2371_v59  ;;  %v2587_v59 = vpack.c.bf16 %v13815_v10, %v13754_v17  ;;  %v12469_v17 = vld [vmem:[#allocation6 + $0xe0] sm:$0xff]   ;;  %v16918_v10 = vrot.slane %v13154_v1, 7  ;;  %v2592_v1 = vpack.c.bf16 %v13921_v26, %v13912_v29  ;;  %v12470_v26 = vld [vmem:[#allocation6 + $0xe8] sm:$0xff]  }
 0x1fb   :  { %v13976_v52 = vpack.c.bf16 %v13972_v7, %v13804_v20  ;;  %v2749_v29 = vpack.c.bf16 %v13606_v53, %v13593_v24  ;;  %v2753_v53 = vpack.c.bf16 %v13725_v38, %v13704_v30  ;;  %v16922_v30 = vpack.c.bf16 %v13804_v20, %v13829_v31  ;;  %v1941_v20 = vld [vmem:[#allocation2 + $0x1c0] sm:$0x1] }
 0x1fc   :  { %v2917_v31 = vrot.slane %v1941_v20, 1 }
 0x1ff   :  { %11069 = vmatmul.mubr.msk.bf16.vlgmr.msra.gmra.mrb[16].mxu1 %vm77_vm0, %v13957_v60 }
 0x200   :  { %11085 = vmatpush3.bf16.msra.mxu1 %v12465_v58  ;;  %11072 = vmatprep.mubr.msk.bf16.mxu1 %vm77_vm0, %v13961_v22  ;;  %v2417_v58 = vpack.c.bf16 %v13832_v34, %v2375_v14  ;;  %v2394_v14 = vrot.slane %v13768_v28, 1 }
 0x201   :  { %11086 = vmatprep.subr.bf16.mxu1 %v12466_v55 }
 0x204   :  { %11087 = vmatpush3.bf16.msra.mxu1 %v12466_v55  ;;  %v2395_v55 = vrot.slane %v1938_v44, 1  ;;  %v2588_v44 = vpack.c.bf16 %v13855_v54, %v13796_v57  ;;  %v14027_v54 = vld [vmem:[#allocation2 + $0x1b8] sm:$0xff] }
 0x205   :  { %11104 = vmatprep.subr.bf16.mxu1 %v12467_v18 }
 0x206   :  { %v13996_v50 = vsel %vm636_vm3, %v2394_v14, %v2395_v55  ;;  %v2589_v14 = vpack.c.bf16 %v13874_v46, %v13820_v12  ;;  %v2591_v12 = vpack.c.bf16 %v13902_v56, %v13879_v13  ;;  %v2593_v46 = vpack.c.bf16 %v13937_v41, %v13907_v2  ;;  %v12471_v41 = vld [vmem:[#allocation6 + $0xf0] sm:$0xff]  }
 0x207   :  { %11073 = vmatmul.mubr.msk.bf16.gmra.mrb[20].mxu1 %vm77_vm0, %v13976_v52  ;;  %v14000_v8 = vpack.c.bf16 %v13996_v50, %v13826_v62  ;;  %v16919_v13 = vrot.slane %v13445_v21, 7  ;;  %v2750_v2 = vpack.c.bf16 %v13646_v3, %v13608_v19  ;;  %v2751_v21 = vpack.c.bf16 %v13664_v39, %v13648_v36  ;;  %v12477_v39 = vld [vmem:[#allocation6 + $0x130] sm:$0xff]  }
 0x208   :  { %11076 = vmatprep.mubr.msk.bf16.mxu1 %vm77_vm0, %v2417_v58  ;;  %v14007_v58 = vld [vmem:[#allocation2 + $0xc8] sm:$0xff]  ;;  %v2754_v19 = vpack.c.bf16 %v13758_v5, %v13727_v63  ;;  %v2755_v3 = vpack.c.bf16 %v13766_v42, %v13760_v25  ;;  %v2756_v36 = vpack.c.bf16 %v14027_v54, %v13768_v28  ;;  %11204 = vmatprep.subr.bf16.mxu0 %v12477_v39  ;;  %v1911_v5 = vld [vmem:[#allocation2 + $0xd0] sm:$0x1]  ;;  %v12472_v63 = vld [vmem:[#allocation6 + $0xf8] sm:$0xff]  }
 0x209   :  { %v2580_v55 = vrot.slane %v14007_v58, 7  ;;  %v2752_v24 = vpack.c.bf16 %v14007_v58, %v13666_v32  ;;  %v16920_v32 = vpack.c.bf16 %v13799_v15, %v13823_v27  ;;  %11205 = vmatpush3.bf16.msra.mxu0 %v12477_v39  ;;  %v2913_v42 = vrot.slane %v14007_v58, 1  ;;  %v12473_v15 = vld [vmem:[#allocation6 + $0x100] sm:$0xff]  }
 0x20a   :  { %v2914_v38 = vrot.slane %v1911_v5, 1  ;;  %v16921_v25 = vpack.c.bf16 %v13719_v11, %v13716_v23  ;;  %v16923_v11 = vpack.c.bf16 %v13807_v4, %v13832_v34  ;;  %v2916_v23 = vrot.slane %v14027_v54, 1  ;;  %v1912_v34 = vld [vmem:[#allocation2 + $0xd8] sm:$0xff] }
 0x20c   :  { %v14082_v27 = vsel %vm636_vm3, %v2913_v42, %v2914_v38 }
 0x20d   :  { %v2924_v28 = vpack.c.bf16 %v14082_v27, %v13972_v7  ;;  %v16925_v7 = vpack.c.bf16 %v13826_v62, %v13840_v35  ;;  %v12475_v62 = vld [vmem:[#allocation6 + $0x110] sm:$0xff]  }
 0x20f   :  { %11077 = vmatmul.mubr.msk.bf16.gmra.mrb[24].mxu1 %vm77_vm0, %v13984_v51 }
 0x210   :  { %11080 = vmatprep.mubr.msk.bf16.mxu1 %vm77_vm0, %v13988_v43  ;;  %v12468_v43 = vld [vmem:[#allocation6 + $0xd8] sm:$0xff]  }
 0x217   :  { %11081 = vmatmul.mubr.msk.bf16.gmra.mrb[28].mxu1 %vm77_vm0, %v14000_v8 }
 0x218   :  { %11088 = vmatprep.mubr.msk.bf16.mxu1 %vm77_vm0, %v2587_v59  ;;  %v14019_v59 = vsel %vm264_vm2, %v16918_v10, %v2580_v55 }
 0x219   :  { %v2590_v57 = vpack.c.bf16 %v14019_v59, %v13884_v9 }
 0x21f   :  { %11089 = vmatmul.mubr.msk.bf16.vlgmr.msra.gmra.mrb[16].mxu1 %vm77_vm0, %v2588_v44  ;;  %v14105_v44 = vld [vmem:[#allocation2 + $0xe0] sm:$0xff] }
 0x220   :  { %11105 = vmatpush3.bf16.msra.mxu1 %v12467_v18  ;;  %11092 = vmatprep.mubr.msk.bf16.mxu1 %vm77_vm0, %v2589_v14  ;;  %v2583_v18 = vrot.slane %v14027_v54, 7  ;;  %16926 = vst [vmem:[#allocation17_spill] sm:$0xff] %v14105_v44  ;;  %v3088_v14 = vrot.slane %v14105_v44, 7 }
 0x221   :  { %11106 = vmatprep.subr.bf16.mxu1 %v12468_v43 }
 0x222   :  { %v14039_v9 = vsel %vm264_vm2, %v16919_v13, %v2583_v18 }
 0x223   :  { %v2594_v56 = vpack.c.bf16 %v14039_v9, %v13945_v61  ;;  %v16924_v61 = vpack.c.bf16 %v13810_v33, %v13835_v6  ;;  %v12474_v33 = vld [vmem:[#allocation6 + $0x108] sm:$0xff]   ;;  %v3087_v6 = vrot.slane %v1912_v34, 7 }
 0x224   :  { %11107 = vmatpush3.bf16.msra.mxu1 %v12468_v43  ;;  %v2918_v43 = vsel %vm636_vm3, %v2916_v23, %v2917_v31 }
 0x225   :  { %11124 = vmatprep.subr.bf16.mxu1 %v12469_v17  ;;  %v2928_v4 = vpack.c.bf16 %v2918_v43, %v13996_v50  ;;  %v14113_v35 = vsel %vm264_vm2, %v3087_v6, %v3088_v14  ;;  %v14120_v50 = vld [vmem:[#allocation2 + $0x1d0] sm:$0xff] }
 0x226   :  { %16927 = vst [vmem:[#allocation21_spill] sm:$0xff] %v14120_v50  ;;  %v16679_v18 = vrot.slane %v14120_v50, 1 }
 0x227   :  { %11093 = vmatmul.mubr.msk.bf16.gmra.mrb[20].mxu1 %vm77_vm0, %v2590_v57  ;;  %v16930_v57 = vld [vmem:[#allocation41_spill] sm:$0xff] }
 0x228   :  { %11096 = vmatprep.mubr.msk.bf16.mxu1 %vm77_vm0, %v2591_v12  ;;  %v16680_v12 = vrot.slane %v14105_v44, 1 }
 0x22f   :  { %11097 = vmatmul.mubr.msk.bf16.gmra.mrb[24].mxu1 %vm77_vm0, %v2592_v1 }
 0x230   :  { %11100 = vmatprep.mubr.msk.bf16.mxu1 %vm77_vm0, %v2593_v46 }
 0x237   :  { %11101 = vmatmul.mubr.msk.bf16.gmra.mrb[28].mxu1 %vm77_vm0, %v2594_v56  ;;  %v12478_v56 = vld [vmem:[#allocation6 + $0x138] sm:$0xff]  }
 0x238   :  { %11108 = vmatprep.mubr.msk.bf16.mxu1 %vm77_vm0, %v2749_v29  ;;  %11206 = vmatprep.subr.bf16.mxu0 %v12478_v56  ;;  %v14180_v29 = vld [vmem:[%s16592_s2 + $0x1] ss:$0 sm:$0xff] }
 0x239   :  { %11207 = vmatpush3.bf16.msra.mxu0 %v12478_v56 }
 0x23f   :  { %11109 = vmatmul.mubr.msk.bf16.vlgmr.msra.gmra.mrb[16].mxu1 %vm77_vm0, %v2750_v2  ;;  %v14185_v2 = vld [vmem:[%s16593_s3 + $0x1] ss:$0 sm:$0xff] }
 0x240   :  { %11125 = vmatpush3.bf16.msra.mxu1 %v12469_v17  ;;  %11112 = vmatprep.mubr.msk.bf16.mxu1 %vm77_vm0, %v2751_v21 }
 0x241   :  { %11126 = vmatprep.subr.bf16.mxu1 %v12470_v26 }
 0x244   :  { %11127 = vmatpush3.bf16.msra.mxu1 %v12470_v26 }
 0x245   :  { %11144 = vmatprep.subr.bf16.mxu1 %v12471_v41 }
 0x247   :  { %11113 = vmatmul.mubr.msk.bf16.gmra.mrb[20].mxu1 %vm77_vm0, %v2752_v24 }
 0x248   :  { %11116 = vmatprep.mubr.msk.bf16.mxu1 %vm77_vm0, %v2753_v53 }
 0x24f   :  { %11117 = vmatmul.mubr.msk.bf16.gmra.mrb[24].mxu1 %vm77_vm0, %v2754_v19 }
 0x250   :  { %11120 = vmatprep.mubr.msk.bf16.mxu1 %vm77_vm0, %v2755_v3 }
 0x257   :  { %11121 = vmatmul.mubr.msk.bf16.gmra.mrb[28].mxu1 %vm77_vm0, %v2756_v36 }
 0x258   :  { %11128 = vmatprep.mubr.msk.bf16.mxu1 %vm77_vm0, %v16920_v32 }
 0x25f   :  { %11129 = vmatmul.mubr.msk.bf16.vlgmr.msra.gmra.mrb[16].mxu1 %vm77_vm0, %v16921_v25 }
 0x260   :  { %11145 = vmatpush3.bf16.msra.mxu1 %v12471_v41  ;;  %11132 = vmatprep.mubr.msk.bf16.mxu1 %vm77_vm0, %v16922_v30 }
 0x261   :  { %11146 = vmatprep.subr.bf16.mxu1 %v12472_v63 }
 0x264   :  { %11147 = vmatpush3.bf16.msra.mxu1 %v12472_v63 }
 0x265   :  { %11164 = vmatprep.subr.bf16.mxu1 %v12473_v15 }
 0x267   :  { %11133 = vmatmul.mubr.msk.bf16.gmra.mrb[20].mxu1 %vm77_vm0, %v2924_v28 }
 0x268   :  { %11136 = vmatprep.mubr.msk.bf16.mxu1 %vm77_vm0, %v16923_v11 }
 0x26f   :  { %11137 = vmatmul.mubr.msk.bf16.gmra.mrb[24].mxu1 %vm77_vm0, %v16924_v61 }
 0x270   :  { %11140 = vmatprep.mubr.msk.bf16.mxu1 %vm77_vm0, %v16925_v7 }
 0x277   :  { %11141 = vmatmul.mubr.msk.bf16.gmra.mrb[28].mxu1 %vm77_vm0, %v2928_v4 }
 0x278   :  { %11148 = vmatprep.mubr.msk.bf16.mxu1 %vm77_vm0, %v13850_v16  ;;  %v3095_v16 = vpack.c.bf16 %v14113_v35, %v14019_v59  ;;  %v16929_v59 = vld [vmem:[#allocation37_spill] sm:$0xff] }
 0x27f   :  { %11149 = vmatmul.mubr.msk.bf16.vlgmr.msra.gmra.mrb[16].mxu1 %vm77_vm0, %v13861_v49  ;;  %v1942_v49 = vld [vmem:[#allocation2 + $0x1c8] sm:$0xff] }
 0x280   :  { %11165 = vmatpush3.bf16.msra.mxu1 %v12473_v15  ;;  %11152 = vmatprep.mubr.msk.bf16.mxu1 %vm77_vm0, %v13888_v45  ;;  %v3090_v55 = vrot.slane %v1942_v49, 7  ;;  %v3091_v45 = vrot.slane %v14120_v50, 7  ;;  %v16933_v49 = vld [vmem:[#allocation13_spill] sm:$0xff] }
 0x281   :  { %11166 = vmatprep.subr.bf16.mxu1 %v12474_v33 }
 0x282   :  { %v14128_v17 = vsel %vm264_vm2, %v3090_v55, %v3091_v45 }
 0x283   :  { %v3096_v10 = vpack.c.bf16 %v14128_v17, %v14039_v9  ;;  %v16932_v9 = vld [vmem:[#allocation16_spill] sm:$0xff] }
 0x284   :  { %11167 = vmatpush3.bf16.msra.mxu1 %v12474_v33 }
 0x285   :  { %11184 = vmatprep.subr.bf16.mxu1 %v12475_v62 }
 0x287   :  { %11153 = vmatmul.mubr.msk.bf16.gmra.mrb[20].mxu1 %vm77_vm0, %v3095_v16 }
 0x288   :  { %11156 = vmatprep.mubr.msk.bf16.mxu1 %vm77_vm0, %v13916_v48  ;;  %v12476_v48 = vld [vmem:[#allocation6 + $0x118] sm:$0xff]  }
 0x28f   :  { %11157 = vmatmul.mubr.msk.bf16.gmra.mrb[24].mxu1 %vm77_vm0, %v13925_v37  ;;  %v16928_v37 = vld [vmem:[#allocation30_spill] sm:$0xff] }
 0x290   :  { %11160 = vmatprep.mubr.msk.bf16.mxu1 %vm77_vm0, %v13949_v40  ;;  %v3233_v40 = vpack.c.bf16 %v14105_v44, %v14007_v58  ;;  %v1914_v58 = vld [vmem:[#allocation2 + $0xe8] sm:$0x1] }
 0x291   :  { %v3374_v1 = vrot.slane %v1914_v58, 1 }
 0x293   :  { %v3375_v46 = vsel %vm636_vm3, %v16680_v12, %v3374_v1 }
 0x297   :  { %11161 = vmatmul.mubr.msk.bf16.gmra.mrb[28].mxu1 %vm77_vm0, %v3096_v10 }
 0x298   :  { %11168 = vmatprep.mubr.msk.bf16.mxu1 %vm77_vm0, %v13618_v0  ;;  %v16931_v0 = vld [vmem:[#allocation42_spill] sm:$0xff] }
 0x29f   :  { %11169 = vmatmul.mubr.msk.bf16.vlgmr.msra.gmra.mrb[16].mxu1 %vm77_vm0, %v13657_v47  ;;  %v3234_v47 = vpack.c.bf16 %v14120_v50, %v14027_v54  ;;  %v3381_v54 = vpack.c.bf16 %v3375_v46, %v14082_v27 }
 0x2a0   :  { %11185 = vmatpush3.bf16.msra.mxu1 %v12475_v62  ;;  %11172 = vmatprep.mubr.msk.bf16.mxu1 %vm77_vm0, %v16928_v37 }
 0x2a1   :  { %11186 = vmatprep.subr.bf16.mxu1 %v12476_v48 }
 0x2a4   :  { %11187 = vmatpush3.bf16.msra.mxu1 %v12476_v48 }
 0x2a7   :  { %11173 = vmatmul.mubr.msk.bf16.gmra.mrb[20].mxu1 %vm77_vm0, %v3233_v40 }
 0x2a8   :  { %11176 = vmatprep.mubr.msk.bf16.mxu1 %vm77_vm0, %v16929_v59 }
 0x2af   :  { %11177 = vmatmul.mubr.msk.bf16.gmra.mrb[24].mxu1 %vm77_vm0, %v16930_v57 }
 0x2b0   :  { %11180 = vmatprep.mubr.msk.bf16.mxu1 %vm77_vm0, %v16931_v0  ;;  %v12480_v0 = vld [vmem:[#allocation6 + $0x128] sm:$0xff]  }
 0x2b7   :  { %11181 = vmatmul.mubr.msk.bf16.gmra.mrb[28].mxu1 %vm77_vm0, %v3234_v47  ;;  %v3613_v47 = vld [vmem:[#allocation2 + $0x70] sm:$0x1] }
 0x2b8   :  { %11188 = vmatprep.mubr.msk.bf16.mxu1 %vm77_vm0, %v13957_v60  ;;  %v1944_v60 = vld [vmem:[#allocation2 + $0x1d8] sm:$0x1]  ;;  %v4076_v56 = vrot.slane %v3613_v47, 1  ;;  %v3619_v47 = vld [vmem:[#allocation2 + $0xa0] sm:$0x1] }
 0x2b9   :  { %v3377_v13 = vrot.slane %v1944_v60, 1 }
 0x2bf   :  { %11189 = vmatmul.mubr.msk.bf16.vlgmr.msra.gmra.mrb[16].mxu1 %vm77_vm0, %v13961_v22  ;;  %v3378_v22 = vsel %vm636_vm3, %v16679_v18, %v3377_v13 }
 0x2c0   :  { %11192 = vmatprep.mubr.msk.bf16.mxu1 %vm77_vm0, %v13976_v52  ;;  %v3382_v52 = vpack.c.bf16 %v3378_v22, %v2918_v43 }
 0x2c7   :  { %11193 = vmatmul.mubr.msk.bf16.gmra.mrb[20].mxu1 %vm77_vm0, %v3381_v54 }
 0x2c8   :  { %11196 = vmatprep.mubr.msk.bf16.mxu1 %vm77_vm0, %v13984_v51  ;;  %v14174_v51 = vld [vmem:[#allocation6 + $0x120] sm:$0xff]  }
 0x2c9   :  { %11224 = vmatprep.subr.bf16.mxu0 %v14174_v51 }
 0x2cf   :  { %11197 = vmatmul.mubr.msk.bf16.gmra.mrb[24].mxu1 %vm77_vm0, %v16932_v9  ;;  %v3610_v9 = vld [vmem:[#allocation2 + $0x58] sm:$0x1] }
 0x2d0   :  { %11200 = vmatprep.mubr.msk.bf16.mxu1 %vm77_vm0, %v14000_v8 }
 0x2d7   :  { %11201 = vmatmul.mubr.msk.bf16.gmra.mrb[28].mxu1 %vm77_vm0, %v3382_v52 }
 0x392   :  { %v11190_v8 = vpop.f32.mrb[16].mxu1 }
 0x393   :  { %v3529_v26 = vmul.f32 %v11190_v8, %v14180_v29  ;;  %v3440_v21 = vpop.f32.mrb[17].mxu1 }
 0x394   :  { %v3527_v41 = vmul.f32 %v14180_v29, %v3440_v21  ;;  %v11191_v24 = vpop.f32.mrb[18].mxu1  ;;  %v14237_v21 = vld [vmem:[#allocation6 + $0x140] sm:$0xff]  }
 0x395   :  { %v3553_v53 = vadd.f32 %v14185_v2, %v3529_v26  ;;  %v3530_v19 = vmul.f32 %v11191_v24, %v14180_v29  ;;  %v3443_v3 = vpop.f32.mrb[19].mxu1 }
 0x396   :  { %v3551_v36 = vadd.f32 %v14185_v2, %v3527_v41  ;;  %v3528_v39 = vmul.f32 %v14180_v29, %v3443_v3 }
 0x397   :  { %v3569_v32 = vmax.f32 %v3553_v53, 0.0  ;;  %v3554_v5 = vadd.f32 %v14185_v2, %v3530_v19  ;;  %v4073_v19 = vrot.slane %v3610_v9, 1  ;;  %v3646_v9 = vld [vmem:[#allocation2 + $0x178] sm:$0x1] }
 0x398   :  { %v3567_v63 = vmax.f32 %v3551_v36, 0.0  ;;  %v3552_v42 = vadd.f32 %v14185_v2, %v3528_v39 }
 0x399   :  { %3585 = vst.msk [vmem:[#allocation2 + $0x50] sm:$0xff] %vm77_vm0, %v3569_v32  ;;  %v3570_v38 = vmax.f32 %v3554_v5, 0.0 }
 0x39a   :  { %3583 = vst.msk [vmem:[#allocation2 + $0x20] sm:$0xff] %vm77_vm0, %v3567_v63  ;;  %v3568_v25 = vmax.f32 %v3552_v42, 0.0  ;;  %v11194_v30 = vpop.f32.mrb[20].mxu1 }
 0x39b   :  { %3586 = vst.msk [vmem:[#allocation2 + $0x68] sm:$0xff] %vm77_vm0, %v3570_v38  ;;  %v3533_v15 = vmul.f32 %v11194_v30, %v14180_v29  ;;  %v3456_v27 = vpop.f32.mrb[21].mxu1 }
 0x39c   :  { %3584 = vst.msk [vmem:[#allocation2 + $0x38] sm:$0xff] %vm77_vm0, %v3568_v25  ;;  %v3531_v28 = vmul.f32 %v14180_v29, %v3456_v27  ;;  %v11195_v11 = vpop.f32.mrb[22].mxu1 }
 0x39d   :  { %v3557_v20 = vadd.f32 %v14185_v2, %v3533_v15  ;;  %v3534_v23 = vmul.f32 %v11195_v11, %v14180_v29  ;;  %v3459_v31 = vpop.f32.mrb[23].mxu1 }
 0x39e   :  { %v3555_v61 = vadd.f32 %v14185_v2, %v3531_v28  ;;  %v3532_v7 = vmul.f32 %v14180_v29, %v3459_v31 }
 0x39f   :  { %v3573_v43 = vmax.f32 %v3557_v20, 0.0  ;;  %v3558_v4 = vadd.f32 %v14185_v2, %v3534_v23 }
 0x3a0   :  { %v3571_v34 = vmax.f32 %v3555_v61, 0.0  ;;  %v3556_v33 = vadd.f32 %v14185_v2, %v3532_v7  ;;  %v14217_v37 = vld [vmem:[#allocation2 + $0x50] sm:$0xff] }
 0x3a1   :  { %3589 = vst.msk [vmem:[#allocation2 + $0xb0] sm:$0xff] %vm77_vm0, %v3573_v43  ;;  %v3574_v6 = vmax.f32 %v3558_v4, 0.0  ;;  %v14208_v14 = vld [vmem:[#allocation2 + $0x20] sm:$0xff]  ;;  %v4072_v53 = vrot.slane %v14217_v37, 1  ;;  %v14279_v4 = vld [vmem:[#allocation2 + $0xf8] sm:$0xff] }
 0x3a2   :  { %3587 = vst.msk [vmem:[#allocation2 + $0x80] sm:$0xff] %vm77_vm0, %v3571_v34  ;;  %v3572_v62 = vmax.f32 %v3556_v33, 0.0  ;;  %v11198_v16 = vpop.f32.mrb[24].mxu1  ;;  %v3768_v55 = vpack.c.bf16 %v14208_v14, %v16933_v49  ;;  %v14232_v13 = vld [vmem:[#allocation2 + $0x68] sm:$0xff]  ;;  %16935 = vst [vmem:[#allocation28_spill] sm:$0xff] %v14279_v4 }
 0x3a3   :  { %3590 = vst.msk [vmem:[#allocation2 + $0xc8] sm:$0xff] %vm77_vm0, %v3574_v6  ;;  %v3537_v45 = vmul.f32 %v11198_v16, %v14180_v29  ;;  %v3472_v10 = vpop.f32.mrb[25].mxu1  ;;  %v14215_v48 = vld [vmem:[#allocation2 + $0x38] sm:$0xff]  ;;  %v4075_v3 = vrot.slane %v14232_v13, 1  ;;  %v14270_v20 = vsel %vm636_vm3, %v4072_v53, %v4073_v19  ;;  %v3704_v12 = vrot.slane %v14232_v13, 7 }
 0x3a4   :  { %3588 = vst.msk [vmem:[#allocation2 + $0x98] sm:$0xff] %vm77_vm0, %v3572_v62  ;;  %v3535_v40 = vmul.f32 %v14180_v29, %v3472_v10  ;;  %v11199_v59 = vpop.f32.mrb[26].mxu1  ;;  %11208 = vmatprep.mubr.msk.bf16.mxu0 %vm77_vm0, %v3768_v55  ;;  %v14224_v57 = vpack.c.bf16 %v14217_v37, %v14215_v48  ;;  %v14288_v55 = vld [vmem:[#allocation2 + $0x28] sm:$0x1] }
 0x3a5   :  { %v3561_v58 = vadd.f32 %v14185_v2, %v3537_v45  ;;  %v3538_v1 = vmul.f32 %v11199_v59, %v14180_v29  ;;  %v3475_v46 = vpop.f32.mrb[27].mxu1  ;;  %v14256_v38 = vsel %vm636_vm3, %v4075_v3, %v4076_v56  ;;  %v14301_v59 = vld [vmem:[#allocation2 + $0x78] sm:$0xff]  ;;  %v3649_v3 = vld [vmem:[#allocation2 + $0x190] sm:$0x1] }
 0x3a6   :  { %v3559_v54 = vadd.f32 %v14185_v2, %v3535_v40  ;;  %v3536_v60 = vmul.f32 %v14180_v29, %v3475_v46  ;;  %11209 = vmatmul.mubr.msk.bf16.vlgmr.msra.gmra.mrb[16].mxu0 %vm77_vm0, %v14224_v57  ;;  %16937 = vst [vmem:[#allocation37_spill] sm:$0xff] %v14301_v59  ;;  %v3640_v46 = vld [vmem:[#allocation2 + $0x148] sm:$0x1] }
 0x3a7   :  { %v3577_v22 = vmax.f32 %v3561_v58, 0.0  ;;  %v3562_v52 = vadd.f32 %v14185_v2, %v3538_v1  ;;  %11225 = vmatpush3.bf16.msra.mxu0 %v14174_v51  ;;  %v3695_v58 = vrot.slane %v14208_v14, 7  ;;  %v3634_v1 = vld [vmem:[#allocation2 + $0x118] sm:$0x1]  ;;  %v4097_v19 = vrot.slane %v3640_v46, 1 }
 0x3a8   :  { %v3575_v8 = vmax.f32 %v3559_v54, 0.0  ;;  %v3560_v26 = vadd.f32 %v14185_v2, %v3536_v60  ;;  %11226 = vmatprep.subr.bf16.mxu0 %v12480_v0  ;;  %v14253_v42 = vld [vmem:[#allocation2 + $0xb0] sm:$0xff]  ;;  %v3643_v60 = vld [vmem:[#allocation2 + $0x160] sm:$0x1]  ;;  %v4091_v53 = vrot.slane %v3634_v1, 1  ;;  %v3701_v1 = vrot.slane %v14217_v37, 7 }
 0x3a9   :  { %3593 = vst.msk [vmem:[#allocation2 + $0x140] sm:$0xff] %vm77_vm0, %v3577_v22  ;;  %v3578_v41 = vmax.f32 %v3562_v52, 0.0  ;;  %v14240_v24 = vld [vmem:[#allocation2 + $0x80] sm:$0xff]  ;;  %v3637_v54 = vld [vmem:[#allocation2 + $0x130] sm:$0x1]  ;;  %v16681_v22 = vrot.slane %v14301_v59, 7 }
 0x3aa   :  { %3591 = vst.msk [vmem:[#allocation2 + $0x110] sm:$0xff] %vm77_vm0, %v3575_v8  ;;  %v3576_v51 = vmax.f32 %v3560_v26, 0.0  ;;  %v11202_v36 = vpop.f32.mrb[28].mxu1  ;;  %v14247_v39 = vpack.c.bf16 %v14240_v24, %v14232_v13  ;;  %v4067_v52 = vrot.slane %v14288_v55, 1  ;;  %v4078_v55 = vrot.slane %v14240_v24, 1 }
 0x3ab   :  { %3594 = vst.msk [vmem:[#allocation2 + $0x158] sm:$0xff] %vm77_vm0, %v3578_v41  ;;  %v3541_v32 = vmul.f32 %v11202_v36, %v14180_v29  ;;  %v3488_v5 = vpop.f32.mrb[29].mxu1  ;;  %v14251_v63 = vld [vmem:[#allocation2 + $0x98] sm:$0xff]  ;;  %11227 = vmatpush3.bf16.msra.mxu0 %v12480_v0  ;;  %v3616_v0 = vld [vmem:[#allocation2 + $0x88] sm:$0x1]  ;;  %v4082_v41 = vrot.slane %v3619_v47, 1 }
 0x3ac   :  { %3592 = vst.msk [vmem:[#allocation2 + $0x128] sm:$0xff] %vm77_vm0, %v3576_v51  ;;  %v3539_v25 = vmul.f32 %v14180_v29, %v3488_v5  ;;  %v11203_v30 = vpop.f32.mrb[30].mxu1  ;;  %11212 = vmatprep.mubr.msk.bf16.mxu0 %vm77_vm0, %v14247_v39  ;;  %v14264_v15 = vpack.c.bf16 %v14253_v42, %v14251_v63  ;;  %11244 = vmatprep.subr.bf16.mxu0 %v14237_v21  ;;  %v4079_v8 = vrot.slane %v3616_v0, 1  ;;  %v16938_v36 = vld [vmem:[#allocation35_spill] sm:$0xff]  ;;  %v16942_v47 = vld [vmem:[#allocation40_spill] sm:$0xff] }
 0x3ad   :  { %v3565_v27 = vadd.f32 %v14185_v2, %v3541_v32  ;;  %v3542_v28 = vmul.f32 %v11203_v30, %v14180_v29  ;;  %v3491_v11 = vpop.f32.mrb[31].mxu1  ;;  %v16939_v32 = vrot.slane %v16938_v36, 7  ;;  %v4100_v30 = vrot.slane %v3643_v60, 1 }
 0x3ae   :  { %16934 = vst [vmem:[#allocation18_spill] sm:$0xff] %v14264_v15  ;;  %v3563_v23 = vadd.f32 %v14185_v2, %v3539_v25  ;;  %v3540_v31 = vmul.f32 %v14180_v29, %v3491_v11  ;;  %11213 = vmatmul.mubr.msk.bf16.gmra.mrb[20].mxu0 %vm77_vm0, %v14264_v15  ;;  %v4094_v25 = vrot.slane %v3637_v54, 1  ;;  %v4069_v11 = vrot.slane %v14215_v48, 1 }
 0x3af   :  { %v3581_v7 = vmax.f32 %v3565_v27, 0.0  ;;  %v3566_v43 = vadd.f32 %v14185_v2, %v3542_v28  ;;  %v14315_v5 = vsel %vm264_vm2, %v16939_v32, %v3695_v58  ;;  %v4103_v27 = vrot.slane %v3646_v9, 1  ;;  %v16943_v32 = vld [vmem:[#allocation38_spill] sm:$0xff] }
 0x3b0   :  { %v3579_v34 = vmax.f32 %v3563_v23, 0.0  ;;  %v3564_v33 = vadd.f32 %v14185_v2, %v3540_v31  ;;  %v14293_v10 = vld [vmem:[#allocation2 + $0x140] sm:$0xff]  ;;  %v4081_v23 = vrot.slane %v14251_v63, 1  ;;  %v3755_v58 = vpack.c.bf16 %v14315_v5, %v16942_v47 }
 0x3b1   :  { %3597 = vst.msk [vmem:[#allocation2 + $0x1a0] sm:$0xff] %vm77_vm0, %v3581_v7  ;;  %v3582_v6 = vmax.f32 %v3566_v43, 0.0  ;;  %v14283_v62 = vld [vmem:[#allocation2 + $0x110] sm:$0xff]  ;;  %v3607_v2 = vld [vmem:[#allocation2 + $0x40] sm:$0x1]  ;;  %v4096_v0 = vrot.slane %v14293_v10, 1 }
 0x3b2   :  { %3595 = vst.msk [vmem:[#allocation2 + $0x170] sm:$0xff] %vm77_vm0, %v3579_v34  ;;  %v3580_v29 = vmax.f32 %v3564_v33, 0.0  ;;  %v3772_v16 = vpack.c.bf16 %v14283_v62, %v14279_v4  ;;  %v4070_v56 = vrot.slane %v3607_v2, 1  ;;  %v14308_v26 = vld [vmem:[#allocation2 + $0x158] sm:$0xff]  ;;  %v3698_v34 = vrot.slane %v14215_v48, 7 }
 0x3b3   :  { %3598 = vst.msk [vmem:[#allocation2 + $0x1b8] sm:$0xff] %vm77_vm0, %v3582_v6  ;;  %v14291_v45 = vld [vmem:[#allocation2 + $0x128] sm:$0xff]  ;;  %v4066_v33 = vrot.slane %v14208_v14, 1  ;;  %v4099_v6 = vrot.slane %v14308_v26, 1  ;;  %v4090_v2 = vrot.slane %v14283_v62, 1  ;;  %v3707_v60 = vrot.slane %v14240_v24, 7 }
 0x3b4   :  { %3596 = vst.msk [vmem:[#allocation2 + $0x188] sm:$0xff] %vm77_vm0, %v3580_v29  ;;  %11216 = vmatprep.mubr.msk.bf16.mxu0 %vm77_vm0, %v3772_v16  ;;  %v14299_v40 = vpack.c.bf16 %v14293_v10, %v14291_v45  ;;  %v4093_v31 = vrot.slane %v14291_v45, 1  ;;  %v4106_v29 = vrot.slane %v3649_v3, 1  ;;  %v14349_v9 = vsel %vm636_vm3, %v4069_v11, %v4070_v56 }
 0x3b5   :  { %v14352_v3 = vsel %vm636_vm3, %v4081_v23, %v4082_v41  ;;  %v16944_v47 = vrot.slane %v16943_v32, 7  ;;  %v14365_v61 = vsel %vm636_vm3, %v4099_v6, %v4100_v30  ;;  %v14371_v41 = vsel %vm636_vm3, %v4066_v33, %v4067_v52  ;;  %v16946_v33 = vld [vmem:[#allocation36_spill] sm:$0xff]  ;;  %v12482_v32 = vld [vmem:[#allocation6 + $0x148] sm:$0xff]  }
 0x3b6   :  { %16936 = vst [vmem:[#allocation30_spill] sm:$0xff] %v14299_v40  ;;  %11217 = vmatmul.mubr.msk.bf16.gmra.mrb[24].mxu0 %vm77_vm0, %v14299_v40  ;;  %v14355_v36 = vsel %vm636_vm3, %v4093_v31, %v4094_v25  ;;  %v14374_v25 = vsel %vm636_vm3, %v4078_v55, %v4079_v8  ;;  %v14377_v11 = vsel %vm636_vm3, %v4090_v2, %v4091_v53  ;;  %v14396_v53 = vld [vmem:[#allocation2 + $0x90] sm:$0xff]  ;;  %v16947_v6 = vrot.slane %v16946_v33, 7  ;;  %v14407_v2 = vld [vmem:[#allocation2 + $0x108] sm:$0xff] }
 0x3b7   :  { %v14361_v18 = vsel %vm264_vm2, %v16944_v47, %v3698_v34  ;;  %v14380_v23 = vsel %vm636_vm3, %v4096_v0, %v4097_v19  ;;  %v14394_v8 = vsel %vm264_vm2, %v16681_v22, %v3707_v60  ;;  %16945 = vst [vmem:[#allocation16_spill] sm:$0xff] %v14396_v53  ;;  %v3629_v55 = vld [vmem:[#allocation2 + $0xf0] sm:$0xff]  ;;  %16948 = vst [vmem:[#allocation13_spill] sm:$0xff] %v14407_v2  ;;  %v14418_v60 = vld [vmem:[#allocation2 + $0xa8] sm:$0xff]  ;;  %v3710_v33 = vrot.slane %v14251_v63, 7 }
 0x3b8   :  { %v14326_v43 = vld [vmem:[#allocation2 + $0x1a0] sm:$0xff]  ;;  %16951 = vst [vmem:[#allocation35_spill] sm:$0xff] %v14418_v60  ;;  %v16685_v22 = vrot.slane %v14418_v60, 7  ;;  %v12483_v19 = vld [vmem:[#allocation6 + $0x150] sm:$0xff]   ;;  %v3725_v60 = vrot.slane %v14293_v10, 7 }
 0x3b9   :  { %v14310_v51 = vld [vmem:[#allocation2 + $0x170] sm:$0xff]  ;;  %v14449_v34 = vld [vmem:[#allocation2 + $0x120] sm:$0xff] }
 0x3ba   :  { %v14319_v28 = vpack.c.bf16 %v14310_v51, %v14308_v26  ;;  %v4102_v46 = vrot.slane %v14310_v51, 1  ;;  %16953 = vst [vmem:[#allocation38_spill] sm:$0xff] %v14449_v34 }
 0x3bb   :  { %v14324_v7 = vld [vmem:[#allocation2 + $0x188] sm:$0xff] }
 0x3bc   :  { %16940 = vst [vmem:[#allocation41_spill] sm:$0xff] %v14319_v28  ;;  %11220 = vmatprep.mubr.msk.bf16.mxu0 %vm77_vm0, %v14319_v28  ;;  %v14335_v16 = vpack.c.bf16 %v14326_v43, %v14324_v7  ;;  %v4105_v54 = vrot.slane %v14324_v7, 1  ;;  %v14383_v31 = vsel %vm636_vm3, %v4102_v46, %v4103_v27  ;;  %v3713_v27 = vrot.slane %v14253_v42, 7 }
 0x3be   :  { %16941 = vst [vmem:[#allocation42_spill] sm:$0xff] %v14335_v16  ;;  %11221 = vmatmul.mubr.msk.bf16.gmra.mrb[28].mxu0 %vm77_vm0, %v14335_v16  ;;  %v14368_v56 = vsel %vm636_vm3, %v4105_v54, %v4106_v29  ;;  %v14405_v29 = vsel %vm264_vm2, %v16947_v6, %v3701_v1  ;;  %v16684_v1 = vrot.slane %v14396_v53, 7  ;;  %v3716_v6 = vrot.slane %v14279_v4, 7  ;;  %v14456_v53 = vld [vmem:[#allocation2 + $0x168] sm:$0xff]  ;;  %v14489_v16 = vld [vmem:[#allocation2 + $0x180] sm:$0xff] }
 0x3bf   :  { %11228 = vmatprep.mubr.msk.bf16.mxu0 %vm77_vm0, %v3755_v58  ;;  %v14411_v0 = vpack.c.bf16 %v14405_v29, %v14361_v18  ;;  %v16949_v58 = vld [vmem:[#allocation39_spill] sm:$0xff]  ;;  %v14454_v30 = vsel %vm264_vm2, %v16685_v22, %v3713_v27  ;;  %16954 = vst [vmem:[#allocation36_spill] sm:$0xff] %v14456_v53  ;;  %v16695_v27 = vrot.slane %v14456_v53, 7  ;;  %16958 = vst [vmem:[#allocation44_spill] sm:$0xff] %v14489_v16  ;;  %v14505_v53 = vld [vmem:[#allocation2 + $0x198] sm:$0xff] }
 0x3c0   :  { %v16950_v46 = vrot.slane %v16949_v58, 7  ;;  %v3715_v58 = vrot.slane %v3629_v55, 7  ;;  %v14439_v52 = vsel %vm264_vm2, %v16684_v1, %v3710_v33  ;;  %v14468_v1 = vld [vmem:[#allocation2 + $0x150] sm:$0xff]  ;;  %16960 = vst [vmem:[#allocation45_spill] sm:$0xff] %v14505_v53 }
 0x3c1   :  { %v14460_v33 = vpack.c.bf16 %v14454_v30, %v14439_v52  ;;  %16956 = vst [vmem:[#allocation43_spill] sm:$0xff] %v14468_v1 }
 0x3c2   :  { %v14416_v54 = vsel %vm264_vm2, %v16950_v46, %v3704_v12  ;;  %v16683_v12 = vrot.slane %v14407_v2, 7  ;;  %v3719_v46 = vrot.slane %v14283_v62, 7  ;;  %v14442_v55 = vsel %vm264_vm2, %v3715_v58, %v3716_v6  ;;  %v14462_v6 = vld [vmem:[#allocation2 + $0x138] sm:$0xff] }
 0x3c3   :  { %v14422_v47 = vpack.c.bf16 %v14394_v8, %v14416_v54  ;;  %16952 = vst [vmem:[#allocation40_spill] sm:$0xff] %v14442_v55  ;;  %16955 = vst [vmem:[#allocation39_spill] sm:$0xff] %v14462_v6  ;;  %v16696_v22 = vrot.slane %v14462_v6, 7  ;;  %v16957_v2 = vrot.slane %v14449_v34, 7  ;;  %v16961_v6 = vrot.slane %v16933_v49, 1 }
 0x3c4   :  { %v14542_v49 = vpack.c.bf16 %v14270_v20, %v14349_v9 }
 0x3c6   :  { %11229 = vmatmul.mubr.msk.bf16.vlgmr.msra.gmra.mrb[16].mxu0 %vm77_vm0, %v14411_v0 }
 0x3c7   :  { %11245 = vmatpush3.bf16.msra.mxu0 %v14237_v21  ;;  %11232 = vmatprep.mubr.msk.bf16.mxu0 %vm77_vm0, %v14422_v47  ;;  %v14447_v21 = vsel %vm264_vm2, %v16683_v12, %v3719_v46  ;;  %v3722_v12 = vrot.slane %v14291_v45, 7  ;;  %v3728_v46 = vrot.slane %v14308_v26, 7 }
 0x3c8   :  { %11246 = vmatprep.subr.bf16.mxu0 %v12482_v32  ;;  %v3759_v58 = vpack.c.bf16 %v14447_v21, %v14442_v55  ;;  %v3601_v55 = vld [vmem:[#allocation2 + $0x10] sm:$0x1] }
 0x3c9   :  { %v14482_v59 = vsel %vm264_vm2, %v16957_v2, %v3722_v12  ;;  %v16959_v2 = vrot.slane %v14468_v1, 7 }
 0x3cb   :  { %11247 = vmatpush3.bf16.msra.mxu0 %v12482_v32  ;;  %v3731_v32 = vrot.slane %v14310_v51, 7  ;;  %v14503_v12 = vsel %vm264_vm2, %v16959_v2, %v3728_v46  ;;  %v16703_v46 = vrot.slane %v14505_v53, 7  ;;  %v3737_v2 = vrot.slane %v14326_v43, 7  ;;  %v12485_v53 = vld [vmem:[#allocation6 + $0x160] sm:$0xff]  }
 0x3cc   :  { %11264 = vmatprep.subr.bf16.mxu0 %v12483_v19 }
 0x3cd   :  { %v14487_v50 = vsel %vm264_vm2, %v16695_v27, %v3731_v32  ;;  %v16704_v27 = vrot.slane %v14489_v16, 7 }
 0x3ce   :  { %11233 = vmatmul.mubr.msk.bf16.gmra.mrb[20].mxu0 %vm77_vm0, %v14460_v33  ;;  %v14509_v32 = vpack.c.bf16 %v14487_v50, %v14503_v12 }
 0x3cf   :  { %11236 = vmatprep.mubr.msk.bf16.mxu0 %vm77_vm0, %v3759_v58  ;;  %v14494_v58 = vsel %vm264_vm2, %v16696_v22, %v3725_v60  ;;  %v3734_v60 = vrot.slane %v14324_v7, 7  ;;  %v4064_v22 = vrot.slane %v3601_v55, 1  ;;  %v14530_v55 = vsel %vm264_vm2, %v16703_v46, %v3737_v2 }
 0x3d0   :  { %v14498_v28 = vpack.c.bf16 %v14494_v58, %v14482_v59  ;;  %v14546_v2 = vpack.c.bf16 %v14374_v25, %v14256_v38  ;;  %v16708_v46 = vrot.slane %v14279_v4, 1  ;;  %v14593_v4 = vld [vmem:[#allocation2 + $0xc0] sm:$0xff] }
 0x3d1   :  { %v14522_v1 = vsel %vm264_vm2, %v16704_v27, %v3734_v60  ;;  %v4065_v34 = vsel %vm636_vm3, %v16961_v6, %v4064_v22  ;;  %v3631_v60 = vld [vmem:[#allocation2 + $0x100] sm:$0x1]  ;;  %v3622_v22 = vld [vmem:[#allocation2 + $0xb8] sm:$0x1] }
 0x3d2   :  { %v14534_v40 = vpack.c.bf16 %v14530_v55, %v14522_v1  ;;  %v4127_v44 = vpack.c.bf16 %v14371_v41, %v4065_v34  ;;  %v12484_v6 = vld [vmem:[#allocation6 + $0x158] sm:$0xff]   ;;  %v4088_v34 = vrot.slane %v3631_v60, 1  ;;  %v4085_v27 = vrot.slane %v3622_v22, 1 }
 0x3d3   :  { %v14570_v22 = vpack.c.bf16 %v14380_v23, %v14355_v36 }
 0x3d4   :  { %v4089_v16 = vsel %vm636_vm3, %v16708_v46, %v4088_v34  ;;  %v3652_v34 = vld [vmem:[#allocation2 + $0x1a8] sm:$0x1]  ;;  %v4301_v46 = vpack.c.bf16 %v14361_v18, %v14315_v5  ;;  %v12487_v5 = vld [vmem:[#allocation6 + $0x170] sm:$0xff]  }
 0x3d5   :  { %16962 = vst [vmem:[#allocation46_spill] sm:$0xff] %v14570_v22 }
 0x3d6   :  { %11237 = vmatmul.mubr.msk.bf16.gmra.mrb[24].mxu0 %vm77_vm0, %v14498_v28 }
 0x3d7   :  { %11240 = vmatprep.mubr.msk.bf16.mxu0 %vm77_vm0, %v14509_v32 }
 0x3de   :  { %11241 = vmatmul.mubr.msk.bf16.gmra.mrb[28].mxu0 %vm77_vm0, %v14534_v40 }
 0x3df   :  { %11248 = vmatprep.mubr.msk.bf16.mxu0 %vm77_vm0, %v4127_v44  ;;  %v4084_v44 = vrot.slane %v14253_v42, 1 }
 0x3e1   :  { %v14558_v15 = vsel %vm636_vm3, %v4084_v44, %v4085_v27  ;;  %v14574_v27 = vpack.c.bf16 %v14383_v31, %v14365_v61 }
 0x3e2   :  { %v14562_v60 = vpack.c.bf16 %v14558_v15, %v14352_v3 }
 0x3e3   :  { %16963 = vst [vmem:[#allocation47_spill] sm:$0xff] %v14574_v27 }
 0x3e6   :  { %11249 = vmatmul.mubr.msk.bf16.vlgmr.msra.gmra.mrb[16].mxu0 %vm77_vm0, %v14542_v49 }
 0x3e7   :  { %11265 = vmatpush3.bf16.msra.mxu0 %v12483_v19  ;;  %11252 = vmatprep.mubr.msk.bf16.mxu0 %vm77_vm0, %v14546_v2  ;;  %v4131_v19 = vpack.c.bf16 %v14377_v11, %v4089_v16  ;;  %v4108_v16 = vrot.slane %v14326_v43, 1 }
 0x3e8   :  { %11266 = vmatprep.subr.bf16.mxu0 %v12484_v6 }
 0x3eb   :  { %11267 = vmatpush3.bf16.msra.mxu0 %v12484_v6  ;;  %v4109_v6 = vrot.slane %v3652_v34, 1  ;;  %v4302_v34 = vpack.c.bf16 %v14416_v54, %v14405_v29  ;;  %v14618_v29 = vld [vmem:[#allocation2 + $0x1b8] sm:$0xff]  ;;  %v4306_v54 = vpack.c.bf16 %v14503_v12, %v14494_v58  ;;  %v4463_v58 = vpack.c.bf16 %v14215_v48, %v14208_v14 }
 0x3ec   :  { %11284 = vmatprep.subr.bf16.mxu0 %v12485_v53  ;;  %v4465_v12 = vpack.c.bf16 %v14251_v63, %v14240_v24  ;;  %v4467_v48 = vpack.c.bf16 %v14291_v45, %v14283_v62  ;;  %v4470_v24 = vpack.c.bf16 %v14618_v29, %v14326_v43  ;;  %v12495_v63 = vld [vmem:[#allocation6 + $0x1c0] sm:$0xff]   ;;  %v3625_v62 = vld [vmem:[#allocation2 + $0xd0] sm:$0x1]  ;;  %v12491_v43 = vld [vmem:[#allocation6 + $0x190] sm:$0xff]  }
 0x3ed   :  { %v14582_v44 = vsel %vm636_vm3, %v4108_v16, %v4109_v6  ;;  %v12486_v16 = vld [vmem:[#allocation6 + $0x168] sm:$0xff]   ;;  %v4303_v6 = vpack.c.bf16 %v14439_v52, %v14394_v8  ;;  %v4305_v8 = vpack.c.bf16 %v14482_v59, %v14447_v21  ;;  %11384 = vmatprep.subr.bf16.mxu1 %v12495_v63 }
 0x3ee   :  { %11253 = vmatmul.mubr.msk.bf16.gmra.mrb[20].mxu0 %vm77_vm0, %v14562_v60  ;;  %11385 = vmatpush3.bf16.msra.mxu1 %v12495_v63  ;;  %v12490_v45 = vld [vmem:[#allocation6 + $0x188] sm:$0xff]  }
 0x3ef   :  { %11256 = vmatprep.mubr.msk.bf16.mxu0 %vm77_vm0, %v4131_v19  ;;  %v14586_v19 = vpack.c.bf16 %v14582_v44, %v14368_v56 }
 0x3f6   :  { %11257 = vmatmul.mubr.msk.bf16.gmra.mrb[24].mxu0 %vm77_vm0, %v14570_v22  ;;  %v16730_v22 = vrot.slane %v14593_v4, 7 }
 0x3f7   :  { %11260 = vmatprep.mubr.msk.bf16.mxu0 %vm77_vm0, %v14574_v27  ;;  %v14595_v27 = vld [vmem:[#allocation2 + $0xc8] sm:$0xff] }
 0x3f8   :  { %v4294_v18 = vrot.slane %v14595_v27, 7  ;;  %v4466_v14 = vpack.c.bf16 %v14595_v27, %v14253_v42  ;;  %v16964_v42 = vpack.c.bf16 %v14349_v9, %v14371_v41 }
 0x3fe   :  { %11261 = vmatmul.mubr.msk.bf16.gmra.mrb[28].mxu0 %vm77_vm0, %v14586_v19 }
 0x3ff   :  { %11268 = vmatprep.mubr.msk.bf16.mxu0 %vm77_vm0, %v4301_v46  ;;  %v14608_v46 = vsel %vm264_vm2, %v16730_v22, %v4294_v18 }
 0x400   :  { %v4304_v52 = vpack.c.bf16 %v14608_v46, %v14454_v30 }
 0x406   :  { %11269 = vmatmul.mubr.msk.bf16.vlgmr.msra.gmra.mrb[16].mxu0 %vm77_vm0, %v4302_v34  ;;  %v4307_v34 = vpack.c.bf16 %v14522_v1, %v14487_v50  ;;  %v4464_v50 = vpack.c.bf16 %v14232_v13, %v14217_v37  ;;  %v12488_v1 = vld [vmem:[#allocation6 + $0x178] sm:$0xff]   ;;  %v4468_v37 = vpack.c.bf16 %v14308_v26, %v14293_v10  ;;  %v4469_v13 = vpack.c.bf16 %v14324_v7, %v14310_v51 }
 0x407   :  { %11285 = vmatpush3.bf16.msra.mxu0 %v12485_v53  ;;  %11272 = vmatprep.mubr.msk.bf16.mxu0 %vm77_vm0, %v4303_v6  ;;  %v14616_v53 = vld [vmem:[#allocation2 + $0x1b0] sm:$0xff]  ;;  %v4627_v10 = vrot.slane %v14595_v27, 1  ;;  %v4628_v26 = vrot.slane %v3625_v62, 1  ;;  %v16965_v51 = vpack.c.bf16 %v14256_v38, %v14270_v20  ;;  %v16966_v7 = vpack.c.bf16 %v14352_v3, %v14374_v25  ;;  %v3655_v20 = vld [vmem:[#allocation2 + $0x1c0] sm:$0x1] }
 0x408   :  { %11286 = vmatprep.subr.bf16.mxu0 %v12486_v16  ;;  %v16729_v30 = vrot.slane %v14616_v53, 7  ;;  %v16967_v38 = vpack.c.bf16 %v14355_v36, %v14377_v11  ;;  %v4630_v3 = vrot.slane %v14618_v29, 1  ;;  %v4631_v25 = vrot.slane %v3655_v20, 1  ;;  %v12492_v11 = vld [vmem:[#allocation6 + $0x198] sm:$0xff]  }
 0x409   :  { %v4629_v9 = vsel %vm636_vm3, %v4627_v10, %v4628_v26  ;;  %v16968_v6 = vpack.c.bf16 %v14365_v61, %v14380_v23  ;;  %v12493_v61 = vld [vmem:[#allocation6 + $0x1a0] sm:$0xff]   ;;  %v16983_v62 = vld [vmem:[#allocation12_spill] sm:$0xff] }
 0x40a   :  { %v4638_v41 = vpack.c.bf16 %v4629_v9, %v14558_v15  ;;  %v16969_v15 = vpack.c.bf16 %v14368_v56, %v14383_v31  ;;  %v4632_v18 = vsel %vm636_vm3, %v4630_v3, %v4631_v25  ;;  %v4809_v56 = vpack.c.bf16 %v14113_v35, %v14608_v46  ;;  %v12494_v35 = vld [vmem:[#allocation6 + $0x1a8] sm:$0xff]  }
 0x40b   :  { %11287 = vmatpush3.bf16.msra.mxu0 %v12486_v16  ;;  %v4297_v16 = vrot.slane %v14618_v29, 7  ;;  %v4642_v36 = vpack.c.bf16 %v4632_v18, %v14582_v44  ;;  %v16977_v46 = vld [vmem:[#allocation46_spill] sm:$0xff] }
 0x40c   :  { %11304 = vmatprep.subr.bf16.mxu0 %v12487_v5 }
 0x40d   :  { %v14631_v59 = vsel %vm264_vm2, %v16729_v30, %v4297_v16  ;;  %v14754_v16 = vld [vmem:[%s16592_s2 + $0x2] ss:$0 sm:$0xff] }
 0x40e   :  { %11273 = vmatmul.mubr.msk.bf16.gmra.mrb[20].mxu0 %vm77_vm0, %v4304_v52  ;;  %v4308_v21 = vpack.c.bf16 %v14631_v59, %v14530_v55  ;;  %v12489_v55 = vld [vmem:[#allocation6 + $0x180] sm:$0xff]   ;;  %v4810_v23 = vpack.c.bf16 %v14128_v17, %v14631_v59  ;;  %v3658_v52 = vld [vmem:[#allocation2 + $0x1d8] sm:$0x1]  ;;  %v14759_v59 = vld [vmem:[%s16593_s3 + $0x2] ss:$0 sm:$0xff] }
 0x40f   :  { %11276 = vmatprep.mubr.msk.bf16.mxu0 %vm77_vm0, %v4305_v8  ;;  %v16972_v17 = vld [vmem:[#allocation30_spill] sm:$0xff]  ;;  %v16978_v8 = vld [vmem:[#allocation47_spill] sm:$0xff] }
 0x416   :  { %11277 = vmatmul.mubr.msk.bf16.gmra.mrb[24].mxu0 %vm77_vm0, %v4306_v54  ;;  %v12496_v54 = vld [vmem:[#allocation6 + $0x1c8] sm:$0xff]  }
 0x417   :  { %11280 = vmatprep.mubr.msk.bf16.mxu0 %vm77_vm0, %v4307_v34  ;;  %11386 = vmatprep.subr.bf16.mxu1 %v12496_v54  ;;  %v14748_v34 = vld [vmem:[#allocation6 + $0x1b0] sm:$0xff]  }
 0x418   :  { %11387 = vmatpush3.bf16.msra.mxu1 %v12496_v54 }
 0x419   :  { %11404 = vmatprep.subr.bf16.mxu1 %v14748_v34 }
 0x41e   :  { %11281 = vmatmul.mubr.msk.bf16.gmra.mrb[28].mxu0 %vm77_vm0, %v4308_v21 }
 0x41f   :  { %11288 = vmatprep.mubr.msk.bf16.mxu0 %vm77_vm0, %v4463_v58 }
 0x426   :  { %11289 = vmatmul.mubr.msk.bf16.vlgmr.msra.gmra.mrb[16].mxu0 %vm77_vm0, %v4464_v50 }
 0x427   :  { %11305 = vmatpush3.bf16.msra.mxu0 %v12487_v5  ;;  %11292 = vmatprep.mubr.msk.bf16.mxu0 %vm77_vm0, %v4465_v12 }
 0x428   :  { %11306 = vmatprep.subr.bf16.mxu0 %v12488_v1 }
 0x42b   :  { %11307 = vmatpush3.bf16.msra.mxu0 %v12488_v1 }
 0x42c   :  { %11324 = vmatprep.subr.bf16.mxu0 %v12489_v55 }
 0x42e   :  { %11293 = vmatmul.mubr.msk.bf16.gmra.mrb[20].mxu0 %vm77_vm0, %v4466_v14 }
 0x42f   :  { %11296 = vmatprep.mubr.msk.bf16.mxu0 %vm77_vm0, %v4467_v48 }
 0x436   :  { %11297 = vmatmul.mubr.msk.bf16.gmra.mrb[24].mxu0 %vm77_vm0, %v4468_v37 }
 0x437   :  { %11300 = vmatprep.mubr.msk.bf16.mxu0 %vm77_vm0, %v4469_v13  ;;  %v16980_v13 = vld [vmem:[#allocation24_spill] sm:$0xff] }
 0x43e   :  { %11301 = vmatmul.mubr.msk.bf16.gmra.mrb[28].mxu0 %vm77_vm0, %v4470_v24  ;;  %v16981_v24 = vmax.f32 %v16980_v13, 0.0 }
 0x43f   :  { %11308 = vmatprep.mubr.msk.bf16.mxu0 %vm77_vm0, %v16964_v42 }
 0x446   :  { %11309 = vmatmul.mubr.msk.bf16.vlgmr.msra.gmra.mrb[16].mxu0 %vm77_vm0, %v16965_v51 }
 0x447   :  { %11325 = vmatpush3.bf16.msra.mxu0 %v12489_v55  ;;  %11312 = vmatprep.mubr.msk.bf16.mxu0 %vm77_vm0, %v16966_v7  ;;  %v16986_v7 = vld [vmem:[#allocation25_spill] sm:$0xff] }
 0x448   :  { %11326 = vmatprep.subr.bf16.mxu0 %v12490_v45 }
 0x44b   :  { %11327 = vmatpush3.bf16.msra.mxu0 %v12490_v45  ;;  %v16984_v45 = vmax.f32 %v16983_v62, 0.0 }
 0x44c   :  { %11344 = vmatprep.subr.bf16.mxu0 %v12491_v43 }
 0x44e   :  { %11313 = vmatmul.mubr.msk.bf16.gmra.mrb[20].mxu0 %vm77_vm0, %v4638_v41 }
 0x44f   :  { %11316 = vmatprep.mubr.msk.bf16.mxu0 %vm77_vm0, %v16967_v38  ;;  %v16989_v38 = vld [vmem:[#allocation23_spill] sm:$0xff] }
 0x450   :  { %v16990_v20 = vmax.f32 %v16989_v38, 0.0 }
 0x456   :  { %11317 = vmatmul.mubr.msk.bf16.gmra.mrb[24].mxu0 %vm77_vm0, %v16968_v6 }
 0x457   :  { %11320 = vmatprep.mubr.msk.bf16.mxu0 %vm77_vm0, %v16969_v15 }
 0x45e   :  { %11321 = vmatmul.mubr.msk.bf16.gmra.mrb[28].mxu0 %vm77_vm0, %v4642_v36 }
 0x45f   :  { %11328 = vmatprep.mubr.msk.bf16.mxu0 %vm77_vm0, %v14411_v0  ;;  %v16973_v0 = vld [vmem:[#allocation41_spill] sm:$0xff] }
 0x466   :  { %11329 = vmatmul.mubr.msk.bf16.vlgmr.msra.gmra.mrb[16].mxu0 %vm77_vm0, %v14422_v47 }
 0x467   :  { %11345 = vmatpush3.bf16.msra.mxu0 %v12491_v43  ;;  %11332 = vmatprep.mubr.msk.bf16.mxu0 %vm77_vm0, %v14460_v33  ;;  %v3628_v33 = vld [vmem:[#allocation2 + $0xe8] sm:$0x1]  ;;  %v16987_v43 = vmax.f32 %v16986_v7, 0.0  ;;  %v17005_v7 = vld [vmem:[#allocation15_spill] sm:$0xff] }
 0x468   :  { %11346 = vmatprep.subr.bf16.mxu0 %v12492_v11 }
 0x46b   :  { %11347 = vmatpush3.bf16.msra.mxu0 %v12492_v11 }
 0x46c   :  { %11364 = vmatprep.subr.bf16.mxu0 %v12493_v61 }
 0x46e   :  { %11333 = vmatmul.mubr.msk.bf16.gmra.mrb[20].mxu0 %vm77_vm0, %v4809_v56 }
 0x46f   :  { %11336 = vmatprep.mubr.msk.bf16.mxu0 %vm77_vm0, %v14498_v28  ;;  %v16970_v28 = vld [vmem:[#allocation18_spill] sm:$0xff] }
 0x476   :  { %11337 = vmatmul.mubr.msk.bf16.gmra.mrb[24].mxu0 %vm77_vm0, %v14509_v32  ;;  %v5088_v32 = vrot.slane %v3628_v33, 1 }
 0x477   :  { %11340 = vmatprep.mubr.msk.bf16.mxu0 %vm77_vm0, %v14534_v40  ;;  %v16971_v40 = vld [vmem:[#allocation17_spill] sm:$0xff] }
 0x478   :  { %v4947_v31 = vpack.c.bf16 %v16971_v40, %v14595_v27  ;;  %v16976_v27 = vrot.slane %v16971_v40, 1 }
 0x47a   :  { %v5089_v44 = vsel %vm636_vm3, %v16976_v27, %v5088_v32 }
 0x47b   :  { %v5095_v5 = vpack.c.bf16 %v5089_v44, %v4629_v9  ;;  %v16998_v44 = vld [vmem:[#allocation29_spill] sm:$0xff] }
 0x47e   :  { %11341 = vmatmul.mubr.msk.bf16.gmra.mrb[28].mxu0 %vm77_vm0, %v4810_v23 }
 0x47f   :  { %11348 = vmatprep.mubr.msk.bf16.mxu0 %vm77_vm0, %v14224_v57  ;;  %v16974_v57 = vld [vmem:[#allocation42_spill] sm:$0xff] }
 0x486   :  { %11349 = vmatmul.mubr.msk.bf16.vlgmr.msra.gmra.mrb[16].mxu0 %vm77_vm0, %v14247_v39  ;;  %v16975_v39 = vld [vmem:[#allocation21_spill] sm:$0xff] }
 0x487   :  { %11365 = vmatpush3.bf16.msra.mxu0 %v12493_v61  ;;  %11352 = vmatprep.mubr.msk.bf16.mxu0 %vm77_vm0, %v16970_v28  ;;  %v4948_v47 = vpack.c.bf16 %v16975_v39, %v14618_v29 }
 0x488   :  { %11366 = vmatprep.subr.bf16.mxu0 %v12494_v35 }
 0x48b   :  { %11367 = vmatpush3.bf16.msra.mxu0 %v12494_v35 }
 0x48e   :  { %11353 = vmatmul.mubr.msk.bf16.gmra.mrb[20].mxu0 %vm77_vm0, %v4947_v31  ;;  %v16992_v31 = vld [vmem:[#allocation27_spill] sm:$0xff] }
 0x48f   :  { %11356 = vmatprep.mubr.msk.bf16.mxu0 %vm77_vm0, %v16972_v17  ;;  %v16993_v17 = vmax.f32 %v16992_v31, 0.0 }
 0x496   :  { %11357 = vmatmul.mubr.msk.bf16.gmra.mrb[24].mxu0 %vm77_vm0, %v16973_v0 }
 0x497   :  { %11360 = vmatprep.mubr.msk.bf16.mxu0 %vm77_vm0, %v16974_v57 }
 0x49e   :  { %11361 = vmatmul.mubr.msk.bf16.gmra.mrb[28].mxu0 %vm77_vm0, %v4948_v47 }
 0x49f   :  { %11368 = vmatprep.mubr.msk.bf16.mxu0 %vm77_vm0, %v14542_v49  ;;  %v5091_v49 = vrot.slane %v3658_v52, 1  ;;  %v14822_v52 = vld [vmem:[#allocation2 + $0x8] sm:$0xff] }
 0x4a0   :  { %17001 = vst [vmem:[#allocation47_spill] sm:$0xff] %v14822_v52 }
 0x4a6   :  { %11369 = vmatmul.mubr.msk.bf16.vlgmr.msra.gmra.mrb[16].mxu0 %vm77_vm0, %v14546_v2  ;;  %v16979_v2 = vrot.slane %v16975_v39, 1  ;;  %v16995_v39 = vld [vmem:[#allocation26_spill] sm:$0xff] }
 0x4a7   :  { %11372 = vmatprep.mubr.msk.bf16.mxu0 %vm77_vm0, %v14562_v60  ;;  %v16996_v47 = vmax.f32 %v16995_v39, 0.0  ;;  %v14885_v39 = vld [vmem:[#allocation6 + $0x1d0] sm:$0xff]  }
 0x4a8   :  { %v5092_v60 = vsel %vm636_vm3, %v16979_v2, %v5091_v49 }
 0x4a9   :  { %v5096_v29 = vpack.c.bf16 %v5092_v60, %v4632_v18 }
 0x4ae   :  { %11373 = vmatmul.mubr.msk.bf16.gmra.mrb[20].mxu0 %vm77_vm0, %v5095_v5  ;;  %v16999_v5 = vmax.f32 %v16998_v44, 0.0 }
 0x4af   :  { %11376 = vmatprep.mubr.msk.bf16.mxu0 %vm77_vm0, %v16977_v46 }
 0x4b6   :  { %11377 = vmatmul.mubr.msk.bf16.gmra.mrb[24].mxu0 %vm77_vm0, %v16978_v8  ;;  %v17002_v8 = vld [vmem:[#allocation14_spill] sm:$0xff] }
 0x4b7   :  { %11380 = vmatprep.mubr.msk.bf16.mxu0 %vm77_vm0, %v14586_v19  ;;  %v17003_v2 = vmax.f32 %v17002_v8, 0.0 }
 0x4be   :  { %11381 = vmatmul.mubr.msk.bf16.gmra.mrb[28].mxu0 %vm77_vm0, %v5096_v29 }
 0x579   :  { %v11370_v19 = vpop.f32.mrb[16].mxu0 }
 0x57a   :  { %v5243_v21 = vmul.f32 %v11370_v19, %v14754_v16  ;;  %v5154_v58 = vpop.f32.mrb[17].mxu0 }
 0x57b   :  { %v5241_v50 = vmul.f32 %v14754_v16, %v5154_v58  ;;  %v11371_v1 = vpop.f32.mrb[18].mxu0 }
 0x57c   :  { %v5267_v12 = vadd.f32 %v14759_v59, %v5243_v21  ;;  %v5244_v55 = vmul.f32 %v11371_v1, %v14754_v16  ;;  %v5157_v14 = vpop.f32.mrb[19].mxu0 }
 0x57d   :  { %v5265_v48 = vadd.f32 %v14759_v59, %v5241_v50  ;;  %v5242_v37 = vmul.f32 %v14754_v16, %v5157_v14 }
 0x57e   :  { %v14769_v63 = vadd.f32 %v5267_v12, %v16981_v24  ;;  %v5268_v42 = vadd.f32 %v14759_v59, %v5244_v55 }
 0x57f   :  { %v14774_v10 = vadd.f32 %v5265_v48, %v16984_v45  ;;  %v5266_v26 = vadd.f32 %v14759_v59, %v5242_v37 }
 0x580   :  { %16982 = vst [vmem:[#allocation18_spill] sm:$0xff] %v14769_v63  ;;  %v16728_v51 = vmax.f32 %v14769_v63, 0.0  ;;  %v14780_v9 = vadd.f32 %v5268_v42, %v16987_v43  ;;  %v17006_v43 = vmax.f32 %v17005_v7, 0.0 }
 0x581   :  { %16985 = vst [vmem:[#allocation17_spill] sm:$0xff] %v14774_v10  ;;  %v16727_v41 = vmax.f32 %v14774_v10, 0.0  ;;  %v14785_v3 = vadd.f32 %v5266_v26, %v16990_v20  ;;  %v11374_v25 = vpop.f32.mrb[20].mxu0  ;;  %v12498_v26 = vld [vmem:[#allocation6 + $0x1b8] sm:$0xff]  }
 0x582   :  { %16988 = vst [vmem:[#allocation30_spill] sm:$0xff] %v14780_v9  ;;  %5315 = vst.msk [vmem:[#allocation2 + $0x50] sm:$0xff] %vm77_vm0, %v16728_v51  ;;  %v16726_v6 = vmax.f32 %v14780_v9, 0.0  ;;  %v5247_v15 = vmul.f32 %v11374_v25, %v14754_v16  ;;  %v5170_v18 = vpop.f32.mrb[21].mxu0  ;;  %v17008_v25 = vld [vmem:[#allocation19_spill] sm:$0xff] }
 0x583   :  { %16991 = vst [vmem:[#allocation41_spill] sm:$0xff] %v14785_v3  ;;  %5313 = vst.msk [vmem:[#allocation2 + $0x20] sm:$0xff] %vm77_vm0, %v16727_v41  ;;  %v16725_v36 = vmax.f32 %v14785_v3, 0.0  ;;  %v5245_v11 = vmul.f32 %v14754_v16, %v5170_v18  ;;  %v11375_v61 = vpop.f32.mrb[22].mxu0 }
 0x584   :  { %5316 = vst.msk [vmem:[#allocation2 + $0x68] sm:$0xff] %vm77_vm0, %v16726_v6  ;;  %v5271_v56 = vadd.f32 %v14759_v59, %v5247_v15  ;;  %v5248_v23 = vmul.f32 %v11375_v61, %v14754_v16  ;;  %v5173_v35 = vpop.f32.mrb[23].mxu0  ;;  %v17009_v15 = vmax.f32 %v17008_v25, 0.0 }
 0x585   :  { %5314 = vst.msk [vmem:[#allocation2 + $0x38] sm:$0xff] %vm77_vm0, %v16725_v36  ;;  %v5269_v28 = vadd.f32 %v14759_v59, %v5245_v11  ;;  %v5246_v40 = vmul.f32 %v14754_v16, %v5173_v35  ;;  %v5379_v36 = vld [vmem:[#allocation2 + $0x190] sm:$0x1] }
 0x586   :  { %v14809_v0 = vadd.f32 %v5271_v56, %v16993_v17  ;;  %v5272_v57 = vadd.f32 %v14759_v59, %v5248_v23  ;;  %v17011_v56 = vld [vmem:[#allocation20_spill] sm:$0xff] }
 0x587   :  { %v14814_v33 = vadd.f32 %v5269_v28, %v16996_v47  ;;  %v5270_v32 = vadd.f32 %v14759_v59, %v5246_v40  ;;  %v17012_v23 = vmax.f32 %v17011_v56, 0.0  ;;  %v17014_v40 = vld [vmem:[#allocation22_spill] sm:$0xff] }
 0x588   :  { %16994 = vst [vmem:[#allocation42_spill] sm:$0xff] %v14809_v0  ;;  %v16724_v27 = vmax.f32 %v14809_v0, 0.0  ;;  %v14820_v46 = vadd.f32 %v5272_v57, %v16999_v5  ;;  %v17015_v31 = vmax.f32 %v17014_v40, 0.0 }
 0x589   :  { %16997 = vst [vmem:[#allocation21_spill] sm:$0xff] %v14814_v33  ;;  %v16723_v49 = vmax.f32 %v14814_v33, 0.0  ;;  %v14827_v60 = vadd.f32 %v5270_v32, %v17003_v2  ;;  %v11378_v29 = vpop.f32.mrb[24].mxu0  ;;  %v14850_v24 = vld [vmem:[#allocation2 + $0x50] sm:$0xff] }
 0x58a   :  { %17000 = vst [vmem:[#allocation46_spill] sm:$0xff] %v14820_v46  ;;  %5319 = vst.msk [vmem:[#allocation2 + $0xb0] sm:$0xff] %vm77_vm0, %v16724_v27  ;;  %v16722_v54 = vmax.f32 %v14820_v46, 0.0  ;;  %v5251_v19 = vmul.f32 %v11378_v29, %v14754_v16  ;;  %v5186_v21 = vpop.f32.mrb[25].mxu0  ;;  %v14834_v58 = vld [vmem:[#allocation2 + $0x20] sm:$0xff]  ;;  %v5802_v40 = vrot.slane %v14850_v24, 1 }
 0x58b   :  { %17004 = vst [vmem:[#allocation24_spill] sm:$0xff] %v14827_v60  ;;  %5317 = vst.msk [vmem:[#allocation2 + $0x80] sm:$0xff] %vm77_vm0, %v16723_v49  ;;  %v16721_v50 = vmax.f32 %v14827_v60, 0.0  ;;  %v5249_v1 = vmul.f32 %v14754_v16, %v5186_v21  ;;  %v11379_v12 = vpop.f32.mrb[26].mxu0  ;;  %v5498_v55 = vpack.c.bf16 %v14834_v58, %v14822_v52  ;;  %v5340_v21 = vld [vmem:[#allocation2 + $0x58] sm:$0x1] }
 0x58c   :  { %5320 = vst.msk [vmem:[#allocation2 + $0xc8] sm:$0xff] %vm77_vm0, %v16722_v54  ;;  %v5275_v14 = vadd.f32 %v14759_v59, %v5251_v19  ;;  %v5252_v48 = vmul.f32 %v11379_v12, %v14754_v16  ;;  %v5189_v37 = vpop.f32.mrb[27].mxu0  ;;  %v14848_v13 = vld [vmem:[#allocation2 + $0x38] sm:$0xff] }
 0x58d   :  { %5318 = vst.msk [vmem:[#allocation2 + $0x98] sm:$0xff] %vm77_vm0, %v16721_v50  ;;  %v5273_v42 = vadd.f32 %v14759_v59, %v5249_v1  ;;  %v5250_v62 = vmul.f32 %v14754_v16, %v5189_v37  ;;  %11388 = vmatprep.mubr.msk.bf16.mxu1 %vm77_vm0, %v5498_v55  ;;  %v14860_v45 = vpack.c.bf16 %v14850_v24, %v14848_v13  ;;  %v5343_v37 = vld [vmem:[#allocation2 + $0x70] sm:$0x1] }
 0x58e   :  { %v14864_v38 = vadd.f32 %v5275_v14, %v17006_v43  ;;  %v5276_v20 = vadd.f32 %v14759_v59, %v5252_v48  ;;  %v17018_v43 = vld [vmem:[#allocation31_spill] sm:$0xff] }
 0x58f   :  { %v14869_v18 = vadd.f32 %v5273_v42, %v17009_v15  ;;  %v5274_v11 = vadd.f32 %v14759_v59, %v5250_v62  ;;  %11389 = vmatmul.mubr.msk.bf16.vlgmr.msra.gmra.mrb[32].mxu1 %vm77_vm0, %v14860_v45  ;;  %v5803_v15 = vrot.slane %v5340_v21, 1  ;;  %v17027_v21 = vld [vmem:[#allocation34_spill] sm:$0xff] }
 0x590   :  { %17007 = vst [vmem:[#allocation12_spill] sm:$0xff] %v14864_v38  ;;  %v16720_v61 = vmax.f32 %v14864_v38, 0.0  ;;  %v14877_v35 = vadd.f32 %v5276_v20, %v17012_v23  ;;  %11405 = vmatpush3.bf16.msra.mxu1 %v14748_v34  ;;  %v14892_v34 = vld [vmem:[#allocation2 + $0x68] sm:$0xff] }
 0x591   :  { %17010 = vst [vmem:[#allocation25_spill] sm:$0xff] %v14869_v18  ;;  %v16719_v28 = vmax.f32 %v14869_v18, 0.0  ;;  %v14883_v17 = vadd.f32 %v5274_v11, %v17015_v31  ;;  %v11382_v57 = vpop.f32.mrb[28].mxu0  ;;  %11406 = vmatprep.subr.bf16.mxu1 %v12498_v26  ;;  %v14912_v48 = vld [vmem:[#allocation2 + $0xb0] sm:$0xff]  ;;  %v5806_v31 = vrot.slane %v5343_v37, 1  ;;  %v5434_v10 = vrot.slane %v14892_v34, 7 }
 0x592   :  { %17013 = vst [vmem:[#allocation23_spill] sm:$0xff] %v14877_v35  ;;  %5323 = vst.msk [vmem:[#allocation2 + $0x140] sm:$0xff] %vm77_vm0, %v16720_v61  ;;  %v16718_v47 = vmax.f32 %v14877_v35, 0.0  ;;  %v5255_v32 = vmul.f32 %v11382_v57, %v14754_v16  ;;  %v5202_v44 = vpop.f32.mrb[29].mxu0  ;;  %v14894_v5 = vld [vmem:[#allocation2 + $0x80] sm:$0xff]  ;;  %v17021_v11 = vld [vmem:[#allocation32_spill] sm:$0xff] }
 0x593   :  { %17016 = vst [vmem:[#allocation27_spill] sm:$0xff] %v14883_v17  ;;  %5321 = vst.msk [vmem:[#allocation2 + $0x110] sm:$0xff] %vm77_vm0, %v16719_v28  ;;  %v16716_v8 = vmax.f32 %v14883_v17, 0.0  ;;  %v5253_v2 = vmul.f32 %v14754_v16, %v5202_v44  ;;  %v11383_v29 = vpop.f32.mrb[30].mxu0  ;;  %v14903_v19 = vpack.c.bf16 %v14894_v5, %v14892_v34  ;;  %v17022_v56 = vmax.f32 %v17021_v11, 0.0  ;;  %v14964_v11 = vld [vmem:[#allocation2 + $0x48] sm:$0xff] }
 0x594   :  { %5324 = vst.msk [vmem:[#allocation2 + $0x158] sm:$0xff] %vm77_vm0, %v16718_v47  ;;  %v5279_v1 = vadd.f32 %v14759_v59, %v5255_v32  ;;  %v5256_v12 = vmul.f32 %v11383_v29, %v14754_v16  ;;  %v5205_v55 = vpop.f32.mrb[31].mxu0  ;;  %v14910_v14 = vld [vmem:[#allocation2 + $0x98] sm:$0xff]  ;;  %11407 = vmatpush3.bf16.msra.mxu1 %v12498_v26  ;;  %v17019_v26 = vmax.f32 %v17018_v43, 0.0  ;;  %17032 = vst [vmem:[#allocation22_spill] sm:$0xff] %v14964_v11  ;;  %v5808_v35 = vrot.slane %v14894_v5, 1 }
 0x595   :  { %5322 = vst.msk [vmem:[#allocation2 + $0x128] sm:$0xff] %vm77_vm0, %v16716_v8  ;;  %v5277_v42 = vadd.f32 %v14759_v59, %v5253_v2  ;;  %v5254_v62 = vmul.f32 %v14754_v16, %v5205_v55  ;;  %11392 = vmatprep.mubr.msk.bf16.mxu1 %vm77_vm0, %v14903_v19  ;;  %v14923_v7 = vpack.c.bf16 %v14912_v48, %v14910_v14  ;;  %v17024_v32 = vld [vmem:[#allocation33_spill] sm:$0xff]  ;;  %v5334_v8 = vld [vmem:[#allocation2 + $0x28] sm:$0x1]  ;;  %v5367_v28 = vld [vmem:[#allocation2 + $0x130] sm:$0x1] }
 0x596   :  { %11424 = vmatprep.subr.bf16.mxu1 %v14885_v39  ;;  %v14928_v20 = vadd.f32 %v5279_v1, %v17019_v26  ;;  %v5280_v25 = vadd.f32 %v14759_v59, %v5256_v12  ;;  %v17025_v44 = vmax.f32 %v17024_v32, 0.0  ;;  %v17028_v1 = vmax.f32 %v17027_v21, 0.0  ;;  %v17031_v26 = vld [vmem:[#allocation28_spill] sm:$0xff]  ;;  %v5349_v47 = vld [vmem:[#allocation2 + $0xa0] sm:$0x1] }
 0x597   :  { %17017 = vst [vmem:[#allocation26_spill] sm:$0xff] %v14923_v7  ;;  %v14933_v23 = vadd.f32 %v5277_v42, %v17022_v56  ;;  %v5278_v16 = vadd.f32 %v14759_v59, %v5254_v62  ;;  %11393 = vmatmul.mubr.msk.bf16.gmra.mrb[36].mxu1 %vm77_vm0, %v14923_v7  ;;  %v5805_v59 = vrot.slane %v14892_v34, 1  ;;  %v5329_v42 = vld [vmem:[#allocation2] sm:$0xff]  ;;  %v14956_v62 = vld [vmem:[#allocation2 + $0x18] sm:$0xff]  ;;  %v14967_v56 = vsel %vm636_vm3, %v5802_v40, %v5803_v15  ;;  %v5370_v61 = vld [vmem:[#allocation2 + $0x148] sm:$0x1] }
 0x598   :  { %17020 = vst [vmem:[#allocation29_spill] sm:$0xff] %v14928_v20  ;;  %v16715_v57 = vmax.f32 %v14928_v20, 0.0  ;;  %v14942_v2 = vadd.f32 %v5280_v25, %v17025_v44  ;;  %17030 = vst [vmem:[#allocation20_spill] sm:$0xff] %v14956_v62  ;;  %v5422_v32 = vrot.slane %v14822_v52, 7  ;;  %v5421_v40 = vrot.slane %v5329_v42, 7 }
 0x599   :  { %17023 = vst [vmem:[#allocation14_spill] sm:$0xff] %v14933_v23  ;;  %v16714_v29 = vmax.f32 %v14933_v23, 0.0  ;;  %v14947_v12 = vadd.f32 %v5278_v16, %v17028_v1  ;;  %v14970_v16 = vsel %vm636_vm3, %v5805_v59, %v5806_v31  ;;  %v14978_v21 = vld [vmem:[#allocation2 + $0x140] sm:$0xff]  ;;  %v16731_v31 = vrot.slane %v14956_v62, 7  ;;  %v17057_v62 = vld [vmem:[#allocation43_spill] sm:$0xff] }
 0x59a   :  { %17026 = vst [vmem:[#allocation15_spill] sm:$0xff] %v14942_v2  ;;  %5327 = vst.msk [vmem:[#allocation2 + $0x1a0] sm:$0xff] %vm77_vm0, %v16715_v57  ;;  %v16713_v55 = vmax.f32 %v14942_v2, 0.0  ;;  %v14954_v37 = vld [vmem:[#allocation2 + $0x110] sm:$0xff]  ;;  %v5425_v59 = vrot.slane %v14834_v58, 7  ;;  %v14995_v57 = vld [vmem:[#allocation2 + $0x60] sm:$0xff]  ;;  %v15000_v50 = vsel %vm264_vm2, %v5421_v40, %v5422_v32 }
 0x59b   :  { %17029 = vst [vmem:[#allocation19_spill] sm:$0xff] %v14947_v12  ;;  %5325 = vst.msk [vmem:[#allocation2 + $0x170] sm:$0xff] %vm77_vm0, %v16714_v29  ;;  %v16717_v43 = vmax.f32 %v14947_v12, 0.0  ;;  %v5502_v25 = vpack.c.bf16 %v14954_v37, %v17031_v26  ;;  %v5373_v42 = vld [vmem:[#allocation2 + $0x160] sm:$0x1]  ;;  %v15009_v6 = vld [vmem:[#allocation2 + $0x158] sm:$0xff] }
 0x59c   :  { %5328 = vst.msk [vmem:[#allocation2 + $0x1b8] sm:$0xff] %vm77_vm0, %v16713_v55  ;;  %v14976_v44 = vld [vmem:[#allocation2 + $0x128] sm:$0xff]  ;;  %v14992_v55 = vld [vmem:[#allocation2 + $0x30] sm:$0xff]  ;;  %17035 = vst [vmem:[#allocation33_spill] sm:$0xff] %v14995_v57  ;;  %v15005_v54 = vsel %vm264_vm2, %v16731_v31, %v5425_v59  ;;  %v5797_v51 = vrot.slane %v5334_v8, 1  ;;  %v5812_v22 = vrot.slane %v5349_v47, 1 }
 0x59d   :  { %5326 = vst.msk [vmem:[#allocation2 + $0x188] sm:$0xff] %vm77_vm0, %v16717_v43  ;;  %11396 = vmatprep.mubr.msk.bf16.mxu1 %vm77_vm0, %v5502_v25  ;;  %v14988_v15 = vpack.c.bf16 %v14978_v21, %v14976_v44  ;;  %17034 = vst [vmem:[#allocation32_spill] sm:$0xff] %v14992_v55  ;;  %v5337_v25 = vld [vmem:[#allocation2 + $0x40] sm:$0x1]  ;;  %v5346_v43 = vld [vmem:[#allocation2 + $0x88] sm:$0x1]  ;;  %v5485_v12 = vpack.c.bf16 %v15005_v54, %v15000_v50 }
 0x59e   :  { %17036 = vst [vmem:[#allocation34_spill] sm:$0xff] %v15000_v50  ;;  %v5800_v1 = vrot.slane %v5337_v25, 1  ;;  %v5809_v30 = vrot.slane %v5346_v43, 1  ;;  %v5364_v40 = vld [vmem:[#allocation2 + $0x118] sm:$0x1]  ;;  %v5824_v59 = vrot.slane %v5367_v28, 1 }
 0x59f   :  { %17033 = vst [vmem:[#allocation31_spill] sm:$0xff] %v14988_v15  ;;  %11397 = vmatmul.mubr.msk.bf16.gmra.mrb[40].mxu1 %vm77_vm0, %v14988_v15  ;;  %v5827_v31 = vrot.slane %v5370_v61, 1  ;;  %v5830_v29 = vrot.slane %v5373_v42, 1  ;;  %v5431_v8 = vrot.slane %v14850_v24, 7  ;;  %v5799_v43 = vrot.slane %v14848_v13, 1 }
 0x5a0   :  { %v5836_v47 = vrot.slane %v5379_v36, 1  ;;  %v5811_v61 = vrot.slane %v14910_v14, 1  ;;  %v5823_v25 = vrot.slane %v14976_v44, 1  ;;  %v5376_v42 = vld [vmem:[#allocation2 + $0x178] sm:$0x1]  ;;  %v5829_v2 = vrot.slane %v15009_v6, 1 }
 0x5a1   :  { %v15019_v27 = vld [vmem:[#allocation2 + $0x1a0] sm:$0xff]  ;;  %v5428_v23 = vrot.slane %v14848_v13, 7  ;;  %v5437_v20 = vrot.slane %v14894_v5, 7  ;;  %v5796_v36 = vrot.slane %v14834_v58, 1  ;;  %v5820_v18 = vrot.slane %v14954_v37, 1 }
 0x5a2   :  { %v15011_v41 = vld [vmem:[#allocation2 + $0x170] sm:$0xff]  ;;  %v5821_v38 = vrot.slane %v5364_v40, 1  ;;  %v5826_v60 = vrot.slane %v14978_v21, 1  ;;  %v17039_v46 = vrot.slane %v14964_v11, 7  ;;  %v15050_v0 = vsel %vm636_vm3, %v5799_v43, %v5800_v1  ;;  %v17041_v1 = vld [vmem:[#allocation37_spill] sm:$0xff] }
 0x5a3   :  { %v15015_v32 = vpack.c.bf16 %v15011_v41, %v15009_v6  ;;  %v5832_v3 = vrot.slane %v15011_v41, 1  ;;  %v5833_v9 = vrot.slane %v5376_v42, 1  ;;  %v15055_v63 = vsel %vm636_vm3, %v5811_v61, %v5812_v22  ;;  %v12501_v61 = vld [vmem:[#allocation6 + $0x1e0] sm:$0xff]  }
 0x5a4   :  { %v15017_v49 = vld [vmem:[#allocation2 + $0x188] sm:$0xff]  ;;  %v15047_v33 = vsel %vm264_vm2, %v17039_v46, %v5431_v8  ;;  %v15058_v40 = vsel %vm636_vm3, %v5823_v25, %v5824_v59  ;;  %v17040_v46 = vrot.slane %v14992_v55, 7  ;;  %v17042_v43 = vrot.slane %v17041_v1, 7  ;;  %v17044_v25 = vld [vmem:[#allocation16_spill] sm:$0xff]  ;;  %v17046_v1 = vld [vmem:[#allocation13_spill] sm:$0xff] }
 0x5a5   :  { %17037 = vst [vmem:[#allocation28_spill] sm:$0xff] %v15015_v32  ;;  %11400 = vmatprep.mubr.msk.bf16.mxu1 %vm77_vm0, %v15015_v32  ;;  %v15029_v28 = vpack.c.bf16 %v15019_v27, %v15017_v49  ;;  %v5835_v17 = vrot.slane %v15017_v49, 1  ;;  %v15074_v11 = vsel %vm636_vm3, %v5796_v36, %v5797_v51  ;;  %v15080_v59 = vsel %vm636_vm3, %v5808_v35, %v5809_v30 }
 0x5a6   :  { %v15066_v8 = vsel %vm264_vm2, %v17040_v46, %v5428_v23  ;;  %v15071_v42 = vsel %vm264_vm2, %v17042_v43, %v5437_v20  ;;  %v15086_v23 = vsel %vm636_vm3, %v5826_v60, %v5827_v31  ;;  %v15091_v20 = vsel %vm636_vm3, %v5832_v3, %v5833_v9  ;;  %v12500_v9 = vld [vmem:[#allocation6 + $0x1d8] sm:$0xff]   ;;  %v17048_v3 = vld [vmem:[#allocation35_spill] sm:$0xff] }
 0x5a7   :  { %17038 = vst [vmem:[#allocation48_spill] sm:$0xff] %v15029_v28  ;;  %11401 = vmatmul.mubr.msk.bf16.gmra.mrb[44].mxu1 %vm77_vm0, %v15029_v28  ;;  %v15077_v22 = vsel %vm636_vm3, %v5835_v17, %v5836_v47  ;;  %v17043_v60 = vrot.slane %v14995_v57, 7  ;;  %v5440_v31 = vrot.slane %v14910_v14, 7  ;;  %v5449_v47 = vrot.slane %v14954_v37, 7 }
 0x5a8   :  { %11408 = vmatprep.mubr.msk.bf16.mxu1 %vm77_vm0, %v5485_v12  ;;  %v15061_v12 = vsel %vm636_vm3, %v5829_v2, %v5830_v29  ;;  %v15083_v2 = vsel %vm636_vm3, %v5820_v18, %v5821_v38  ;;  %v15101_v38 = vpack.c.bf16 %v15047_v33, %v15066_v8  ;;  %v17045_v36 = vrot.slane %v17044_v25, 7  ;;  %v17050_v25 = vld [vmem:[#allocation40_spill] sm:$0xff]  ;;  %v17055_v29 = vld [vmem:[#allocation39_spill] sm:$0xff] }
 0x5a9   :  { %v15106_v18 = vsel %vm264_vm2, %v17043_v60, %v5434_v10  ;;  %v5443_v10 = vrot.slane %v14912_v48, 7  ;;  %v17047_v43 = vrot.slane %v17046_v1, 7  ;;  %v17049_v30 = vrot.slane %v17048_v3, 7  ;;  %v17051_v3 = vld [vmem:[#allocation38_spill] sm:$0xff] }
 0x5aa   :  { %v15112_v35 = vpack.c.bf16 %v15071_v42, %v15106_v18  ;;  %v15125_v46 = vsel %vm264_vm2, %v17045_v36, %v5440_v31  ;;  %v5452_v36 = vrot.slane %v14976_v44, 7  ;;  %v17056_v57 = vrot.slane %v17055_v29, 7 }
 0x5ab   :  { %v15130_v60 = vsel %vm264_vm2, %v17047_v43, %v5449_v47  ;;  %v5461_v47 = vrot.slane %v15011_v41, 7  ;;  %v17053_v43 = vld [vmem:[#allocation36_spill] sm:$0xff]  ;;  %v16756_v29 = vrot.slane %v14822_v52, 1 }
 0x5ac   :  { %v5489_v31 = vpack.c.bf16 %v15130_v60, %v17050_v25  ;;  %v17054_v25 = vrot.slane %v17053_v43, 7 }
 0x5ae   :  { %v15158_v51 = vsel %vm264_vm2, %v17054_v25, %v5461_v47  ;;  %v5464_v47 = vrot.slane %v15017_v49, 7 }
 0x5af   :  { %11409 = vmatmul.mubr.msk.bf16.vlgmr.msra.gmra.mrb[32].mxu1 %vm77_vm0, %v15101_v38 }
 0x5b0   :  { %11425 = vmatpush3.bf16.msra.mxu1 %v14885_v39  ;;  %11412 = vmatprep.mubr.msk.bf16.mxu1 %vm77_vm0, %v15112_v35  ;;  %v15135_v39 = vsel %vm264_vm2, %v17049_v30, %v5443_v10  ;;  %v5455_v30 = vrot.slane %v14978_v21, 7  ;;  %v17052_v10 = vrot.slane %v17051_v3, 7  ;;  %v17058_v3 = vrot.slane %v17057_v62, 7 }
 0x5b1   :  { %11426 = vmatprep.subr.bf16.mxu1 %v12500_v9  ;;  %v15139_v17 = vpack.c.bf16 %v15135_v39, %v15125_v46  ;;  %v5467_v62 = vrot.slane %v15019_v27, 7 }
 0x5b2   :  { %v15153_v1 = vsel %vm264_vm2, %v17052_v10, %v5452_v36  ;;  %v15163_v55 = vsel %vm264_vm2, %v17056_v57, %v5455_v30  ;;  %v17059_v30 = vld [vmem:[#allocation44_spill] sm:$0xff] }
 0x5b3   :  { %v15167_v50 = vpack.c.bf16 %v15163_v55, %v15153_v1 }
 0x5b4   :  { %11427 = vmatpush3.bf16.msra.mxu1 %v12500_v9  ;;  %v5458_v9 = vrot.slane %v15009_v6, 7 }
 0x5b5   :  { %11444 = vmatprep.subr.bf16.mxu1 %v12501_v61 }
 0x5b6   :  { %v15172_v36 = vsel %vm264_vm2, %v17058_v3, %v5458_v9  ;;  %v17060_v9 = vrot.slane %v17059_v30, 7  ;;  %v17061_v3 = vld [vmem:[#allocation45_spill] sm:$0xff]  ;;  %v5352_v30 = vld [vmem:[#allocation2 + $0xb8] sm:$0x1] }
 0x5b7   :  { %11413 = vmatmul.mubr.msk.bf16.gmra.mrb[36].mxu1 %vm77_vm0, %v15139_v17  ;;  %v15176_v10 = vpack.c.bf16 %v15158_v51, %v15172_v36  ;;  %v17062_v28 = vrot.slane %v17061_v3, 7  ;;  %v12503_v3 = vld [vmem:[#allocation6 + $0x1f0] sm:$0xff]  }
 0x5b8   :  { %11416 = vmatprep.mubr.msk.bf16.mxu1 %vm77_vm0, %v5489_v31  ;;  %v5331_v31 = vld [vmem:[#allocation2 + $0x10] sm:$0x1]  ;;  %v15188_v43 = vsel %vm264_vm2, %v17060_v9, %v5464_v47  ;;  %v5361_v47 = vld [vmem:[#allocation2 + $0x100] sm:$0x1] }
 0x5b9   :  { %v5794_v57 = vrot.slane %v5331_v31, 1  ;;  %v15196_v32 = vsel %vm264_vm2, %v17062_v28, %v5467_v62  ;;  %v12502_v9 = vld [vmem:[#allocation6 + $0x1e8] sm:$0xff]   ;;  %v15212_v28 = vpack.c.bf16 %v15080_v59, %v14970_v16  ;;  %v5818_v62 = vrot.slane %v5361_v47, 1 }
 0x5ba   :  { %v15200_v31 = vpack.c.bf16 %v15196_v32, %v15188_v43 }
 0x5bb   :  { %v5795_v25 = vsel %vm636_vm3, %v16756_v29, %v5794_v57  ;;  %v15208_v57 = vpack.c.bf16 %v14967_v56, %v15050_v0  ;;  %v17063_v29 = vrot.slane %v17031_v26, 1  ;;  %v15235_v26 = vpack.c.bf16 %v15086_v23, %v15058_v40 }
 0x5bc   :  { %v5857_v15 = vpack.c.bf16 %v15074_v11, %v5795_v25  ;;  %v5815_v25 = vrot.slane %v5352_v30, 1  ;;  %v15239_v30 = vpack.c.bf16 %v15091_v20, %v15061_v12 }
 0x5bd   :  { %v5819_v52 = vsel %vm636_vm3, %v17063_v29, %v5818_v62  ;;  %v5382_v29 = vld [vmem:[#allocation2 + $0x1a8] sm:$0x1] }
 0x5be   :  { %17064 = vst [vmem:[#allocation37_spill] sm:$0xff] %v15239_v30 }
 0x5bf   :  { %11417 = vmatmul.mubr.msk.bf16.gmra.mrb[40].mxu1 %vm77_vm0, %v15167_v50 }
 0x5c0   :  { %11420 = vmatprep.mubr.msk.bf16.mxu1 %vm77_vm0, %v15176_v10 }
 0x5c7   :  { %11421 = vmatmul.mubr.msk.bf16.gmra.mrb[44].mxu1 %vm77_vm0, %v15200_v31 }
 0x5c8   :  { %11428 = vmatprep.mubr.msk.bf16.mxu1 %vm77_vm0, %v5857_v15  ;;  %v5814_v15 = vrot.slane %v14912_v48, 1 }
 0x5ca   :  { %v15223_v7 = vsel %vm636_vm3, %v5814_v15, %v5815_v25  ;;  %v6031_v25 = vpack.c.bf16 %v15066_v8, %v15005_v54  ;;  %v12505_v54 = vld [vmem:[#allocation6 + $0x200] sm:$0xff]   ;;  %v17065_v8 = vrot.slane %v14593_v4, 7  ;;  %v6036_v4 = vpack.c.bf16 %v15172_v36, %v15163_v55  ;;  %v12506_v36 = vld [vmem:[#allocation6 + $0x208] sm:$0xff]  }
 0x5cb   :  { %v15227_v47 = vpack.c.bf16 %v15223_v7, %v15055_v63  ;;  %v6193_v55 = vpack.c.bf16 %v14848_v13, %v14834_v58  ;;  %v6197_v13 = vpack.c.bf16 %v14976_v44, %v14954_v37  ;;  %v12508_v37 = vld [vmem:[#allocation6 + $0x218] sm:$0xff]   ;;  %v17068_v44 = vpack.c.bf16 %v14970_v16, %v14967_v56 }
 0x5cc   :  { %v17070_v56 = vpack.c.bf16 %v15058_v40, %v15083_v2 }
 0x5cf   :  { %11429 = vmatmul.mubr.msk.bf16.vlgmr.msra.gmra.mrb[32].mxu1 %vm77_vm0, %v15208_v57 }
 0x5d0   :  { %11445 = vmatpush3.bf16.msra.mxu1 %v12501_v61  ;;  %11432 = vmatprep.mubr.msk.bf16.mxu1 %vm77_vm0, %v15212_v28  ;;  %v5861_v61 = vpack.c.bf16 %v15083_v2, %v5819_v52  ;;  %v5838_v52 = vrot.slane %v15019_v27, 1  ;;  %v5356_v2 = vld [vmem:[#allocation2 + $0xd8] sm:$0xff] }
 0x5d1   :  { %11446 = vmatprep.subr.bf16.mxu1 %v12502_v9 }
 0x5d4   :  { %11447 = vmatpush3.bf16.msra.mxu1 %v12502_v9  ;;  %v5839_v9 = vrot.slane %v5382_v29, 1  ;;  %v6032_v29 = vpack.c.bf16 %v15106_v18, %v15047_v33  ;;  %v15278_v18 = vld [vmem:[#allocation2 + $0x1b8] sm:$0xff] }
 0x5d5   :  { %11464 = vmatprep.subr.bf16.mxu1 %v12503_v3  ;;  %v6360_v16 = vrot.slane %v15278_v18, 1 }
 0x5d6   :  { %v15247_v62 = vsel %vm636_vm3, %v5838_v52, %v5839_v9  ;;  %v6033_v52 = vpack.c.bf16 %v15125_v46, %v15071_v42  ;;  %v6035_v42 = vpack.c.bf16 %v15153_v1, %v15130_v60  ;;  %v6037_v46 = vpack.c.bf16 %v15188_v43, %v15158_v51 }
 0x5d7   :  { %11433 = vmatmul.mubr.msk.bf16.gmra.mrb[36].mxu1 %vm77_vm0, %v15227_v47  ;;  %v15251_v15 = vpack.c.bf16 %v15247_v62, %v15077_v22  ;;  %v17066_v60 = vrot.slane %v14616_v53, 7  ;;  %v6194_v51 = vpack.c.bf16 %v14892_v34, %v14850_v24  ;;  %v6195_v53 = vpack.c.bf16 %v14910_v14, %v14894_v5  ;;  %v12513_v14 = vld [vmem:[#allocation6 + $0x250] sm:$0xff]  }
 0x5d8   :  { %11436 = vmatprep.mubr.msk.bf16.mxu1 %vm77_vm0, %v5861_v61  ;;  %v15258_v61 = vld [vmem:[#allocation2 + $0xc8] sm:$0xff]  ;;  %v6198_v24 = vpack.c.bf16 %v15009_v6, %v14978_v21  ;;  %v6199_v34 = vpack.c.bf16 %v15017_v49, %v15011_v41  ;;  %v6200_v5 = vpack.c.bf16 %v15278_v18, %v15019_v27  ;;  %11564 = vmatprep.subr.bf16.mxu0 %v12513_v14  ;;  %v5355_v6 = vld [vmem:[#allocation2 + $0xd0] sm:$0x1] }
 0x5d9   :  { %v6024_v9 = vrot.slane %v15258_v61, 7  ;;  %v6196_v58 = vpack.c.bf16 %v15258_v61, %v14912_v48  ;;  %v17067_v48 = vpack.c.bf16 %v15050_v0, %v15074_v11  ;;  %11565 = vmatpush3.bf16.msra.mxu0 %v12513_v14  ;;  %v6357_v41 = vrot.slane %v15258_v61, 1  ;;  %v12509_v0 = vld [vmem:[#allocation6 + $0x220] sm:$0xff]  }
 0x5da   :  { %v6358_v49 = vrot.slane %v5355_v6, 1  ;;  %v17069_v27 = vpack.c.bf16 %v15055_v63, %v15080_v59  ;;  %v5385_v63 = vld [vmem:[#allocation2 + $0x1c0] sm:$0x1]  ;;  %v17071_v43 = vpack.c.bf16 %v15061_v12, %v15086_v23  ;;  %v12510_v12 = vld [vmem:[#allocation6 + $0x228] sm:$0xff]   ;;  %v6531_v23 = vrot.slane %v5356_v2, 7 }
 0x5db   :  { %v6361_v59 = vrot.slane %v5385_v63, 1 }
 0x5dc   :  { %v15333_v11 = vsel %vm636_vm3, %v6357_v41, %v6358_v49 }
 0x5dd   :  { %v6368_v21 = vpack.c.bf16 %v15333_v11, %v15223_v7  ;;  %v17072_v7 = vpack.c.bf16 %v15077_v22, %v15091_v20  ;;  %v12511_v22 = vld [vmem:[#allocation6 + $0x230] sm:$0xff]  }
 0x5df   :  { %11437 = vmatmul.mubr.msk.bf16.gmra.mrb[40].mxu1 %vm77_vm0, %v15235_v26 }
 0x5e0   :  { %11440 = vmatprep.mubr.msk.bf16.mxu1 %vm77_vm0, %v15239_v30  ;;  %v12504_v30 = vld [vmem:[#allocation6 + $0x1f8] sm:$0xff]  }
 0x5e7   :  { %11441 = vmatmul.mubr.msk.bf16.gmra.mrb[44].mxu1 %vm77_vm0, %v15251_v15 }
 0x5e8   :  { %11448 = vmatprep.mubr.msk.bf16.mxu1 %vm77_vm0, %v6031_v25  ;;  %v15270_v25 = vsel %vm264_vm2, %v17065_v8, %v6024_v9 }
 0x5e9   :  { %v6034_v33 = vpack.c.bf16 %v15270_v25, %v15135_v39 }
 0x5ef   :  { %11449 = vmatmul.mubr.msk.bf16.vlgmr.msra.gmra.mrb[32].mxu1 %vm77_vm0, %v6032_v29  ;;  %v15356_v29 = vld [vmem:[#allocation2 + $0xe0] sm:$0xff] }
 0x5f0   :  { %11465 = vmatpush3.bf16.msra.mxu1 %v12503_v3  ;;  %11452 = vmatprep.mubr.msk.bf16.mxu1 %vm77_vm0, %v6033_v52  ;;  %v6027_v3 = vrot.slane %v15278_v18, 7  ;;  %17073 = vst [vmem:[#allocation16_spill] sm:$0xff] %v15356_v29  ;;  %v6532_v52 = vrot.slane %v15356_v29, 7 }
 0x5f1   :  { %11466 = vmatprep.subr.bf16.mxu1 %v12504_v30 }
 0x5f2   :  { %v15290_v39 = vsel %vm264_vm2, %v17066_v60, %v6027_v3  ;;  %v15364_v20 = vsel %vm264_vm2, %v6531_v23, %v6532_v52 }
 0x5f3   :  { %v6038_v1 = vpack.c.bf16 %v15290_v39, %v15196_v32  ;;  %v12507_v32 = vld [vmem:[#allocation6 + $0x210] sm:$0xff]   ;;  %17074 = vst [vmem:[#allocation13_spill] sm:$0xff] %v15364_v20 }
 0x5f4   :  { %11467 = vmatpush3.bf16.msra.mxu1 %v12504_v30  ;;  %v6362_v30 = vsel %vm636_vm3, %v6360_v16, %v6361_v59 }
 0x5f5   :  { %11484 = vmatprep.subr.bf16.mxu1 %v12505_v54  ;;  %v6372_v40 = vpack.c.bf16 %v6362_v30, %v15247_v62  ;;  %v15371_v62 = vld [vmem:[#allocation2 + $0x1d0] sm:$0xff] }
 0x5f6   :  { %17075 = vst [vmem:[#allocation35_spill] sm:$0xff] %v15371_v62  ;;  %v16761_v60 = vrot.slane %v15371_v62, 1 }
 0x5f7   :  { %11453 = vmatmul.mubr.msk.bf16.gmra.mrb[36].mxu1 %vm77_vm0, %v6034_v33  ;;  %v17079_v33 = vld [vmem:[#allocation31_spill] sm:$0xff] }
 0x5f8   :  { %11456 = vmatprep.mubr.msk.bf16.mxu1 %vm77_vm0, %v6035_v42  ;;  %v6678_v42 = vpack.c.bf16 %v15371_v62, %v15278_v18 }
 0x5ff   :  { %11457 = vmatmul.mubr.msk.bf16.gmra.mrb[40].mxu1 %vm77_vm0, %v6036_v4  ;;  %v16762_v4 = vrot.slane %v15356_v29, 1 }
 0x600   :  { %11460 = vmatprep.mubr.msk.bf16.mxu1 %vm77_vm0, %v6037_v46 }
 0x607   :  { %11461 = vmatmul.mubr.msk.bf16.gmra.mrb[44].mxu1 %vm77_vm0, %v6038_v1  ;;  %v17082_v1 = vld [vmem:[#allocation37_spill] sm:$0xff] }
 0x608   :  { %11468 = vmatprep.mubr.msk.bf16.mxu1 %vm77_vm0, %v6193_v55  ;;  %v12514_v55 = vld [vmem:[#allocation6 + $0x258] sm:$0xff]  }
 0x609   :  { %11566 = vmatprep.subr.bf16.mxu0 %v12514_v55 }
 0x60a   :  { %11567 = vmatpush3.bf16.msra.mxu0 %v12514_v55 }
 0x60f   :  { %11469 = vmatmul.mubr.msk.bf16.vlgmr.msra.gmra.mrb[32].mxu1 %vm77_vm0, %v6194_v51  ;;  %v15432_v51 = vld [vmem:[%s16592_s2 + $0x3] ss:$0 sm:$0xff] }
 0x610   :  { %11485 = vmatpush3.bf16.msra.mxu1 %v12505_v54  ;;  %11472 = vmatprep.mubr.msk.bf16.mxu1 %vm77_vm0, %v6195_v53 }
 0x611   :  { %11486 = vmatprep.subr.bf16.mxu1 %v12506_v36 }
 0x614   :  { %11487 = vmatpush3.bf16.msra.mxu1 %v12506_v36  ;;  %v15437_v36 = vld [vmem:[%s16593_s3 + $0x3] ss:$0 sm:$0xff] }
 0x615   :  { %11504 = vmatprep.subr.bf16.mxu1 %v12507_v32 }
 0x617   :  { %11473 = vmatmul.mubr.msk.bf16.gmra.mrb[36].mxu1 %vm77_vm0, %v6196_v58 }
 0x618   :  { %11476 = vmatprep.mubr.msk.bf16.mxu1 %vm77_vm0, %v6197_v13 }
 0x61f   :  { %11477 = vmatmul.mubr.msk.bf16.gmra.mrb[40].mxu1 %vm77_vm0, %v6198_v24 }
 0x620   :  { %11480 = vmatprep.mubr.msk.bf16.mxu1 %vm77_vm0, %v6199_v34 }
 0x627   :  { %11481 = vmatmul.mubr.msk.bf16.gmra.mrb[44].mxu1 %vm77_vm0, %v6200_v5 }
 0x628   :  { %11488 = vmatprep.mubr.msk.bf16.mxu1 %vm77_vm0, %v17067_v48 }
 0x62f   :  { %11489 = vmatmul.mubr.msk.bf16.vlgmr.msra.gmra.mrb[32].mxu1 %vm77_vm0, %v17068_v44 }
 0x630   :  { %11505 = vmatpush3.bf16.msra.mxu1 %v12507_v32  ;;  %11492 = vmatprep.mubr.msk.bf16.mxu1 %vm77_vm0, %v17069_v27 }
 0x631   :  { %11506 = vmatprep.subr.bf16.mxu1 %v12508_v37 }
 0x634   :  { %11507 = vmatpush3.bf16.msra.mxu1 %v12508_v37 }
 0x635   :  { %11524 = vmatprep.subr.bf16.mxu1 %v12509_v0 }
 0x637   :  { %11493 = vmatmul.mubr.msk.bf16.gmra.mrb[36].mxu1 %vm77_vm0, %v6368_v21 }
 0x638   :  { %11496 = vmatprep.mubr.msk.bf16.mxu1 %vm77_vm0, %v17070_v56 }
 0x63f   :  { %11497 = vmatmul.mubr.msk.bf16.gmra.mrb[40].mxu1 %vm77_vm0, %v17071_v43 }
 0x640   :  { %11500 = vmatprep.mubr.msk.bf16.mxu1 %vm77_vm0, %v17072_v7 }
 0x647   :  { %11501 = vmatmul.mubr.msk.bf16.gmra.mrb[44].mxu1 %vm77_vm0, %v6372_v40 }
 0x648   :  { %11508 = vmatprep.mubr.msk.bf16.mxu1 %vm77_vm0, %v15101_v38  ;;  %v6539_v38 = vpack.c.bf16 %v15364_v20, %v15270_v25  ;;  %v17078_v25 = vmov 0.0  }
 0x64f   :  { %11509 = vmatmul.mubr.msk.bf16.vlgmr.msra.gmra.mrb[32].mxu1 %vm77_vm0, %v15112_v35  ;;  %v5386_v35 = vld [vmem:[#allocation2 + $0x1c8] sm:$0xff] }
 0x650   :  { %11525 = vmatpush3.bf16.msra.mxu1 %v12509_v0  ;;  %11512 = vmatprep.mubr.msk.bf16.mxu1 %vm77_vm0, %v15139_v17  ;;  %v6534_v9 = vrot.slane %v5386_v35, 7  ;;  %v6535_v17 = vrot.slane %v15371_v62, 7 }
 0x651   :  { %11526 = vmatprep.subr.bf16.mxu1 %v12510_v12 }
 0x652   :  { %v15379_v54 = vsel %vm264_vm2, %v6534_v9, %v6535_v17  ;;  %v17083_v9 = vld [vmem:[#allocation47_spill] sm:$0xff] }
 0x653   :  { %17076 = vst [vmem:[#allocation40_spill] sm:$0xff] %v15379_v54  ;;  %v6540_v8 = vpack.c.bf16 %v15379_v54, %v15290_v39 }
 0x654   :  { %11527 = vmatpush3.bf16.msra.mxu1 %v12510_v12 }
 0x655   :  { %11544 = vmatprep.subr.bf16.mxu1 %v12511_v22 }
 0x657   :  { %11513 = vmatmul.mubr.msk.bf16.gmra.mrb[36].mxu1 %vm77_vm0, %v6539_v38 }
 0x658   :  { %11516 = vmatprep.mubr.msk.bf16.mxu1 %vm77_vm0, %v15167_v50  ;;  %v12512_v50 = vld [vmem:[#allocation6 + $0x238] sm:$0xff]  }
 0x65f   :  { %11517 = vmatmul.mubr.msk.bf16.gmra.mrb[40].mxu1 %vm77_vm0, %v15176_v10  ;;  %v17077_v10 = vld [vmem:[#allocation26_spill] sm:$0xff] }
 0x660   :  { %11520 = vmatprep.mubr.msk.bf16.mxu1 %vm77_vm0, %v15200_v31  ;;  %v6677_v31 = vpack.c.bf16 %v15356_v29, %v15258_v61  ;;  %v5358_v61 = vld [vmem:[#allocation2 + $0xe8] sm:$0x1]  ;;  %v7082_v29 = vld [vmem:[#allocation2 + $0x138] sm:$0xff] }
 0x661   :  { %v6818_v46 = vrot.slane %v5358_v61, 1 }
 0x663   :  { %v6819_v3 = vsel %vm636_vm3, %v16762_v4, %v6818_v46  ;;  %v12516_v46 = vld [vmem:[#allocation6 + $0x248] sm:$0xff]  }
 0x664   :  { %v6825_v18 = vpack.c.bf16 %v6819_v3, %v15333_v11  ;;  %v7057_v3 = vld [vmem:[#allocation2 + $0x70] sm:$0x1] }
 0x667   :  { %11521 = vmatmul.mubr.msk.bf16.gmra.mrb[44].mxu1 %vm77_vm0, %v6540_v8 }
 0x668   :  { %11528 = vmatprep.mubr.msk.bf16.mxu1 %vm77_vm0, %v14860_v45  ;;  %v17080_v45 = vld [vmem:[#allocation28_spill] sm:$0xff] }
 0x66f   :  { %11529 = vmatmul.mubr.msk.bf16.vlgmr.msra.gmra.mrb[32].mxu1 %vm77_vm0, %v14903_v19  ;;  %v17081_v19 = vld [vmem:[#allocation48_spill] sm:$0xff] }
 0x670   :  { %11545 = vmatpush3.bf16.msra.mxu1 %v12511_v22  ;;  %11532 = vmatprep.mubr.msk.bf16.mxu1 %vm77_vm0, %v17077_v10 }
 0x671   :  { %11546 = vmatprep.subr.bf16.mxu1 %v12512_v50 }
 0x674   :  { %11547 = vmatpush3.bf16.msra.mxu1 %v12512_v50 }
 0x675   :  { %11744 = vmatprep.subr.bf16.mxu1 %v17078_v25 }
 0x677   :  { %11533 = vmatmul.mubr.msk.bf16.gmra.mrb[36].mxu1 %vm77_vm0, %v6677_v31 }
 0x678   :  { %11536 = vmatprep.mubr.msk.bf16.mxu1 %vm77_vm0, %v17079_v33 }
 0x67f   :  { %11537 = vmatmul.mubr.msk.bf16.gmra.mrb[40].mxu1 %vm77_vm0, %v17080_v45 }
 0x680   :  { %11540 = vmatprep.mubr.msk.bf16.mxu1 %vm77_vm0, %v17081_v19 }
 0x687   :  { %11541 = vmatmul.mubr.msk.bf16.gmra.mrb[44].mxu1 %vm77_vm0, %v6678_v42 }
 0x688   :  { %11548 = vmatprep.mubr.msk.bf16.mxu1 %vm77_vm0, %v15208_v57  ;;  %v5388_v57 = vld [vmem:[#allocation2 + $0x1d8] sm:$0x1] }
 0x689   :  { %v6821_v39 = vrot.slane %v5388_v57, 1 }
 0x68f   :  { %11549 = vmatmul.mubr.msk.bf16.vlgmr.msra.gmra.mrb[32].mxu1 %vm77_vm0, %v15212_v28  ;;  %v6822_v28 = vsel %vm636_vm3, %v16761_v60, %v6821_v39  ;;  %v17091_v60 = vld [vmem:[#allocation34_spill] sm:$0xff] }
 0x690   :  { %11552 = vmatprep.mubr.msk.bf16.mxu1 %vm77_vm0, %v15227_v47  ;;  %v6826_v47 = vpack.c.bf16 %v6822_v28, %v6362_v30 }
 0x697   :  { %11553 = vmatmul.mubr.msk.bf16.gmra.mrb[36].mxu1 %vm77_vm0, %v6825_v18 }
 0x698   :  { %11556 = vmatprep.mubr.msk.bf16.mxu1 %vm77_vm0, %v15235_v26  ;;  %v15426_v26 = vld [vmem:[#allocation6 + $0x240] sm:$0xff]  }
 0x699   :  { %11584 = vmatprep.subr.bf16.mxu0 %v15426_v26 }
 0x69f   :  { %11557 = vmatmul.mubr.msk.bf16.gmra.mrb[40].mxu1 %vm77_vm0, %v17082_v1 }
 0x6a0   :  { %11560 = vmatprep.mubr.msk.bf16.mxu1 %vm77_vm0, %v15251_v15 }
 0x6a7   :  { %11561 = vmatmul.mubr.msk.bf16.gmra.mrb[44].mxu1 %vm77_vm0, %v6826_v47  ;;  %v7054_v47 = vld [vmem:[#allocation2 + $0x58] sm:$0x1] }
 0x762   :  { %v11550_v15 = vpop.f32.mrb[32].mxu1 }
 0x763   :  { %v6973_v53 = vmul.f32 %v11550_v15, %v15432_v51  ;;  %v6884_v32 = vpop.f32.mrb[33].mxu1 }
 0x764   :  { %v6971_v58 = vmul.f32 %v15432_v51, %v6884_v32  ;;  %v11551_v13 = vpop.f32.mrb[34].mxu1 }
 0x765   :  { %v6997_v24 = vadd.f32 %v15437_v36, %v6973_v53  ;;  %v6974_v34 = vmul.f32 %v11551_v13, %v15432_v51  ;;  %v6887_v5 = vpop.f32.mrb[35].mxu1  ;;  %v7520_v53 = vrot.slane %v7057_v3, 1  ;;  %v15491_v13 = vld [vmem:[#allocation6 + $0x260] sm:$0xff]   ;;  %v15551_v3 = vld [vmem:[#allocation2 + $0x118] sm:$0x1] }
 0x766   :  { %v6995_v14 = vadd.f32 %v15437_v36, %v6971_v58  ;;  %v6972_v48 = vmul.f32 %v15432_v51, %v6887_v5 }
 0x767   :  { %v7013_v6 = vmax.f32 %v6997_v24, 0.0  ;;  %v6998_v37 = vadd.f32 %v15437_v36, %v6974_v34 }
 0x768   :  { %v7011_v41 = vmax.f32 %v6995_v14, 0.0  ;;  %v6996_v49 = vadd.f32 %v15437_v36, %v6972_v48  ;;  %v7517_v14 = vrot.slane %v7054_v47, 1 }
 0x769   :  { %7029 = vst.msk [vmem:[#allocation2 + $0x50] sm:$0xff] %vm77_vm0, %v7013_v6  ;;  %v7014_v44 = vmax.f32 %v6998_v37, 0.0 }
 0x76a   :  { %7027 = vst.msk [vmem:[#allocation2 + $0x20] sm:$0xff] %vm77_vm0, %v7011_v41  ;;  %v7012_v27 = vmax.f32 %v6996_v49, 0.0  ;;  %v11554_v0 = vpop.f32.mrb[36].mxu1 }
 0x76b   :  { %7030 = vst.msk [vmem:[#allocation2 + $0x68] sm:$0xff] %vm77_vm0, %v7014_v44  ;;  %v6977_v11 = vmul.f32 %v11554_v0, %v15432_v51  ;;  %v6900_v21 = vpop.f32.mrb[37].mxu1 }
 0x76c   :  { %7028 = vst.msk [vmem:[#allocation2 + $0x38] sm:$0xff] %vm77_vm0, %v7012_v27  ;;  %v6975_v56 = vmul.f32 %v15432_v51, %v6900_v21  ;;  %v11555_v63 = vpop.f32.mrb[38].mxu1 }
 0x76d   :  { %v7001_v16 = vadd.f32 %v15437_v36, %v6977_v11  ;;  %v6978_v59 = vmul.f32 %v11555_v63, %v15432_v51  ;;  %v6903_v43 = vpop.f32.mrb[39].mxu1 }
 0x76e   :  { %v6999_v7 = vadd.f32 %v15437_v36, %v6975_v56  ;;  %v6976_v30 = vmul.f32 %v15432_v51, %v6903_v43 }
 0x76f   :  { %v7017_v40 = vmax.f32 %v7001_v16, 0.0  ;;  %v7002_v2 = vadd.f32 %v15437_v36, %v6978_v59 }
 0x770   :  { %v7015_v12 = vmax.f32 %v6999_v7, 0.0  ;;  %v7000_v23 = vadd.f32 %v15437_v36, %v6976_v30  ;;  %v15465_v8 = vld [vmem:[#allocation2 + $0x50] sm:$0xff] }
 0x771   :  { %7033 = vst.msk [vmem:[#allocation2 + $0xb0] sm:$0xff] %vm77_vm0, %v7017_v40  ;;  %v7018_v52 = vmax.f32 %v7002_v2, 0.0  ;;  %v15460_v22 = vld [vmem:[#allocation2 + $0x20] sm:$0xff]  ;;  %v7516_v5 = vrot.slane %v15465_v8, 1  ;;  %v15530_v40 = vld [vmem:[#allocation2 + $0x28] sm:$0x1] }
 0x772   :  { %7031 = vst.msk [vmem:[#allocation2 + $0x80] sm:$0xff] %vm77_vm0, %v7015_v12  ;;  %v7016_v38 = vmax.f32 %v7000_v23, 0.0  ;;  %v11558_v35 = vpop.f32.mrb[40].mxu1  ;;  %v7212_v17 = vpack.c.bf16 %v15460_v22, %v17083_v9  ;;  %v15467_v50 = vld [vmem:[#allocation2 + $0x68] sm:$0xff]  ;;  %v17092_v2 = vld [vmem:[#allocation32_spill] sm:$0xff] }
 0x773   :  { %7034 = vst.msk [vmem:[#allocation2 + $0xc8] sm:$0xff] %vm77_vm0, %v7018_v52  ;;  %v6981_v10 = vmul.f32 %v11558_v35, %v15432_v51  ;;  %v6916_v31 = vpop.f32.mrb[41].mxu1  ;;  %v15471_v33 = vld [vmem:[#allocation2 + $0x38] sm:$0xff]  ;;  %v7519_v48 = vrot.slane %v15467_v50, 1  ;;  %v15524_v43 = vsel %vm636_vm3, %v7516_v5, %v7517_v14  ;;  %v17093_v45 = vrot.slane %v17092_v2, 7 }
 0x774   :  { %7032 = vst.msk [vmem:[#allocation2 + $0x98] sm:$0xff] %vm77_vm0, %v7016_v38  ;;  %v6979_v19 = vmul.f32 %v15432_v51, %v6916_v31  ;;  %v11559_v42 = vpop.f32.mrb[42].mxu1  ;;  %11568 = vmatprep.mubr.msk.bf16.mxu0 %vm77_vm0, %v7212_v17  ;;  %v15480_v61 = vpack.c.bf16 %v15465_v8, %v15471_v33  ;;  %v15535_v52 = vld [vmem:[#allocation2 + $0xf8] sm:$0xff]  ;;  %v15537_v38 = vld [vmem:[#allocation2 + $0x40] sm:$0x1] }
 0x775   :  { %v7005_v18 = vadd.f32 %v15437_v36, %v6981_v10  ;;  %v6982_v57 = vmul.f32 %v11559_v42, %v15432_v51  ;;  %v6919_v39 = vpop.f32.mrb[43].mxu1  ;;  %v15510_v0 = vsel %vm636_vm3, %v7519_v48, %v7520_v53  ;;  %v15539_v35 = vld [vmem:[#allocation2 + $0xb8] sm:$0x1]  ;;  %v15542_v10 = vld [vmem:[#allocation2 + $0x88] sm:$0x1]  ;;  %v7514_v53 = vrot.slane %v15537_v38, 1 }
 0x776   :  { %17084 = vst [vmem:[#allocation38_spill] sm:$0xff] %v15480_v61  ;;  %v7003_v1 = vadd.f32 %v15437_v36, %v6979_v19  ;;  %v6980_v28 = vmul.f32 %v15432_v51, %v6919_v39  ;;  %11569 = vmatmul.mubr.msk.bf16.vlgmr.msra.gmra.mrb[32].mxu0 %vm77_vm0, %v15480_v61  ;;  %v15544_v31 = vld [vmem:[#allocation2 + $0xa0] sm:$0x1]  ;;  %v15546_v19 = vld [vmem:[#allocation2 + $0xd0] sm:$0x1]  ;;  %v15558_v39 = vld [vmem:[#allocation2 + $0x78] sm:$0xff] }
 0x777   :  { %v7021_v55 = vmax.f32 %v7005_v18, 0.0  ;;  %v7006_v15 = vadd.f32 %v15437_v36, %v6982_v57  ;;  %11585 = vmatpush3.bf16.msra.mxu0 %v15426_v26  ;;  %v15553_v18 = vld [vmem:[#allocation2 + $0x148] sm:$0x1]  ;;  %v7090_v14 = vld [vmem:[#allocation2 + $0x178] sm:$0x1] }
 0x778   :  { %v7019_v32 = vmax.f32 %v7003_v1, 0.0  ;;  %v7004_v58 = vadd.f32 %v15437_v36, %v6980_v28  ;;  %11586 = vmatprep.subr.bf16.mxu0 %v12516_v46  ;;  %v15507_v27 = vld [vmem:[#allocation2 + $0xb0] sm:$0xff]  ;;  %v15562_v28 = vld [vmem:[#allocation2 + $0x160] sm:$0x1] }
 0x779   :  { %7037 = vst.msk [vmem:[#allocation2 + $0x140] sm:$0xff] %vm77_vm0, %v7021_v55  ;;  %v7022_v24 = vmax.f32 %v7006_v15, 0.0  ;;  %v15494_v34 = vld [vmem:[#allocation2 + $0x80] sm:$0xff]  ;;  %v15560_v1 = vld [vmem:[#allocation2 + $0x130] sm:$0x1]  ;;  %v7511_v15 = vrot.slane %v15530_v40, 1 }
 0x77a   :  { %7035 = vst.msk [vmem:[#allocation2 + $0x110] sm:$0xff] %vm77_vm0, %v7019_v32  ;;  %v7020_v26 = vmax.f32 %v7004_v58, 0.0  ;;  %v11562_v6 = vpop.f32.mrb[44].mxu1  ;;  %v15501_v37 = vpack.c.bf16 %v15494_v34, %v15467_v50  ;;  %v15571_v32 = vld [vmem:[#allocation2 + $0x1a8] sm:$0x1]  ;;  %v17088_v38 = vld [vmem:[#allocation20_spill] sm:$0xff] }
 0x77b   :  { %7038 = vst.msk [vmem:[#allocation2 + $0x158] sm:$0xff] %vm77_vm0, %v7022_v24  ;;  %v6985_v41 = vmul.f32 %v11562_v6, %v15432_v51  ;;  %v6932_v49 = vpop.f32.mrb[45].mxu1  ;;  %v15505_v44 = vld [vmem:[#allocation2 + $0x98] sm:$0xff]  ;;  %11587 = vmatpush3.bf16.msra.mxu0 %v12516_v46  ;;  %v7139_v24 = vrot.slane %v15460_v22, 7  ;;  %v15581_v48 = vld [vmem:[#allocation2 + $0x1c0] sm:$0x1] }
 0x77c   :  { %17085 = vst [vmem:[#allocation36_spill] sm:$0xff] %v15501_v37  ;;  %7036 = vst.msk [vmem:[#allocation2 + $0x128] sm:$0xff] %vm77_vm0, %v7020_v26  ;;  %v6983_v11 = vmul.f32 %v15432_v51, %v6932_v49  ;;  %v11563_v21 = vpop.f32.mrb[46].mxu1  ;;  %11572 = vmatprep.mubr.msk.bf16.mxu0 %vm77_vm0, %v15501_v37  ;;  %v15518_v56 = vpack.c.bf16 %v15507_v27, %v15505_v44  ;;  %11604 = vmatprep.subr.bf16.mxu0 %v15491_v13  ;;  %v7523_v6 = vrot.slane %v15542_v10, 1  ;;  %v7093_v49 = vld [vmem:[#allocation2 + $0x190] sm:$0x1] }
 0x77d   :  { %v7009_v63 = vadd.f32 %v15437_v36, %v6985_v41  ;;  %v6986_v16 = vmul.f32 %v11563_v21, %v15432_v51  ;;  %v6935_v59 = vpop.f32.mrb[47].mxu1  ;;  %v7526_v41 = vrot.slane %v15544_v31, 1  ;;  %v7535_v21 = vrot.slane %v15551_v3, 1  ;;  %v7091_v37 = vld [vmem:[#allocation2 + $0x180] sm:$0xff] }
 0x77e   :  { %17086 = vst [vmem:[#allocation39_spill] sm:$0xff] %v15518_v56  ;;  %v7007_v7 = vadd.f32 %v15437_v36, %v6983_v11  ;;  %v6984_v30 = vmul.f32 %v15432_v51, %v6935_v59  ;;  %11573 = vmatmul.mubr.msk.bf16.gmra.mrb[36].mxu0 %vm77_vm0, %v15518_v56  ;;  %v7544_v59 = vrot.slane %v15562_v28, 1  ;;  %v7145_v10 = vrot.slane %v15465_v8, 7 }
 0x77f   :  { %v7025_v12 = vmax.f32 %v7009_v63, 0.0  ;;  %v7010_v23 = vadd.f32 %v15437_v36, %v6986_v16  ;;  %v7538_v63 = vrot.slane %v15560_v1, 1  ;;  %v7541_v16 = vrot.slane %v15553_v18, 1 }
 0x780   :  { %v7023_v17 = vmax.f32 %v7007_v7, 0.0  ;;  %v7008_v51 = vadd.f32 %v15437_v36, %v6984_v30  ;;  %v15567_v55 = vld [vmem:[#allocation2 + $0x140] sm:$0xff]  ;;  %v7142_v7 = vrot.slane %v15471_v33, 7  ;;  %v7547_v30 = vrot.slane %v7090_v14, 1 }
 0x781   :  { %7041 = vst.msk [vmem:[#allocation2 + $0x1a0] sm:$0xff] %vm77_vm0, %v7025_v12  ;;  %v7026_v42 = vmax.f32 %v7010_v23, 0.0  ;;  %v15549_v46 = vld [vmem:[#allocation2 + $0x110] sm:$0xff]  ;;  %v7510_v31 = vrot.slane %v15460_v22, 1  ;;  %v7148_v18 = vrot.slane %v15467_v50, 7  ;;  %v7540_v12 = vrot.slane %v15567_v55, 1 }
 0x782   :  { %7039 = vst.msk [vmem:[#allocation2 + $0x170] sm:$0xff] %vm77_vm0, %v7023_v17  ;;  %v7024_v57 = vmax.f32 %v7008_v51, 0.0  ;;  %v7216_v36 = vpack.c.bf16 %v15549_v46, %v15535_v52  ;;  %v15596_v23 = vld [vmem:[#allocation2 + $0x158] sm:$0xff]  ;;  %v17089_v17 = vrot.slane %v17088_v38, 7  ;;  %v7534_v14 = vrot.slane %v15549_v46, 1 }
 0x783   :  { %7042 = vst.msk [vmem:[#allocation2 + $0x1b8] sm:$0xff] %vm77_vm0, %v7026_v42  ;;  %v15565_v47 = vld [vmem:[#allocation2 + $0x128] sm:$0xff]  ;;  %v7550_v42 = vrot.slane %v7093_v49, 1  ;;  %v15628_v1 = vsel %vm264_vm2, %v17093_v45, %v7142_v7  ;;  %v7543_v40 = vrot.slane %v15596_v23, 1  ;;  %v7151_v5 = vrot.slane %v15494_v34, 7 }
 0x784   :  { %7040 = vst.msk [vmem:[#allocation2 + $0x188] sm:$0xff] %vm77_vm0, %v7024_v57  ;;  %11576 = vmatprep.mubr.msk.bf16.mxu0 %vm77_vm0, %v7216_v36  ;;  %v15577_v58 = vpack.c.bf16 %v15567_v55, %v15565_v47  ;;  %v15601_v51 = vsel %vm264_vm2, %v17089_v17, %v7139_v24  ;;  %v7513_v57 = vrot.slane %v15471_v33, 1  ;;  %v7522_v36 = vrot.slane %v15494_v34, 1 }
 0x785   :  { %v7525_v24 = vrot.slane %v15505_v44, 1  ;;  %v7537_v49 = vrot.slane %v15565_v47, 1  ;;  %v7199_v4 = vpack.c.bf16 %v15601_v51, %v17091_v60  ;;  %v15640_v60 = vsel %vm636_vm3, %v7510_v31, %v7511_v15 }
 0x786   :  { %17087 = vst [vmem:[#allocation43_spill] sm:$0xff] %v15577_v58  ;;  %11577 = vmatmul.mubr.msk.bf16.gmra.mrb[40].mxu0 %vm77_vm0, %v15577_v58  ;;  %v15644_v45 = vsel %vm636_vm3, %v7513_v57, %v7514_v53  ;;  %v15647_v7 = vsel %vm636_vm3, %v7522_v36, %v7523_v6  ;;  %v7528_v26 = vrot.slane %v15507_v27, 1  ;;  %v15657_v15 = vsel %vm636_vm3, %v7534_v14, %v7535_v21  ;;  %v15662_v53 = vld [vmem:[#allocation2 + $0xc8] sm:$0xff] }
 0x787   :  { %v15654_v62 = vsel %vm636_vm3, %v7525_v24, %v7526_v41  ;;  %v15660_v31 = vsel %vm636_vm3, %v7537_v49, %v7538_v63  ;;  %v15668_v57 = vsel %vm636_vm3, %v7540_v12, %v7541_v16  ;;  %v15671_v36 = vsel %vm636_vm3, %v7543_v40, %v7544_v59  ;;  %v7061_v49 = vld [vmem:[#allocation2 + $0x90] sm:$0xff]  ;;  %v17096_v59 = vld [vmem:[#allocation22_spill] sm:$0xff] }
 0x788   :  { %v15621_v17 = vld [vmem:[#allocation2 + $0x1a0] sm:$0xff]  ;;  %v8071_v40 = vrot.slane %v15662_v53, 1  ;;  %v17095_v12 = vrot.slane %v15558_v39, 7  ;;  %v7172_v56 = vrot.slane %v15596_v23, 7 }
 0x789   :  { %v15605_v3 = vld [vmem:[#allocation2 + $0x170] sm:$0xff]  ;;  %v7552_v14 = vrot.slane %v15621_v17, 1 }
 0x78a   :  { %v15614_v28 = vpack.c.bf16 %v15605_v3, %v15596_v23  ;;  %v7546_v2 = vrot.slane %v15605_v3, 1  ;;  %v15676_v21 = vld [vmem:[#allocation2 + $0x1b8] sm:$0xff] }
 0x78b   :  { %v15619_v38 = vld [vmem:[#allocation2 + $0x188] sm:$0xff]  ;;  %v8074_v16 = vrot.slane %v15676_v21, 1 }
 0x78c   :  { %17090 = vst [vmem:[#allocation44_spill] sm:$0xff] %v15614_v28  ;;  %11580 = vmatprep.mubr.msk.bf16.mxu0 %vm77_vm0, %v15614_v28  ;;  %v15636_v11 = vpack.c.bf16 %v15621_v17, %v15619_v38  ;;  %v7549_v25 = vrot.slane %v15619_v38, 1  ;;  %v15681_v24 = vsel %vm636_vm3, %v7546_v2, %v7547_v30  ;;  %v17098_v30 = vld [vmem:[#allocation33_spill] sm:$0xff] }
 0x78d   :  { %v17099_v6 = vrot.slane %v17098_v30, 7 }
 0x78e   :  { %17094 = vst [vmem:[#allocation45_spill] sm:$0xff] %v15636_v11  ;;  %11581 = vmatmul.mubr.msk.bf16.gmra.mrb[44].mxu0 %vm77_vm0, %v15636_v11  ;;  %v15674_v41 = vsel %vm636_vm3, %v7549_v25, %v7550_v42  ;;  %v15698_v42 = vsel %vm264_vm2, %v17095_v12, %v7151_v5  ;;  %v7073_v5 = vld [vmem:[#allocation2 + $0xf0] sm:$0xff]  ;;  %v7076_v12 = vld [vmem:[#allocation2 + $0x108] sm:$0xff]  ;;  %v17100_v11 = vrot.slane %v15539_v35, 1  ;;  %v17101_v25 = vrot.slane %v15546_v19, 1 }
 0x78f   :  { %11588 = vmatprep.mubr.msk.bf16.mxu0 %vm77_vm0, %v7199_v4  ;;  %v17097_v4 = vrot.slane %v17096_v59, 7  ;;  %v15713_v39 = vsel %vm264_vm2, %v17099_v6, %v7148_v18  ;;  %v12518_v59 = vld [vmem:[#allocation6 + $0x268] sm:$0xff]   ;;  %v17102_v18 = vrot.slane %v15571_v32, 1  ;;  %v7159_v30 = vrot.slane %v7073_v5, 7 }
 0x790   :  { %v15718_v2 = vsel %vm636_vm3, %v7528_v26, %v17100_v11  ;;  %v15723_v28 = vsel %vm636_vm3, %v8071_v40, %v17101_v25  ;;  %v17103_v26 = vrot.slane %v15581_v48, 1  ;;  %v15743_v11 = vpack.c.bf16 %v15698_v42, %v15713_v39 }
 0x791   :  { %v15708_v63 = vsel %vm264_vm2, %v17097_v4, %v7145_v10  ;;  %v7064_v4 = vld [vmem:[#allocation2 + $0xa8] sm:$0xff]  ;;  %v15732_v6 = vsel %vm636_vm3, %v7552_v14, %v17102_v18  ;;  %v7153_v25 = vrot.slane %v7061_v49, 7  ;;  %v7154_v40 = vrot.slane %v15505_v44, 7 }
 0x792   :  { %v15727_v10 = vpack.c.bf16 %v15708_v63, %v15628_v1  ;;  %v15739_v19 = vsel %vm636_vm3, %v8074_v16, %v17103_v26  ;;  %v7160_v14 = vrot.slane %v15535_v52, 7  ;;  %v7162_v48 = vrot.slane %v7076_v12, 7  ;;  %v12519_v26 = vld [vmem:[#allocation6 + $0x270] sm:$0xff]   ;;  %v7079_v12 = vld [vmem:[#allocation2 + $0x120] sm:$0xff] }
 0x793   :  { %v7163_v16 = vrot.slane %v15549_v46, 7  ;;  %v7156_v49 = vrot.slane %v7064_v4, 7  ;;  %v7157_v18 = vrot.slane %v15507_v27, 7  ;;  %v15757_v32 = vsel %vm264_vm2, %v7153_v25, %v7154_v40 }
 0x794   :  { %v7161_v35 = vsel %vm264_vm2, %v7159_v30, %v7160_v14  ;;  %v7165_v40 = vrot.slane %v7079_v12, 7  ;;  %v7166_v14 = vrot.slane %v15565_v47, 7  ;;  %v7085_v30 = vld [vmem:[#allocation2 + $0x150] sm:$0xff] }
 0x795   :  { %v15761_v5 = vsel %vm264_vm2, %v7162_v48, %v7163_v16  ;;  %v15764_v58 = vsel %vm264_vm2, %v7156_v49, %v7157_v18  ;;  %v7175_v16 = vrot.slane %v15605_v3, 7  ;;  %v7169_v49 = vrot.slane %v15567_v55, 7 }
 0x796   :  { %11589 = vmatmul.mubr.msk.bf16.vlgmr.msra.gmra.mrb[32].mxu0 %vm77_vm0, %v15727_v10  ;;  %v15768_v4 = vpack.c.bf16 %v15764_v58, %v15757_v32  ;;  %v7203_v25 = vpack.c.bf16 %v15761_v5, %v7161_v35  ;;  %v7171_v18 = vrot.slane %v7085_v30, 7  ;;  %v15779_v35 = vsel %vm264_vm2, %v7165_v40, %v7166_v14  ;;  %v7094_v30 = vld [vmem:[#allocation2 + $0x198] sm:$0xff] }
 0x797   :  { %11605 = vmatpush3.bf16.msra.mxu0 %v15491_v13  ;;  %11592 = vmatprep.mubr.msk.bf16.mxu0 %vm77_vm0, %v15743_v11  ;;  %v7088_v13 = vld [vmem:[#allocation2 + $0x168] sm:$0xff]  ;;  %v7177_v14 = vrot.slane %v7091_v37, 7 }
 0x798   :  { %11606 = vmatprep.subr.bf16.mxu0 %v12518_v59  ;;  %17104 = vst [vmem:[#allocation26_spill] sm:$0xff] %v15768_v4  ;;  %v7174_v48 = vrot.slane %v7088_v13, 7  ;;  %v7045_v13 = vld [vmem:[#allocation2 + $0x10] sm:$0x1] }
 0x79a   :  { %v15782_v12 = vsel %vm264_vm2, %v7174_v48, %v7175_v16  ;;  %v7178_v48 = vrot.slane %v15619_v38, 7  ;;  %v7508_v16 = vrot.slane %v7045_v13, 1  ;;  %v7075_v13 = vld [vmem:[#allocation2 + $0x100] sm:$0x1] }
 0x79b   :  { %11607 = vmatpush3.bf16.msra.mxu0 %v12518_v59  ;;  %v7168_v59 = vrot.slane %v7082_v29, 7  ;;  %v15792_v29 = vsel %vm264_vm2, %v7171_v18, %v7172_v56  ;;  %v17105_v18 = vrot.slane %v17083_v9, 1  ;;  %v15821_v9 = vpack.c.bf16 %v15647_v7, %v15510_v0 }
 0x79c   :  { %11624 = vmatprep.subr.bf16.mxu0 %v12519_v26  ;;  %v15796_v40 = vpack.c.bf16 %v15782_v12, %v15792_v29  ;;  %v7179_v56 = vsel %vm264_vm2, %v7177_v14, %v7178_v48  ;;  %v12520_v14 = vld [vmem:[#allocation6 + $0x278] sm:$0xff]   ;;  %v7531_v48 = vrot.slane %v15535_v52, 1 }
 0x79d   :  { %v15785_v61 = vsel %vm264_vm2, %v7168_v59, %v7169_v49  ;;  %v7180_v59 = vrot.slane %v7094_v30, 7  ;;  %v7181_v49 = vrot.slane %v15621_v17, 7  ;;  %v7509_v54 = vsel %vm636_vm3, %v17105_v18, %v7508_v16 }
 0x79e   :  { %11593 = vmatmul.mubr.msk.bf16.gmra.mrb[36].mxu0 %vm77_vm0, %v15768_v4  ;;  %v7571_v4 = vpack.c.bf16 %v15640_v60, %v7509_v54  ;;  %v15817_v30 = vpack.c.bf16 %v15524_v43, %v15644_v45  ;;  %v7532_v54 = vrot.slane %v7075_v13, 1  ;;  %v15851_v18 = vpack.c.bf16 %v15732_v6, %v15674_v41 }
 0x79f   :  { %11596 = vmatprep.mubr.msk.bf16.mxu0 %vm77_vm0, %v7203_v25  ;;  %v15789_v25 = vpack.c.bf16 %v15785_v61, %v15779_v35  ;;  %v7182_v37 = vsel %vm264_vm2, %v7180_v59, %v7181_v49  ;;  %v15831_v59 = vpack.c.bf16 %v15718_v2, %v15654_v62  ;;  %v15843_v49 = vpack.c.bf16 %v15681_v24, %v15671_v36 }
 0x7a0   :  { %v15809_v20 = vpack.c.bf16 %v7182_v37, %v7179_v56  ;;  %v7533_v16 = vsel %vm636_vm3, %v7531_v48, %v7532_v54  ;;  %v7745_v13 = vpack.c.bf16 %v15628_v1, %v15601_v51  ;;  %v7746_v48 = vpack.c.bf16 %v15713_v39, %v15708_v63  ;;  %v12522_v54 = vld [vmem:[#allocation6 + $0x288] sm:$0xff]   ;;  %v12523_v51 = vld [vmem:[#allocation6 + $0x290] sm:$0xff]  }
 0x7a1   :  { %v7575_v52 = vpack.c.bf16 %v15657_v15, %v7533_v16  ;;  %17106 = vst [vmem:[#allocation31_spill] sm:$0xff] %v15843_v49  ;;  %v7747_v16 = vpack.c.bf16 %v15757_v32, %v15698_v42  ;;  %v7749_v63 = vpack.c.bf16 %v15779_v35, %v15761_v5  ;;  %v7097_v42 = vld [vmem:[#allocation2 + $0x1b0] sm:$0xff]  ;;  %v7750_v39 = vpack.c.bf16 %v15792_v29, %v15785_v61  ;;  %v12524_v61 = vld [vmem:[#allocation6 + $0x298] sm:$0xff]  }
 0x7a2   :  { %v7751_v32 = vpack.c.bf16 %v7179_v56, %v15782_v12  ;;  %v17107_v35 = vpack.c.bf16 %v15471_v33, %v15460_v22  ;;  %v17108_v12 = vpack.c.bf16 %v15467_v50, %v15465_v8  ;;  %v17109_v29 = vpack.c.bf16 %v15505_v44, %v15494_v34  ;;  %v12525_v56 = vld [vmem:[#allocation6 + $0x2a0] sm:$0xff]  }
 0x7a3   :  { %v7910_v22 = vpack.c.bf16 %v15662_v53, %v15507_v27  ;;  %v17110_v8 = vpack.c.bf16 %v15565_v47, %v15549_v46  ;;  %v17111_v50 = vpack.c.bf16 %v15596_v23, %v15567_v55  ;;  %v17112_v33 = vpack.c.bf16 %v15619_v38, %v15605_v3  ;;  %v12526_v27 = vld [vmem:[#allocation6 + $0x2a8] sm:$0xff]   ;;  %v12527_v55 = vld [vmem:[#allocation6 + $0x2b0] sm:$0xff]   ;;  %v12528_v38 = vld [vmem:[#allocation6 + $0x2b8] sm:$0xff]  }
 0x7a4   :  { %v7914_v34 = vpack.c.bf16 %v15676_v21, %v15621_v17  ;;  %v17113_v44 = vpack.c.bf16 %v15644_v45, %v15640_v60  ;;  %v17114_v46 = vpack.c.bf16 %v15510_v0, %v15524_v43  ;;  %v17115_v47 = vpack.c.bf16 %v15654_v62, %v15647_v7  ;;  %v17121_v17 = vld [vmem:[#allocation26_spill] sm:$0xff]  ;;  %v17122_v45 = vld [vmem:[#allocation13_spill] sm:$0xff] }
 0x7a5   :  { %v17116_v23 = vpack.c.bf16 %v15723_v28, %v15718_v2  ;;  %v17117_v0 = vpack.c.bf16 %v15660_v31, %v15657_v15  ;;  %v17118_v43 = vpack.c.bf16 %v15671_v36, %v15668_v57  ;;  %v17119_v62 = vpack.c.bf16 %v15674_v41, %v15681_v24  ;;  %v12529_v60 = vld [vmem:[#allocation6 + $0x2c0] sm:$0xff]   ;;  %v17123_v15 = vld [vmem:[#allocation40_spill] sm:$0xff]  ;;  %v12530_v36 = vld [vmem:[#allocation6 + $0x2c8] sm:$0xff]  }
 0x7a6   :  { %11597 = vmatmul.mubr.msk.bf16.gmra.mrb[40].mxu0 %vm77_vm0, %v15789_v25  ;;  %v17120_v3 = vpack.c.bf16 %v15739_v19, %v15732_v6  ;;  %v17125_v41 = vld [vmem:[#allocation36_spill] sm:$0xff]  ;;  %v17126_v24 = vld [vmem:[#allocation39_spill] sm:$0xff] }
 0x7a7   :  { %11600 = vmatprep.mubr.msk.bf16.mxu0 %vm77_vm0, %v15796_v40  ;;  %v17127_v2 = vld [vmem:[#allocation16_spill] sm:$0xff] }
 0x7a8   :  { %v17129_v6 = vld [vmem:[#allocation44_spill] sm:$0xff] }
 0x7ae   :  { %11601 = vmatmul.mubr.msk.bf16.gmra.mrb[44].mxu0 %vm77_vm0, %v15809_v20 }
 0x7af   :  { %11608 = vmatprep.mubr.msk.bf16.mxu0 %vm77_vm0, %v7571_v4  ;;  %v12521_v4 = vld [vmem:[#allocation6 + $0x280] sm:$0xff]  }
 0x7b6   :  { %11609 = vmatmul.mubr.msk.bf16.vlgmr.msra.gmra.mrb[32].mxu0 %vm77_vm0, %v15817_v30 }
 0x7b7   :  { %11625 = vmatpush3.bf16.msra.mxu0 %v12519_v26  ;;  %11612 = vmatprep.mubr.msk.bf16.mxu0 %vm77_vm0, %v15821_v9  ;;  %v15839_v26 = vpack.c.bf16 %v15668_v57, %v15660_v31  ;;  %v17124_v57 = vld [vmem:[#allocation38_spill] sm:$0xff] }
 0x7b8   :  { %11626 = vmatprep.subr.bf16.mxu0 %v12520_v14 }
 0x7bb   :  { %11627 = vmatpush3.bf16.msra.mxu0 %v12520_v14  ;;  %v7067_v14 = vld [vmem:[#allocation2 + $0xc0] sm:$0xff] }
 0x7bc   :  { %11644 = vmatprep.subr.bf16.mxu0 %v12521_v4 }
 0x7be   :  { %11613 = vmatmul.mubr.msk.bf16.gmra.mrb[36].mxu0 %vm77_vm0, %v15831_v59 }
 0x7bf   :  { %11616 = vmatprep.mubr.msk.bf16.mxu0 %vm77_vm0, %v7575_v52  ;;  %v7737_v52 = vrot.slane %v7067_v14, 7  ;;  %v17132_v14 = vrot.slane %v17127_v2, 1 }
 0x7c6   :  { %11617 = vmatmul.mubr.msk.bf16.gmra.mrb[40].mxu0 %vm77_vm0, %v15839_v26 }
 0x7c7   :  { %11620 = vmatprep.mubr.msk.bf16.mxu0 %vm77_vm0, %v15843_v49  ;;  %v7738_v49 = vrot.slane %v15662_v53, 7 }
 0x7c9   :  { %v7739_v1 = vsel %vm264_vm2, %v7737_v52, %v7738_v49  ;;  %v7741_v49 = vrot.slane %v15676_v21, 7 }
 0x7ca   :  { %v8253_v7 = vpack.c.bf16 %v17122_v45, %v7739_v1 }
 0x7ce   :  { %11621 = vmatmul.mubr.msk.bf16.gmra.mrb[44].mxu0 %vm77_vm0, %v15851_v18 }
 0x7cf   :  { %11628 = vmatprep.mubr.msk.bf16.mxu0 %vm77_vm0, %v7745_v13  ;;  %v7748_v13 = vpack.c.bf16 %v7739_v1, %v15764_v58 }
 0x7d6   :  { %11629 = vmatmul.mubr.msk.bf16.vlgmr.msra.gmra.mrb[32].mxu0 %vm77_vm0, %v7746_v48 }
 0x7d7   :  { %11645 = vmatpush3.bf16.msra.mxu0 %v12521_v4  ;;  %11632 = vmatprep.mubr.msk.bf16.mxu0 %vm77_vm0, %v7747_v16  ;;  %v7740_v4 = vrot.slane %v7097_v42, 7  ;;  %v17133_v16 = vld [vmem:[#allocation31_spill] sm:$0xff] }
 0x7d8   :  { %11646 = vmatprep.subr.bf16.mxu0 %v12522_v54 }
 0x7d9   :  { %v7742_v58 = vsel %vm264_vm2, %v7740_v4, %v7741_v49 }
 0x7da   :  { %v7752_v5 = vpack.c.bf16 %v7742_v58, %v7182_v37  ;;  %v8254_v31 = vpack.c.bf16 %v17123_v15, %v7742_v58  ;;  %v17135_v58 = vld [vmem:[#allocation18_spill] sm:$0xff] }
 0x7db   :  { %11647 = vmatpush3.bf16.msra.mxu0 %v12522_v54 }
 0x7dc   :  { %11664 = vmatprep.subr.bf16.mxu0 %v12523_v51 }
 0x7de   :  { %11633 = vmatmul.mubr.msk.bf16.gmra.mrb[36].mxu0 %vm77_vm0, %v7748_v13 }
 0x7df   :  { %11636 = vmatprep.mubr.msk.bf16.mxu0 %vm77_vm0, %v7749_v63 }
 0x7e6   :  { %11637 = vmatmul.mubr.msk.bf16.gmra.mrb[40].mxu0 %vm77_vm0, %v7750_v39 }
 0x7e7   :  { %11640 = vmatprep.mubr.msk.bf16.mxu0 %vm77_vm0, %v7751_v32 }
 0x7ee   :  { %11641 = vmatmul.mubr.msk.bf16.gmra.mrb[44].mxu0 %vm77_vm0, %v7752_v5  ;;  %v17136_v5 = vmax.f32 %v17135_v58, 0.0 }
 0x7ef   :  { %11648 = vmatprep.mubr.msk.bf16.mxu0 %vm77_vm0, %v17107_v35 }
 0x7f6   :  { %11649 = vmatmul.mubr.msk.bf16.vlgmr.msra.gmra.mrb[32].mxu0 %vm77_vm0, %v17108_v12  ;;  %v17137_v12 = vld [vmem:[#allocation17_spill] sm:$0xff] }
 0x7f7   :  { %11665 = vmatpush3.bf16.msra.mxu0 %v12523_v51  ;;  %11652 = vmatprep.mubr.msk.bf16.mxu0 %vm77_vm0, %v17109_v29  ;;  %v17138_v29 = vmax.f32 %v17137_v12, 0.0 }
 0x7f8   :  { %11666 = vmatprep.subr.bf16.mxu0 %v12524_v61 }
 0x7fb   :  { %11667 = vmatpush3.bf16.msra.mxu0 %v12524_v61 }
 0x7fc   :  { %11684 = vmatprep.subr.bf16.mxu0 %v12525_v56 }
 0x7fe   :  { %11653 = vmatmul.mubr.msk.bf16.gmra.mrb[36].mxu0 %vm77_vm0, %v7910_v22 }
 0x7ff   :  { %11656 = vmatprep.mubr.msk.bf16.mxu0 %vm77_vm0, %v17110_v8  ;;  %v16022_v8 = vld [vmem:[%s16594_s4] ss:$0 sm:$0xff] }
 0x806   :  { %11657 = vmatmul.mubr.msk.bf16.gmra.mrb[40].mxu0 %vm77_vm0, %v17111_v50 }
 0x807   :  { %11660 = vmatprep.mubr.msk.bf16.mxu0 %vm77_vm0, %v17112_v33  ;;  %v17139_v33 = vld [vmem:[#allocation30_spill] sm:$0xff] }
 0x80e   :  { %11661 = vmatmul.mubr.msk.bf16.gmra.mrb[44].mxu0 %vm77_vm0, %v7914_v34  ;;  %v17140_v34 = vmax.f32 %v17139_v33, 0.0 }
 0x80f   :  { %11668 = vmatprep.mubr.msk.bf16.mxu0 %vm77_vm0, %v17113_v44 }
 0x816   :  { %11669 = vmatmul.mubr.msk.bf16.vlgmr.msra.gmra.mrb[32].mxu0 %vm77_vm0, %v17114_v46  ;;  %v17141_v46 = vld [vmem:[#allocation41_spill] sm:$0xff] }
 0x817   :  { %11685 = vmatpush3.bf16.msra.mxu0 %v12525_v56  ;;  %11672 = vmatprep.mubr.msk.bf16.mxu0 %vm77_vm0, %v17115_v47  ;;  %v17142_v47 = vmax.f32 %v17141_v46, 0.0  ;;  %v17153_v46 = vld [vmem:[#allocation25_spill] sm:$0xff] }
 0x818   :  { %11686 = vmatprep.subr.bf16.mxu0 %v12526_v27 }
 0x81b   :  { %11687 = vmatpush3.bf16.msra.mxu0 %v12526_v27 }
 0x81c   :  { %11704 = vmatprep.subr.bf16.mxu0 %v12527_v55 }
 0x81e   :  { %11673 = vmatmul.mubr.msk.bf16.gmra.mrb[36].mxu0 %vm77_vm0, %v17116_v23 }
 0x81f   :  { %11676 = vmatprep.mubr.msk.bf16.mxu0 %vm77_vm0, %v17117_v0 }
 0x826   :  { %11677 = vmatmul.mubr.msk.bf16.gmra.mrb[40].mxu0 %vm77_vm0, %v17118_v43 }
 0x827   :  { %11680 = vmatprep.mubr.msk.bf16.mxu0 %vm77_vm0, %v17119_v62 }
 0x82e   :  { %11681 = vmatmul.mubr.msk.bf16.gmra.mrb[44].mxu0 %vm77_vm0, %v17120_v3 }
 0x82f   :  { %11688 = vmatprep.mubr.msk.bf16.mxu0 %vm77_vm0, %v15727_v10  ;;  %v17128_v10 = vld [vmem:[#allocation43_spill] sm:$0xff] }
 0x836   :  { %11689 = vmatmul.mubr.msk.bf16.vlgmr.msra.gmra.mrb[32].mxu0 %vm77_vm0, %v15743_v11  ;;  %v17130_v11 = vld [vmem:[#allocation45_spill] sm:$0xff] }
 0x837   :  { %11705 = vmatpush3.bf16.msra.mxu0 %v12527_v55  ;;  %11692 = vmatprep.mubr.msk.bf16.mxu0 %vm77_vm0, %v17121_v17 }
 0x838   :  { %11706 = vmatprep.subr.bf16.mxu0 %v12528_v38 }
 0x83b   :  { %11707 = vmatpush3.bf16.msra.mxu0 %v12528_v38 }
 0x83c   :  { %11724 = vmatprep.subr.bf16.mxu0 %v12529_v60 }
 0x83e   :  { %11693 = vmatmul.mubr.msk.bf16.gmra.mrb[36].mxu0 %vm77_vm0, %v8253_v7 }
 0x83f   :  { %11696 = vmatprep.mubr.msk.bf16.mxu0 %vm77_vm0, %v15789_v25  ;;  %v17131_v25 = vld [vmem:[#allocation35_spill] sm:$0xff] }
 0x846   :  { %11697 = vmatmul.mubr.msk.bf16.gmra.mrb[40].mxu0 %vm77_vm0, %v15796_v40  ;;  %v8392_v40 = vpack.c.bf16 %v17131_v25, %v15676_v21  ;;  %v7102_v21 = vld [vmem:[#allocation2 + $0x1d8] sm:$0x1] }
 0x847   :  { %11700 = vmatprep.mubr.msk.bf16.mxu0 %vm77_vm0, %v15809_v20  ;;  %v8391_v20 = vpack.c.bf16 %v17127_v2, %v15662_v53  ;;  %v7072_v53 = vld [vmem:[#allocation2 + $0xe8] sm:$0x1] }
 0x848   :  { %v8532_v37 = vrot.slane %v7072_v53, 1  ;;  %v17143_v2 = vld [vmem:[#allocation42_spill] sm:$0xff] }
 0x84a   :  { %v8533_v48 = vsel %vm636_vm3, %v17132_v14, %v8532_v37 }
 0x84b   :  { %v8539_v54 = vpack.c.bf16 %v8533_v48, %v15723_v28  ;;  %v12604_v28 = vmov 0  }
 0x84c   :  { %12439 = vset.pattern.permute.xlu0 %v12604_v28  ;;  %12440 = vset.pattern.permute.xlu1 %v12604_v28 }
 0x84e   :  { %11701 = vmatmul.mubr.msk.bf16.gmra.mrb[44].mxu0 %vm77_vm0, %v8254_v31 }
 0x84f   :  { %11708 = vmatprep.mubr.msk.bf16.mxu0 %vm77_vm0, %v17124_v57 }
 0x856   :  { %11709 = vmatmul.mubr.msk.bf16.vlgmr.msra.gmra.mrb[32].mxu0 %vm77_vm0, %v17125_v41 }
 0x857   :  { %11725 = vmatpush3.bf16.msra.mxu0 %v12529_v60  ;;  %11712 = vmatprep.mubr.msk.bf16.mxu0 %vm77_vm0, %v17126_v24 }
 0x858   :  { %11726 = vmatprep.subr.bf16.mxu0 %v12530_v36 }
 0x85b   :  { %11727 = vmatpush3.bf16.msra.mxu0 %v12530_v36 }
 0x85e   :  { %11713 = vmatmul.mubr.msk.bf16.gmra.mrb[36].mxu0 %vm77_vm0, %v8391_v20  ;;  %v17144_v20 = vmax.f32 %v17143_v2, 0.0 }
 0x85f   :  { %11716 = vmatprep.mubr.msk.bf16.mxu0 %vm77_vm0, %v17128_v10 }
 0x866   :  { %11717 = vmatmul.mubr.msk.bf16.gmra.mrb[40].mxu0 %vm77_vm0, %v17129_v6 }
 0x867   :  { %11720 = vmatprep.mubr.msk.bf16.mxu0 %vm77_vm0, %v17130_v11 }
 0x86e   :  { %11721 = vmatmul.mubr.msk.bf16.gmra.mrb[44].mxu0 %vm77_vm0, %v8392_v40 }
 0x86f   :  { %11728 = vmatprep.mubr.msk.bf16.mxu0 %vm77_vm0, %v15817_v30  ;;  %v8535_v30 = vrot.slane %v7102_v21, 1 }
 0x876   :  { %11729 = vmatmul.mubr.msk.bf16.vlgmr.msra.gmra.mrb[32].mxu0 %vm77_vm0, %v15821_v9  ;;  %v17134_v9 = vrot.slane %v17131_v25, 1  ;;  %v17145_v25 = vld [vmem:[#allocation21_spill] sm:$0xff] }
 0x877   :  { %11732 = vmatprep.mubr.msk.bf16.mxu0 %vm77_vm0, %v15831_v59  ;;  %v17146_v40 = vmax.f32 %v17145_v25, 0.0 }
 0x878   :  { %v8536_v59 = vsel %vm636_vm3, %v17134_v9, %v8535_v30  ;;  %v17149_v9 = vld [vmem:[#allocation24_spill] sm:$0xff] }
 0x879   :  { %v8540_v52 = vpack.c.bf16 %v8536_v59, %v15739_v19  ;;  %v17150_v59 = vmax.f32 %v17149_v9, 0.0  ;;  %v17159_v9 = vld [vmem:[#allocation29_spill] sm:$0xff] }
 0x87e   :  { %11733 = vmatmul.mubr.msk.bf16.gmra.mrb[36].mxu0 %vm77_vm0, %v8539_v54  ;;  %v17147_v54 = vld [vmem:[#allocation46_spill] sm:$0xff] }
 0x87f   :  { %11736 = vmatprep.mubr.msk.bf16.mxu0 %vm77_vm0, %v15839_v26  ;;  %v16000_v26 = vld [vmem:[%s16592_s2 + $0x4] ss:$0 sm:$0xff]  ;;  %v17148_v21 = vmax.f32 %v17147_v54, 0.0 }
 0x886   :  { %11737 = vmatmul.mubr.msk.bf16.gmra.mrb[40].mxu0 %vm77_vm0, %v17133_v16 }
 0x887   :  { %11740 = vmatprep.mubr.msk.bf16.mxu0 %vm77_vm0, %v15851_v18  ;;  %v16005_v18 = vld [vmem:[%s16593_s3 + $0x4] ss:$0 sm:$0xff] }
 0x88e   :  { %11741 = vmatmul.mubr.msk.bf16.gmra.mrb[44].mxu0 %vm77_vm0, %v8540_v52 }
 0x949   :  { %v11730_v51 = vpop.f32.mrb[32].mxu0 }
 0x94a   :  { %v8687_v1 = vmul.f32 %v11730_v51, %v16000_v26  ;;  %v8598_v13 = vpop.f32.mrb[33].mxu0 }
 0x94b   :  { %v8685_v19 = vmul.f32 %v16000_v26, %v8598_v13  ;;  %v11731_v63 = vpop.f32.mrb[34].mxu0 }
 0x94c   :  { %v8711_v42 = vadd.f32 %v16005_v18, %v8687_v1  ;;  %v8688_v39 = vmul.f32 %v11731_v63, %v16000_v26  ;;  %v8601_v32 = vpop.f32.mrb[35].mxu0 }
 0x94d   :  { %v8709_v4 = vadd.f32 %v16005_v18, %v8685_v19  ;;  %v8686_v49 = vmul.f32 %v16000_v26, %v8601_v32 }
 0x94e   :  { %v8727_v35 = vadd.f32 %v8711_v42, %v17136_v5  ;;  %v8712_v61 = vadd.f32 %v16005_v18, %v8688_v39 }
 0x94f   :  { %v8725_v56 = vadd.f32 %v8709_v4, %v17138_v29  ;;  %v8710_v22 = vadd.f32 %v16005_v18, %v8686_v49  ;;  %v17151_v29 = vld [vmem:[#allocation12_spill] sm:$0xff] }
 0x950   :  { %v16024_v50 = vmax.f32 %v8727_v35, 0.0  ;;  %v8728_v44 = vadd.f32 %v8712_v61, %v17140_v34 }
 0x951   :  { %v16028_v27 = vmax.f32 %v8725_v56, 0.0  ;;  %v8726_v55 = vadd.f32 %v8710_v22, %v17142_v47  ;;  %v11734_v23 = vpop.f32.mrb[36].mxu0  ;;  %v17152_v56 = vmax.f32 %v17151_v29, 0.0  ;;  %v17154_v47 = vmax.f32 %v17153_v46, 0.0  ;;  %v17165_v29 = vld [vmem:[#allocation19_spill] sm:$0xff] }
 0x952   :  { %v16032_v0 = vmax.f32 %v8728_v44, 0.0  ;;  %v8691_v43 = vmul.f32 %v11734_v23, %v16000_v26  ;;  %v8614_v62 = vpop.f32.mrb[37].mxu0  ;;  %v8766_v3 = vmul.f32 %v16022_v8, %v16024_v50 }
 0x953   :  { %v16037_v38 = vmax.f32 %v8726_v55, 0.0  ;;  %v8689_v17 = vmul.f32 %v16000_v26, %v8614_v62  ;;  %v11735_v60 = vpop.f32.mrb[38].mxu0  ;;  %v8764_v45 = vmul.f32 %v16022_v8, %v16028_v27  ;;  %v17155_v62 = vld [vmem:[#allocation23_spill] sm:$0xff] }
 0x954   :  { %v8715_v7 = vadd.f32 %v16005_v18, %v8691_v43  ;;  %v8692_v15 = vmul.f32 %v11735_v60, %v16000_v26  ;;  %v8617_v31 = vpop.f32.mrb[39].mxu0  ;;  %v8786_v57 = vsel %vm77_vm0, %v8766_v3, 0.0  ;;  %v8767_v36 = vmul.f32 %v16022_v8, %v16032_v0 }
 0x955   :  { %v8713_v41 = vadd.f32 %v16005_v18, %v8689_v17  ;;  %v8690_v24 = vmul.f32 %v16000_v26, %v8617_v31  ;;  %8787 = vadd.xlane.f32.xlu0 %v8786_v57  ;;  %v8765_v14 = vmul.f32 %v16022_v8, %v16037_v38  ;;  %v8780_v16 = vsel %vm77_vm0, %v8764_v45, 0.0 }
 0x956   :  { %v8731_v10 = vadd.f32 %v8715_v7, %v17144_v20  ;;  %v8716_v6 = vadd.f32 %v16005_v18, %v8692_v15  ;;  %v8789_v11 = vsel %vm77_vm0, %v8767_v36, 0.0  ;;  %v17156_v3 = vmax.f32 %v17155_v62, 0.0  ;;  %v17157_v15 = vld [vmem:[#allocation27_spill] sm:$0xff] }
 0x957   :  { %v8729_v53 = vadd.f32 %v8713_v41, %v17146_v40  ;;  %v8714_v37 = vadd.f32 %v16005_v18, %v8690_v24  ;;  %8790 = vadd.xlane.f32.xlu1 %v8789_v11  ;;  %v8783_v32 = vsel %vm77_vm0, %v8765_v14, 0.0  ;;  %v17158_v31 = vmax.f32 %v17157_v15, 0.0  ;;  %v12531_v15 = vld [vmem:[%s16596_s7] sm:$0xff]  }
 0x958   :  { %v16058_v48 = vmax.f32 %v8731_v10, 0.0  ;;  %v8732_v30 = vadd.f32 %v8716_v6, %v17148_v21  ;;  %11745 = vmatpush3.bf16.msra.mxu1 %v12531_v15 }
 0x959   :  { %v8730_v52 = vadd.f32 %v8714_v37, %v17150_v59  ;;  %8781 = vadd.xlane.f32.xlu0 %v8780_v16  ;;  %v11738_v28 = vpop.f32.mrb[40].mxu0  ;;  %v16068_v19 = vmax.f32 %v8729_v53, 0.0  ;;  %v17160_v59 = vmax.f32 %v17159_v9, 0.0 }
 0x95a   :  { %v16065_v51 = vmax.f32 %v8732_v30, 0.0  ;;  %v8695_v1 = vmul.f32 %v11738_v28, %v16000_v26  ;;  %v8630_v13 = vpop.f32.mrb[41].mxu0  ;;  %v8770_v35 = vmul.f32 %v16022_v8, %v16058_v48 }
 0x95b   :  { %v16070_v63 = vmax.f32 %v8730_v52, 0.0  ;;  %v8693_v42 = vmul.f32 %v16000_v26, %v8630_v13  ;;  %v11739_v39 = vpop.f32.mrb[42].mxu0  ;;  %v8768_v45 = vmul.f32 %v16022_v8, %v16068_v19  ;;  %v17161_v13 = vld [vmem:[#allocation14_spill] sm:$0xff] }
 0x95c   :  { %v8719_v4 = vadd.f32 %v16005_v18, %v8695_v1  ;;  %v8696_v49 = vmul.f32 %v11739_v39, %v16000_v26  ;;  %v8633_v58 = vpop.f32.mrb[43].mxu0  ;;  %v8771_v5 = vmul.f32 %v16022_v8, %v16065_v51  ;;  %v8798_v60 = vsel %vm77_vm0, %v8770_v35, 0.0 }
 0x95d   :  { %v8717_v61 = vadd.f32 %v16005_v18, %v8693_v42  ;;  %v8694_v12 = vmul.f32 %v16000_v26, %v8633_v58  ;;  %8784 = vadd.xlane.f32.xlu0 %v8783_v32  ;;  %v8769_v44 = vmul.f32 %v16022_v8, %v16070_v63  ;;  %v8792_v37 = vsel %vm77_vm0, %v8768_v45, 0.0 }
 0x95e   :  { %v8735_v22 = vadd.f32 %v8719_v4, %v17152_v56  ;;  %v8720_v33 = vadd.f32 %v16005_v18, %v8696_v49  ;;  %v8801_v34 = vsel %vm77_vm0, %v8771_v5, 0.0  ;;  %v17162_v42 = vmax.f32 %v17161_v13, 0.0 }
 0x95f   :  { %v8733_v55 = vadd.f32 %v8717_v61, %v17154_v47  ;;  %v8718_v23 = vadd.f32 %v16005_v18, %v8694_v12  ;;  %8802 = vadd.xlane.f32.xlu1 %v8801_v34  ;;  %v8795_v20 = vsel %vm77_vm0, %v8769_v44, 0.0  ;;  %v17166_v56 = vmax.f32 %v17165_v29, 0.0 }
 0x960   :  { %v16091_v43 = vmax.f32 %v8735_v22, 0.0  ;;  %v8736_v17 = vadd.f32 %v8720_v33, %v17156_v3 }
 0x961   :  { %v16098_v7 = vmax.f32 %v8733_v55, 0.0  ;;  %v8734_v57 = vadd.f32 %v8718_v23, %v17158_v31  ;;  %8799 = vadd.xlane.f32.xlu0 %v8798_v60  ;;  %v11742_v36 = vpop.f32.mrb[44].mxu0  ;;  %v17167_v31 = vmov 0.0  }
 0x962   :  { %v16102_v41 = vmax.f32 %v8736_v17, 0.0  ;;  %v8699_v24 = vmul.f32 %v11742_v36, %v16000_v26  ;;  %v8646_v2 = vpop.f32.mrb[45].mxu0  ;;  %v8774_v14 = vmul.f32 %v16022_v8, %v16091_v43  ;;  %v16158_v17 = vld [vmem:[%s16599_s11 + $0x1] ss:$0 sm:$0xff]  ;;  %11746 = vmatprep.subr.bf16.mxu1 %v17167_v31  ;;  %11752 = vmatprep.mubr.msk.bf16.mxu1 %vm12605_vm4, %v17167_v31 }
 0x963   :  { %v8697_v10 = vmul.f32 %v16000_v26, %v8646_v2  ;;  %8796 = vadd.xlane.f32.xlu1 %v8795_v20  ;;  %v11743_v6 = vpop.f32.mrb[46].mxu0  ;;  %v8772_v11 = vmul.f32 %v16022_v8, %v16098_v7  ;;  %v16114_v54 = vmax.f32 %v8734_v57, 0.0  ;;  %v12532_v57 = vld [vmem:[%s16596_s7 + $0x8] sm:$0xff]   ;;  %v10345_v36 = vld [vmem:[#allocation4] ss:$0 sm:$0xff]  ;;  %v12534_v2 = vld [vmem:[%s16596_s7 + $0x18] sm:$0xff]   ;;  %v9343_v20 = vmul.f32 %v16158_v17, %v16037_v38 }
 0x964   :  { %v8723_v25 = vadd.f32 %v16005_v18, %v8699_v24  ;;  %v8700_v40 = vmul.f32 %v11743_v6, %v16000_v26  ;;  %v8649_v53 = vpop.f32.mrb[47].mxu0  ;;  %v8775_v1 = vmul.f32 %v16022_v8, %v16102_v41  ;;  %v8810_v5 = vsel %vm77_vm0, %v8774_v14, 0.0  ;;  %11747 = vmatpush3.bf16.msra.mxu1 %v12532_v57  ;;  %v12533_v24 = vld [vmem:[%s16596_s7 + $0x10] sm:$0xff]  }
 0x965   :  { %v8721_v21 = vadd.f32 %v16005_v18, %v8697_v10  ;;  %v8698_v30 = vmul.f32 %v16000_v26, %v8649_v53  ;;  %8793 = vadd.xlane.f32.xlu0 %v8792_v37  ;;  %v8804_v16 = vsel %vm77_vm0, %v8772_v11, 0.0  ;;  %v17163_v26 = vld [vmem:[#allocation15_spill] sm:$0xff]  ;;  %v8773_v61 = vmul.f32 %v16022_v8, %v16114_v54  ;;  %11748 = vmatprep.subr.bf16.mxu1 %v17167_v31 }
 0x966   :  { %v8739_v52 = vadd.f32 %v8723_v25, %v17160_v59  ;;  %v8724_v28 = vadd.f32 %v16005_v18, %v8700_v40  ;;  %v17164_v49 = vmax.f32 %v17163_v26, 0.0  ;;  %v9361_v10 = vsel %vm77_vm0, %v9343_v20, 0.0 }
 0x967   :  { %v8737_v39 = vadd.f32 %v8721_v21, %v17162_v42  ;;  %v8722_v32 = vadd.f32 %v16005_v18, %v8698_v30  ;;  %8805 = vadd.xlane.f32.xlu1 %v8804_v16  ;;  %v8813_v18 = vsel %vm77_vm0, %v8775_v1, 0.0  ;;  %v8807_v47 = vsel %vm77_vm0, %v8773_v61, 0.0 }
 0x968   :  { %v16127_v4 = vmax.f32 %v8739_v52, 0.0  ;;  %v8740_v58 = vadd.f32 %v8724_v28, %v17164_v49  ;;  %11749 = vmatpush3.bf16.msra.mxu1 %v12533_v24  ;;  %v9346_v6 = vmul.f32 %v16158_v17, %v16068_v19  ;;  %v9342_v11 = vmul.f32 %v16158_v17, %v16028_v27 }
 0x969   :  { %v16132_v35 = vmax.f32 %v8737_v39, 0.0  ;;  %8811 = vadd.xlane.f32.xlu0 %v8810_v5  ;;  %v8738_v22 = vadd.f32 %v8722_v32, %v17166_v56  ;;  %11750 = vmatprep.subr.bf16.mxu1 %v17167_v31  ;;  %v9350_v37 = vmul.f32 %v16158_v17, %v16098_v7  ;;  %v9348_v21 = vmul.f32 %v16158_v17, %v16058_v48  ;;  %v10362_v56 = vld [vmem:[%s16600_s12 + $0x1] ss:$0 sm:$0xff] }
 0x96a   :  { %v16136_v12 = vmax.f32 %v8740_v58, 0.0  ;;  %v8778_v33 = vmul.f32 %v16022_v8, %v16127_v4  ;;  %v9370_v25 = vsel %vm77_vm0, %v9346_v6, 0.0  ;;  %v9358_v53 = vsel %vm77_vm0, %v9342_v11, 0.0 }
 0x96b   :  { %8814 = vadd.xlane.f32.xlu1 %v8813_v18  ;;  %v8776_v44 = vmul.f32 %v16022_v8, %v16132_v35  ;;  %v16146_v46 = vmax.f32 %v8738_v22, 0.0  ;;  %v9354_v40 = vmul.f32 %v16158_v17, %v16132_v35  ;;  %v9382_v30 = vsel %vm77_vm0, %v9350_v37, 0.0 }
 0x96c   :  { %v8822_v34 = vsel %vm77_vm0, %v8778_v33, 0.0  ;;  %v8779_v55 = vmul.f32 %v16022_v8, %v16136_v12  ;;  %11751 = vmatpush3.bf16.msra.mxu1 %v12534_v2  ;;  %v9351_v16 = vmul.f32 %v16158_v17, %v16114_v54  ;;  %v9376_v9 = vsel %vm77_vm0, %v9348_v21, 0.0 }
 0x96d   :  { %8823 = vadd.xlane.f32.xlu0 %v8822_v34  ;;  %v8816_v23 = vsel %vm77_vm0, %v8776_v44, 0.0  ;;  %v8777_v3 = vmul.f32 %v16022_v8, %v16146_v46  ;;  %v16162_v60 = vmul.f32 %v16158_v17, %v16146_v46  ;;  %v10344_v8 = vld [vmem:[#allocation3] ss:$0 sm:$0xff]  ;;  %11756 = vmatprep.subr.bf16.mxu1 %v17167_v31  ;;  %v9394_v14 = vsel %vm77_vm0, %v9354_v40, 0.0  ;;  %v10364_v34 = vld [vmem:[%s16601_s13 + $0x1] ss:$0 sm:$0xff] }
 0x96e   :  { %v8825_v62 = vsel %vm77_vm0, %v8779_v55, 0.0  ;;  %v9356_v59 = vmul.f32 %v16158_v17, %v16127_v4  ;;  %v9385_v52 = vsel %vm77_vm0, %v9351_v16, 0.0  ;;  %v9344_v28 = vmul.f32 %v16158_v17, %v16024_v50 }
 0x96f   :  { %8808 = vadd.xlane.f32.xlu1 %v8807_v47  ;;  %v8819_v45 = vsel %vm77_vm0, %v8777_v3, 0.0  ;;  %v9345_v42 = vmul.f32 %v16158_v17, %v16032_v0  ;;  %v9352_v32 = vmul.f32 %v16158_v17, %v16091_v43  ;;  %v9353_v49 = vmul.f32 %v16158_v17, %v16102_v41  ;;  %v10356_v47 = vld [vmem:[%s16599_s11] ss:$0 sm:$0xff] }
 0x970   :  { %v9400_v1 = vsel %vm77_vm0, %v9356_v59, 0.0  ;;  %v9364_v13 = vsel %vm77_vm0, %v9344_v28, 0.0  ;;  %v9347_v5 = vmul.f32 %v16158_v17, %v16070_v63  ;;  %v9349_v29 = vmul.f32 %v16158_v17, %v16065_v51 }
 0x971   :  { %8817 = vadd.xlane.f32.xlu0 %v8816_v23  ;;  %v9367_v39 = vsel %vm77_vm0, %v9345_v42, 0.0  ;;  %v9388_v26 = vsel %vm77_vm0, %v9352_v32, 0.0  ;;  %v9391_v58 = vsel %vm77_vm0, %v9353_v49, 0.0  ;;  %v9357_v18 = vmul.f32 %v16158_v17, %v16136_v12 }
 0x972   :  { %v9373_v61 = vsel %vm77_vm0, %v9347_v5, 0.0  ;;  %v9379_v22 = vsel %vm77_vm0, %v9349_v29, 0.0  ;;  %v9187_v23 = vmul.f32 %v10356_v47, %v16037_v38  ;;  %v9196_v20 = vmul.f32 %v10356_v47, %v16091_v43 }
 0x973   :  { %8826 = vadd.xlane.f32.xlu1 %v8825_v62  ;;  %v9403_v33 = vsel %vm77_vm0, %v9357_v18, 0.0  ;;  %v9190_v11 = vmul.f32 %v10356_v47, %v16068_v19  ;;  %v9192_v43 = vmul.f32 %v10356_v47, %v16058_v48  ;;  %v9200_v19 = vmul.f32 %v10356_v47, %v16127_v4 }
 0x974   :  { %v9205_v17 = vsel %vm77_vm0, %v9187_v23, 0.0  ;;  %v9189_v59 = vmul.f32 %v10356_v47, %v16032_v0  ;;  %v9191_v28 = vmul.f32 %v10356_v47, %v16070_v63  ;;  %v16288_v49 = vmul.f32 %v10356_v47, %v16146_v46 }
 0x975   :  { %v9214_v40 = vsel %vm77_vm0, %v9190_v11, 0.0  ;;  %v9220_v42 = vsel %vm77_vm0, %v9192_v43, 0.0  ;;  %v9244_v0 = vsel %vm77_vm0, %v9200_v19, 0.0 }
 0x977   :  { %8820 = vadd.xlane.f32.xlu1 %v8819_v45  ;;  %v9194_v45 = vmul.f32 %v10356_v47, %v16098_v7  ;;  %v9232_v7 = vsel %vm77_vm0, %v9196_v20, 0.0 }
 0x979   :  { %v9226_v57 = vsel %vm77_vm0, %v9194_v45, 0.0 }
 0x987   :  { %8835 = vperm.xlu0 %12439, %v10344_v8  }
 0x988   :  { %8861 = vperm.xlu1 %12440, %v10345_v36   ;;  %v9188_v36 = vmul.f32 %v10356_v47, %v16024_v50  ;;  %v9198_v50 = vmul.f32 %v10356_v47, %v16132_v35  ;;  %v9197_v35 = vmul.f32 %v10356_v47, %v16102_v41 }
 0x98a   :  { %v9208_v2 = vsel %vm77_vm0, %v9188_v36, 0.0  ;;  %v9238_v21 = vsel %vm77_vm0, %v9198_v50, 0.0  ;;  %v9235_v63 = vsel %vm77_vm0, %v9197_v35, 0.0 }
 0x9a6   :  { %9362 = vadd.xlane.f32.xlu0 %v9361_v10 }
 0x9aa   :  { %9371 = vadd.xlane.f32.xlu0 %v9370_v25 }
 0x9ac   :  { %9359 = vadd.xlane.f32.xlu1 %v9358_v53  ;;  %v8943_v53 = vlaneseq }
 0x9ae   :  { %9395 = vadd.xlane.f32.xlu0 %v9394_v14  ;;  %v8944_v16 = vand.u32 127, %v8943_v53  ;;  %v16270_v48 = vshrl.u32 %v8943_v53, 7 }
 0x9b0   :  { %9383 = vadd.xlane.f32.xlu1 %v9382_v30  ;;  %v9186_v30 = vmul.f32 %v10356_v47, %v16028_v27  ;;  %v8956_v5 = vadd.s32 4294967280, %v8944_v16  ;;  %v16293_v29 = vadd.s32 4294967264, %v8944_v16  ;;  %v16298_v18 = vadd.s32 4294967256, %v8944_v16 }
 0x9b2   :  { %9377 = vadd.xlane.f32.xlu0 %v9376_v9  ;;  %v9195_v9 = vmul.f32 %v10356_v47, %v16114_v54  ;;  %v9202_v4 = vsel %vm77_vm0, %v9186_v30, 0.0  ;;  %v9211_v54 = vsel %vm77_vm0, %v9189_v59, 0.0 }
 0x9b4   :  { %9386 = vadd.xlane.f32.xlu1 %v9385_v52  ;;  %v9229_v41 = vsel %vm77_vm0, %v9195_v9, 0.0 }
 0x9b6   :  { %9401 = vadd.xlane.f32.xlu0 %v9400_v1  ;;  %v9193_v1 = vmul.f32 %v10356_v47, %v16065_v51 }
 0x9b8   :  { %9365 = vadd.xlane.f32.xlu1 %v9364_v13  ;;  %v9201_v13 = vmul.f32 %v10356_v47, %v16136_v12  ;;  %v16279_v12 = vsel %vm77_vm0, %v9191_v28, 0.0  ;;  %v16282_v32 = vsel %vm77_vm0, %v9193_v1, 0.0 }
 0x9bc   :  { %9368 = vadd.xlane.f32.xlu1 %v9367_v39  ;;  %v8949_v39 = vadd.s32 4294967288, %v8944_v16 }
 0x9c0   :  { %9389 = vadd.xlane.f32.xlu1 %v9388_v26  ;;  %v16285_v26 = vsel %vm77_vm0, %v9201_v13, 0.0 }
 0x9c4   :  { %9392 = vadd.xlane.f32.xlu1 %v9391_v58  ;;  %v16291_v58 = vsub.s32 %v8944_v16, %v16270_v48 }
 0x9c8   :  { %9374 = vadd.xlane.f32.xlu1 %v9373_v61  ;;  %v8963_v61 = vadd.s32 4294967272, %v8944_v16 }
 0x9cc   :  { %9414 = vperm.xlu0 %12439, %v10362_v56   ;;  %9380 = vadd.xlane.f32.xlu1 %v9379_v22  ;;  %v16296_v22 = vsub.s32 %v8949_v39, %v16270_v48 }
 0x9d0   :  { %9404 = vadd.xlane.f32.xlu1 %v9403_v33  ;;  %v16300_v33 = vadd.s32 4294967248, %v8944_v16 }
 0x9e1   :  { %9441 = vperm.xlu1 %12440, %v10364_v34   ;;  %v16302_v34 = vadd.s32 4294967240, %v8944_v16 }
 0x9e2   :  { %v16234_v44 = vpop.xlane.xlu0 %8787 }
 0x9e4   :  { %v16242_v62 = vpop.xlane.xlu1 %8790 }
 0x9e6   :  { %v16239_v55 = vpop.xlane.xlu0 %8781 }
 0x9ea   :  { %v16244_v3 = vpop.xlane.xlu0 %8784 }
 0x9eb   :  { %9206 = vadd.xlane.f32.xlu0 %v9205_v17 }
 0x9ec   :  { %v16248_v15 = vpop.xlane.xlu1 %8802 }
 0x9ee   :  { %v16250_v8 = vpop.xlane.xlu0 %8799 }
 0x9ef   :  { %9227 = vadd.xlane.f32.xlu0 %v9226_v57 }
 0x9f0   :  { %v8797_v24 = vpop.xlane.xlu1 %8796 }
 0x9f2   :  { %v8794_v38 = vpop.xlane.xlu0 %8793 }
 0x9f3   :  { %9209 = vadd.xlane.f32.xlu0 %v9208_v2 }
 0x9f4   :  { %v8806_v10 = vpop.xlane.xlu1 %8805 }
 0x9f6   :  { %v8812_v6 = vpop.xlane.xlu0 %8811 }
 0x9f7   :  { %9233 = vadd.xlane.f32.xlu0 %v9232_v7 }
 0x9f8   :  { %v8815_v25 = vpop.xlane.xlu1 %8814 }
 0x9fa   :  { %v8824_v37 = vpop.xlane.xlu0 %8823 }
 0x9fb   :  { %9215 = vadd.xlane.f32.xlu0 %v9214_v40 }
 0x9fc   :  { %v8809_v14 = vpop.xlane.xlu1 %8808 }
 0x9fe   :  { %v8818_v27 = vpop.xlane.xlu0 %8817 }
 0x9ff   :  { %9239 = vadd.xlane.f32.xlu0 %v9238_v21 }
 0xa00   :  { %v8827_v52 = vpop.xlane.xlu1 %8826 }
 0xa03   :  { %9221 = vadd.xlane.f32.xlu0 %v9220_v42 }
 0xa04   :  { %v8821_v51 = vpop.xlane.xlu1 %8820 }
 0xa05   :  { %9203 = vadd.xlane.f32.xlu1 %v9202_v4 }
 0xa06   :  { %v8836_v56 = vpop.permute.xlu0 %8835 }
 0xa07   :  { %9245 = vadd.xlane.f32.xlu0 %v9244_v0  ;;  %v8838_v46 = vmul.f32 %v8836_v56, %v16239_v55  ;;  %v8839_v47 = vmul.f32 %v8836_v56, %v16244_v3  ;;  %v8840_v23 = vmul.f32 %v8836_v56, %v16234_v44  ;;  %v8841_v17 = vmul.f32 %v8836_v56, %v16242_v62 }
 0xa08   :  { %v8862_v45 = vpop.permute.xlu1 %8861  ;;  %v8842_v57 = vmul.f32 %v8836_v56, %v8794_v38  ;;  %v8843_v36 = vmul.f32 %v8836_v56, %v8797_v24  ;;  %v8844_v2 = vmul.f32 %v8836_v56, %v16250_v8  ;;  %v8845_v20 = vmul.f32 %v8836_v56, %v16248_v15 }
 0xa09   :  { %9230 = vadd.xlane.f32.xlu1 %v9229_v41  ;;  %v8846_v7 = vmul.f32 %v8836_v56, %v8806_v10  ;;  %v8847_v11 = vmul.f32 %v8836_v56, %v8809_v14  ;;  %v8848_v40 = vmul.f32 %v8836_v56, %v8812_v6  ;;  %v8849_v50 = vmul.f32 %v8836_v56, %v8815_v25 }
 0xa0a   :  { %v8850_v53 = vmul.f32 %v8836_v56, %v8818_v27  ;;  %v8851_v55 = vmul.f32 %v8836_v56, %v8821_v51  ;;  %v8852_v21 = vmul.f32 %v8836_v56, %v8824_v37  ;;  %v8853_v3 = vmul.f32 %v8836_v56, %v8827_v52 }
 0xa0b   :  { %v8864_v43 = vadd.f32 %v8862_v45, %v8838_v46  ;;  %v8865_v44 = vadd.f32 %v8862_v45, %v8839_v47  ;;  %v8866_v30 = vadd.f32 %v8862_v45, %v8840_v23  ;;  %v8867_v62 = vadd.f32 %v8862_v45, %v8841_v17 }
 0xa0c   :  { %v8868_v16 = vadd.f32 %v8862_v45, %v8842_v57  ;;  %v8869_v38 = vadd.f32 %v8862_v45, %v8843_v36  ;;  %v8870_v24 = vadd.f32 %v8862_v45, %v8844_v2  ;;  %v8871_v19 = vadd.f32 %v8862_v45, %v8845_v20 }
 0xa0d   :  { %9212 = vadd.xlane.f32.xlu1 %v9211_v54  ;;  %v8872_v8 = vadd.f32 %v8862_v45, %v8846_v7  ;;  %v8873_v15 = vadd.f32 %v8862_v45, %v8847_v11  ;;  %v8874_v9 = vadd.f32 %v8862_v45, %v8848_v40  ;;  %v8875_v10 = vadd.f32 %v8862_v45, %v8849_v50 }
 0xa0e   :  { %v8876_v14 = vadd.f32 %v8862_v45, %v8850_v53  ;;  %v8877_v6 = vadd.f32 %v8862_v45, %v8851_v55  ;;  %v8878_v25 = vadd.f32 %v8862_v45, %v8852_v21  ;;  %v8879_v59 = vadd.f32 %v8862_v45, %v8853_v3 }
 0xa0f   :  { %v8880_v35 = vmax.f32 %v8864_v43, 0.0  ;;  %v8881_v37 = vmax.f32 %v8865_v44, 0.0  ;;  %v8882_v52 = vmax.f32 %v8866_v30, 0.0  ;;  %v8883_v28 = vmax.f32 %v8867_v62, 0.0 }
 0xa10   :  { %v8884_v1 = vmax.f32 %v8868_v16, 0.0  ;;  %v8885_v13 = vmax.f32 %v8869_v38, 0.0  ;;  %v8886_v27 = vmax.f32 %v8870_v24, 0.0  ;;  %v8887_v42 = vmax.f32 %v8871_v19, 0.0  ;;  %v10357_v38 = vld [vmem:[%s16600_s12] ss:$0 sm:$0xff] }
 0xa11   :  { %9236 = vadd.xlane.f32.xlu1 %v9235_v63  ;;  %v8888_v4 = vmax.f32 %v8872_v8, 0.0  ;;  %v8889_v39 = vmax.f32 %v8873_v15, 0.0  ;;  %v8890_v0 = vmax.f32 %v8874_v9, 0.0  ;;  %v8891_v41 = vmax.f32 %v8875_v10, 0.0 }
 0xa12   :  { %v8892_v54 = vmax.f32 %v8876_v14, 0.0  ;;  %v8893_v51 = vmax.f32 %v8877_v6, 0.0  ;;  %v16311_v56 = vsub.s32 %v8956_v5, %v16270_v48  ;;  %v16314_v46 = vsub.s32 %v8963_v61, %v16270_v48 }
 0xa13   :  { %v8894_v47 = vmax.f32 %v8878_v25, 0.0  ;;  %v8895_v23 = vmax.f32 %v8879_v59, 0.0  ;;  %v8896_v17 = vpack.c.bf16 %v8881_v37, %v8880_v35  ;;  %v8897_v45 = vpack.c.bf16 %v8883_v28, %v8882_v52 }
 0xa14   :  { %v8898_v63 = vpack.c.bf16 %v8885_v13, %v8884_v1  ;;  %v8899_v57 = vpack.c.bf16 %v8887_v42, %v8886_v27  ;;  %v8900_v36 = vpack.c.bf16 %v8889_v39, %v8888_v4  ;;  %v8901_v2 = vpack.c.bf16 %v8891_v41, %v8890_v0 }
 0xa15   :  { %9218 = vadd.xlane.f32.xlu1 %v16279_v12  ;;  %v8927_v20 = vunpack.c.l.b16 %v8896_v17  ;;  %v8928_v7 = vunpack.c.h.b16 %v8896_v17  ;;  %v8929_v5 = vunpack.c.l.b16 %v8897_v45  ;;  %v16319_v61 = vsub.s32 %v16293_v29, %v16270_v48 }
 0xa16   :  { %v8902_v11 = vpack.c.bf16 %v8893_v51, %v8892_v54  ;;  %v8930_v40 = vunpack.c.h.b16 %v8897_v45  ;;  %v16323_v50 = vsub.s32 %v16298_v18, %v16270_v48  ;;  %v16327_v53 = vsub.s32 %v16300_v33, %v16270_v48 }
 0xa17   :  { %v8935_v12 = vunpack.c.l.b16 %v8900_v36  ;;  %v8936_v55 = vunpack.c.h.b16 %v8900_v36  ;;  %v8937_v21 = vunpack.c.l.b16 %v8901_v2  ;;  %v16331_v3 = vsub.s32 %v16302_v34, %v16270_v48 }
 0xa18   :  { %v8903_v29 = vpack.c.bf16 %v8895_v23, %v8894_v47  ;;  %v8931_v43 = vunpack.c.l.b16 %v8898_v63  ;;  %v8932_v44 = vunpack.c.h.b16 %v8898_v63  ;;  %v8933_v30 = vunpack.c.l.b16 %v8899_v57 }
 0xa19   :  { %9224 = vadd.xlane.f32.xlu1 %v16282_v32  ;;  %v8938_v18 = vunpack.c.h.b16 %v8901_v2  ;;  %v8948_v62 = vrot.slane %v8927_v20, %v16291_v58  ;;  %v8953_v33 = vrot.slane %v8928_v7, %v16296_v22  ;;  %v8960_v16 = vrot.slane %v8929_v5, %v16311_v56  ;;  %v12535_v20 = vld [vmem:[%s16598_s9] sm:$0xff]  }
 0xa1a   :  { %v8934_v24 = vunpack.c.h.b16 %v8899_v57  ;;  %v8939_v48 = vunpack.c.l.b16 %v8902_v11  ;;  %v8940_v34 = vunpack.c.h.b16 %v8902_v11  ;;  %v8967_v19 = vrot.slane %v8930_v40, %v16314_v46 }
 0xa1b   :  { %v8955_v8 = vsel %vm8954_vm5, %v8953_v33, %v8948_v62  ;;  %v9001_v32 = vrot.slane %v8935_v12, %v16291_v58  ;;  %v9005_v15 = vrot.slane %v8936_v55, %v16296_v22  ;;  %v9010_v9 = vrot.slane %v8937_v21, %v16311_v56 }
 0xa1c   :  { %v8941_v10 = vunpack.c.l.b16 %v8903_v29  ;;  %v8962_v14 = vsel %vm8961_vm6, %v8960_v16, %v8955_v8  ;;  %v8974_v6 = vrot.slane %v8931_v43, %v16319_v61  ;;  %v8981_v25 = vrot.slane %v8932_v44, %v16323_v50  ;;  %v12536_v44 = vld [vmem:[%s16598_s9 + $0x8] sm:$0xff]  }
 0xa1d   :  { %9257 = vperm.xlu0 %12439, %v10357_v38   ;;  %9248 = vadd.xlane.f32.xlu1 %v16285_v26  ;;  %v8942_v59 = vunpack.c.h.b16 %v8903_v29  ;;  %v8969_v35 = vsel %vm8968_vm7, %v8967_v19, %v8962_v14  ;;  %v9006_v37 = vsel %vm8954_vm5, %v9005_v15, %v9001_v32  ;;  %v9015_v52 = vrot.slane %v8938_v18, %v16314_v46 }
 0xa1e   :  { %v8976_v28 = vsel %vm8975_vm8, %v8974_v6, %v8969_v35  ;;  %v8988_v1 = vrot.slane %v8933_v30, %v16327_v53  ;;  %v9011_v13 = vsel %vm8961_vm6, %v9010_v9, %v9006_v37  ;;  %v9020_v27 = vrot.slane %v8939_v48, %v16319_v61 }
 0xa1f   :  { %v8983_v42 = vsel %vm8982_vm9, %v8981_v25, %v8976_v28  ;;  %v8995_v4 = vrot.slane %v8934_v24, %v16331_v3  ;;  %v9016_v26 = vsel %vm8968_vm7, %v9015_v52, %v9011_v13  ;;  %v9025_v39 = vrot.slane %v8940_v34, %v16323_v50 }
 0xa20   :  { %v8990_v0 = vsel %vm8989_vm10, %v8988_v1, %v8983_v42  ;;  %v9021_v41 = vsel %vm8975_vm8, %v9020_v27, %v9016_v26  ;;  %v9030_v54 = vrot.slane %v8941_v10, %v16327_v53  ;;  %v9397_v51 = vsel %vm77_vm0, %v16162_v60, 0.0  ;;  %v10358_v60 = vld [vmem:[%s16601_s13] ss:$0 sm:$0xff] }
 0xa21   :  { %v8997_v47 = vsel %vm8996_vm11, %v8995_v4, %v8990_v0  ;;  %v9026_v23 = vsel %vm8982_vm9, %v9025_v39, %v9021_v41  ;;  %v9035_v17 = vrot.slane %v8942_v59, %v16331_v3  ;;  %9398 = vadd.xlane.f32.xlu1 %v9397_v51  ;;  %v9241_v36 = vsel %vm77_vm0, %v16288_v49, 0.0 }
 0xa22   :  { %v9031_v45 = vsel %vm8989_vm10, %v9030_v54, %v9026_v23 }
 0xa23   :  { %v9036_v63 = vsel %vm8996_vm11, %v9035_v17, %v9031_v45 }
 0xa24   :  { %v9038_v57 = vsel %vm9037_vm12, %v9036_v63, %v8997_v47 }
 0xa25   :  { %v9039_v2 = vpack.c.b16 %v9038_v57, %v9038_v57  ;;  %9242 = vadd.xlane.f32.xlu1 %v9241_v36 }
 0xa27   :  { %11753 = vmatmul.mubr.msk.bf16.vlgmr.msra.gmra.mrb[48].mxu1 %vm9064_vm13, %v9039_v2 }
 0xa28   :  { %11760 = vmatprep.mubr.msk.bf16.mxu1 %vm12605_vm4, %v17167_v31  ;;  %11757 = vmatpush3.bf16.msra.mxu1 %v12535_v20 }
 0xa29   :  { %11758 = vmatprep.subr.bf16.mxu1 %v17167_v31 }
 0xa2c   :  { %11759 = vmatpush3.bf16.msra.mxu1 %v12536_v44 }
 0xa2d   :  { %11764 = vmatprep.subr.bf16.mxu1 %v17167_v31 }
 0xa33   :  { %v9363_v21 = vpop.xlane.xlu0 %9362 }
 0xa36   :  { %9283 = vperm.xlu1 %12440, %v10358_v60  }
 0xa37   :  { %v9372_v43 = vpop.xlane.xlu0 %9371 }
 0xa39   :  { %v9360_v49 = vpop.xlane.xlu1 %9359 }
 0xa3b   :  { %v9396_v18 = vpop.xlane.xlu0 %9395 }
 0xa3d   :  { %v9384_v7 = vpop.xlane.xlu1 %9383 }
 0xa3f   :  { %v9378_v33 = vpop.xlane.xlu0 %9377 }
 0xa41   :  { %v9387_v5 = vpop.xlane.xlu1 %9386 }
 0xa43   :  { %v9402_v38 = vpop.xlane.xlu0 %9401 }
 0xa45   :  { %v9366_v11 = vpop.xlane.xlu1 %9365 }
 0xa49   :  { %v9369_v40 = vpop.xlane.xlu1 %9368 }
 0xa4b   :  { %v16391_v48 = vpop.permute.xlu0 %9414 }
 0xa4c   :  { %v9417_v19 = vmul.f32 %v16391_v48, %v9360_v49  ;;  %v9418_v8 = vmul.f32 %v16391_v48, %v9363_v21  ;;  %v9419_v9 = vmul.f32 %v16391_v48, %v9366_v11  ;;  %v9420_v10 = vmul.f32 %v16391_v48, %v9369_v40 }
 0xa4d   :  { %v9390_v12 = vpop.xlane.xlu1 %9389  ;;  %v9425_v52 = vmul.f32 %v16391_v48, %v9384_v7  ;;  %v9426_v28 = vmul.f32 %v16391_v48, %v9387_v5  ;;  %v9421_v41 = vmul.f32 %v16391_v48, %v9372_v43  ;;  %v9431_v49 = vmul.f32 %v16391_v48, %v9402_v38 }
 0xa4e   :  { %v9427_v27 = vmul.f32 %v16391_v48, %v9390_v12  ;;  %v9423_v5 = vmul.f32 %v16391_v48, %v9378_v33 }
 0xa51   :  { %v9393_v55 = vpop.xlane.xlu1 %9392 }
 0xa52   :  { %v9428_v39 = vmul.f32 %v16391_v48, %v9393_v55 }
 0xa55   :  { %v9375_v29 = vpop.xlane.xlu1 %9374 }
 0xa56   :  { %v9422_v0 = vmul.f32 %v16391_v48, %v9375_v29 }
 0xa59   :  { %v9381_v30 = vpop.xlane.xlu1 %9380 }
 0xa5a   :  { %v9424_v60 = vmul.f32 %v16391_v48, %v9381_v30 }
 0xa5d   :  { %v9405_v62 = vpop.xlane.xlu1 %9404 }
 0xa5e   :  { %v9432_v21 = vmul.f32 %v16391_v48, %v9405_v62 }
 0xa61   :  { %v16387_v16 = vpop.permute.xlu1 %9441 }
 0xa62   :  { %v9444_v32 = vadd.f32 %v16387_v16, %v9417_v19  ;;  %v9445_v15 = vadd.f32 %v16387_v16, %v9418_v8  ;;  %v9446_v6 = vadd.f32 %v16387_v16, %v9419_v9  ;;  %v9447_v25 = vadd.f32 %v16387_v16, %v9420_v10 }
 0xa63   :  { %v9452_v42 = vadd.f32 %v16387_v16, %v9425_v52  ;;  %v9453_v4 = vadd.f32 %v16387_v16, %v9426_v28  ;;  %v9454_v51 = vadd.f32 %v16387_v16, %v9427_v27  ;;  %v9455_v47 = vadd.f32 %v16387_v16, %v9428_v39 }
 0xa64   :  { %v9460_v59 = vmax.f32 %v9444_v32, 0.0  ;;  %v9461_v35 = vmax.f32 %v9445_v15, 0.0  ;;  %v9462_v1 = vmax.f32 %v9446_v6, 0.0  ;;  %v9463_v13 = vmax.f32 %v9447_v25, 0.0 }
 0xa65   :  { %v9448_v23 = vadd.f32 %v16387_v16, %v9421_v41  ;;  %v9449_v17 = vadd.f32 %v16387_v16, %v9422_v0  ;;  %v9468_v63 = vmax.f32 %v9452_v42, 0.0  ;;  %v9469_v57 = vmax.f32 %v9453_v4, 0.0 }
 0xa66   :  { %v9476_v26 = vpack.c.bf16 %v9461_v35, %v9460_v59  ;;  %v9477_v45 = vpack.c.bf16 %v9463_v13, %v9462_v1  ;;  %v9470_v7 = vmax.f32 %v9454_v51, 0.0  ;;  %v9471_v11 = vmax.f32 %v9455_v47, 0.0 }
 0xa67   :  { %v9464_v40 = vmax.f32 %v9448_v23, 0.0  ;;  %v9465_v12 = vmax.f32 %v9449_v17, 0.0  ;;  %v9480_v29 = vpack.c.bf16 %v9469_v57, %v9468_v63  ;;  %v9450_v30 = vadd.f32 %v16387_v16, %v9423_v5 }
 0xa68   :  { %v9500_v36 = vunpack.c.l.b16 %v9476_v26  ;;  %v9501_v2 = vunpack.c.h.b16 %v9476_v26  ;;  %v9502_v55 = vunpack.c.l.b16 %v9477_v45  ;;  %v9451_v19 = vadd.f32 %v16387_v16, %v9424_v60 }
 0xa69   :  { %v9458_v38 = vadd.f32 %v16387_v16, %v9431_v49  ;;  %v9459_v33 = vadd.f32 %v16387_v16, %v9432_v21  ;;  %v9429_v32 = vmul.f32 %v16391_v48, %v9396_v18  ;;  %v9481_v15 = vpack.c.bf16 %v9471_v11, %v9470_v7 }
 0xa6a   :  { %v9519_v43 = vrot.slane %v9500_v36, %v16291_v58  ;;  %v9523_v44 = vrot.slane %v9501_v2, %v16296_v22  ;;  %v9478_v9 = vpack.c.bf16 %v9465_v12, %v9464_v40  ;;  %v9528_v62 = vrot.slane %v9502_v55, %v16311_v56 }
 0xa6b   :  { %v9508_v10 = vunpack.c.l.b16 %v9480_v29  ;;  %v9509_v6 = vunpack.c.h.b16 %v9480_v29  ;;  %v9503_v25 = vunpack.c.h.b16 %v9477_v45  ;;  %v9466_v35 = vmax.f32 %v9450_v30, 0.0 }
 0xa6c   :  { %v9524_v59 = vsel %vm8954_vm5, %v9523_v44, %v9519_v43  ;;  %v9467_v52 = vmax.f32 %v9451_v19, 0.0  ;;  %v9456_v28 = vadd.f32 %v16387_v16, %v9429_v32  ;;  %v9474_v1 = vmax.f32 %v9458_v38, 0.0 }
 0xa6d   :  { %v9475_v13 = vmax.f32 %v9459_v33, 0.0  ;;  %v9510_v42 = vunpack.c.l.b16 %v9481_v15  ;;  %v9504_v18 = vunpack.c.l.b16 %v9478_v9  ;;  %v9529_v26 = vsel %vm8961_vm6, %v9528_v62, %v9524_v59 }
 0xa6e   :  { %v9558_v39 = vrot.slane %v9508_v10, %v16291_v58  ;;  %v9562_v0 = vrot.slane %v9509_v6, %v16296_v22  ;;  %v9533_v41 = vrot.slane %v9503_v25, %v16314_v46  ;;  %v9479_v47 = vpack.c.bf16 %v9467_v52, %v9466_v35 }
 0xa6f   :  { %v9472_v23 = vmax.f32 %v9456_v28, 0.0  ;;  %v9505_v17 = vunpack.c.h.b16 %v9478_v9  ;;  %v9483_v63 = vpack.c.bf16 %v9475_v13, %v9474_v1  ;;  %v9567_v57 = vrot.slane %v9510_v42, %v16311_v56 }
 0xa70   :  { %v9534_v45 = vsel %vm8968_vm7, %v9533_v41, %v9529_v26  ;;  %v9538_v36 = vrot.slane %v9504_v18, %v16319_v61  ;;  %v9511_v2 = vunpack.c.h.b16 %v9481_v15  ;;  %v9563_v60 = vsel %vm8954_vm5, %v9562_v0, %v9558_v39 }
 0xa71   :  { %v9506_v7 = vunpack.c.l.b16 %v9479_v47  ;;  %v9514_v11 = vunpack.c.l.b16 %v9483_v63  ;;  %v9568_v40 = vsel %vm8961_vm6, %v9567_v57, %v9563_v60  ;;  %v9507_v29 = vunpack.c.h.b16 %v9479_v47 }
 0xa72   :  { %v9539_v5 = vsel %vm8975_vm8, %v9538_v36, %v9534_v45  ;;  %v9572_v21 = vrot.slane %v9511_v2, %v16314_v46  ;;  %v9515_v43 = vunpack.c.h.b16 %v9483_v63 }
 0xa73   :  { %v9548_v38 = vrot.slane %v9506_v7, %v16327_v53  ;;  %v9587_v32 = vrot.slane %v9514_v11, %v16327_v53  ;;  %v9553_v10 = vrot.slane %v9507_v29, %v16331_v3 }
 0xa74   :  { %v9573_v33 = vsel %vm8968_vm7, %v9572_v21, %v9568_v40  ;;  %v9592_v6 = vrot.slane %v9515_v43, %v16331_v3 }
 0xa78   :  { %v9207_v52 = vpop.xlane.xlu0 %9206 }
 0xa7c   :  { %v9228_v1 = vpop.xlane.xlu0 %9227 }
 0xa80   :  { %v9210_v13 = vpop.xlane.xlu0 %9209 }
 0xa92   :  { %v16389_v24 = vpop.xlane.xlu1 %9203 }
 0xa96   :  { %v16393_v34 = vpop.xlane.xlu1 %9230 }
 0xa9a   :  { %v16401_v14 = vpop.xlane.xlu1 %9212 }
 0xa9e   :  { %v16405_v37 = vpop.xlane.xlu1 %9236 }
 0xaa2   :  { %v16415_v54 = vpop.xlane.xlu1 %9218 }
 0xaa6   :  { %v16422_v20 = vpop.xlane.xlu1 %9224 }
 0xaaa   :  { %v16431_v8 = vpop.xlane.xlu1 %9248 }
 0xaae   :  { %v9399_v27 = vpop.xlane.xlu1 %9398 }
 0xaaf   :  { %v9430_v4 = vmul.f32 %v16391_v48, %v9399_v27  ;;  %v9234_v27 = vpop.xlane.xlu0 %9233 }
 0xab1   :  { %v9457_v51 = vadd.f32 %v16387_v16, %v9430_v4  ;;  %v9543_v16 = vrot.slane %v9505_v17, %v16323_v50 }
 0xab2   :  { %v9243_v39 = vpop.xlane.xlu1 %9242 }
 0xab3   :  { %v9473_v48 = vmax.f32 %v9457_v51, 0.0  ;;  %v9544_v44 = vsel %vm8982_vm9, %v9543_v16, %v9539_v5  ;;  %v9216_v42 = vpop.xlane.xlu0 %9215 }
 0xab4   :  { %v9549_v9 = vsel %vm8989_vm10, %v9548_v38, %v9544_v44 }
 0xab5   :  { %v9482_v49 = vpack.c.bf16 %v9473_v48, %v9472_v23  ;;  %v9554_v59 = vsel %vm8996_vm11, %v9553_v10, %v9549_v9 }
 0xab6   :  { %v16470_v41 = vpop.permute.xlu1 %9283 }
 0xab7   :  { %v9512_v12 = vunpack.c.l.b16 %v9482_v49  ;;  %v9513_v55 = vunpack.c.h.b16 %v9482_v49  ;;  %v9240_v4 = vpop.xlane.xlu0 %9239 }
 0xab9   :  { %v9577_v30 = vrot.slane %v9512_v12, %v16319_v61  ;;  %v9582_v19 = vrot.slane %v9513_v55, %v16323_v50 }
 0xabb   :  { %v9578_v15 = vsel %vm8975_vm8, %v9577_v30, %v9573_v33  ;;  %v9222_v18 = vpop.xlane.xlu0 %9221 }
 0xabc   :  { %v9583_v62 = vsel %vm8982_vm9, %v9582_v19, %v9578_v15 }
 0xabd   :  { %v9588_v25 = vsel %vm8989_vm10, %v9587_v32, %v9583_v62 }
 0xabe   :  { %v9593_v35 = vsel %vm8996_vm11, %v9592_v6, %v9588_v25 }
 0xabf   :  { %v16468_v28 = vsel %vm9037_vm12, %v9593_v35, %v9554_v59  ;;  %v9246_v26 = vpop.xlane.xlu0 %9245 }
 0xac3   :  { %v9258_v0 = vpop.permute.xlu0 %9257 }
 0xac4   :  { %v9260_v51 = vmul.f32 %v9258_v0, %v16389_v24  ;;  %v9261_v47 = vmul.f32 %v9258_v0, %v9207_v52  ;;  %v9268_v23 = vmul.f32 %v9258_v0, %v9228_v1  ;;  %v9269_v17 = vmul.f32 %v9258_v0, %v16393_v34  ;;  %v12537_v52 = vld [vmem:[%s16602_s14 + $0x20] sm:$0xff]  }
 0xac5   :  { %v9262_v57 = vmul.f32 %v9258_v0, %v9210_v13  ;;  %v9263_v48 = vmul.f32 %v9258_v0, %v16401_v14  ;;  %v9271_v60 = vmul.f32 %v9258_v0, %v16405_v37  ;;  %v9270_v49 = vmul.f32 %v9258_v0, %v9234_v27  ;;  %v10346_v14 = vld [vmem:[%s16597_s8] ss:$0 sm:$0xff] }
 0xac6   :  { %v9286_v45 = vadd.f32 %v16470_v41, %v9260_v51  ;;  %v9287_v63 = vadd.f32 %v16470_v41, %v9261_v47  ;;  %v9294_v36 = vadd.f32 %v16470_v41, %v9268_v23  ;;  %v9295_v2 = vadd.f32 %v16470_v41, %v9269_v17 }
 0xac7   :  { %v9288_v24 = vadd.f32 %v16470_v41, %v9262_v57  ;;  %v9289_v7 = vadd.f32 %v16470_v41, %v9263_v48  ;;  %v9296_v34 = vadd.f32 %v16470_v41, %v9270_v49  ;;  %v9297_v5 = vadd.f32 %v16470_v41, %v9271_v60  ;;  %v12538_v48 = vld [vmem:[%s16602_s14 + $0x28] sm:$0xff]  }
 0xac8   :  { %v9302_v16 = vmax.f32 %v9286_v45, 0.0  ;;  %v9303_v11 = vmax.f32 %v9287_v63, 0.0  ;;  %v9310_v40 = vmax.f32 %v9294_v36, 0.0  ;;  %v9311_v12 = vmax.f32 %v9295_v2, 0.0 }
 0xac9   :  { %v9264_v55 = vmul.f32 %v9258_v0, %v9216_v42  ;;  %v9304_v21 = vmax.f32 %v9288_v24, 0.0  ;;  %v9305_v29 = vmax.f32 %v9289_v7, 0.0  ;;  %v9312_v43 = vmax.f32 %v9296_v34, 0.0 }
 0xaca   :  { %v9313_v44 = vmax.f32 %v9297_v5, 0.0  ;;  %v9318_v30 = vpack.c.bf16 %v9303_v11, %v9302_v16  ;;  %v9265_v19 = vmul.f32 %v9258_v0, %v16415_v54  ;;  %v9272_v32 = vmul.f32 %v9258_v0, %v9240_v4  ;;  %v12539_v5 = vld [vmem:[%s16602_s14 + $0x30] sm:$0xff]  }
 0xacb   :  { %v9322_v15 = vpack.c.bf16 %v9311_v12, %v9310_v40  ;;  %v9273_v9 = vmul.f32 %v9258_v0, %v9243_v39  ;;  %v9290_v25 = vadd.f32 %v16470_v41, %v9264_v55  ;;  %v9319_v1 = vpack.c.bf16 %v9305_v29, %v9304_v21 }
 0xacc   :  { %v9291_v59 = vadd.f32 %v16470_v41, %v9265_v19  ;;  %v9298_v35 = vadd.f32 %v16470_v41, %v9272_v32  ;;  %v9323_v13 = vpack.c.bf16 %v9313_v44, %v9312_v43  ;;  %v9671_v27 = vunpack.c.l.b16 %v9318_v30  ;;  %v12540_v43 = vld [vmem:[%s16602_s14 + $0x38] sm:$0xff]  }
 0xacd   :  { %v9299_v54 = vadd.f32 %v16470_v41, %v9273_v9  ;;  %v9672_v4 = vunpack.c.h.b16 %v9318_v30  ;;  %v9679_v39 = vunpack.c.l.b16 %v9322_v15  ;;  %v9680_v51 = vunpack.c.h.b16 %v9322_v15 }
 0xace   :  { %v9266_v47 = vmul.f32 %v9258_v0, %v9222_v18  ;;  %v9274_v23 = vmul.f32 %v9258_v0, %v9246_v26  ;;  %v9267_v17 = vmul.f32 %v9258_v0, %v16422_v20  ;;  %v9275_v45 = vmul.f32 %v9258_v0, %v16431_v8 }
 0xacf   :  { %v9306_v63 = vmax.f32 %v9290_v25, 0.0  ;;  %v9307_v57 = vmax.f32 %v9291_v59, 0.0  ;;  %v9314_v36 = vmax.f32 %v9298_v35, 0.0  ;;  %v9315_v2 = vmax.f32 %v9299_v54, 0.0  ;;  %v12541_v25 = vld [vmem:[%s16602_s14] sm:$0xff]  }
 0xad0   :  { %v9673_v18 = vunpack.c.l.b16 %v9319_v1  ;;  %v9681_v26 = vunpack.c.l.b16 %v9323_v13  ;;  %v9690_v20 = vrot.slane %v9671_v27, %v16291_v58  ;;  %v9694_v8 = vrot.slane %v9672_v4, %v16296_v22 }
 0xad1   :  { %v9729_v0 = vrot.slane %v9679_v39, %v16291_v58  ;;  %v9733_v60 = vrot.slane %v9680_v51, %v16296_v22  ;;  %v9292_v49 = vadd.f32 %v16470_v41, %v9266_v47  ;;  %v9293_v24 = vadd.f32 %v16470_v41, %v9267_v17 }
 0xad2   :  { %v9300_v7 = vadd.f32 %v16470_v41, %v9274_v23  ;;  %v9301_v34 = vadd.f32 %v16470_v41, %v9275_v45  ;;  %v9320_v16 = vpack.c.bf16 %v9307_v57, %v9306_v63  ;;  %v9324_v11 = vpack.c.bf16 %v9315_v2, %v9314_v36  ;;  %v12543_v23 = vld [vmem:[%s16602_s14 + $0x10] sm:$0xff]  }
 0xad3   :  { %v9699_v40 = vrot.slane %v9673_v18, %v16311_v56  ;;  %v9738_v58 = vrot.slane %v9681_v26, %v16311_v56  ;;  %v9674_v22 = vunpack.c.h.b16 %v9319_v1  ;;  %v9682_v12 = vunpack.c.h.b16 %v9323_v13  ;;  %v10352_v26 = vld [vmem:[#allocation5] ss:$0 sm:$0xff] }
 0xad4   :  { %v9734_v55 = vsel %vm8954_vm5, %v9733_v60, %v9729_v0  ;;  %v9308_v41 = vmax.f32 %v9292_v49, 0.0  ;;  %v9309_v21 = vmax.f32 %v9293_v24, 0.0  ;;  %v9317_v29 = vmax.f32 %v9301_v34, 0.0 }
 0xad5   :  { %v9675_v44 = vunpack.c.l.b16 %v9320_v16  ;;  %v9683_v30 = vunpack.c.l.b16 %v9324_v11  ;;  %v9739_v19 = vsel %vm8961_vm6, %v9738_v58, %v9734_v55  ;;  %v9676_v9 = vunpack.c.h.b16 %v9320_v16  ;;  %v10375_v16 = vld [vmem:[%s16603_s15] ss:$0 sm:$0xff]  ;;  %s12606_s15 = smov [#allocation9]  }
 0xad6   :  { %v9321_v32 = vpack.c.bf16 %v9309_v21, %v9308_v41 }
 0xad7   :  { %v9709_v59 = vrot.slane %v9675_v44, %v16319_v61  ;;  %v9748_v35 = vrot.slane %v9683_v30, %v16319_v61  ;;  %v9714_v27 = vrot.slane %v9676_v9, %v16323_v50  ;;  %v12542_v61 = vld [vmem:[%s16602_s14 + $0x8] sm:$0xff]  }
 0xafa   :  { %v9102_v37 = vpop.f32.mrb[48].mxu1 }
 0xafb   :  { %v9103_v38 = vadd.f32 %v10346_v14, %v9102_v37  ;;  %v11754_v33 = vpop.f32.mrb[49].mxu1  ;;  %v9695_v14 = vsel %vm8954_vm5, %v9694_v8, %v9690_v20  ;;  %v9316_v37 = vmax.f32 %v9300_v7, 0.0 }
 0xafc   :  { %v9105_v62 = vpop.f32.mrb[50].mxu1  ;;  %v9700_v56 = vsel %vm8961_vm6, %v9699_v40, %v9695_v14  ;;  %v9743_v33 = vrot.slane %v9682_v12, %v16314_v46 }
 0xafd   :  { %v9108_v10 = vmax.f32 %v9103_v38, 0.0  ;;  %v11755_v6 = vpop.f32.mrb[51].mxu1  ;;  %v9704_v38 = vrot.slane %v9674_v22, %v16314_v46  ;;  %v9325_v15 = vpack.c.bf16 %v9317_v29, %v9316_v37  ;;  %v9684_v62 = vunpack.c.h.b16 %v9324_v11 }
 0xafe   :  { %v9744_v6 = vsel %vm8968_vm7, %v9743_v33, %v9739_v19  ;;  %v9595_v46 = vpack.c.b16 %v16468_v28, %v16468_v28  ;;  %v9678_v28 = vunpack.c.h.b16 %v9321_v32 }
 0xaff   :  { %v9109_v42 = vpack.c.bf16 %v9108_v10, %v9108_v10  ;;  %v9705_v10 = vsel %vm8968_vm7, %v9704_v38, %v9700_v56  ;;  %v9685_v54 = vunpack.c.l.b16 %v9325_v15  ;;  %v9749_v13 = vsel %vm8975_vm8, %v9748_v35, %v9744_v6 }
 0xb00   :  { %v9710_v1 = vsel %vm8975_vm8, %v9709_v59, %v9705_v10  ;;  %v9686_v4 = vunpack.c.h.b16 %v9325_v15  ;;  %v9724_v63 = vrot.slane %v9678_v28, %v16331_v3 }
 0xb01   :  { %11761 = vmatmul.mubr.msk.bf16.vlgmr.msra.gmra.mrb[52].mxu1 %vm77_vm0, %v9109_v42  ;;  %v9753_v42 = vrot.slane %v9684_v62, %v16323_v50  ;;  %v9715_v39 = vsel %vm8982_vm9, %v9714_v27, %v9710_v1  ;;  %v9758_v50 = vrot.slane %v9685_v54, %v16327_v53 }
 0xb02   :  { %11765 = vmatpush3.bf16.msra.mxu1 %v12537_v52  ;;  %11772 = vmatprep.mubr.msk.bf16.mxu1 %vm12605_vm4, %v17167_v31  ;;  %v9677_v52 = vunpack.c.l.b16 %v9321_v32  ;;  %v9763_v57 = vrot.slane %v9686_v4, %v16331_v3 }
 0xb03   :  { %11766 = vmatprep.subr.bf16.mxu1 %v17167_v31  ;;  %v9754_v51 = vsel %vm8982_vm9, %v9753_v42, %v9749_v13 }
 0xb04   :  { %v9719_v47 = vrot.slane %v9677_v52, %v16327_v53  ;;  %v9759_v45 = vsel %vm8989_vm10, %v9758_v50, %v9754_v51  ;;  %v12544_v53 = vld [vmem:[%s16602_s14 + $0x18] sm:$0xff]  }
 0xb05   :  { %v9764_v36 = vsel %vm8996_vm11, %v9763_v57, %v9759_v45 }
 0xb06   :  { %11767 = vmatpush3.bf16.msra.mxu1 %v12538_v48  ;;  %v9720_v17 = vsel %vm8989_vm10, %v9719_v47, %v9715_v39 }
 0xb07   :  { %11768 = vmatprep.subr.bf16.mxu1 %v17167_v31  ;;  %v9725_v48 = vsel %vm8996_vm11, %v9724_v63, %v9720_v17 }
 0xb08   :  { %v9765_v2 = vsel %vm9037_vm12, %v9764_v36, %v9725_v48 }
 0xb09   :  { %v9766_v18 = vpack.c.b16 %v9765_v2, %v9765_v2 }
 0xb0a   :  { %11769 = vmatpush3.bf16.msra.mxu1 %v12539_v5 }
 0xb0b   :  { %11770 = vmatprep.subr.bf16.mxu1 %v17167_v31 }
 0xb0e   :  { %11771 = vmatpush3.bf16.msra.mxu1 %v12540_v43 }
 0xb0f   :  { %11776 = vmatprep.subr.bf16.mxu1 %v17167_v31 }
 0xb11   :  { %11773 = vmatmul.mubr.msk.bf16.vlgmr.msra.gmra.mrb[56].mxu1 %vm9064_vm13, %v9595_v46 }
 0xb12   :  { %11777 = vmatpush3.bf16.msra.mxu1 %v12541_v25  ;;  %11784 = vmatprep.mubr.msk.bf16.mxu1 %vm12605_vm4, %v17167_v31 }
 0xb13   :  { %11778 = vmatprep.subr.bf16.mxu1 %v17167_v31 }
 0xb16   :  { %11779 = vmatpush3.bf16.msra.mxu1 %v12542_v61 }
 0xb17   :  { %11780 = vmatprep.subr.bf16.mxu1 %v17167_v31 }
 0xb1a   :  { %11781 = vmatpush3.bf16.msra.mxu1 %v12543_v23 }
 0xb1b   :  { %11782 = vmatprep.subr.bf16.mxu1 %v17167_v31 }
 0xb1e   :  { %11783 = vmatpush3.bf16.msra.mxu1 %v12544_v53 }
 0xb21   :  { %11785 = vmatmul.mubr.msk.bf16.vlgmr.msra.gmra.mrb[60].mxu1 %vm9064_vm13, %v9766_v18 }
 0xbd4   :  { %v9170_v20 = vpop.f32.mrb[52].mxu1 }
 0xbd5   :  { %v9171_v3 = vadd.f32 %v10352_v26, %v9170_v20  ;;  %v11762_v8 = vpop.f32.mrb[53].mxu1 }
 0xbd6   :  { %v9173_v0 = vpop.f32.mrb[54].mxu1 }
 0xbd7   :  { %12545 = vtanh.f32 %v9171_v3  ;;  %v11763_v60 = vpop.f32.mrb[55].mxu1 }
 0xbe1   :  { %v12546_v49 = vpop.eup %12545 }
 0xbe2   :  { %9178 = vst.msk [vmem:[%s16604_s16] sm:$0x3] %vm9177_vm14, %v12546_v49  ;;  %s9864_s16 = sshll.u32 %s12606_s15, 4  ;;  %s9865_s16 = int_to_ptr.vmem [resolvable:$true] %s9864_s16 }
 0xbe3   :  { %s12574_s12 = scalar_lea.vmem %s9865_s16, 32  ;;  %p12579_p9 = scmp.lt.s32.totalorder %s9865_s16, %s9865_s16 }
 0xbe4   :  { %v9657_v31 = vpop.f32.mrb[56].mxu1  ;;  %p12575_p8 = scmp.ne.s32.totalorder %s9865_s16, %s12574_s12  ;;  %p12580_p10 = scmp.lt.s32.totalorder %s12574_s12, %s12574_s12 }
 0xbe5   :  { %v11774_v24 = vpop.f32.mrb[57].mxu1 }
 0xbe6   :  { %v9660_v7 = vpop.f32.mrb[58].mxu1  ;;  %p12581_p11 = por %p12580_p10, %p12579_p9 }
 0xbe7   :  { %v11775_v34 = vpop.f32.mrb[59].mxu1 }
 0xbe8   :  { %p12582_p12 = pnand %p12581_p11, %p12575_p8 }
 0xbf4   :  { %v9828_v5 = vpop.f32.mrb[60].mxu1 }
 0xbf5   :  { %v9829_v11 = vadd.f32 %v9828_v5, %v9657_v31  ;;  %v11786_v40 = vpop.f32.mrb[61].mxu1 }
 0xbf6   :  { %v9831_v58 = vpop.f32.mrb[62].mxu1 }
 0xbf7   :  { %v11787_v22 = vpop.f32.mrb[63].mxu1  ;;  %v9841_v12 = vadd.f32 %v10375_v16, %v9829_v11 }
 0xbf9   :  { %v9843_v14 = vsel %vm9842_vm15, %v9841_v12, -inf }
 0xbfa   :  { %9844 = vmax.xlane.f32.xlu1 %v9843_v14 }
 0xc87   :  { %v9845_v55 = vpop.xlane.xlu1 %9844 }
 0xc88   :  { %v9846_v41 = vsub.f32 %v9841_v12, %v9845_v55 }
 0xc8a   :  { %v9847_v21 = vmul.f32 1.442695, %v9846_v41 }
 0xc8c   :  { %12547 = vpow2.f32 %v9847_v21 }
 0xc96   :  { %v12548_v37 = vpop.eup %12547 }
 0xc97   :  { %v9849_v29 = vsel %vm9842_vm15, %v12548_v37, 0.0 }
 0xc98   :  { %9850 = vadd.xlane.f32.xlu0 %v9849_v29 }
 0xd25   :  { %v9851_v43 = vpop.xlane.xlu0 %9850 }
 0xd26   :  { %12549 = vlog2.f32 %v9851_v43 }
 0xd30   :  { %v12550_v44 = vpop.eup %12549 }
 0xd31   :  { %v9853_v30 = vmul.f32 0.6931472, %v12550_v44 }
 0xd33   :  { %v9854_v56 = vsub.f32 %v9846_v41, %v9853_v30 }
 0xd35   :  { %9855 = vst.msk [vmem:[#allocation9] sm:$0x3] %vm9842_vm15, %v9854_v56 }
 0xd36   :  { %12585 = shalt.err (!%p12582_p12)
}
 0xd37   :  { %s12586_s25 = scalar_lea.hbm %s16605_s17, 32 }
 0xd38   :  { %p12587_p13 = scmp.ne.s32.totalorder %s16605_s17, %s12586_s25  ;;  %p12590_p0 = scmp.lt.u32.totalorder %s12586_s25, %s16605_s17 }
 0xd3a   :  { %p12592_p1 = pnand %p12590_p0, %p12587_p13 }
 0xd3c   :  { %12595 = shalt.err (!%p12592_p1)
}
 0xd3d   :  { %9867 = dma.vmem_to_hbm [thread:$0]  %s9865_s16, 32, %s16605_s17, [#allocation8]  }
 0xd3e   :  { %12598 = dma.done.wait [#allocation8], 32  }
 0xd3f   :  { %12599 = vsyncadd [#allocation8], 4294967264 }
 0xd40   :  { %9873 = vsyncpa [#allocation7], 1 }
 0xd41   :  { %9874 = vsyncpa [#allocation8], 1 }

</bundles_post_ra>
